<compile_context>
chip_gen: v7x
topology: tpu7x:2x2x1
jax: 0.10.0
libtpu: 0.0.40
codegen_flags: <defaults>
</compile_context>

<pallas_src>
import functools

import jax
import jax.numpy as jnp
from jax.experimental import pallas as pl
from jax.experimental.pallas import tpu as pltpu

COMPUTE_DTYPE = jnp.bfloat16  # MXU-native on v5e/v6e/v7x; accumulate in f32.


# ---------------------------------------------------------------------------
# Chip-aware sizing helpers
# ---------------------------------------------------------------------------
@functools.lru_cache(maxsize=1)
def _vmem_capacity_bytes():
    try:
        return int(pltpu.get_tpu_info().vmem_capacity_bytes)
    except Exception:
        return 64 << 20  # conservative fallback (v7x-sized VMEM)


def _vmem_limit_bytes():
    # Leave ~20% headroom under physical VMEM for compiler scratch / spills.
    # (v7x: ~51 MiB of 64; v5e/v6e: ~102 MiB of 128.)
    return int(_vmem_capacity_bytes() * 4 // 5)


def _is_big_vmem():
    return _vmem_capacity_bytes() >= (96 << 20)


def _pick_batch_block(b, pref):
    """Batch block <= pref that keeps >= 2 grid steps (v7x dual-TC sharding)."""
    if b < 2:
        return 1, b
    bb = max(1, min(pref, -(-b // 2)))
    return bb, -(-b // bb) * bb


def _choose_block_m(m):
    cands = (1024, 512, 256, 128, 64, 32, 16, 8) if _is_big_vmem() else \
            (512, 256, 128, 64, 32, 16, 8)
    for bm in cands:
        if m > bm:                      # guarantees >= 2 steps when m is large
            return bm
    return 8


def _choose_block_k(k):
    cands = (4096, 2048, 1024, 512, 256, 128) if _is_big_vmem() else \
            (2048, 1024, 512, 256, 128)
    for bk in cands:
        if k >= bk and k % bk == 0:
            return bk
    return k


def _pad_leading(x, target):
    pad = target - x.shape[0]
    if pad > 0:
        x = jnp.pad(x, ((0, pad),) + ((0, 0),) * (x.ndim - 1))
    return x


# ---------------------------------------------------------------------------
# Layout helpers (space-to-depth turns the stride-2 convs into stride-1 convs)
# ---------------------------------------------------------------------------
def _space_to_depth(x):
    b, h, w, c = x.shape
    x = x.reshape(b, h // 2, 2, w // 2, 2, c)
    x = x.transpose(0, 1, 3, 2, 4, 5)
    return x.reshape(b, h // 2, w // 2, 4 * c)


def _s2d_weight(w):
    kh, kw, cin, cout = w.shape
    w = w.reshape(kh // 2, 2, kw // 2, 2, cin, cout)
    w = w.transpose(0, 2, 1, 3, 4, 5)
    return w.reshape(kh // 2, kw // 2, 4 * cin, cout)


# ---------------------------------------------------------------------------
# In-kernel building blocks
# ---------------------------------------------------------------------------
def _pad_hw1(x):
    """Zero halo of 1 around H and W of an in-VMEM value (via concatenate)."""
    b, h, w, c = x.shape
    zr = jnp.zeros((b, 1, w, c), x.dtype)
    x = jnp.concatenate([zr, x, zr], axis=1)
    zc = jnp.zeros((b, h + 2, 1, c), x.dtype)
    return jnp.concatenate([zc, x, zc], axis=2)


def _conv_matmul(xpad, w_ref, b_ref, kh, kw, ho, wo, relu):
    """kh x kw stride-1 conv as ONE MXU matmul (taps folded into K).

    xpad : (bb, ho+kh-1, wo+kw-1, cin) VMEM value that already contains the halo.
    w_ref: (kh*kw*cin, cout) with K ordered as (di, dj, cin).

    The kw sublane (W) shifts are hoisted, so there is one shifted slice per
    kernel column instead of one per tap; the H shifts are on a free outer axis.
    Accumulation over the kh*kw taps happens inside the MXU (no per-tap f32
    read-modify-write of an (M, cout) accumulator value).
    """
    bb, _, _, cin = xpad.shape
    m = bb * ho * wo
    xw = [xpad[:, :, dj:dj + wo, :] for dj in range(kw)]
    cols = [xw[dj][:, di:di + ho, :, :].reshape(m, cin)
            for di in range(kh) for dj in range(kw)]
    patch = jnp.concatenate(cols, axis=-1) if len(cols) > 1 else cols[0]
    y = jnp.dot(patch, w_ref[...], preferred_element_type=jnp.float32)
    y = y + b_ref[...]
    if relu:
        y = jnp.maximum(y, 0.0)
    return y  # (m, cout) float32


def _conv1_kernel(x_ref, w_ref, b_ref, o_ref):
    """First conv: single im2col matmul on the (already s2d'd) input tile."""
    bb, hp, wp, _ = x_ref.shape
    _, ho, wo, cout = o_ref.shape
    y = _conv_matmul(x_ref[...], w_ref, b_ref, hp - ho + 1, wp - wo + 1,
                     ho, wo, True)
    o_ref[...] = y.reshape(bb, ho, wo, cout).astype(o_ref.dtype)


def _trunk_kernel(x_ref, cw2_ref, cb2_ref, cw3_ref, cb3_ref,
                  r1w1_ref, r1b1_ref, r1w2_ref, r1b2_ref,
                  r2w1_ref, r2b1_ref, r2w2_ref, r2b2_ref, o_ref):
    """conv2(2x2 s2d) + conv3(3x3) + ResBlock x2 on one VMEM-resident tile."""
    bb = x_ref.shape[0]
    _, ho, wo, c = o_ref.shape
    m = bb * ho * wo
    cdt = o_ref.dtype

    # conv2: the s2d'd stride-2 conv; the halo is already part of the input tile.
    h = _conv_matmul(x_ref[...], cw2_ref, cb2_ref, 2, 2, ho, wo, True)
    h = h.astype(cdt).reshape(bb, ho, wo, c)

    # conv3: 3x3 / pad 1 / ReLU; halo built in-kernel (never touches HBM).
    h = _conv_matmul(_pad_hw1(h), cw3_ref, cb3_ref, 3, 3, ho, wo, True)
    h = h.astype(cdt).reshape(bb, ho, wo, c)

    # Two ResBlocks: 3x3 -> ReLU -> 1x1 -> +residual -> ReLU, all in VMEM.
    for w1_ref, b1_ref, w2_ref, b2_ref in (
            (r1w1_ref, r1b1_ref, r1w2_ref, r1b2_ref),
            (r2w1_ref, r2b1_ref, r2w2_ref, r2b2_ref)):
        a = _conv_matmul(_pad_hw1(h), w1_ref, b1_ref, 3, 3, ho, wo, True)
        y = jnp.dot(a.astype(cdt), w2_ref[...],
                    preferred_element_type=jnp.float32) + b2_ref[...]
        y = y + h.reshape(m, c).astype(jnp.float32)        # residual add
        h = jnp.maximum(y, 0.0).astype(cdt).reshape(bb, ho, wo, c)

    o_ref[...] = h


def _pov_head_kernel(x_ref, wp_ref, bp_ref, vec_ref,
                     wv1_ref, bv1_ref, wv2_ref, bv2_ref, wv3_ref, bv3_ref,
                     wq1p_ref, wq1v_ref, bq1_ref, wq2_ref, bq2_ref,
                     wq3_ref, bq3_ref, o_ref, acc_ref):
    """K-tiled pov_fc + vec MLP + concat + q head, one kernel."""
    @pl.when(pl.program_id(1) == 0)
    def _():
        acc_ref[...] = jnp.zeros_like(acc_ref)

    acc_ref[...] += jnp.dot(x_ref[...], wp_ref[...],
                            preferred_element_type=jnp.float32)

    @pl.when(pl.program_id(1) == pl.num_programs(1) - 1)
    def _():
        cdt = x_ref.dtype
        f32 = jnp.float32

        def lin(x, w_ref, b_ref, relu):
            y = jnp.dot(x.astype(cdt), w_ref[...],
                        preferred_element_type=f32) + b_ref[...]
            return jnp.maximum(y, 0.0) if relu else y

        pov = acc_ref[...] + bp_ref[...]          # pov_fc has no activation
        v = lin(vec_ref[...], wv1_ref, bv1_ref, True)
        v = lin(v, wv2_ref, bv2_ref, True)
        v = lin(v, wv3_ref, bv3_ref, True)
        # concat([pov, vec_features]) @ W_q1 == two K-partition matmuls.
        q = (jnp.dot(pov.astype(cdt), wq1p_ref[...], preferred_element_type=f32)
             + jnp.dot(v.astype(cdt), wq1v_ref[...], preferred_element_type=f32)
             + bq1_ref[...])
        q = jnp.maximum(q, 0.0)
        q = lin(q, wq2_ref, bq2_ref, True)
        q = lin(q, wq3_ref, bq3_ref, False)
        o_ref[...] = q.astype(o_ref.dtype)


# ---------------------------------------------------------------------------
# Wrappers
# ---------------------------------------------------------------------------
def conv1_pallas(x_nhwc, w, b):
    """Conv2d(3, n_hid, 4, stride=2, padding=1) + ReLU."""
    bsz = x_nhwc.shape[0]
    cout = w.shape[-1]
    x = jnp.pad(x_nhwc.astype(COMPUTE_DTYPE), ((0, 0), (1, 1), (1, 1), (0, 0)))
    x = _space_to_depth(x)                                 # (B, 33, 33, 12)
    ws = _s2d_weight(w)                                    # (2, 2, 12, cout)
    kh, kw, cin, _ = ws.shape
    wr = ws.reshape(kh * kw * cin, cout).astype(COMPUTE_DTYPE)
    b2 = b.reshape(1, cout).astype(jnp.float32)

    # conv1's spatial is 4x the later layers -> smaller batch block.
    bb, bp = _pick_batch_block(bsz, 4 if _is_big_vmem() else 2)
    x = _pad_leading(x, bp)
    hp, wp = x.shape[1], x.shape[2]
    ho, wo = hp - kh + 1, wp - kw + 1

    out = pl.pallas_call(
        _conv1_kernel,
        out_shape=jax.ShapeDtypeStruct((bp, ho, wo, cout), COMPUTE_DTYPE),
        grid=(bp // bb,),
        in_specs=[
            pl.BlockSpec((bb, hp, wp, cin), lambda i: (i, 0, 0, 0)),
            pl.BlockSpec(wr.shape, lambda i: (0, 0)),
            pl.BlockSpec(b2.shape, lambda i: (0, 0)),
        ],
        out_specs=pl.BlockSpec((bb, ho, wo, cout), lambda i: (i, 0, 0, 0)),
        compiler_params=pltpu.CompilerParams(
            dimension_semantics=("parallel",),
            vmem_limit_bytes=_vmem_limit_bytes()),
    )(x, wr, b2)
    return out[:bsz] if bp != bsz else out


def trunk_pallas(y1, params):
    """conv2 + conv3 + res1 + res2 fused: one pallas_call, one HBM round trip."""
    bsz = y1.shape[0]
    n_hid = y1.shape[-1]
    c = 2 * n_hid
    # TODO(synk): fold this pad + space-to-depth into conv1's output layout so
    # the (B,32,32,n_hid) activation does not take an extra plain-JAX HBM pass.
    x = jnp.pad(y1.astype(COMPUTE_DTYPE), ((0, 0), (1, 1), (1, 1), (0, 0)))
    x = _space_to_depth(x)                                  # (B, 17, 17, 4*n_hid)

    cw2 = _s2d_weight(params["conv2"]["w"]).reshape(-1, c).astype(COMPUTE_DTYPE)
    cb2 = params["conv2"]["b"].reshape(1, c).astype(jnp.float32)
    cw3 = params["conv3"]["w"].reshape(-1, c).astype(COMPUTE_DTYPE)
    cb3 = params["conv3"]["b"].reshape(1, c).astype(jnp.float32)

    def res_args(p):
        ch = p["w1"].shape[-1]
        return (p["w1"].reshape(-1, ch).astype(COMPUTE_DTYPE),
                p["b1"].reshape(1, ch).astype(jnp.float32),
                p["w2"].reshape(ch, c).astype(COMPUTE_DTYPE),
                p["b2"].reshape(1, c).astype(jnp.float32))

    weights = (cw2, cb2, cw3, cb3) + res_args(params["res1"]) + res_args(params["res2"])

    bb, bp = _pick_batch_block(bsz, 16 if _is_big_vmem() else 8)
    x = _pad_leading(x, bp)
    hp, wp, cin = x.shape[1], x.shape[2], x.shape[3]
    ho, wo = hp - 1, wp - 1                                 # 2x2 stride-1 conv

    # TODO(synk): mark the constant weight/bias blocks pipeline_mode=pl.Buffered(1)
    # once single-buffered pipeline_mode is confirmed on the target jax build.
    in_specs = [pl.BlockSpec((bb, hp, wp, cin), lambda i: (i, 0, 0, 0))]
    in_specs += [pl.BlockSpec(a.shape, lambda i: (0, 0)) for a in weights]

    out = pl.pallas_call(
        _trunk_kernel,
        out_shape=jax.ShapeDtypeStruct((bp, ho, wo, c), COMPUTE_DTYPE),
        grid=(bp // bb,),
        in_specs=in_specs,
        out_specs=pl.BlockSpec((bb, ho, wo, c), lambda i: (i, 0, 0, 0)),
        compiler_params=pltpu.CompilerParams(
            dimension_semantics=("parallel",),
            vmem_limit_bytes=_vmem_limit_bytes()),
    )(x, *weights)
    return out[:bsz] if bp != bsz else out


def pov_head_pallas(pov_flat, vec, params):
    """Fused pov_fc (K-tiled) + vec network + concat + q net."""
    bsz, k = pov_flat.shape
    dv = vec.shape[1]
    dp = params["pov_fc"]["w"].shape[1]
    na = params["q_fc3"]["w"].shape[1]
    cdt = COMPUTE_DTYPE
    f32 = jnp.float32
    wq1 = params["q_fc1"]["w"]

    bm = _choose_block_m(bsz)
    mp = -(-bsz // bm) * bm
    bk = _choose_block_k(k)

    xb = _pad_leading(pov_flat.astype(cdt), mp)
    vb = _pad_leading(vec.astype(cdt), mp)

    # TODO(synk): pipeline_mode=pl.Buffered(3) on the streamed pov_fc weight
    # block (and Buffered(1) on the constant head weights) once pipeline_mode
    # behaviour is confirmed on the target jax build.
    operands = (
        xb,
        params["pov_fc"]["w"].astype(cdt),
        params["pov_fc"]["b"].reshape(1, dp).astype(f32),
        vb,
        params["vec_fc1"]["w"].astype(cdt), params["vec_fc1"]["b"].reshape(1, -1).astype(f32),
        params["vec_fc2"]["w"].astype(cdt), params["vec_fc2"]["b"].reshape(1, -1).astype(f32),
        params["vec_fc3"]["w"].astype(cdt), params["vec_fc3"]["b"].reshape(1, -1).astype(f32),
        wq1[:dp].astype(cdt), wq1[dp:].astype(cdt),
        params["q_fc1"]["b"].reshape(1, -1).astype(f32),
        params["q_fc2"]["w"].astype(cdt), params["q_fc2"]["b"].reshape(1, -1).astype(f32),
        params["q_fc3"]["w"].astype(cdt), params["q_fc3"]["b"].reshape(1, -1).astype(f32),
    )

    in_specs = [
        pl.BlockSpec((bm, bk), lambda i, j: (i, j)),   # pov activations (K-tiled)
        pl.BlockSpec((bk, dp), lambda i, j: (j, 0)),   # pov_fc weight (K-tiled)
        pl.BlockSpec((1, dp), lambda i, j: (0, 0)),
        pl.BlockSpec((bm, dv), lambda i, j: (i, 0)),
    ]
    in_specs += [pl.BlockSpec(a.shape, lambda i, j: (0, 0)) for a in operands[4:]]

    out = pl.pallas_call(
        _pov_head_kernel,
        out_shape=jax.ShapeDtypeStruct((mp, na), f32),
        grid=(mp // bm, k // bk),
        in_specs=in_specs,
        out_specs=pl.BlockSpec((bm, na), lambda i, j: (i, 0)),
        scratch_shapes=[pltpu.VMEM((bm, dp), f32)],
        compiler_params=pltpu.CompilerParams(
            dimension_semantics=("parallel", "arbitrary"),
            vmem_limit_bytes=_vmem_limit_bytes()),
    )(*operands)
    return out[:bsz] if mp != bsz else out


# ---------------------------------------------------------------------------
# Parameter init (deterministic, synthetic) and forward pass
# ---------------------------------------------------------------------------
def _conv_p(key, kh, kw, cin, cout):
    k1, k2 = jax.random.split(key)
    scale = 1.0 / jnp.sqrt(kh * kw * cin)
    return {"w": jax.random.normal(k1, (kh, kw, cin, cout), jnp.float32) * scale,
            "b": jax.random.normal(k2, (cout,), jnp.float32) * 0.01}


def _lin_p(key, k, n):
    k1, k2 = jax.random.split(key)
    scale = 1.0 / jnp.sqrt(k)
    return {"w": jax.random.normal(k1, (k, n), jnp.float32) * scale,
            "b": jax.random.normal(k2, (n,), jnp.float32) * 0.01}


def init_qnetwork_params(key, num_actions, vec_dim, vec_network_dim=128,
                         vec_feature_dim=128, n_hid=64, pov_feature_dim=128,
                         q_net_dim=128):
    ks = jax.random.split(key, 12)
    c2 = 2 * n_hid
    ch = c2 // 4

    def _res_p(k):
        k1, k2 = jax.random.split(k)
        a = _conv_p(k1, 3, 3, c2, ch)
        b = _conv_p(k2, 1, 1, ch, c2)
        return {"w1": a["w"], "b1": a["b"], "w2": b["w"], "b2": b["b"]}

    return {
        "conv1": _conv_p(ks[0], 4, 4, 3, n_hid),
        "conv2": _conv_p(ks[1], 4, 4, n_hid, c2),
        "conv3": _conv_p(ks[2], 3, 3, c2, c2),
        "res1": _res_p(ks[3]),
        "res2": _res_p(ks[4]),
        "pov_fc": _lin_p(ks[5], c2 * 16 * 16, pov_feature_dim),
        "vec_fc1": _lin_p(ks[6], vec_dim, vec_network_dim),
        "vec_fc2": _lin_p(ks[7], vec_network_dim, vec_network_dim),
        "vec_fc3": _lin_p(ks[8], vec_network_dim, vec_feature_dim),
        "q_fc1": _lin_p(ks[9], pov_feature_dim + vec_feature_dim, q_net_dim),
        "q_fc2": _lin_p(ks[10], q_net_dim, q_net_dim),
        "q_fc3": _lin_p(ks[11], q_net_dim, num_actions),
    }


def qnetwork_forward(params, pov_nchw, vec):
    bsz = pov_nchw.shape[0]
    # NCHW -> NHWC layout glue (channels-last is the TPU-native lane layout).
    x = jnp.transpose(pov_nchw, (0, 2, 3, 1))
    y1 = conv1_pallas(x, params["conv1"]["w"], params["conv1"]["b"])
    y = trunk_pallas(y1, params)                            # (B, 16, 16, 2*n_hid)
    # einops Rearrange 'b c h w -> b (h w c)' == flat reshape of the NHWC tensor.
    pov_flat = y.reshape(bsz, -1)
    return pov_head_pallas(pov_flat, vec, params)


def qnetwork_reference(params, pov_nchw, vec):
    """Pure-JAX f32 reference used for a tolerance check."""
    def conv(x, w, b, stride, pad, relu):
        y = jax.lax.conv_general_dilated(
            x, w, (stride, stride), [(pad, pad), (pad, pad)],
            dimension_numbers=("NHWC", "HWIO", "NHWC")) + b
        return jax.nn.relu(y) if relu else y

    x = jnp.transpose(pov_nchw, (0, 2, 3, 1))
    x = conv(x, params["conv1"]["w"], params["conv1"]["b"], 2, 1, True)
    x = conv(x, params["conv2"]["w"], params["conv2"]["b"], 2, 1, True)
    x = conv(x, params["conv3"]["w"], params["conv3"]["b"], 1, 1, True)
    for rp in (params["res1"], params["res2"]):
        h = conv(x, rp["w1"], rp["b1"], 1, 1, True)
        h = conv(h, rp["w2"], rp["b2"], 1, 0, False)
        x = jax.nn.relu(h + x)
    x = x.reshape(x.shape[0], -1)
    pov = x @ params["pov_fc"]["w"] + params["pov_fc"]["b"]
    v = vec
    for name in ("vec_fc1", "vec_fc2", "vec_fc3"):
        v = jax.nn.relu(v @ params[name]["w"] + params[name]["b"])
    q = jnp.concatenate([pov, v], axis=1)
    q = jax.nn.relu(q @ params["q_fc1"]["w"] + params["q_fc1"]["b"])
    q = jax.nn.relu(q @ params["q_fc2"]["w"] + params["q_fc2"]["b"])
    return q @ params["q_fc3"]["w"] + params["q_fc3"]["b"]


if __name__ == "__main__":
    # Small hyperparameters consistent with the module's constructor.
    # Spatial input must be 64x64 (the flatten Linear hard-codes 16*16 spatial).
    num_actions = 4
    vec_dim = 10
    B = 2
    hps = dict(vec_network_dim=32, vec_feature_dim=32, n_hid=8,
               pov_feature_dim=32, q_net_dim=32)

    key = jax.random.PRNGKey(0)
    k_pov, k_vec = jax.random.split(key)
    pov = jax.random.normal(k_pov, (B, 3, 64, 64), jnp.float32)   # NCHW like torch
    vec = jax.random.normal(k_vec, (B, vec_dim), jnp.float32)

    params = init_qnetwork_params(jax.random.PRNGKey(1), num_actions, vec_dim, **hps)

    fwd = jax.jit(qnetwork_forward)
    q = jax.block_until_ready(fwd(params, pov, vec))
    assert q.shape == (B, num_actions), q.shape
    assert bool(jnp.all(jnp.isfinite(q)))

    # bf16-tolerance check against a pure-JAX f32 reference.
    q_ref = jax.block_until_ready(jax.jit(qnetwork_reference)(params, pov, vec))
    err = float(jnp.max(jnp.abs(q - q_ref)))
    tol = 0.2 + 0.05 * float(jnp.max(jnp.abs(q_ref)))
    assert err < tol, (err, tol)

    print("KERNEL_OK")
</pallas_src>

<mosaic_0001>
module attributes {stable_mosaic.version = 11 : i64} {
  func.func @_conv1_kernel(%arg0: i32, %arg1: memref<1x33x33x12xbf16, #tpu.memory_space<vmem>>, %arg2: memref<48x8xbf16, #tpu.memory_space<vmem>>, %arg3: memref<1x8xf32, #tpu.memory_space<vmem>>, %arg4: memref<1x32x32x8xbf16, #tpu.memory_space<vmem>>) attributes {dimension_semantics = [#tpu.dimension_semantics<parallel>], iteration_bounds = array<i64: 2>, scalar_prefetch = 0 : i64, scratch_operands = 0 : i64, tpu.core_type = #tpu.core_type<tc>, window_params = [{transform_indices = @transform_0, window_bounds = array<i64: 1, 33, 33, 12>}, {pipeline_mode = #tpu.pipeline_mode<synchronous>, transform_indices = @transform_1, window_bounds = array<i64: 48, 8>}, {pipeline_mode = #tpu.pipeline_mode<synchronous>, transform_indices = @transform_2, window_bounds = array<i64: 1, 8>}, {transform_indices = @transform_3, window_bounds = array<i64: 1, 32, 32, 8>}]} {
    %c0 = arith.constant 0 : index
    %c0_0 = arith.constant 0 : index
    %c0_1 = arith.constant 0 : index
    %c0_2 = arith.constant 0 : index
    %0 = vector.load %arg1[%c0, %c0_0, %c0_1, %c0_2] : memref<1x33x33x12xbf16, #tpu.memory_space<vmem>>, vector<1x33x33x12xbf16>
    %1 = vector.extract_strided_slice %0 {offsets = [0, 0, 0, 0], sizes = [1, 33, 32, 12], strides = [1, 1, 1, 1]} : vector<1x33x33x12xbf16> to vector<1x33x32x12xbf16>
    %2 = vector.extract_strided_slice %0 {offsets = [0, 0, 1, 0], sizes = [1, 33, 32, 12], strides = [1, 1, 1, 1]} : vector<1x33x33x12xbf16> to vector<1x33x32x12xbf16>
    %3 = vector.extract_strided_slice %1 {offsets = [0, 0, 0, 0], sizes = [1, 32, 32, 12], strides = [1, 1, 1, 1]} : vector<1x33x32x12xbf16> to vector<1x32x32x12xbf16>
    %4 = vector.shape_cast %3 : vector<1x32x32x12xbf16> to vector<1024x12xbf16>
    %5 = vector.extract_strided_slice %2 {offsets = [0, 0, 0, 0], sizes = [1, 32, 32, 12], strides = [1, 1, 1, 1]} : vector<1x33x32x12xbf16> to vector<1x32x32x12xbf16>
    %6 = vector.shape_cast %5 : vector<1x32x32x12xbf16> to vector<1024x12xbf16>
    %7 = vector.extract_strided_slice %1 {offsets = [0, 1, 0, 0], sizes = [1, 32, 32, 12], strides = [1, 1, 1, 1]} : vector<1x33x32x12xbf16> to vector<1x32x32x12xbf16>
    %8 = vector.shape_cast %7 : vector<1x32x32x12xbf16> to vector<1024x12xbf16>
    %9 = vector.extract_strided_slice %2 {offsets = [0, 1, 0, 0], sizes = [1, 32, 32, 12], strides = [1, 1, 1, 1]} : vector<1x33x32x12xbf16> to vector<1x32x32x12xbf16>
    %10 = vector.shape_cast %9 : vector<1x32x32x12xbf16> to vector<1024x12xbf16>
    %11 = tpu.concatenate %4, %6, %8, %10 in 1 : vector<1024x12xbf16>, vector<1024x12xbf16>, vector<1024x12xbf16>, vector<1024x12xbf16> -> vector<1024x48xbf16>
    %c0_3 = arith.constant 0 : index
    %c0_4 = arith.constant 0 : index
    %12 = vector.load %arg2[%c0_3, %c0_4] : memref<48x8xbf16, #tpu.memory_space<vmem>>, vector<48x8xbf16>
    %cst = arith.constant dense<0.000000e+00> : vector<1024x8xf32>
    %13 = tpu.matmul %11, %12, %cst {dimension_numbers = #tpu.dot_dimension_numbers<[1], [0], [0], [1], [0, 0, 1, 1], [], []>} : vector<1024x48xbf16>, vector<48x8xbf16>, vector<1024x8xf32> -> vector<1024x8xf32>
    %c0_5 = arith.constant 0 : index
    %c0_6 = arith.constant 0 : index
    %14 = vector.load %arg3[%c0_5, %c0_6] : memref<1x8xf32, #tpu.memory_space<vmem>>, vector<1x8xf32>
    %15 = vector.broadcast %14 : vector<1x8xf32> to vector<1024x8xf32>
    %16 = arith.addf %13, %15 : vector<1024x8xf32>
    %cst_7 = arith.constant 0.000000e+00 : f32
    %17 = vector.broadcast %cst_7 : f32 to vector<1024x8xf32>
    %18 = arith.maximumf %16, %17 : vector<1024x8xf32>
    %19 = vector.shape_cast %18 : vector<1024x8xf32> to vector<1x32x32x8xf32>
    %20 = arith.truncf %19 : vector<1x32x32x8xf32> to vector<1x32x32x8xbf16>
    %c0_8 = arith.constant 0 : index
    %c0_9 = arith.constant 0 : index
    %c0_10 = arith.constant 0 : index
    %c0_11 = arith.constant 0 : index
    %21 = vector.load %arg4[%c0_8, %c0_9, %c0_10, %c0_11] : memref<1x32x32x8xbf16, #tpu.memory_space<vmem>>, vector<1x32x32x8xbf16>
    tpu.vector_store %arg4[%c0_8, %c0_9, %c0_10, %c0_11], %20 {strides = array<i32>} : memref<1x32x32x8xbf16, #tpu.memory_space<vmem>>, vector<1x32x32x8xbf16>,
    return
  }
  func.func @transform_0(%arg0: i32) -> (i32, i32, i32, i32) {
    %c0_i32 = arith.constant 0 : i32
    %c0_i32_0 = arith.constant 0 : i32
    %c0_i32_1 = arith.constant 0 : i32
    %c0_i32_2 = arith.constant 0 : i32
    return %arg0, %c0_i32, %c0_i32_0, %c0_i32_1 : i32, i32, i32, i32
  }
  func.func @transform_1(%arg0: i32) -> (i32, i32) {
    %c0_i32 = arith.constant 0 : i32
    %c0_i32_0 = arith.constant 0 : i32
    %c0_i32_1 = arith.constant 0 : i32
    return %c0_i32, %c0_i32_0 : i32, i32
  }
  func.func @transform_2(%arg0: i32) -> (i32, i32) {
    %c0_i32 = arith.constant 0 : i32
    %c0_i32_0 = arith.constant 0 : i32
    %c0_i32_1 = arith.constant 0 : i32
    return %c0_i32, %c0_i32_0 : i32, i32
  }
  func.func @transform_3(%arg0: i32) -> (i32, i32, i32, i32) {
    %c0_i32 = arith.constant 0 : i32
    %c0_i32_0 = arith.constant 0 : i32
    %c0_i32_1 = arith.constant 0 : i32
    %c0_i32_2 = arith.constant 0 : i32
    return %arg0, %c0_i32, %c0_i32_0, %c0_i32_1 : i32, i32, i32, i32
  }
}

module attributes {stable_mosaic.version = 11 : i64} {
  func.func @_trunk_kernel(%arg0: i32, %arg1: memref<1x17x17x32xbf16, #tpu.memory_space<vmem>>, %arg2: memref<128x16xbf16, #tpu.memory_space<vmem>>, %arg3: memref<1x16xf32, #tpu.memory_space<vmem>>, %arg4: memref<144x16xbf16, #tpu.memory_space<vmem>>, %arg5: memref<1x16xf32, #tpu.memory_space<vmem>>, %arg6: memref<144x4xbf16, #tpu.memory_space<vmem>>, %arg7: memref<1x4xf32, #tpu.memory_space<vmem>>, %arg8: memref<4x16xbf16, #tpu.memory_space<vmem>>, %arg9: memref<1x16xf32, #tpu.memory_space<vmem>>, %arg10: memref<144x4xbf16, #tpu.memory_space<vmem>>, %arg11: memref<1x4xf32, #tpu.memory_space<vmem>>, %arg12: memref<4x16xbf16, #tpu.memory_space<vmem>>, %arg13: memref<1x16xf32, #tpu.memory_space<vmem>>, %arg14: memref<1x16x16x16xbf16, #tpu.memory_space<vmem>>) attributes {dimension_semantics = [#tpu.dimension_semantics<parallel>], iteration_bounds = array<i64: 2>, scalar_prefetch = 0 : i64, scratch_operands = 0 : i64, tpu.core_type = #tpu.core_type<tc>, window_params = [{transform_indices = @transform_0, window_bounds = array<i64: 1, 17, 17, 32>}, {pipeline_mode = #tpu.pipeline_mode<synchronous>, transform_indices = @transform_1, window_bounds = array<i64: 128, 16>}, {pipeline_mode = #tpu.pipeline_mode<synchronous>, transform_indices = @transform_2, window_bounds = array<i64: 1, 16>}, {pipeline_mode = #tpu.pipeline_mode<synchronous>, transform_indices = @transform_3, window_bounds = array<i64: 144, 16>}, {pipeline_mode = #tpu.pipeline_mode<synchronous>, transform_indices = @transform_4, window_bounds = array<i64: 1, 16>}, {pipeline_mode = #tpu.pipeline_mode<synchronous>, transform_indices = @transform_5, window_bounds = array<i64: 144, 4>}, {pipeline_mode = #tpu.pipeline_mode<synchronous>, transform_indices = @transform_6, window_bounds = array<i64: 1, 4>}, {pipeline_mode = #tpu.pipeline_mode<synchronous>, transform_indices = @transform_7, window_bounds = array<i64: 4, 16>}, {pipeline_mode = #tpu.pipeline_mode<synchronous>, transform_indices = @transform_8, window_bounds = array<i64: 1, 16>}, {pipeline_mode = #tpu.pipeline_mode<synchronous>, transform_indices = @transform_9, window_bounds = array<i64: 144, 4>}, {pipeline_mode = #tpu.pipeline_mode<synchronous>, transform_indices = @transform_10, window_bounds = array<i64: 1, 4>}, {pipeline_mode = #tpu.pipeline_mode<synchronous>, transform_indices = @transform_11, window_bounds = array<i64: 4, 16>}, {pipeline_mode = #tpu.pipeline_mode<synchronous>, transform_indices = @transform_12, window_bounds = array<i64: 1, 16>}, {transform_indices = @transform_13, window_bounds = array<i64: 1, 16, 16, 16>}]} {
    %c0 = arith.constant 0 : index
    %c0_0 = arith.constant 0 : index
    %c0_1 = arith.constant 0 : index
    %c0_2 = arith.constant 0 : index
    %0 = vector.load %arg1[%c0, %c0_0, %c0_1, %c0_2] : memref<1x17x17x32xbf16, #tpu.memory_space<vmem>>, vector<1x17x17x32xbf16>
    %1 = vector.extract_strided_slice %0 {offsets = [0, 0, 0, 0], sizes = [1, 17, 16, 32], strides = [1, 1, 1, 1]} : vector<1x17x17x32xbf16> to vector<1x17x16x32xbf16>
    %2 = vector.extract_strided_slice %0 {offsets = [0, 0, 1, 0], sizes = [1, 17, 16, 32], strides = [1, 1, 1, 1]} : vector<1x17x17x32xbf16> to vector<1x17x16x32xbf16>
    %3 = vector.extract_strided_slice %1 {offsets = [0, 0, 0, 0], sizes = [1, 16, 16, 32], strides = [1, 1, 1, 1]} : vector<1x17x16x32xbf16> to vector<1x16x16x32xbf16>
    %4 = vector.shape_cast %3 : vector<1x16x16x32xbf16> to vector<256x32xbf16>
    %5 = vector.extract_strided_slice %2 {offsets = [0, 0, 0, 0], sizes = [1, 16, 16, 32], strides = [1, 1, 1, 1]} : vector<1x17x16x32xbf16> to vector<1x16x16x32xbf16>
    %6 = vector.shape_cast %5 : vector<1x16x16x32xbf16> to vector<256x32xbf16>
    %7 = vector.extract_strided_slice %1 {offsets = [0, 1, 0, 0], sizes = [1, 16, 16, 32], strides = [1, 1, 1, 1]} : vector<1x17x16x32xbf16> to vector<1x16x16x32xbf16>
    %8 = vector.shape_cast %7 : vector<1x16x16x32xbf16> to vector<256x32xbf16>
    %9 = vector.extract_strided_slice %2 {offsets = [0, 1, 0, 0], sizes = [1, 16, 16, 32], strides = [1, 1, 1, 1]} : vector<1x17x16x32xbf16> to vector<1x16x16x32xbf16>
    %10 = vector.shape_cast %9 : vector<1x16x16x32xbf16> to vector<256x32xbf16>
    %11 = tpu.concatenate %4, %6, %8, %10 in 1 : vector<256x32xbf16>, vector<256x32xbf16>, vector<256x32xbf16>, vector<256x32xbf16> -> vector<256x128xbf16>
    %c0_3 = arith.constant 0 : index
    %c0_4 = arith.constant 0 : index
    %12 = vector.load %arg2[%c0_3, %c0_4] : memref<128x16xbf16, #tpu.memory_space<vmem>>, vector<128x16xbf16>
    %cst = arith.constant dense<0.000000e+00> : vector<256x16xf32>
    %13 = tpu.matmul %11, %12, %cst {dimension_numbers = #tpu.dot_dimension_numbers<[1], [0], [0], [1], [0, 0, 1, 1], [], []>} : vector<256x128xbf16>, vector<128x16xbf16>, vector<256x16xf32> -> vector<256x16xf32>
    %c0_5 = arith.constant 0 : index
    %c0_6 = arith.constant 0 : index
    %14 = vector.load %arg3[%c0_5, %c0_6] : memref<1x16xf32, #tpu.memory_space<vmem>>, vector<1x16xf32>
    %15 = vector.broadcast %14 : vector<1x16xf32> to vector<256x16xf32>
    %16 = arith.addf %13, %15 : vector<256x16xf32>
    %cst_7 = arith.constant 0.000000e+00 : f32
    %17 = vector.broadcast %cst_7 : f32 to vector<256x16xf32>
    %18 = arith.maximumf %16, %17 : vector<256x16xf32>
    %19 = arith.truncf %18 : vector<256x16xf32> to vector<256x16xbf16>
    %20 = vector.shape_cast %19 : vector<256x16xbf16> to vector<1x16x16x16xbf16>
    %cst_8 = arith.constant 0.000000e+00 : bf16
    %21 = vector.broadcast %cst_8 : bf16 to vector<1x1x16x16xbf16>
    %22 = tpu.concatenate %21, %20, %21 in 1 : vector<1x1x16x16xbf16>, vector<1x16x16x16xbf16>, vector<1x1x16x16xbf16> -> vector<1x18x16x16xbf16>
    %cst_9 = arith.constant 0.000000e+00 : bf16
    %23 = vector.broadcast %cst_9 : bf16 to vector<1x18x1x16xbf16>
    %24 = tpu.concatenate %23, %22, %23 in 2 : vector<1x18x1x16xbf16>, vector<1x18x16x16xbf16>, vector<1x18x1x16xbf16> -> vector<1x18x18x16xbf16>
    %25 = vector.extract_strided_slice %24 {offsets = [0, 0, 0, 0], sizes = [1, 18, 16, 16], strides = [1, 1, 1, 1]} : vector<1x18x18x16xbf16> to vector<1x18x16x16xbf16>
    %26 = vector.extract_strided_slice %24 {offsets = [0, 0, 1, 0], sizes = [1, 18, 16, 16], strides = [1, 1, 1, 1]} : vector<1x18x18x16xbf16> to vector<1x18x16x16xbf16>
    %27 = vector.extract_strided_slice %24 {offsets = [0, 0, 2, 0], sizes = [1, 18, 16, 16], strides = [1, 1, 1, 1]} : vector<1x18x18x16xbf16> to vector<1x18x16x16xbf16>
    %28 = vector.extract_strided_slice %25 {offsets = [0, 0, 0, 0], sizes = [1, 16, 16, 16], strides = [1, 1, 1, 1]} : vector<1x18x16x16xbf16> to vector<1x16x16x16xbf16>
    %29 = vector.shape_cast %28 : vector<1x16x16x16xbf16> to vector<256x16xbf16>
    %30 = vector.extract_strided_slice %26 {offsets = [0, 0, 0, 0], sizes = [1, 16, 16, 16], strides = [1, 1, 1, 1]} : vector<1x18x16x16xbf16> to vector<1x16x16x16xbf16>
    %31 = vector.shape_cast %30 : vector<1x16x16x16xbf16> to vector<256x16xbf16>
    %32 = vector.extract_strided_slice %27 {offsets = [0, 0, 0, 0], sizes = [1, 16, 16, 16], strides = [1, 1, 1, 1]} : vector<1x18x16x16xbf16> to vector<1x16x16x16xbf16>
    %33 = vector.shape_cast %32 : vector<1x16x16x16xbf16> to vector<256x16xbf16>
    %34 = vector.extract_strided_slice %25 {offsets = [0, 1, 0, 0], sizes = [1, 16, 16, 16], strides = [1, 1, 1, 1]} : vector<1x18x16x16xbf16> to vector<1x16x16x16xbf16>
    %35 = vector.shape_cast %34 : vector<1x16x16x16xbf16> to vector<256x16xbf16>
    %36 = vector.extract_strided_slice %26 {offsets = [0, 1, 0, 0], sizes = [1, 16, 16, 16], strides = [1, 1, 1, 1]} : vector<1x18x16x16xbf16> to vector<1x16x16x16xbf16>
    %37 = vector.shape_cast %36 : vector<1x16x16x16xbf16> to vector<256x16xbf16>
    %38 = vector.extract_strided_slice %27 {offsets = [0, 1, 0, 0], sizes = [1, 16, 16, 16], strides = [1, 1, 1, 1]} : vector<1x18x16x16xbf16> to vector<1x16x16x16xbf16>
    %39 = vector.shape_cast %38 : vector<1x16x16x16xbf16> to vector<256x16xbf16>
    %40 = vector.extract_strided_slice %25 {offsets = [0, 2, 0, 0], sizes = [1, 16, 16, 16], strides = [1, 1, 1, 1]} : vector<1x18x16x16xbf16> to vector<1x16x16x16xbf16>
    %41 = vector.shape_cast %40 : vector<1x16x16x16xbf16> to vector<256x16xbf16>
    %42 = vector.extract_strided_slice %26 {offsets = [0, 2, 0, 0], sizes = [1, 16, 16, 16], strides = [1, 1, 1, 1]} : vector<1x18x16x16xbf16> to vector<1x16x16x16xbf16>
    %43 = vector.shape_cast %42 : vector<1x16x16x16xbf16> to vector<256x16xbf16>
    %44 = vector.extract_strided_slice %27 {offsets = [0, 2, 0, 0], sizes = [1, 16, 16, 16], strides = [1, 1, 1, 1]} : vector<1x18x16x16xbf16> to vector<1x16x16x16xbf16>
    %45 = vector.shape_cast %44 : vector<1x16x16x16xbf16> to vector<256x16xbf16>
    %46 = tpu.concatenate %29, %31, %33, %35, %37, %39, %41, %43, %45 in 1 : vector<256x16xbf16>, vector<256x16xbf16>, vector<256x16xbf16>, vector<256x16xbf16>, vector<256x16xbf16>, vector<256x16xbf16>, vector<256x16xbf16>, vector<256x16xbf16>, vector<256x16xbf16> -> vector<256x144xbf16>
    %c0_10 = arith.constant 0 : index
    %c0_11 = arith.constant 0 : index
    %47 = vector.load %arg4[%c0_10, %c0_11] : memref<144x16xbf16, #tpu.memory_space<vmem>>, vector<144x16xbf16>
    %cst_12 = arith.constant dense<0.000000e+00> : vector<256x16xf32>
    %48 = tpu.matmul %46, %47, %cst_12 {dimension_numbers = #tpu.dot_dimension_numbers<[1], [0], [0], [1], [0, 0, 1, 1], [], []>} : vector<256x144xbf16>, vector<144x16xbf16>, vector<256x16xf32> -> vector<256x16xf32>
    %c0_13 = arith.constant 0 : index
    %c0_14 = arith.constant 0 : index
    %49 = vector.load %arg5[%c0_13, %c0_14] : memref<1x16xf32, #tpu.memory_space<vmem>>, vector<1x16xf32>
    %50 = vector.broadcast %49 : vector<1x16xf32> to vector<256x16xf32>
    %51 = arith.addf %48, %50 : vector<256x16xf32>
    %cst_15 = arith.constant 0.000000e+00 : f32
    %52 = vector.broadcast %cst_15 : f32 to vector<256x16xf32>
    %53 = arith.maximumf %51, %52 : vector<256x16xf32>
    %54 = arith.truncf %53 : vector<256x16xf32> to vector<256x16xbf16>
    %55 = vector.shape_cast %54 : vector<256x16xbf16> to vector<1x16x16x16xbf16>
    %cst_16 = arith.constant 0.000000e+00 : bf16
    %56 = vector.broadcast %cst_16 : bf16 to vector<1x1x16x16xbf16>
    %57 = tpu.concatenate %56, %55, %56 in 1 : vector<1x1x16x16xbf16>, vector<1x16x16x16xbf16>, vector<1x1x16x16xbf16> -> vector<1x18x16x16xbf16>
    %cst_17 = arith.constant 0.000000e+00 : bf16
    %58 = vector.broadcast %cst_17 : bf16 to vector<1x18x1x16xbf16>
    %59 = tpu.concatenate %58, %57, %58 in 2 : vector<1x18x1x16xbf16>, vector<1x18x16x16xbf16>, vector<1x18x1x16xbf16> -> vector<1x18x18x16xbf16>
    %60 = vector.extract_strided_slice %59 {offsets = [0, 0, 0, 0], sizes = [1, 18, 16, 16], strides = [1, 1, 1, 1]} : vector<1x18x18x16xbf16> to vector<1x18x16x16xbf16>
    %61 = vector.extract_strided_slice %59 {offsets = [0, 0, 1, 0], sizes = [1, 18, 16, 16], strides = [1, 1, 1, 1]} : vector<1x18x18x16xbf16> to vector<1x18x16x16xbf16>
    %62 = vector.extract_strided_slice %59 {offsets = [0, 0, 2, 0], sizes = [1, 18, 16, 16], strides = [1, 1, 1, 1]} : vector<1x18x18x16xbf16> to vector<1x18x16x16xbf16>
    %63 = vector.extract_strided_slice %60 {offsets = [0, 0, 0, 0], sizes = [1, 16, 16, 16], strides = [1, 1, 1, 1]} : vector<1x18x16x16xbf16> to vector<1x16x16x16xbf16>
    %64 = vector.shape_cast %63 : vector<1x16x16x16xbf16> to vector<256x16xbf16>
    %65 = vector.extract_strided_slice %61 {offsets = [0, 0, 0, 0], sizes = [1, 16, 16, 16], strides = [1, 1, 1, 1]} : vector<1x18x16x16xbf16> to vector<1x16x16x16xbf16>
    %66 = vector.shape_cast %65 : vector<1x16x16x16xbf16> to vector<256x16xbf16>
    %67 = vector.extract_strided_slice %62 {offsets = [0, 0, 0, 0], sizes = [1, 16, 16, 16], strides = [1, 1, 1, 1]} : vector<1x18x16x16xbf16> to vector<1x16x16x16xbf16>
    %68 = vector.shape_cast %67 : vector<1x16x16x16xbf16> to vector<256x16xbf16>
    %69 = vector.extract_strided_slice %60 {offsets = [0, 1, 0, 0], sizes = [1, 16, 16, 16], strides = [1, 1, 1, 1]} : vector<1x18x16x16xbf16> to vector<1x16x16x16xbf16>
    %70 = vector.shape_cast %69 : vector<1x16x16x16xbf16> to vector<256x16xbf16>
    %71 = vector.extract_strided_slice %61 {offsets = [0, 1, 0, 0], sizes = [1, 16, 16, 16], strides = [1, 1, 1, 1]} : vector<1x18x16x16xbf16> to vector<1x16x16x16xbf16>
    %72 = vector.shape_cast %71 : vector<1x16x16x16xbf16> to vector<256x16xbf16>
    %73 = vector.extract_strided_slice %62 {offsets = [0, 1, 0, 0], sizes = [1, 16, 16, 16], strides = [1, 1, 1, 1]} : vector<1x18x16x16xbf16> to vector<1x16x16x16xbf16>
    %74 = vector.shape_cast %73 : vector<1x16x16x16xbf16> to vector<256x16xbf16>
    %75 = vector.extract_strided_slice %60 {offsets = [0, 2, 0, 0], sizes = [1, 16, 16, 16], strides = [1, 1, 1, 1]} : vector<1x18x16x16xbf16> to vector<1x16x16x16xbf16>
    %76 = vector.shape_cast %75 : vector<1x16x16x16xbf16> to vector<256x16xbf16>
    %77 = vector.extract_strided_slice %61 {offsets = [0, 2, 0, 0], sizes = [1, 16, 16, 16], strides = [1, 1, 1, 1]} : vector<1x18x16x16xbf16> to vector<1x16x16x16xbf16>
    %78 = vector.shape_cast %77 : vector<1x16x16x16xbf16> to vector<256x16xbf16>
    %79 = vector.extract_strided_slice %62 {offsets = [0, 2, 0, 0], sizes = [1, 16, 16, 16], strides = [1, 1, 1, 1]} : vector<1x18x16x16xbf16> to vector<1x16x16x16xbf16>
    %80 = vector.shape_cast %79 : vector<1x16x16x16xbf16> to vector<256x16xbf16>
    %81 = tpu.concatenate %64, %66, %68, %70, %72, %74, %76, %78, %80 in 1 : vector<256x16xbf16>, vector<256x16xbf16>, vector<256x16xbf16>, vector<256x16xbf16>, vector<256x16xbf16>, vector<256x16xbf16>, vector<256x16xbf16>, vector<256x16xbf16>, vector<256x16xbf16> -> vector<256x144xbf16>
    %c0_18 = arith.constant 0 : index
    %c0_19 = arith.constant 0 : index
    %82 = vector.load %arg6[%c0_18, %c0_19] : memref<144x4xbf16, #tpu.memory_space<vmem>>, vector<144x4xbf16>
    %cst_20 = arith.constant dense<0.000000e+00> : vector<256x4xf32>
    %83 = tpu.matmul %81, %82, %cst_20 {dimension_numbers = #tpu.dot_dimension_numbers<[1], [0], [0], [1], [0, 0, 1, 1], [], []>} : vector<256x144xbf16>, vector<144x4xbf16>, vector<256x4xf32> -> vector<256x4xf32>
    %c0_21 = arith.constant 0 : index
    %c0_22 = arith.constant 0 : index
    %84 = vector.load %arg7[%c0_21, %c0_22] : memref<1x4xf32, #tpu.memory_space<vmem>>, vector<1x4xf32>
    %85 = vector.broadcast %84 : vector<1x4xf32> to vector<256x4xf32>
    %86 = arith.addf %83, %85 : vector<256x4xf32>
    %cst_23 = arith.constant 0.000000e+00 : f32
    %87 = vector.broadcast %cst_23 : f32 to vector<256x4xf32>
    %88 = arith.maximumf %86, %87 : vector<256x4xf32>
    %89 = arith.truncf %88 : vector<256x4xf32> to vector<256x4xbf16>
    %c0_24 = arith.constant 0 : index
    %c0_25 = arith.constant 0 : index
    %90 = vector.load %arg8[%c0_24, %c0_25] : memref<4x16xbf16, #tpu.memory_space<vmem>>, vector<4x16xbf16>
    %cst_26 = arith.constant dense<0.000000e+00> : vector<256x16xf32>
    %91 = tpu.matmul %89, %90, %cst_26 {dimension_numbers = #tpu.dot_dimension_numbers<[1], [0], [0], [1], [0, 0, 1, 1], [], []>} : vector<256x4xbf16>, vector<4x16xbf16>, vector<256x16xf32> -> vector<256x16xf32>
    %c0_27 = arith.constant 0 : index
    %c0_28 = arith.constant 0 : index
    %92 = vector.load %arg9[%c0_27, %c0_28] : memref<1x16xf32, #tpu.memory_space<vmem>>, vector<1x16xf32>
    %93 = vector.broadcast %92 : vector<1x16xf32> to vector<256x16xf32>
    %94 = arith.addf %91, %93 : vector<256x16xf32>
    %95 = vector.shape_cast %55 : vector<1x16x16x16xbf16> to vector<256x16xbf16>
    %96 = arith.extf %95 : vector<256x16xbf16> to vector<256x16xf32>
    %97 = arith.addf %94, %96 : vector<256x16xf32>
    %cst_29 = arith.constant 0.000000e+00 : f32
    %98 = vector.broadcast %cst_29 : f32 to vector<256x16xf32>
    %99 = arith.maximumf %97, %98 : vector<256x16xf32>
    %100 = arith.truncf %99 : vector<256x16xf32> to vector<256x16xbf16>
    %101 = vector.shape_cast %100 : vector<256x16xbf16> to vector<1x16x16x16xbf16>
    %cst_30 = arith.constant 0.000000e+00 : bf16
    %102 = vector.broadcast %cst_30 : bf16 to vector<1x1x16x16xbf16>
    %103 = tpu.concatenate %102, %101, %102 in 1 : vector<1x1x16x16xbf16>, vector<1x16x16x16xbf16>, vector<1x1x16x16xbf16> -> vector<1x18x16x16xbf16>
    %cst_31 = arith.constant 0.000000e+00 : bf16
    %104 = vector.broadcast %cst_31 : bf16 to vector<1x18x1x16xbf16>
    %105 = tpu.concatenate %104, %103, %104 in 2 : vector<1x18x1x16xbf16>, vector<1x18x16x16xbf16>, vector<1x18x1x16xbf16> -> vector<1x18x18x16xbf16>
    %106 = vector.extract_strided_slice %105 {offsets = [0, 0, 0, 0], sizes = [1, 18, 16, 16], strides = [1, 1, 1, 1]} : vector<1x18x18x16xbf16> to vector<1x18x16x16xbf16>
    %107 = vector.extract_strided_slice %105 {offsets = [0, 0, 1, 0], sizes = [1, 18, 16, 16], strides = [1, 1, 1, 1]} : vector<1x18x18x16xbf16> to vector<1x18x16x16xbf16>
    %108 = vector.extract_strided_slice %105 {offsets = [0, 0, 2, 0], sizes = [1, 18, 16, 16], strides = [1, 1, 1, 1]} : vector<1x18x18x16xbf16> to vector<1x18x16x16xbf16>
    %109 = vector.extract_strided_slice %106 {offsets = [0, 0, 0, 0], sizes = [1, 16, 16, 16], strides = [1, 1, 1, 1]} : vector<1x18x16x16xbf16> to vector<1x16x16x16xbf16>
    %110 = vector.shape_cast %109 : vector<1x16x16x16xbf16> to vector<256x16xbf16>
    %111 = vector.extract_strided_slice %107 {offsets = [0, 0, 0, 0], sizes = [1, 16, 16, 16], strides = [1, 1, 1, 1]} : vector<1x18x16x16xbf16> to vector<1x16x16x16xbf16>
    %112 = vector.shape_cast %111 : vector<1x16x16x16xbf16> to vector<256x16xbf16>
    %113 = vector.extract_strided_slice %108 {offsets = [0, 0, 0, 0], sizes = [1, 16, 16, 16], strides = [1, 1, 1, 1]} : vector<1x18x16x16xbf16> to vector<1x16x16x16xbf16>
    %114 = vector.shape_cast %113 : vector<1x16x16x16xbf16> to vector<256x16xbf16>
    %115 = vector.extract_strided_slice %106 {offsets = [0, 1, 0, 0], sizes = [1, 16, 16, 16], strides = [1, 1, 1, 1]} : vector<1x18x16x16xbf16> to vector<1x16x16x16xbf16>
    %116 = vector.shape_cast %115 : vector<1x16x16x16xbf16> to vector<256x16xbf16>
    %117 = vector.extract_strided_slice %107 {offsets = [0, 1, 0, 0], sizes = [1, 16, 16, 16], strides = [1, 1, 1, 1]} : vector<1x18x16x16xbf16> to vector<1x16x16x16xbf16>
    %118 = vector.shape_cast %117 : vector<1x16x16x16xbf16> to vector<256x16xbf16>
    %119 = vector.extract_strided_slice %108 {offsets = [0, 1, 0, 0], sizes = [1, 16, 16, 16], strides = [1, 1, 1, 1]} : vector<1x18x16x16xbf16> to vector<1x16x16x16xbf16>
    %120 = vector.shape_cast %119 : vector<1x16x16x16xbf16> to vector<256x16xbf16>
    %121 = vector.extract_strided_slice %106 {offsets = [0, 2, 0, 0], sizes = [1, 16, 16, 16], strides = [1, 1, 1, 1]} : vector<1x18x16x16xbf16> to vector<1x16x16x16xbf16>
    %122 = vector.shape_cast %121 : vector<1x16x16x16xbf16> to vector<256x16xbf16>
    %123 = vector.extract_strided_slice %107 {offsets = [0, 2, 0, 0], sizes = [1, 16, 16, 16], strides = [1, 1, 1, 1]} : vector<1x18x16x16xbf16> to vector<1x16x16x16xbf16>
    %124 = vector.shape_cast %123 : vector<1x16x16x16xbf16> to vector<256x16xbf16>
    %125 = vector.extract_strided_slice %108 {offsets = [0, 2, 0, 0], sizes = [1, 16, 16, 16], strides = [1, 1, 1, 1]} : vector<1x18x16x16xbf16> to vector<1x16x16x16xbf16>
    %126 = vector.shape_cast %125 : vector<1x16x16x16xbf16> to vector<256x16xbf16>
    %127 = tpu.concatenate %110, %112, %114, %116, %118, %120, %122, %124, %126 in 1 : vector<256x16xbf16>, vector<256x16xbf16>, vector<256x16xbf16>, vector<256x16xbf16>, vector<256x16xbf16>, vector<256x16xbf16>, vector<256x16xbf16>, vector<256x16xbf16>, vector<256x16xbf16> -> vector<256x144xbf16>
    %c0_32 = arith.constant 0 : index
    %c0_33 = arith.constant 0 : index
    %128 = vector.load %arg10[%c0_32, %c0_33] : memref<144x4xbf16, #tpu.memory_space<vmem>>, vector<144x4xbf16>
    %cst_34 = arith.constant dense<0.000000e+00> : vector<256x4xf32>
    %129 = tpu.matmul %127, %128, %cst_34 {dimension_numbers = #tpu.dot_dimension_numbers<[1], [0], [0], [1], [0, 0, 1, 1], [], []>} : vector<256x144xbf16>, vector<144x4xbf16>, vector<256x4xf32> -> vector<256x4xf32>
    %c0_35 = arith.constant 0 : index
    %c0_36 = arith.constant 0 : index
    %130 = vector.load %arg11[%c0_35, %c0_36] : memref<1x4xf32, #tpu.memory_space<vmem>>, vector<1x4xf32>
    %131 = vector.broadcast %130 : vector<1x4xf32> to vector<256x4xf32>
    %132 = arith.addf %129, %131 : vector<256x4xf32>
    %cst_37 = arith.constant 0.000000e+00 : f32
    %133 = vector.broadcast %cst_37 : f32 to vector<256x4xf32>
    %134 = arith.maximumf %132, %133 : vector<256x4xf32>
    %135 = arith.truncf %134 : vector<256x4xf32> to vector<256x4xbf16>
    %c0_38 = arith.constant 0 : index
    %c0_39 = arith.constant 0 : index
    %136 = vector.load %arg12[%c0_38, %c0_39] : memref<4x16xbf16, #tpu.memory_space<vmem>>, vector<4x16xbf16>
    %cst_40 = arith.constant dense<0.000000e+00> : vector<256x16xf32>
    %137 = tpu.matmul %135, %136, %cst_40 {dimension_numbers = #tpu.dot_dimension_numbers<[1], [0], [0], [1], [0, 0, 1, 1], [], []>} : vector<256x4xbf16>, vector<4x16xbf16>, vector<256x16xf32> -> vector<256x16xf32>
    %c0_41 = arith.constant 0 : index
    %c0_42 = arith.constant 0 : index
    %138 = vector.load %arg13[%c0_41, %c0_42] : memref<1x16xf32, #tpu.memory_space<vmem>>, vector<1x16xf32>
    %139 = vector.broadcast %138 : vector<1x16xf32> to vector<256x16xf32>
    %140 = arith.addf %137, %139 : vector<256x16xf32>
    %141 = vector.shape_cast %101 : vector<1x16x16x16xbf16> to vector<256x16xbf16>
    %142 = arith.extf %141 : vector<256x16xbf16> to vector<256x16xf32>
    %143 = arith.addf %140, %142 : vector<256x16xf32>
    %cst_43 = arith.constant 0.000000e+00 : f32
    %144 = vector.broadcast %cst_43 : f32 to vector<256x16xf32>
    %145 = arith.maximumf %143, %144 : vector<256x16xf32>
    %146 = arith.truncf %145 : vector<256x16xf32> to vector<256x16xbf16>
    %147 = vector.shape_cast %146 : vector<256x16xbf16> to vector<1x16x16x16xbf16>
    %c0_44 = arith.constant 0 : index
    %c0_45 = arith.constant 0 : index
    %c0_46 = arith.constant 0 : index
    %c0_47 = arith.constant 0 : index
    %148 = vector.load %arg14[%c0_44, %c0_45, %c0_46, %c0_47] : memref<1x16x16x16xbf16, #tpu.memory_space<vmem>>, vector<1x16x16x16xbf16>
    tpu.vector_store %arg14[%c0_44, %c0_45, %c0_46, %c0_47], %147 {strides = array<i32>} : memref<1x16x16x16xbf16, #tpu.memory_space<vmem>>, vector<1x16x16x16xbf16>,
    return
  }
  func.func @transform_0(%arg0: i32) -> (i32, i32, i32, i32) {
    %c0_i32 = arith.constant 0 : i32
    %c0_i32_0 = arith.constant 0 : i32
    %c0_i32_1 = arith.constant 0 : i32
    %c0_i32_2 = arith.constant 0 : i32
    return %arg0, %c0_i32, %c0_i32_0, %c0_i32_1 : i32, i32, i32, i32
  }
  func.func @transform_1(%arg0: i32) -> (i32, i32) {
    %c0_i32 = arith.constant 0 : i32
    %c0_i32_0 = arith.constant 0 : i32
    %c0_i32_1 = arith.constant 0 : i32
    return %c0_i32, %c0_i32_0 : i32, i32
  }
  func.func @transform_2(%arg0: i32) -> (i32, i32) {
    %c0_i32 = arith.constant 0 : i32
    %c0_i32_0 = arith.constant 0 : i32
    %c0_i32_1 = arith.constant 0 : i32
    return %c0_i32, %c0_i32_0 : i32, i32
  }
  func.func @transform_3(%arg0: i32) -> (i32, i32) {
    %c0_i32 = arith.constant 0 : i32
    %c0_i32_0 = arith.constant 0 : i32
    %c0_i32_1 = arith.constant 0 : i32
    return %c0_i32, %c0_i32_0 : i32, i32
  }
  func.func @transform_4(%arg0: i32) -> (i32, i32) {
    %c0_i32 = arith.constant 0 : i32
    %c0_i32_0 = arith.constant 0 : i32
    %c0_i32_1 = arith.constant 0 : i32
    return %c0_i32, %c0_i32_0 : i32, i32
  }
  func.func @transform_5(%arg0: i32) -> (i32, i32) {
    %c0_i32 = arith.constant 0 : i32
    %c0_i32_0 = arith.constant 0 : i32
    %c0_i32_1 = arith.constant 0 : i32
    return %c0_i32, %c0_i32_0 : i32, i32
  }
  func.func @transform_6(%arg0: i32) -> (i32, i32) {
    %c0_i32 = arith.constant 0 : i32
    %c0_i32_0 = arith.constant 0 : i32
    %c0_i32_1 = arith.constant 0 : i32
    return %c0_i32, %c0_i32_0 : i32, i32
  }
  func.func @transform_7(%arg0: i32) -> (i32, i32) {
    %c0_i32 = arith.constant 0 : i32
    %c0_i32_0 = arith.constant 0 : i32
    %c0_i32_1 = arith.constant 0 : i32
    return %c0_i32, %c0_i32_0 : i32, i32
  }
  func.func @transform_8(%arg0: i32) -> (i32, i32) {
    %c0_i32 = arith.constant 0 : i32
    %c0_i32_0 = arith.constant 0 : i32
    %c0_i32_1 = arith.constant 0 : i32
    return %c0_i32, %c0_i32_0 : i32, i32
  }
  func.func @transform_9(%arg0: i32) -> (i32, i32) {
    %c0_i32 = arith.constant 0 : i32
    %c0_i32_0 = arith.constant 0 : i32
    %c0_i32_1 = arith.constant 0 : i32
    return %c0_i32, %c0_i32_0 : i32, i32
  }
  func.func @transform_10(%arg0: i32) -> (i32, i32) {
    %c0_i32 = arith.constant 0 : i32
    %c0_i32_0 = arith.constant 0 : i32
    %c0_i32_1 = arith.constant 0 : i32
    return %c0_i32, %c0_i32_0 : i32, i32
  }
  func.func @transform_11(%arg0: i32) -> (i32, i32) {
    %c0_i32 = arith.constant 0 : i32
    %c0_i32_0 = arith.constant 0 : i32
    %c0_i32_1 = arith.constant 0 : i32
    return %c0_i32, %c0_i32_0 : i32, i32
  }
  func.func @transform_12(%arg0: i32) -> (i32, i32) {
    %c0_i32 = arith.constant 0 : i32
    %c0_i32_0 = arith.constant 0 : i32
    %c0_i32_1 = arith.constant 0 : i32
    return %c0_i32, %c0_i32_0 : i32, i32
  }
  func.func @transform_13(%arg0: i32) -> (i32, i32, i32, i32) {
    %c0_i32 = arith.constant 0 : i32
    %c0_i32_0 = arith.constant 0 : i32
    %c0_i32_1 = arith.constant 0 : i32
    %c0_i32_2 = arith.constant 0 : i32
    return %arg0, %c0_i32, %c0_i32_0, %c0_i32_1 : i32, i32, i32, i32
  }
}

module attributes {stable_mosaic.version = 11 : i64} {
  func.func @_pov_head_kernel(%arg0: i32, %arg1: i32, %arg2: memref<8x2048xbf16, #tpu.memory_space<vmem>>, %arg3: memref<2048x32xbf16, #tpu.memory_space<vmem>>, %arg4: memref<1x32xf32, #tpu.memory_space<vmem>>, %arg5: memref<8x10xbf16, #tpu.memory_space<vmem>>, %arg6: memref<10x32xbf16, #tpu.memory_space<vmem>>, %arg7: memref<1x32xf32, #tpu.memory_space<vmem>>, %arg8: memref<32x32xbf16, #tpu.memory_space<vmem>>, %arg9: memref<1x32xf32, #tpu.memory_space<vmem>>, %arg10: memref<32x32xbf16, #tpu.memory_space<vmem>>, %arg11: memref<1x32xf32, #tpu.memory_space<vmem>>, %arg12: memref<32x32xbf16, #tpu.memory_space<vmem>>, %arg13: memref<32x32xbf16, #tpu.memory_space<vmem>>, %arg14: memref<1x32xf32, #tpu.memory_space<vmem>>, %arg15: memref<32x32xbf16, #tpu.memory_space<vmem>>, %arg16: memref<1x32xf32, #tpu.memory_space<vmem>>, %arg17: memref<32x4xbf16, #tpu.memory_space<vmem>>, %arg18: memref<1x4xf32, #tpu.memory_space<vmem>>, %arg19: memref<8x4xf32, #tpu.memory_space<vmem>>, %arg20: memref<8x32xf32, #tpu.memory_space<vmem>>) attributes {dimension_semantics = [#tpu.dimension_semantics<parallel>, #tpu.dimension_semantics<arbitrary>], iteration_bounds = array<i64: 1, 2>, scalar_prefetch = 0 : i64, scratch_operands = 1 : i64, tpu.core_type = #tpu.core_type<tc>, window_params = [{transform_indices = @transform_0, window_bounds = array<i64: 8, 2048>}, {transform_indices = @transform_1, window_bounds = array<i64: 2048, 32>}, {pipeline_mode = #tpu.pipeline_mode<synchronous>, transform_indices = @transform_2, window_bounds = array<i64: 1, 32>}, {transform_indices = @transform_3, window_bounds = array<i64: 8, 10>}, {pipeline_mode = #tpu.pipeline_mode<synchronous>, transform_indices = @transform_4, window_bounds = array<i64: 10, 32>}, {pipeline_mode = #tpu.pipeline_mode<synchronous>, transform_indices = @transform_5, window_bounds = array<i64: 1, 32>}, {pipeline_mode = #tpu.pipeline_mode<synchronous>, transform_indices = @transform_6, window_bounds = array<i64: 32, 32>}, {pipeline_mode = #tpu.pipeline_mode<synchronous>, transform_indices = @transform_7, window_bounds = array<i64: 1, 32>}, {pipeline_mode = #tpu.pipeline_mode<synchronous>, transform_indices = @transform_8, window_bounds = array<i64: 32, 32>}, {pipeline_mode = #tpu.pipeline_mode<synchronous>, transform_indices = @transform_9, window_bounds = array<i64: 1, 32>}, {pipeline_mode = #tpu.pipeline_mode<synchronous>, transform_indices = @transform_10, window_bounds = array<i64: 32, 32>}, {pipeline_mode = #tpu.pipeline_mode<synchronous>, transform_indices = @transform_11, window_bounds = array<i64: 32, 32>}, {pipeline_mode = #tpu.pipeline_mode<synchronous>, transform_indices = @transform_12, window_bounds = array<i64: 1, 32>}, {pipeline_mode = #tpu.pipeline_mode<synchronous>, transform_indices = @transform_13, window_bounds = array<i64: 32, 32>}, {pipeline_mode = #tpu.pipeline_mode<synchronous>, transform_indices = @transform_14, window_bounds = array<i64: 1, 32>}, {pipeline_mode = #tpu.pipeline_mode<synchronous>, transform_indices = @transform_15, window_bounds = array<i64: 32, 4>}, {pipeline_mode = #tpu.pipeline_mode<synchronous>, transform_indices = @transform_16, window_bounds = array<i64: 1, 4>}, {transform_indices = @transform_17, window_bounds = array<i64: 8, 4>}]} {
    %c0_i32 = arith.constant 0 : i32
    %0 = arith.cmpi eq, %arg1, %c0_i32 : i32
    %1 = arith.extui %0 : i1 to i32
    %c0_i32_0 = arith.constant 0 : i32
    %2 = arith.cmpi ne, %1, %c0_i32_0 : i32
    scf.if %2 {
      %cst_9 = arith.constant 0.000000e+00 : f32
      %12 = vector.broadcast %cst_9 : f32 to vector<8x32xf32>
      %c0_10 = arith.constant 0 : index
      %c0_11 = arith.constant 0 : index
      %13 = vector.load %arg20[%c0_10, %c0_11] : memref<8x32xf32, #tpu.memory_space<vmem>>, vector<8x32xf32>
      tpu.vector_store %arg20[%c0_10, %c0_11], %12 {strides = array<i32>} : memref<8x32xf32, #tpu.memory_space<vmem>>, vector<8x32xf32>,
    } else {
    }
    %c0 = arith.constant 0 : index
    %c0_1 = arith.constant 0 : index
    %3 = vector.load %arg20[%c0, %c0_1] : memref<8x32xf32, #tpu.memory_space<vmem>>, vector<8x32xf32>
    %c0_2 = arith.constant 0 : index
    %c0_3 = arith.constant 0 : index
    %4 = vector.load %arg2[%c0_2, %c0_3] : memref<8x2048xbf16, #tpu.memory_space<vmem>>, vector<8x2048xbf16>
    %c0_4 = arith.constant 0 : index
    %c0_5 = arith.constant 0 : index
    %5 = vector.load %arg3[%c0_4, %c0_5] : memref<2048x32xbf16, #tpu.memory_space<vmem>>, vector<2048x32xbf16>
    %cst = arith.constant dense<0.000000e+00> : vector<8x32xf32>
    %6 = tpu.matmul %4, %5, %cst {dimension_numbers = #tpu.dot_dimension_numbers<[1], [0], [0], [1], [0, 0, 1, 1], [], []>} : vector<8x2048xbf16>, vector<2048x32xbf16>, vector<8x32xf32> -> vector<8x32xf32>
    %7 = arith.addf %3, %6 : vector<8x32xf32>
    %c0_6 = arith.constant 0 : index
    %c0_7 = arith.constant 0 : index
    %8 = vector.load %arg20[%c0_6, %c0_7] : memref<8x32xf32, #tpu.memory_space<vmem>>, vector<8x32xf32>
    tpu.vector_store %arg20[%c0_6, %c0_7], %7 {strides = array<i32>} : memref<8x32xf32, #tpu.memory_space<vmem>>, vector<8x32xf32>,
    %c1_i32 = arith.constant 1 : i32
    %9 = arith.cmpi eq, %arg1, %c1_i32 : i32
    %10 = arith.extui %9 : i1 to i32
    %c0_i32_8 = arith.constant 0 : i32
    %11 = arith.cmpi ne, %10, %c0_i32_8 : i32
    scf.if %11 {
      %c0_9 = arith.constant 0 : index
      %c0_10 = arith.constant 0 : index
      %12 = vector.load %arg20[%c0_9, %c0_10] : memref<8x32xf32, #tpu.memory_space<vmem>>, vector<8x32xf32>
      %c0_11 = arith.constant 0 : index
      %c0_12 = arith.constant 0 : index
      %13 = vector.load %arg4[%c0_11, %c0_12] : memref<1x32xf32, #tpu.memory_space<vmem>>, vector<1x32xf32>
      %14 = vector.broadcast %13 : vector<1x32xf32> to vector<8x32xf32>
      %15 = arith.addf %12, %14 : vector<8x32xf32>
      %c0_13 = arith.constant 0 : index
      %c0_14 = arith.constant 0 : index
      %16 = vector.load %arg5[%c0_13, %c0_14] : memref<8x10xbf16, #tpu.memory_space<vmem>>, vector<8x10xbf16>
      %c0_15 = arith.constant 0 : index
      %c0_16 = arith.constant 0 : index
      %17 = vector.load %arg6[%c0_15, %c0_16] : memref<10x32xbf16, #tpu.memory_space<vmem>>, vector<10x32xbf16>
      %cst_17 = arith.constant dense<0.000000e+00> : vector<8x32xf32>
      %18 = tpu.matmul %16, %17, %cst_17 {dimension_numbers = #tpu.dot_dimension_numbers<[1], [0], [0], [1], [0, 0, 1, 1], [], []>} : vector<8x10xbf16>, vector<10x32xbf16>, vector<8x32xf32> -> vector<8x32xf32>
      %c0_18 = arith.constant 0 : index
      %c0_19 = arith.constant 0 : index
      %19 = vector.load %arg7[%c0_18, %c0_19] : memref<1x32xf32, #tpu.memory_space<vmem>>, vector<1x32xf32>
      %20 = vector.broadcast %19 : vector<1x32xf32> to vector<8x32xf32>
      %21 = arith.addf %18, %20 : vector<8x32xf32>
      %cst_20 = arith.constant 0.000000e+00 : f32
      %22 = vector.broadcast %cst_20 : f32 to vector<8x32xf32>
      %23 = arith.maximumf %21, %22 : vector<8x32xf32>
      %24 = arith.truncf %23 : vector<8x32xf32> to vector<8x32xbf16>
      %c0_21 = arith.constant 0 : index
      %c0_22 = arith.constant 0 : index
      %25 = vector.load %arg8[%c0_21, %c0_22] : memref<32x32xbf16, #tpu.memory_space<vmem>>, vector<32x32xbf16>
      %cst_23 = arith.constant dense<0.000000e+00> : vector<8x32xf32>
      %26 = tpu.matmul %24, %25, %cst_23 {dimension_numbers = #tpu.dot_dimension_numbers<[1], [0], [0], [1], [0, 0, 1, 1], [], []>} : vector<8x32xbf16>, vector<32x32xbf16>, vector<8x32xf32> -> vector<8x32xf32>
      %c0_24 = arith.constant 0 : index
      %c0_25 = arith.constant 0 : index
      %27 = vector.load %arg9[%c0_24, %c0_25] : memref<1x32xf32, #tpu.memory_space<vmem>>, vector<1x32xf32>
      %28 = vector.broadcast %27 : vector<1x32xf32> to vector<8x32xf32>
      %29 = arith.addf %26, %28 : vector<8x32xf32>
      %cst_26 = arith.constant 0.000000e+00 : f32
      %30 = vector.broadcast %cst_26 : f32 to vector<8x32xf32>
      %31 = arith.maximumf %29, %30 : vector<8x32xf32>
      %32 = arith.truncf %31 : vector<8x32xf32> to vector<8x32xbf16>
      %c0_27 = arith.constant 0 : index
      %c0_28 = arith.constant 0 : index
      %33 = vector.load %arg10[%c0_27, %c0_28] : memref<32x32xbf16, #tpu.memory_space<vmem>>, vector<32x32xbf16>
      %cst_29 = arith.constant dense<0.000000e+00> : vector<8x32xf32>
      %34 = tpu.matmul %32, %33, %cst_29 {dimension_numbers = #tpu.dot_dimension_numbers<[1], [0], [0], [1], [0, 0, 1, 1], [], []>} : vector<8x32xbf16>, vector<32x32xbf16>, vector<8x32xf32> -> vector<8x32xf32>
      %c0_30 = arith.constant 0 : index
      %c0_31 = arith.constant 0 : index
      %35 = vector.load %arg11[%c0_30, %c0_31] : memref<1x32xf32, #tpu.memory_space<vmem>>, vector<1x32xf32>
      %36 = vector.broadcast %35 : vector<1x32xf32> to vector<8x32xf32>
      %37 = arith.addf %34, %36 : vector<8x32xf32>
      %cst_32 = arith.constant 0.000000e+00 : f32
      %38 = vector.broadcast %cst_32 : f32 to vector<8x32xf32>
      %39 = arith.maximumf %37, %38 : vector<8x32xf32>
      %40 = arith.truncf %15 : vector<8x32xf32> to vector<8x32xbf16>
      %c0_33 = arith.constant 0 : index
      %c0_34 = arith.constant 0 : index
      %41 = vector.load %arg12[%c0_33, %c0_34] : memref<32x32xbf16, #tpu.memory_space<vmem>>, vector<32x32xbf16>
      %cst_35 = arith.constant dense<0.000000e+00> : vector<8x32xf32>
      %42 = tpu.matmul %40, %41, %cst_35 {dimension_numbers = #tpu.dot_dimension_numbers<[1], [0], [0], [1], [0, 0, 1, 1], [], []>} : vector<8x32xbf16>, vector<32x32xbf16>, vector<8x32xf32> -> vector<8x32xf32>
      %43 = arith.truncf %39 : vector<8x32xf32> to vector<8x32xbf16>
      %c0_36 = arith.constant 0 : index
      %c0_37 = arith.constant 0 : index
      %44 = vector.load %arg13[%c0_36, %c0_37] : memref<32x32xbf16, #tpu.memory_space<vmem>>, vector<32x32xbf16>
      %cst_38 = arith.constant dense<0.000000e+00> : vector<8x32xf32>
      %45 = tpu.matmul %43, %44, %cst_38 {dimension_numbers = #tpu.dot_dimension_numbers<[1], [0], [0], [1], [0, 0, 1, 1], [], []>} : vector<8x32xbf16>, vector<32x32xbf16>, vector<8x32xf32> -> vector<8x32xf32>
      %46 = arith.addf %42, %45 : vector<8x32xf32>
      %c0_39 = arith.constant 0 : index
      %c0_40 = arith.constant 0 : index
      %47 = vector.load %arg14[%c0_39, %c0_40] : memref<1x32xf32, #tpu.memory_space<vmem>>, vector<1x32xf32>
      %48 = vector.broadcast %47 : vector<1x32xf32> to vector<8x32xf32>
      %49 = arith.addf %46, %48 : vector<8x32xf32>
      %cst_41 = arith.constant 0.000000e+00 : f32
      %50 = vector.broadcast %cst_41 : f32 to vector<8x32xf32>
      %51 = arith.maximumf %49, %50 : vector<8x32xf32>
      %52 = arith.truncf %51 : vector<8x32xf32> to vector<8x32xbf16>
      %c0_42 = arith.constant 0 : index
      %c0_43 = arith.constant 0 : index
      %53 = vector.load %arg15[%c0_42, %c0_43] : memref<32x32xbf16, #tpu.memory_space<vmem>>, vector<32x32xbf16>
      %cst_44 = arith.constant dense<0.000000e+00> : vector<8x32xf32>
      %54 = tpu.matmul %52, %53, %cst_44 {dimension_numbers = #tpu.dot_dimension_numbers<[1], [0], [0], [1], [0, 0, 1, 1], [], []>} : vector<8x32xbf16>, vector<32x32xbf16>, vector<8x32xf32> -> vector<8x32xf32>
      %c0_45 = arith.constant 0 : index
      %c0_46 = arith.constant 0 : index
      %55 = vector.load %arg16[%c0_45, %c0_46] : memref<1x32xf32, #tpu.memory_space<vmem>>, vector<1x32xf32>
      %56 = vector.broadcast %55 : vector<1x32xf32> to vector<8x32xf32>
      %57 = arith.addf %54, %56 : vector<8x32xf32>
      %cst_47 = arith.constant 0.000000e+00 : f32
      %58 = vector.broadcast %cst_47 : f32 to vector<8x32xf32>
      %59 = arith.maximumf %57, %58 : vector<8x32xf32>
      %60 = arith.truncf %59 : vector<8x32xf32> to vector<8x32xbf16>
      %c0_48 = arith.constant 0 : index
      %c0_49 = arith.constant 0 : index
      %61 = vector.load %arg17[%c0_48, %c0_49] : memref<32x4xbf16, #tpu.memory_space<vmem>>, vector<32x4xbf16>
      %cst_50 = arith.constant dense<0.000000e+00> : vector<8x4xf32>
      %62 = tpu.matmul %60, %61, %cst_50 {dimension_numbers = #tpu.dot_dimension_numbers<[1], [0], [0], [1], [0, 0, 1, 1], [], []>} : vector<8x32xbf16>, vector<32x4xbf16>, vector<8x4xf32> -> vector<8x4xf32>
      %c0_51 = arith.constant 0 : index
      %c0_52 = arith.constant 0 : index
      %63 = vector.load %arg18[%c0_51, %c0_52] : memref<1x4xf32, #tpu.memory_space<vmem>>, vector<1x4xf32>
      %64 = vector.broadcast %63 : vector<1x4xf32> to vector<8x4xf32>
      %65 = arith.addf %62, %64 : vector<8x4xf32>
      %c0_53 = arith.constant 0 : index
      %c0_54 = arith.constant 0 : index
      %66 = vector.load %arg19[%c0_53, %c0_54] : memref<8x4xf32, #tpu.memory_space<vmem>>, vector<8x4xf32>
      tpu.vector_store %arg19[%c0_53, %c0_54], %65 {strides = array<i32>} : memref<8x4xf32, #tpu.memory_space<vmem>>, vector<8x4xf32>,
    } else {
    }
    return
  }
  func.func @transform_0(%arg0: i32, %arg1: i32) -> (i32, i32) {
    %c0_i32 = arith.constant 0 : i32
    return %arg0, %arg1 : i32, i32
  }
  func.func @transform_1(%arg0: i32, %arg1: i32) -> (i32, i32) {
    %c0_i32 = arith.constant 0 : i32
    %c0_i32_0 = arith.constant 0 : i32
    return %arg1, %c0_i32 : i32, i32
  }
  func.func @transform_2(%arg0: i32, %arg1: i32) -> (i32, i32) {
    %c0_i32 = arith.constant 0 : i32
    %c0_i32_0 = arith.constant 0 : i32
    %c0_i32_1 = arith.constant 0 : i32
    return %c0_i32, %c0_i32_0 : i32, i32
  }
  func.func @transform_3(%arg0: i32, %arg1: i32) -> (i32, i32) {
    %c0_i32 = arith.constant 0 : i32
    %c0_i32_0 = arith.constant 0 : i32
    return %arg0, %c0_i32 : i32, i32
  }
  func.func @transform_4(%arg0: i32, %arg1: i32) -> (i32, i32) {
    %c0_i32 = arith.constant 0 : i32
    %c0_i32_0 = arith.constant 0 : i32
    %c0_i32_1 = arith.constant 0 : i32
    return %c0_i32, %c0_i32_0 : i32, i32
  }
  func.func @transform_5(%arg0: i32, %arg1: i32) -> (i32, i32) {
    %c0_i32 = arith.constant 0 : i32
    %c0_i32_0 = arith.constant 0 : i32
    %c0_i32_1 = arith.constant 0 : i32
    return %c0_i32, %c0_i32_0 : i32, i32
  }
  func.func @transform_6(%arg0: i32, %arg1: i32) -> (i32, i32) {
    %c0_i32 = arith.constant 0 : i32
    %c0_i32_0 = arith.constant 0 : i32
    %c0_i32_1 = arith.constant 0 : i32
    return %c0_i32, %c0_i32_0 : i32, i32
  }
  func.func @transform_7(%arg0: i32, %arg1: i32) -> (i32, i32) {
    %c0_i32 = arith.constant 0 : i32
    %c0_i32_0 = arith.constant 0 : i32
    %c0_i32_1 = arith.constant 0 : i32
    return %c0_i32, %c0_i32_0 : i32, i32
  }
  func.func @transform_8(%arg0: i32, %arg1: i32) -> (i32, i32) {
    %c0_i32 = arith.constant 0 : i32
    %c0_i32_0 = arith.constant 0 : i32
    %c0_i32_1 = arith.constant 0 : i32
    return %c0_i32, %c0_i32_0 : i32, i32
  }
  func.func @transform_9(%arg0: i32, %arg1: i32) -> (i32, i32) {
    %c0_i32 = arith.constant 0 : i32
    %c0_i32_0 = arith.constant 0 : i32
    %c0_i32_1 = arith.constant 0 : i32
    return %c0_i32, %c0_i32_0 : i32, i32
  }
  func.func @transform_10(%arg0: i32, %arg1: i32) -> (i32, i32) {
    %c0_i32 = arith.constant 0 : i32
    %c0_i32_0 = arith.constant 0 : i32
    %c0_i32_1 = arith.constant 0 : i32
    return %c0_i32, %c0_i32_0 : i32, i32
  }
  func.func @transform_11(%arg0: i32, %arg1: i32) -> (i32, i32) {
    %c0_i32 = arith.constant 0 : i32
    %c0_i32_0 = arith.constant 0 : i32
    %c0_i32_1 = arith.constant 0 : i32
    return %c0_i32, %c0_i32_0 : i32, i32
  }
  func.func @transform_12(%arg0: i32, %arg1: i32) -> (i32, i32) {
    %c0_i32 = arith.constant 0 : i32
    %c0_i32_0 = arith.constant 0 : i32
    %c0_i32_1 = arith.constant 0 : i32
    return %c0_i32, %c0_i32_0 : i32, i32
  }
  func.func @transform_13(%arg0: i32, %arg1: i32) -> (i32, i32) {
    %c0_i32 = arith.constant 0 : i32
    %c0_i32_0 = arith.constant 0 : i32
    %c0_i32_1 = arith.constant 0 : i32
    return %c0_i32, %c0_i32_0 : i32, i32
  }
  func.func @transform_14(%arg0: i32, %arg1: i32) -> (i32, i32) {
    %c0_i32 = arith.constant 0 : i32
    %c0_i32_0 = arith.constant 0 : i32
    %c0_i32_1 = arith.constant 0 : i32
    return %c0_i32, %c0_i32_0 : i32, i32
  }
  func.func @transform_15(%arg0: i32, %arg1: i32) -> (i32, i32) {
    %c0_i32 = arith.constant 0 : i32
    %c0_i32_0 = arith.constant 0 : i32
    %c0_i32_1 = arith.constant 0 : i32
    return %c0_i32, %c0_i32_0 : i32, i32
  }
  func.func @transform_16(%arg0: i32, %arg1: i32) -> (i32, i32) {
    %c0_i32 = arith.constant 0 : i32
    %c0_i32_0 = arith.constant 0 : i32
    %c0_i32_1 = arith.constant 0 : i32
    return %c0_i32, %c0_i32_0 : i32, i32
  }
  func.func @transform_17(%arg0: i32, %arg1: i32) -> (i32, i32) {
    %c0_i32 = arith.constant 0 : i32
    %c0_i32_0 = arith.constant 0 : i32
    return %arg0, %c0_i32 : i32, i32
  }
}

</mosaic_0001>

<bundles_post_ra>
// kernel: qnetwork_forward.3
= control target key start
LH: loop header
LB: loop body
LE: loop exit
PB: predicated region body
PF: predicated region fallthrough
CT: control target
= control target key end

     0   :  { %s5477_s12 = smov 0   ;;  %s7978_s0 = inlined_call_operand.vmem [shape: bf16[2,33,33,12], index: 0, kind: input, shape index: {}]   ;;  %s7979_s1 = inlined_call_operand.vmem [shape: bf16[48,8], index: 1, kind: input, shape index: {}]   ;;  %s7980_s2 = inlined_call_operand.vmem [shape: f32[1,8], index: 2, kind: input, shape index: {}]   ;;  %s7981_s3 = inlined_call_operand.vmem [shape: bf16[2,32,32,8], index: 3, kind: output, shape index: {}]  }
   0x1 LB: > { %s4684_s13 = sadd.s32 4294967295, %s5452_s12   ;;  %p4688_p0 = scmp.ge.s32.totalorder %s5452_s12, 1  ;;  %s5452_s12 = sphi %s5477_s12, %s13_s12  }
   0x2   : > { %p137_p1 = scmp.lt.s32.totalorder %s5452_s12, 3 }
   0x4   : > { %p138_p2 = pnand %p4688_p0, %p137_p1 }
   0x6   : > { %141 = sbr.rel (%p138_p2) target bundleno = 759 (0x2f7), region = 32 }
   0xd   : > { %p161_p3 = scmp.lt.s32.totalorder %s4684_s13, 1  ;;  %s5454_s18 = smov 24   ;;  %vm337_vm0 = vsmask.f32 3328  ;;  %vm338_vm1 = vsmask.f32 7440 }
   0xe   : > { %vm5564_vm2 = vmor %vm337_vm0, %vm338_vm1  ;;  %s5455_s21 = smov 12   ;;  %s5456_s26 = smov 36   ;;  %vm2704_vm3 = vcmask 97280   ;;  %vm2897_vm4 = vcmask 195584   ;;  %vm3026_vm5 = vcmask 293888   ;;  %vm3186_vm6 = vcmask 392192  }
   0xf   : > { %s8025_s13 = smov (!%p161_p3, %s4684_s13), 1  ;;  %vm4500_vm7 = vcmask 60416  }
  0x10   : > { %s5358_s14 = smul.u32 660, %s8025_s13  ;;  %s5022_s29 = sshll.u32 %s8025_s13, 9 }
  0x11   : > { %s7397_s5 = scalar_lea.vmem %s7981_s3, %s5022_s29 }
  0x12   : > { %s5491_s17 = scalar_lea.vmem %s7978_s0, %s5358_s14 }
  0x13   : > { %v257_v0 = vld [vmem:[%s5491_s17 + $0x154] sm:$0xf]  ;;  %v258_v1 = vld [vmem:[%s5491_s17 + $0x158] sm:$0xf]  ;;  %v259_v20 = vld [vmem:[%s5491_s17 + $0x15c] sm:$0xf] }
  0x14   : > { %v177_v2 = vld [vmem:[%s5491_s17 + $0x14] sm:$0xf]  ;;  %v1098_v3 = vshll.u32 %v258_v1, 16  ;;  %v1102_v4 = vshrl.u32 %v258_v1, 16  ;;  %v5496_v5 = vcombine.low %v257_v0, %v258_v1  ;;  %v1089_v6 = vshrl.u32 %v257_v0, 16 }
  0x15   : > { %v178_v7 = vld [vmem:[%s5491_s17 + $0x18] sm:$0xf]  ;;  %v1092_v8 = vshll.u32 %v257_v0, 16  ;;  %v385_v15 = vshrl.u32 %v177_v2, 16  ;;  %v388_v19 = vshll.u32 %v177_v2, 16  ;;  %v1108_v24 = vshll.u32 %v259_v20, 16 }
  0x16   : > { %v394_v9 = vshll.u32 %v178_v7, 16  ;;  %v398_v10 = vshrl.u32 %v178_v7, 16  ;;  %v5499_v11 = vcombine.low %v177_v2, %v178_v7  ;;  %v5501_v12 = vrot.slane %v1098_v3, 5  ;;  %2506 = vrot.lane.b32.xlu1 %v5496_v5, %s5454_s18  ;;  %v260_v23 = vld [vmem:[%s5491_s17 + $0x160] sm:$0xf] }
  0x17   : > { %v1104_v13 = vrot.slane %v1102_v4, 4  ;;  %v1091_v14 = vrot.slane %v1089_v6, 4  ;;  %v1094_v16 = vrot.slane %v1092_v8, 5  ;;  %v5513_v22 = vrot.slane %v385_v15, 4  ;;  %v179_v29 = vld [vmem:[%s5491_s17 + $0x1c] sm:$0xf] }
  0x18   : > { %v5505_v17 = vrot.slane %v394_v9, 5  ;;  %v5507_v18 = vrot.slane %v398_v10, 4  ;;  %2442 = vrot.lane.b32.xlu0 %v5499_v11, %s5454_s18  ;;  %v1112_v25 = vshrl.u32 %v259_v20, 16  ;;  %v5516_v27 = vrot.slane %v388_v19, 5  ;;  %v180_v33 = vld [vmem:[%s5491_s17 + $0x20] sm:$0xf] }
  0x19   : > { %v1105_v21 = vor.u32 %v1104_v13, %v5501_v12  ;;  %v1095_v26 = vor.u32 %v1094_v16, %v1091_v14  ;;  %v1118_v28 = vshll.u32 %v260_v23, 16  ;;  %v1122_v32 = vshrl.u32 %v260_v23, 16  ;;  %v174_v34 = vld [vmem:[%s5491_s17 + $0x8] sm:$0xf]  ;;  %v175_v39 = vld [vmem:[%s5491_s17 + $0xc] sm:$0xf] }
  0x1a   : > { %v401_v31 = vor.u32 %v5507_v18, %v5505_v17  ;;  %v391_v36 = vor.u32 %v5516_v27, %v5513_v22  ;;  %v5529_v37 = vrot.slane %v1108_v24, 5  ;;  %v5531_v38 = vrot.slane %v1112_v25, 4  ;;  %v176_v44 = vld [vmem:[%s5491_s17 + $0x10] sm:$0x1]  ;;  %v172_v49 = vld [vmem:[%s5491_s17] sm:$0xf] }
  0x1b   : > { %v5519_v30 = vrot.slane %v1105_v21, 4  ;;  %v5525_v35 = vrot.slane %v1095_v26, 4  ;;  %v5534_v40 = vrot.slane %v1118_v28, 5  ;;  %v5536_v41 = vcombine.low %v259_v20, %v260_v23  ;;  %v173_v54 = vld [vmem:[%s5491_s17 + $0x4] sm:$0xf] }
  0x1c   : > { %v404_v42 = vshll.u32 %v179_v29, 16  ;;  %v408_v43 = vshrl.u32 %v179_v29, 16  ;;  %v5539_v45 = vrot.slane %v1122_v32, 4  ;;  %v414_v46 = vshll.u32 %v180_v33, 16  ;;  %v254_v63 = vld [vmem:[%s5491_s17 + $0x148] sm:$0xf] }
  0x1d   : > { %v418_v47 = vshrl.u32 %v180_v33, 16  ;;  %v5541_v48 = vcombine.low %v179_v29, %v180_v33  ;;  %2508 = vrot.lane.b32.xlu1 %v5536_v41, %s5454_s18  ;;  %v360_v52 = vshll.u32 %v174_v34, 16  ;;  %v364_v53 = vshrl.u32 %v174_v34, 16  ;;  %v255_v4 = vld [vmem:[%s5491_s17 + $0x14c] sm:$0xf]  ;;  %v5392_v10 = vld [vmem:[%s7979_s1] sm:$0xff]  }
  0x1e   : > { %v5546_v50 = vrot.slane %v404_v42, 5  ;;  %v5548_v51 = vrot.slane %v408_v43, 4  ;;  %v5551_v55 = vrot.slane %v414_v46, 5  ;;  %v370_v57 = vshll.u32 %v175_v39, 16  ;;  %v256_v23 = vld [vmem:[%s5491_s17 + $0x150] sm:$0x1]  ;;  %5218 = vmatprep.subr.bf16.mxu0 %v5392_v10  ;;  %5352 = vmatprep.subr.bf16.mxu1 %v5392_v10 }
  0x1f   : > { %v5553_v56 = vrot.slane %v418_v47, 4  ;;  %2444 = vrot.lane.b32.xlu0 %v5541_v48, %s5454_s18  ;;  %v374_v58 = vshrl.u32 %v175_v39, 16  ;;  %v362_v59 = vrot.slane %v360_v52, 5  ;;  %v366_v60 = vrot.slane %v364_v53, 4  ;;  %v5572_v33 = vld [vmem:[%s5491_s17 + $0x140] sm:$0xf]  ;;  %5219 = vmatpush3.bf16.msra.mxu0 %v5392_v10 }
  0x20   : > { %v380_v61 = vshll.u32 %v176_v44, 16  ;;  %v341_v62 = vshrl.u32 %v172_v49, 16  ;;  %v372_v0 = vrot.slane %v370_v57, 5  ;;  %v344_v2 = vshll.u32 %v172_v49, 16  ;;  %5355 = vmatpush3.bf16.msra.mxu1 %v5392_v10  ;;  %v5579_v52 = vld [vmem:[%s5491_s17 + $0x144] sm:$0xf] }
  0x21   : > { %v376_v1 = vrot.slane %v374_v58, 4  ;;  %v350_v3 = vshll.u32 %v173_v54, 16  ;;  %v367_v6 = vor.u32 %v366_v60, %v362_v59  ;;  %v354_v9 = vshrl.u32 %v173_v54, 16 }
  0x22   : > { %v382_v7 = vrot.slane %v380_v61, 5  ;;  %v343_v8 = vrot.slane %v341_v62, 4  ;;  %v346_v15 = vrot.slane %v344_v2, 5  ;;  %v1064_v19 = vshll.u32 %v254_v63, 16 }
  0x23   : > { %v377_v14 = vor.u32 %v376_v1, %v372_v0  ;;  %v352_v16 = vrot.slane %v350_v3, 5  ;;  %v368_v20 = vrot.slane %v367_v6, 4  ;;  %v356_v21 = vrot.slane %v354_v9, 4 }
  0x24   : > { %v1068_v24 = vshrl.u32 %v254_v63, 16  ;;  %v1074_v25 = vshll.u32 %v255_v4, 16  ;;  %v347_v28 = vor.u32 %v346_v15, %v343_v8  ;;  %v5569_v29 = vrot.slane %v1064_v19, 5 }
  0x25   : > { %v378_v26 = vrot.slane %v377_v14, 4  ;;  %v1078_v32 = vshrl.u32 %v255_v4, 16  ;;  %v373_v34 = vsel %vm5564_vm2, %v368_v20, %v372_v0  ;;  %v357_v39 = vor.u32 %v356_v21, %v352_v16  ;;  %v5395_v4 = vld [vmem:[%s7979_s1 + $0x8] sm:$0xff]  }
  0x26   : > { %v1070_v42 = vrot.slane %v1068_v24, 4  ;;  %v1076_v43 = vrot.slane %v1074_v25, 5  ;;  %v348_v46 = vrot.slane %v347_v28, 4  ;;  %v1084_v49 = vshll.u32 %v256_v23, 16  ;;  %5220 = vmatprep.subr.bf16.mxu0 %v5395_v4  ;;  %5353 = vmatprep.subr.bf16.mxu1 %v5395_v4  ;;  %v261_v23 = vld [vmem:[%s5491_s17 + $0x164] sm:$0x1] }
  0x27   : > { %v383_v44 = vsel %vm5564_vm2, %v378_v26, %v382_v7  ;;  %v1080_v47 = vrot.slane %v1078_v32, 4  ;;  %v358_v54 = vrot.slane %v357_v39, 4  ;;  %v1045_v58 = vshrl.u32 %v5572_v33, 16  ;;  %5221 = vmatpush3.bf16.msra.mxu0 %v5395_v4  ;;  %v181_v25 = vld [vmem:[%s5491_s17 + $0x24] sm:$0x1]  ;;  %5356 = vmatpush3.bf16.msra.mxu1 %v5395_v4 }
  0x28   : > { %v4757_v53 = vcombine.low %v373_v34, %v383_v44  ;;  %v1071_v57 = vor.u32 %v1070_v42, %v5569_v29  ;;  %v353_v60 = vsel %vm5564_vm2, %v348_v46, %v352_v16  ;;  %v1086_v62 = vrot.slane %v1084_v49, 5  ;;  %v5398_v16 = vld [vmem:[%s7979_s1 + $0x10] sm:$0xff]   ;;  %v5633_v39 = vld [vmem:[%s5491_s17 + $0x168] sm:$0xf]  ;;  %v263_v46 = vld [vmem:[%s5491_s17 + $0x16c] sm:$0xf] }
  0x29   : > { %v1081_v61 = vor.u32 %v1080_v47, %v1076_v43  ;;  %v1048_v63 = vshll.u32 %v5572_v33, 16  ;;  %v363_v0 = vsel %vm5564_vm2, %v358_v54, %v362_v59  ;;  %v1047_v2 = vrot.slane %v1045_v58, 4  ;;  %5222 = vmatprep.subr.bf16.mxu0 %v5398_v16  ;;  %5354 = vmatprep.subr.bf16.mxu1 %v5398_v16 }
  0x2a   : > { %2306 = vrot.lane.b32.xlu1 %v4757_v53, %s5455_s21  ;;  %v1072_v1 = vrot.slane %v1071_v57, 4  ;;  %v1054_v3 = vshll.u32 %v5579_v52, 16  ;;  %v4756_v6 = vcombine.low %v353_v60, %v363_v0  ;;  %v1058_v9 = vshrl.u32 %v5579_v52, 16  ;;  %v5656_v60 = vld [vmem:[%s5491_s17 + $0x28] sm:$0xf] }
  0x2b   : > { %v1082_v7 = vrot.slane %v1081_v61, 4  ;;  %v1050_v8 = vrot.slane %v1048_v63, 5  ;;  %v1101_v59 = vsel %vm5564_vm2, %v5525_v35, %v5501_v12  ;;  %v1111_v15 = vsel %vm5564_vm2, %v5519_v30, %v5529_v37  ;;  %5223 = vmatpush3.bf16.msra.mxu0 %v5398_v16  ;;  %5357 = vmatpush3.bf16.msra.mxu1 %v5398_v16 }
  0x2c   : > { %v1077_v10 = vsel %vm5564_vm2, %v1072_v1, %v1076_v43  ;;  %v1056_v14 = vrot.slane %v1054_v3, 5  ;;  %2304 = vrot.lane.b32.xlu0 %v4756_v6, %s5455_s21  ;;  %v1060_v21 = vrot.slane %v1058_v9, 4  ;;  %v402_v12 = vrot.slane %v401_v31, 4  ;;  %v183_v1 = vld [vmem:[%s5491_s17 + $0x2c] sm:$0xf] }
  0x2d   : > { %v1087_v19 = vsel %vm5564_vm2, %v1082_v7, %v1086_v62  ;;  %v1051_v20 = vor.u32 %v1050_v8, %v1047_v2  ;;  %v392_v30 = vrot.slane %v391_v36, 4  ;;  %v1115_v24 = vor.u32 %v5531_v38, %v5529_v37  ;;  %v265_v2 = vld [vmem:[%s5491_s17 + $0x174] sm:$0xf] }
  0x2e   : > { %v5617_v35 = vcombine.low %v1077_v10, %v1087_v19  ;;  %v1061_v28 = vor.u32 %v1060_v21, %v1056_v14  ;;  %v4790_v32 = vcombine.low %v1101_v59, %v1111_v15  ;;  %v1125_v34 = vor.u32 %v5539_v45, %v5534_v40 }
  0x2f   : > { %v1052_v26 = vrot.slane %v1051_v20, 4  ;;  %v1116_v18 = vrot.slane %v1115_v24, 4  ;;  %v1128_v22 = vshll.u32 %v261_v23, 16  ;;  %v411_v27 = vor.u32 %v5548_v51, %v5546_v50  ;;  %v184_v20 = vld [vmem:[%s5491_s17 + $0x30] sm:$0xf] }
  0x30   : > { %7997 = vst [vmem:[#allocation2_spill] sm:$0xff] %v5617_v35  ;;  %2370 = vrot.lane.b32.xlu1 %v5617_v35, %s5455_s21  ;;  %v421_v31 = vor.u32 %v5553_v56, %v5551_v55  ;;  %v1062_v37 = vrot.slane %v1061_v28, 4  ;;  %v1126_v38 = vrot.slane %v1125_v34, 4  ;;  %v424_v45 = vshll.u32 %v181_v25, 16 }
  0x31   : > { %v1057_v36 = vsel %vm5564_vm2, %v1052_v26, %v1056_v14  ;;  %v1121_v42 = vsel %vm5564_vm2, %v1116_v18, %v5534_v40  ;;  %v1130_v43 = vrot.slane %v1128_v22, 5  ;;  %v412_v44 = vrot.slane %v411_v27, 4  ;;  %v266_v27 = vld [vmem:[%s5491_s17 + $0x178] sm:$0x1] }
  0x32   : > { %v422_v51 = vrot.slane %v421_v31, 4  ;;  %v1067_v56 = vsel %vm5564_vm2, %v1062_v37, %v5569_v29  ;;  %v397_v47 = vsel %vm5564_vm2, %v392_v30, %v5505_v17  ;;  %v407_v49 = vsel %vm5564_vm2, %v402_v12, %v5546_v50  ;;  %v264_v50 = vld [vmem:[%s5491_s17 + $0x170] sm:$0xf]  ;;  %v185_v12 = vld [vmem:[%s5491_s17 + $0x34] sm:$0xf] }
  0x33   : > { %v426_v40 = vrot.slane %v424_v45, 5  ;;  %v5648_v53 = vcombine.low %v1057_v36, %v1067_v56  ;;  %v1131_v54 = vsel %vm5564_vm2, %v1126_v38, %v1130_v43  ;;  %v1133_v29 = vshrl.u32 %v5633_v39, 16 }
  0x34   : > { %2640 = vrot.lane.b32.xlu1 %v4790_v32, %s5456_s26  ;;  %v1136_v57 = vshll.u32 %v5633_v39, 16  ;;  %v4791_v17 = vcombine.low %v1121_v42, %v1131_v54  ;;  %v1142_v58 = vshll.u32 %v263_v46, 16  ;;  %v4758_v61 = vcombine.low %v397_v47, %v407_v49 }
  0x35   : > { %7998 = vst [vmem:[#allocation3_spill] sm:$0xff] %v5648_v53  ;;  %2368 = vrot.lane.b32.xlu0 %v5648_v53, %s5455_s21  ;;  %v417_v62 = vsel %vm5564_vm2, %v412_v44, %v5551_v55  ;;  %v427_v63 = vsel %vm5564_vm2, %v422_v51, %v426_v40  ;;  %v1146_v0 = vshrl.u32 %v263_v46, 16  ;;  %v1135_v3 = vrot.slane %v1133_v29, 4  ;;  %v5935_v53 = vld [vmem:[%s5491_s17 + $0xc] sm:$0xf] }
  0x36   : > { %v1138_v4 = vrot.slane %v1136_v57, 5  ;;  %v429_v6 = vshrl.u32 %v5656_v60, 16  ;;  %v1152_v7 = vshll.u32 %v264_v50, 16  ;;  %v4759_v8 = vcombine.low %v417_v62, %v427_v63 }
  0x37   : > { %v1144_v9 = vrot.slane %v1142_v58, 5  ;;  %v432_v10 = vshll.u32 %v5656_v60, 16  ;;  %v1156_v55 = vshrl.u32 %v264_v50, 16  ;;  %v1148_v14 = vrot.slane %v1146_v0, 4 }
  0x38   : > { %2642 = vrot.lane.b32.xlu1 %v4791_v17, %s5456_s26  ;;  %v438_v59 = vshll.u32 %v183_v1, 16  ;;  %v1162_v15 = vshll.u32 %v265_v2, 16  ;;  %v1166_v16 = vshrl.u32 %v265_v2, 16  ;;  %v442_v19 = vshrl.u32 %v183_v1, 16 }
  0x39   : > { %2576 = vrot.lane.b32.xlu0 %v4758_v61, %s5456_s26  ;;  %v431_v21 = vrot.slane %v429_v6, 4  ;;  %v1154_v23 = vrot.slane %v1152_v7, 5  ;;  %v1158_v30 = vrot.slane %v1156_v55, 4  ;;  %v1139_v26 = vor.u32 %v1138_v4, %v1135_v3 }
  0x3a   : > { %v1164_v24 = vrot.slane %v1162_v15, 5  ;;  %v1168_v25 = vrot.slane %v1166_v16, 4  ;;  %v434_v28 = vrot.slane %v432_v10, 5  ;;  %v440_v34 = vrot.slane %v438_v59, 5  ;;  %v268_v10 = vld [vmem:[%s5491_s17 + $0x180] sm:$0xf] }
  0x3b   : > { %v448_v18 = vshll.u32 %v184_v20, 16  ;;  %v1149_v22 = vor.u32 %v1148_v14, %v1144_v9  ;;  %v444_v31 = vrot.slane %v442_v19, 4  ;;  %v452_v36 = vshrl.u32 %v184_v20, 16 }
  0x3c   : > { %2372 = vrot.lane.b32.xlu1 %v4790_v32, %s5455_s21  ;;  %v458_v37 = vshll.u32 %v185_v12, 16  ;;  %v462_v38 = vshrl.u32 %v185_v12, 16  ;;  %v5679_v32 = vcombine.low %v5633_v39, %v263_v46  ;;  %v1140_v45 = vrot.slane %v1139_v26, 4  ;;  %v186_v46 = vld [vmem:[%s5491_s17 + $0x38] sm:$0x1] }
  0x3d   : > { %2578 = vrot.lane.b32.xlu0 %v4759_v8, %s5456_s26  ;;  %v1150_v42 = vrot.slane %v1149_v22, 4  ;;  %v1159_v43 = vor.u32 %v1158_v30, %v1154_v23  ;;  %v1169_v44 = vor.u32 %v1168_v25, %v1164_v24  ;;  %v1172_v51 = vshll.u32 %v266_v27, 16 }
  0x3e   : > { %v450_v56 = vrot.slane %v448_v18, 5  ;;  %v435_v47 = vor.u32 %v434_v28, %v431_v21  ;;  %v454_v49 = vrot.slane %v452_v36, 4  ;;  %v460_v40 = vrot.slane %v458_v37, 5  ;;  %v187_v28 = vld [vmem:[%s5491_s17 + $0x3c] sm:$0xf] }
  0x3f   : > { %v464_v54 = vrot.slane %v462_v38, 4  ;;  %v445_v29 = vor.u32 %v444_v31, %v440_v34  ;;  %v5684_v57 = vcombine.low %v264_v50, %v265_v2  ;;  %v1145_v39 = vsel %vm5564_vm2, %v1140_v45, %v1144_v9 }
  0x40   : > { %2374 = vrot.lane.b32.xlu1 %v4791_v17, %s5455_s21  ;;  %v1155_v17 = vsel %vm5564_vm2, %v1150_v42, %v1154_v23  ;;  %v1160_v58 = vrot.slane %v1159_v43, 4  ;;  %v1174_v62 = vrot.slane %v1172_v51, 5  ;;  %v5693_v63 = vcombine.low %v5656_v60, %v183_v1 }
  0x41   : > { %2308 = vrot.lane.b32.xlu0 %v4758_v61, %s5455_s21  ;;  %v1170_v61 = vrot.slane %v1169_v44, 4  ;;  %v436_v0 = vrot.slane %v435_v47, 4  ;;  %v446_v50 = vrot.slane %v445_v29, 4  ;;  %v455_v2 = vor.u32 %v454_v49, %v450_v56  ;;  %v189_v47 = vld [vmem:[%s5491_s17 + $0x44] sm:$0xf] }
  0x42   : > { %v465_v3 = vor.u32 %v464_v54, %v460_v40  ;;  %v468_v4 = vshll.u32 %v186_v46, 16  ;;  %v4792_v6 = vcombine.low %v1145_v39, %v1155_v17  ;;  %v1165_v7 = vsel %vm5564_vm2, %v1160_v58, %v1164_v24  ;;  %v270_v24 = vld [vmem:[%s5491_s17 + $0x188] sm:$0xf] }
  0x43   : > { %v1175_v9 = vsel %vm5564_vm2, %v1170_v61, %v1174_v62  ;;  %v5705_v60 = vcombine.low %v184_v20, %v185_v12  ;;  %v441_v1 = vsel %vm5564_vm2, %v436_v0, %v440_v34  ;;  %v451_v55 = vsel %vm5564_vm2, %v446_v50, %v450_v56  ;;  %v269_v20 = vld [vmem:[%s5491_s17 + $0x184] sm:$0xf]  ;;  %v188_v34 = vld [vmem:[%s5491_s17 + $0x40] sm:$0xf]  ;;  %v271_v50 = vld [vmem:[%s5491_s17 + $0x18c] sm:$0x1] }
  0x44   : > { %2510 = vrot.lane.b32.xlu1 %v5679_v32, %s5454_s18  ;;  %v456_v14 = vrot.slane %v455_v2, 4  ;;  %v466_v59 = vrot.slane %v465_v3, 4  ;;  %v470_v15 = vrot.slane %v468_v4, 5  ;;  %v4793_v16 = vcombine.low %v1165_v7, %v1175_v9 }
  0x45   : > { %2310 = vrot.lane.b32.xlu0 %v4759_v8, %s5455_s21  ;;  %v267_v8 = vld [vmem:[%s5491_s17 + $0x17c] sm:$0xf]  ;;  %v1186_v23 = vshll.u32 %v268_v10, 16  ;;  %v1190_v30 = vshrl.u32 %v268_v10, 16  ;;  %v4760_v12 = vcombine.low %v441_v1, %v451_v55  ;;  %v1196_v31 = vshll.u32 %v269_v20, 16 }
  0x46   : > { %v1177_v19 = vshrl.u32 %v267_v8, 16  ;;  %v1180_v21 = vshll.u32 %v267_v8, 16  ;;  %v461_v25 = vsel %vm5564_vm2, %v456_v14, %v460_v40  ;;  %v471_v26 = vsel %vm5564_vm2, %v466_v59, %v470_v15  ;;  %v190_v40 = vld [vmem:[%s5491_s17 + $0x48] sm:$0xf] }
  0x47   : > { %v1188_v27 = vrot.slane %v1186_v23, 5  ;;  %v1192_v36 = vrot.slane %v1190_v30, 4  ;;  %v1200_v37 = vshrl.u32 %v269_v20, 16  ;;  %v1206_v38 = vshll.u32 %v270_v24, 16 }
  0x48   : > { %2512 = vrot.lane.b32.xlu1 %v5684_v57, %s5454_s18  ;;  %v1179_v18 = vrot.slane %v1177_v19, 4  ;;  %v1182_v22 = vrot.slane %v1180_v21, 5  ;;  %v1210_v45 = vshrl.u32 %v270_v24, 16  ;;  %v4761_v42 = vcombine.low %v461_v25, %v471_v26 }
  0x49   : > { %2446 = vrot.lane.b32.xlu0 %v5693_v63, %s5454_s18  ;;  %v473_v43 = vshrl.u32 %v187_v28, 16  ;;  %v476_v44 = vshll.u32 %v187_v28, 16  ;;  %v482_v51 = vshll.u32 %v188_v34, 16  ;;  %v486_v56 = vshrl.u32 %v188_v34, 16 }
  0x4a   : > { %v1198_v49 = vrot.slane %v1196_v31, 5  ;;  %v1183_v54 = vor.u32 %v1182_v22, %v1179_v18  ;;  %v1202_v29 = vrot.slane %v1200_v37, 4  ;;  %v1208_v39 = vrot.slane %v1206_v38, 5 }
  0x4b   : > { %v1212_v46 = vrot.slane %v1210_v45, 4  ;;  %v1193_v17 = vor.u32 %v1192_v36, %v1188_v27  ;;  %v475_v58 = vrot.slane %v473_v43, 4  ;;  %v478_v61 = vrot.slane %v476_v44, 5  ;;  %v272_v44 = vld [vmem:[%s5491_s17 + $0x190] sm:$0xf] }
  0x4c   : > { %2644 = vrot.lane.b32.xlu1 %v4792_v6, %s5456_s26  ;;  %v484_v62 = vrot.slane %v482_v51, 5  ;;  %v492_v0 = vshll.u32 %v189_v47, 16  ;;  %v488_v2 = vrot.slane %v486_v56, 4  ;;  %v496_v3 = vshrl.u32 %v189_v47, 16 }
  0x4d   : > { %2448 = vrot.lane.b32.xlu0 %v5705_v60, %s5454_s18  ;;  %v502_v4 = vshll.u32 %v190_v40, 16  ;;  %v506_v7 = vshrl.u32 %v190_v40, 16  ;;  %v1184_v9 = vrot.slane %v1183_v54, 4  ;;  %v1194_v1 = vrot.slane %v1193_v17, 4 }
  0x4e   : > { %v1203_v55 = vor.u32 %v1202_v29, %v1198_v49  ;;  %v1213_v14 = vor.u32 %v1212_v46, %v1208_v39  ;;  %v1216_v59 = vshll.u32 %v271_v50, 16  ;;  %v494_v15 = vrot.slane %v492_v0, 5  ;;  %v192_v50 = vld [vmem:[%s5491_s17 + $0x50] sm:$0xf] }
  0x4f   : > { %v479_v19 = vor.u32 %v478_v61, %v475_v58  ;;  %v498_v21 = vrot.slane %v496_v3, 4  ;;  %v504_v23 = vrot.slane %v502_v4, 5  ;;  %v508_v30 = vrot.slane %v506_v7, 4  ;;  %v275_v61 = vld [vmem:[%s5491_s17 + $0x19c] sm:$0xf] }
  0x50   : > { %2646 = vrot.lane.b32.xlu1 %v4793_v16, %s5456_s26  ;;  %v489_v25 = vor.u32 %v488_v2, %v484_v62  ;;  %v1199_v26 = vsel %vm5564_vm2, %v1194_v1, %v1198_v49  ;;  %v1214_v18 = vrot.slane %v1213_v14, 4  ;;  %v1218_v22 = vrot.slane %v1216_v59, 5  ;;  %v193_v2 = vld [vmem:[%s5491_s17 + $0x54] sm:$0xf] }
  0x51   : > { %2580 = vrot.lane.b32.xlu0 %v4760_v12, %s5456_s26  ;;  %v5743_v31 = vcombine.low %v187_v28, %v188_v34  ;;  %v480_v36 = vrot.slane %v479_v19, 4  ;;  %v5755_v28 = vcombine.low %v189_v47, %v190_v40  ;;  %v1224_v46 = vshll.u32 %v272_v44, 16  ;;  %v274_v47 = vld [vmem:[%s5491_s17 + $0x198] sm:$0xf] }
  0x52   : > { %v490_v37 = vrot.slane %v489_v25, 4  ;;  %v1219_v43 = vsel %vm5564_vm2, %v1214_v18, %v1218_v22  ;;  %v1250_v14 = vshll.u32 %v275_v61, 16  ;;  %v1254_v59 = vshrl.u32 %v275_v61, 16  ;;  %v194_v25 = vld [vmem:[%s5491_s17 + $0x58] sm:$0xf] }
  0x53   : > { %v485_v34 = vsel %vm5564_vm2, %v480_v36, %v484_v62  ;;  %v1226_v4 = vrot.slane %v1224_v46, 5  ;;  %v517_v19 = vshrl.u32 %v192_v50, 16 }
  0x54   : > { %2376 = vrot.lane.b32.xlu1 %v4792_v6, %s5455_s21  ;;  %v5730_v6 = vcombine.low %v267_v8, %v268_v10  ;;  %v1189_v8 = vsel %vm5564_vm2, %v1184_v9, %v1188_v27  ;;  %v191_v10 = vld [vmem:[%s5491_s17 + $0x4c] sm:$0x1]  ;;  %v495_v51 = vsel %vm5564_vm2, %v490_v37, %v494_v15  ;;  %v1240_v9 = vshll.u32 %v274_v47, 16 }
  0x55   : > { %2582 = vrot.lane.b32.xlu0 %v4761_v42, %s5456_s26  ;;  %v512_v38 = vshll.u32 %v191_v10, 16  ;;  %v4794_v27 = vcombine.low %v1189_v8, %v1199_v26  ;;  %v4762_v40 = vcombine.low %v485_v34, %v495_v51  ;;  %v195_v10 = vld [vmem:[%s5491_s17 + $0x5c] sm:$0xf]  ;;  %v1252_v18 = vrot.slane %v1250_v14, 5 }
  0x56   : > { %v1242_v8 = vrot.slane %v1240_v9, 5  ;;  %v1256_v22 = vrot.slane %v1254_v59, 4  ;;  %v519_v37 = vrot.slane %v517_v19, 4  ;;  %v540_v34 = vshrl.u32 %v194_v25, 16 }
  0x57   : > { %v514_v54 = vrot.slane %v512_v38, 5  ;;  %v536_v38 = vshll.u32 %v194_v25, 16  ;;  %v546_v51 = vshll.u32 %v195_v10, 16  ;;  %v5793_v59 = vcombine.low %v192_v50, %v193_v2 }
  0x58   : > { %2378 = vrot.lane.b32.xlu1 %v4793_v16, %s5455_s21  ;;  %v5735_v16 = vcombine.low %v269_v20, %v270_v24  ;;  %v499_v20 = vor.u32 %v498_v21, %v494_v15  ;;  %v509_v24 = vor.u32 %v508_v30, %v504_v23  ;;  %v520_v21 = vshll.u32 %v192_v50, 16 }
  0x59   : > { %2312 = vrot.lane.b32.xlu0 %v4760_v12, %s5455_s21  ;;  %v1204_v12 = vrot.slane %v1203_v55, 4  ;;  %v1244_v55 = vshrl.u32 %v274_v47, 16  ;;  %v530_v30 = vshrl.u32 %v193_v2, 16  ;;  %v1257_v46 = vor.u32 %v1256_v22, %v1252_v18 }
  0x5a   : > { %v500_v56 = vrot.slane %v499_v20, 4  ;;  %v510_v49 = vrot.slane %v509_v24, 4  ;;  %v522_v20 = vrot.slane %v520_v21, 5  ;;  %v5805_v50 = vcombine.low %v194_v25, %v195_v10  ;;  %v279_v25 = vld [vmem:[%s5491_s17 + $0x1ac] sm:$0xf] }
  0x5b   : > { %v1209_v45 = vsel %vm5564_vm2, %v1204_v12, %v1208_v39  ;;  %v1221_v39 = vshrl.u32 %v272_v44, 16  ;;  %v1246_v12 = vrot.slane %v1244_v55, 4  ;;  %v1258_v55 = vrot.slane %v1257_v46, 4  ;;  %v198_v46 = vld [vmem:[%s5491_s17 + $0x68] sm:$0xf] }
  0x5c   : > { %2514 = vrot.lane.b32.xlu1 %v5730_v6, %s5454_s18  ;;  %v4795_v29 = vcombine.low %v1209_v45, %v1219_v43  ;;  %v505_v62 = vsel %vm5564_vm2, %v500_v56, %v504_v23  ;;  %v515_v0 = vsel %vm5564_vm2, %v510_v49, %v514_v54  ;;  %v526_v23 = vshll.u32 %v193_v2, 16  ;;  %v276_v45 = vld [vmem:[%s5491_s17 + $0x1a0] sm:$0x1] }
  0x5d   : > { %2314 = vrot.lane.b32.xlu0 %v4761_v42, %s5455_s21  ;;  %v273_v42 = vld [vmem:[%s5491_s17 + $0x194] sm:$0xf]  ;;  %v1223_v3 = vrot.slane %v1221_v39, 4  ;;  %v4763_v15 = vcombine.low %v505_v62, %v515_v0  ;;  %v532_v43 = vrot.slane %v530_v30, 4  ;;  %v550_v56 = vshrl.u32 %v195_v10, 16 }
  0x5e   : > { %v1230_v17 = vshll.u32 %v273_v42, 16  ;;  %v1234_v58 = vshrl.u32 %v273_v42, 16  ;;  %v528_v24 = vrot.slane %v526_v23, 5  ;;  %v1247_v39 = vor.u32 %v1246_v12, %v1242_v8 }
  0x5f   : > { %v1227_v26 = vor.u32 %v1226_v4, %v1223_v3  ;;  %v523_v62 = vor.u32 %v522_v20, %v519_v37  ;;  %v542_v0 = vrot.slane %v540_v34, 4  ;;  %v548_v3 = vrot.slane %v546_v51, 5 }
  0x60   : > { %2516 = vrot.lane.b32.xlu1 %v5735_v16, %s5454_s18  ;;  %v1232_v7 = vrot.slane %v1230_v17, 5  ;;  %v1236_v1 = vrot.slane %v1234_v58, 4  ;;  %v1260_v17 = vshll.u32 %v276_v45, 16  ;;  %v538_v58 = vrot.slane %v536_v38, 5 }
  0x61   : > { %2450 = vrot.lane.b32.xlu0 %v5743_v31, %s5454_s18  ;;  %v1228_v49 = vrot.slane %v1227_v26, 4  ;;  %v552_v4 = vrot.slane %v550_v56, 4  ;;  %v533_v9 = vor.u32 %v532_v43, %v528_v24  ;;  %v524_v19 = vrot.slane %v523_v62, 4  ;;  %v277_v26 = vld [vmem:[%s5491_s17 + $0x1a4] sm:$0xf] }
  0x62   : > { %v1237_v36 = vor.u32 %v1236_v1, %v1232_v7  ;;  %v1262_v14 = vrot.slane %v1260_v17, 5  ;;  %v1265_v20 = vshrl.u32 %v277_v26, 16  ;;  %v1268_v38 = vshll.u32 %v277_v26, 16  ;;  %v197_v56 = vld [vmem:[%s5491_s17 + $0x64] sm:$0xf] }
  0x63   : > { %v534_v21 = vrot.slane %v533_v9, 4  ;;  %v529_v2 = vsel %vm5564_vm2, %v524_v19, %v528_v24  ;;  %v280_v24 = vld [vmem:[%s5491_s17 + $0x1b0] sm:$0xf]  ;;  %v1284_v17 = vshll.u32 %v279_v25, 16  ;;  %v1288_v62 = vshrl.u32 %v279_v25, 16 }
  0x64   : > { %2648 = vrot.lane.b32.xlu1 %v4794_v27, %s5456_s26  ;;  %v1238_v54 = vrot.slane %v1237_v36, 4  ;;  %v199_v9 = vld [vmem:[%s5491_s17 + $0x6c] sm:$0xf] }
  0x65   : > { %2452 = vrot.lane.b32.xlu0 %v5755_v28, %s5454_s18  ;;  %v539_v12 = vsel %vm5564_vm2, %v534_v21, %v538_v58  ;;  %v1290_v21 = vrot.slane %v1288_v62, 4 }
  0x66   : > { %v1243_v1 = vsel %vm5564_vm2, %v1238_v54, %v1242_v8  ;;  %v1263_v8 = vsel %vm5564_vm2, %v1258_v55, %v1262_v14  ;;  %v4764_v10 = vcombine.low %v529_v2, %v539_v12  ;;  %v1270_v54 = vrot.slane %v1268_v38, 5  ;;  %v200_v55 = vld [vmem:[%s5491_s17 + $0x70] sm:$0xf] }
  0x67   : > { %v1286_v14 = vrot.slane %v1284_v17, 5  ;;  %v590_v2 = vshll.u32 %v200_v55, 16  ;;  %v594_v12 = vshrl.u32 %v200_v55, 16 }
  0x68   : > { %2650 = vrot.lane.b32.xlu1 %v4795_v29, %s5456_s26 }
  0x69   : > { %2584 = vrot.lane.b32.xlu0 %v4762_v40, %s5456_s26  ;;  %v596_v62 = vrot.slane %v594_v12, 4  ;;  %v283_v12 = vld [vmem:[%s5491_s17 + $0x1bc] sm:$0xf] }
  0x6c   : > { %2380 = vrot.lane.b32.xlu1 %v4794_v27, %s5455_s21  ;;  %v5780_v27 = vcombine.low %v272_v44, %v273_v42  ;;  %v1233_v44 = vsel %vm5564_vm2, %v1228_v49, %v1232_v7  ;;  %v196_v42 = vld [vmem:[%s5491_s17 + $0x60] sm:$0x1]  ;;  %v1267_v49 = vrot.slane %v1265_v20, 4 }
  0x6d   : > { %2586 = vrot.lane.b32.xlu0 %v4763_v15, %s5456_s26  ;;  %v556_v23 = vshll.u32 %v196_v42, 16  ;;  %v4796_v7 = vcombine.low %v1233_v44, %v1243_v1  ;;  %v561_v44 = vshrl.u32 %v197_v56, 16  ;;  %v564_v42 = vshll.u32 %v197_v56, 16 }
  0x6e   : > { %v570_v1 = vshll.u32 %v198_v46, 16  ;;  %v1271_v19 = vor.u32 %v1270_v54, %v1267_v49 }
  0x6f   : > { %v558_v36 = vrot.slane %v556_v23, 5 }
  0x70   : > { %2382 = vrot.lane.b32.xlu1 %v4795_v29, %s5455_s21  ;;  %v5785_v29 = vcombine.low %v274_v47, %v275_v61  ;;  %v543_v47 = vor.u32 %v542_v0, %v538_v58  ;;  %v553_v61 = vor.u32 %v552_v4, %v548_v3  ;;  %v1294_v0 = vshll.u32 %v280_v24, 16 }
  0x71   : > { %2316 = vrot.lane.b32.xlu0 %v4762_v40, %s5455_s21  ;;  %v1248_v40 = vrot.slane %v1247_v39, 4  ;;  %v1298_v4 = vshrl.u32 %v280_v24, 16  ;;  %v572_v20 = vrot.slane %v570_v1, 5 }
  0x72   : > { %v554_v22 = vrot.slane %v553_v61, 4 }
  0x73   : > { %v1253_v30 = vsel %vm5564_vm2, %v1248_v40, %v1252_v18  ;;  %v544_v18 = vrot.slane %v543_v47, 4  ;;  %v574_v40 = vshrl.u32 %v198_v46, 16  ;;  %v1296_v47 = vrot.slane %v1294_v0, 5 }
  0x74   : > { %2518 = vrot.lane.b32.xlu1 %v5780_v27, %s5454_s18  ;;  %v4797_v37 = vcombine.low %v1253_v30, %v1263_v8  ;;  %v559_v51 = vsel %vm5564_vm2, %v554_v22, %v558_v36  ;;  %v1300_v61 = vrot.slane %v1298_v4, 4  ;;  %v580_v30 = vshll.u32 %v199_v9, 16 }
  0x75   : > { %2318 = vrot.lane.b32.xlu0 %v4763_v15, %s5455_s21  ;;  %v278_v15 = vld [vmem:[%s5491_s17 + $0x1a8] sm:$0xf]  ;;  %v549_v34 = vsel %vm5564_vm2, %v544_v18, %v548_v3  ;;  %v584_v8 = vshrl.u32 %v199_v9, 16  ;;  %v281_v18 = vld [vmem:[%s5491_s17 + $0x1b4] sm:$0x1]  ;;  %v563_v22 = vrot.slane %v561_v44, 4 }
  0x76   : > { %v1274_v45 = vshll.u32 %v278_v15, 16  ;;  %v1278_v43 = vshrl.u32 %v278_v15, 16  ;;  %v4765_v3 = vcombine.low %v549_v34, %v559_v51  ;;  %v566_v36 = vrot.slane %v564_v42, 5  ;;  %v201_v44 = vld [vmem:[%s5491_s17 + $0x74] sm:$0x1] }
  0x77   : > { %v576_v38 = vrot.slane %v574_v40, 4  ;;  %v1291_v34 = vor.u32 %v1290_v21, %v1286_v14  ;;  %v1301_v51 = vor.u32 %v1300_v61, %v1296_v47  ;;  %v1304_v49 = vshll.u32 %v281_v18, 16 }
  0x78   : > { %2520 = vrot.lane.b32.xlu1 %v5785_v29, %s5454_s18  ;;  %v5822_v39 = vrot.slane %v1274_v45, 5  ;;  %v1280_v58 = vrot.slane %v1278_v43, 4  ;;  %v1272_v45 = vrot.slane %v1271_v19, 4  ;;  %v582_v54 = vrot.slane %v580_v30, 5 }
  0x79   : > { %2454 = vrot.lane.b32.xlu0 %v5793_v59, %s5454_s18  ;;  %v586_v17 = vrot.slane %v584_v8, 4  ;;  %v567_v0 = vor.u32 %v566_v36, %v563_v22  ;;  %v577_v4 = vor.u32 %v576_v38, %v572_v20  ;;  %v1302_v42 = vrot.slane %v1301_v51, 4 }
  0x7a   : > { %v1281_v23 = vor.u32 %v1280_v58, %v5822_v39  ;;  %v5836_v58 = vrot.slane %v590_v2, 5  ;;  %v1306_v1 = vrot.slane %v1304_v49, 5  ;;  %v5849_v40 = vcombine.low %v197_v56, %v198_v46 }
  0x7b   : > { %v587_v19 = vor.u32 %v586_v17, %v582_v54  ;;  %v568_v21 = vrot.slane %v567_v0, 4  ;;  %v578_v61 = vrot.slane %v577_v4, 4 }
  0x7c   : > { %2652 = vrot.lane.b32.xlu1 %v4796_v7, %s5456_s26  ;;  %v1282_v43 = vrot.slane %v1281_v23, 4  ;;  %8000 = vst [vmem:[#allocation5_spill] sm:$0xff] %v5849_v40  ;;  %v1307_v46 = vsel %vm5564_vm2, %v1302_v42, %v1306_v1  ;;  %v5900_v1 = vld [vmem:[%s5491_s17 + $0x80] sm:$0xf] }
  0x7d   : > { %2456 = vrot.lane.b32.xlu0 %v5805_v50, %s5454_s18  ;;  %v588_v30 = vrot.slane %v587_v19, 4  ;;  %v573_v18 = vsel %vm5564_vm2, %v568_v21, %v572_v20  ;;  %v583_v22 = vsel %vm5564_vm2, %v578_v61, %v582_v54 }
  0x7e   : > { %v4766_v20 = vcombine.low %v573_v18, %v583_v22 }
  0x7f   : > { %v593_v49 = vsel %vm5564_vm2, %v588_v30, %v5836_v58 }
  0x80   : > { %2654 = vrot.lane.b32.xlu1 %v4797_v37, %s5456_s26 }
  0x81   : > { %2588 = vrot.lane.b32.xlu0 %v4764_v10, %s5456_s26 }
  0x84   : > { %2384 = vrot.lane.b32.xlu1 %v4796_v7, %s5455_s21  ;;  %v5833_v7 = vcombine.low %v277_v26, %v278_v15  ;;  %v5841_v26 = vcombine.low %v279_v25, %v280_v24  ;;  %v1277_v15 = vsel %vm5564_vm2, %v1272_v45, %v5822_v39  ;;  %v597_v25 = vor.u32 %v596_v62, %v5836_v58  ;;  %v5872_v45 = vld [vmem:[%s5491_s17 + $0x78] sm:$0xf]  ;;  %v285_v62 = vld [vmem:[%s5491_s17 + $0x1c4] sm:$0xf] }
  0x85   : > { %2590 = vrot.lane.b32.xlu0 %v4765_v3, %s5456_s26  ;;  %v600_v24 = vshll.u32 %v201_v44, 16  ;;  %v605_v4 = vshrl.u32 %v5872_v45, 16  ;;  %v608_v44 = vshll.u32 %v5872_v45, 16  ;;  %v1342_v21 = vshrl.u32 %v285_v62, 16 }
  0x86   : > { %7999 = vst [vmem:[#allocation4_spill] sm:$0xff] %v5841_v26  ;;  %v598_v8 = vrot.slane %v597_v25, 4 }
  0x87   : > { %v602_v2 = vrot.slane %v600_v24, 5  ;;  %v1338_v24 = vshll.u32 %v285_v62, 16 }
  0x88   : > { %2386 = vrot.lane.b32.xlu1 %v4797_v37, %s5455_s21  ;;  %v1287_v37 = vsel %vm5564_vm2, %v1282_v43, %v1286_v14  ;;  %v5854_v23 = vpop.permute.xlu1 %2506  ;;  %v282_v14 = vld [vmem:[%s5491_s17 + $0x1b8] sm:$0xf]  ;;  %v1322_v43 = vshrl.u32 %v283_v12, 16 }
  0x89   : > { %2320 = vrot.lane.b32.xlu0 %v4764_v10, %s5455_s21  ;;  %v1292_v10 = vrot.slane %v1291_v34, 4  ;;  %v4798_v39 = vcombine.low %v1277_v15, %v1287_v37  ;;  %v1312_v38 = vshll.u32 %v282_v14, 16  ;;  %v5878_v34 = vld [vmem:[%s5491_s17 + $0x1c0] sm:$0xf]  ;;  %v603_v54 = vsel %vm5564_vm2, %v598_v8, %v602_v2 }
  0x8a   : > { %v5882_v51 = vpop.permute.xlu0 %2442  ;;  %v1328_v58 = vshll.u32 %v5878_v34, 16  ;;  %v1332_v42 = vshrl.u32 %v5878_v34, 16  ;;  %v1324_v25 = vrot.slane %v1322_v43, 4  ;;  %v4767_v61 = vcombine.low %v593_v49, %v603_v54 }
  0x8b   : > { %v1297_v56 = vsel %vm5564_vm2, %v1292_v10, %v1296_v47  ;;  %v1309_v47 = vshrl.u32 %v282_v14, 16  ;;  %v1314_v37 = vrot.slane %v1312_v38, 5  ;;  %v624_v8 = vshll.u32 %v5900_v1, 16 }
  0x8c   : > { %2522 = vrot.lane.b32.xlu1 %v5833_v7, %s5454_s18  ;;  %v4799_v36 = vcombine.low %v1297_v56, %v1307_v46  ;;  %v607_v56 = vrot.slane %v605_v4, 4  ;;  %v610_v46 = vrot.slane %v608_v44, 5  ;;  %v1334_v38 = vrot.slane %v1332_v42, 4 }
  0x8d   : > { %2322 = vrot.lane.b32.xlu0 %v4765_v3, %s5455_s21  ;;  %v5863_v3 = vcombine.low %v199_v9, %v200_v55  ;;  %v5875_v9 = vld [vmem:[%s5491_s17 + $0x7c] sm:$0xf]  ;;  %v1318_v55 = vshll.u32 %v283_v12, 16  ;;  %v1311_v0 = vrot.slane %v1309_v47, 4  ;;  %v5913_v47 = vrot.slane %v1328_v58, 5 }
  0x8e   : > { %v614_v15 = vshll.u32 %v5875_v9, 16  ;;  %v618_v10 = vshrl.u32 %v5875_v9, 16  ;;  %v628_v43 = vshrl.u32 %v5900_v1, 16  ;;  %v5917_v49 = vrot.slane %v1338_v24, 5 }
  0x8f   : > { %8001 = vst [vmem:[#allocation6_spill] sm:$0xff] %v5863_v3  ;;  %v5889_v17 = vpop.permute.xlu1 %2508  ;;  %v5902_v19 = vrot.slane %v1318_v55, 5  ;;  %v205_v55 = vld [vmem:[%s5491_s17 + $0x84] sm:$0xf]  ;;  %v1344_v54 = vrot.slane %v1342_v21, 4  ;;  %v1315_v4 = vor.u32 %v1314_v37, %v1311_v0  ;;  %v611_v21 = vor.u32 %v610_v46, %v607_v56 }
  0x90   : > { %2524 = vrot.lane.b32.xlu1 %v5841_v26, %s5454_s18  ;;  %v5905_v30 = vrot.slane %v614_v15, 5  ;;  %v620_v22 = vrot.slane %v618_v10, 4  ;;  %v286_v15 = vld [vmem:[%s5491_s17 + $0x1c8] sm:$0x1]  ;;  %v5924_v10 = vrot.slane %v624_v8, 5  ;;  %v634_v58 = vshll.u32 %v205_v55, 16 }
  0x91   : > { %2458 = vrot.lane.b32.xlu0 %v5849_v40, %s5454_s18  ;;  %v5908_v2 = vpop.permute.xlu0 %2444  ;;  %v1325_v44 = vor.u32 %v1324_v25, %v5902_v19  ;;  %v638_v42 = vshrl.u32 %v205_v55, 16  ;;  %v630_v24 = vrot.slane %v628_v43, 4  ;;  %v1335_v37 = vor.u32 %v1334_v38, %v5913_v47  ;;  %v5932_v8 = vld [vmem:[%s5491_s17 + $0x8] sm:$0xf]  ;;  %v5441_v56 = vld [vmem:[%s5491_s17] sm:$0xf] }
  0x92   : > { %v621_v0 = vor.u32 %v620_v22, %v5905_v30  ;;  %v1316_v25 = vrot.slane %v1315_v4, 4  ;;  %v5442_v46 = vld [vmem:[%s5491_s17 + $0x4] sm:$0xf]  ;;  %v5443_v43 = vld [vmem:[%s5491_s17 + $0x148] sm:$0xf] }
  0x93   : > { %v1326_v35 = vrot.slane %v1325_v44, 4  ;;  %v4692_v22 = vcombine.low %v5441_v56, %v5442_v46  ;;  %v5444_v4 = vld [vmem:[%s5491_s17 + $0x14c] sm:$0xf]  ;;  %v612_v56 = vrot.slane %v611_v21, 4  ;;  %v1336_v40 = vrot.slane %v1335_v37, 4 }
  0x94   : > { %2656 = vrot.lane.b32.xlu1 %v4798_v39, %s5456_s26  ;;  %v5943_v44 = vcombine.low %v5443_v43, %v5444_v4  ;;  %v622_v46 = vrot.slane %v621_v0, 4  ;;  %v206_v26 = vld [vmem:[%s5491_s17 + $0x88] sm:$0x1]  ;;  %v631_v43 = vor.u32 %v630_v24, %v5924_v10  ;;  %v5970_v21 = vcombine.low %v5900_v1, %v205_v55  ;;  %v5976_v24 = vld [vmem:[%s5491_s17 + $0x1cc] sm:$0xf] }
  0x95   : > { %2460 = vrot.lane.b32.xlu0 %v5863_v3, %s5454_s18  ;;  %v5952_v3 = vrot.slane %v634_v58, 5  ;;  %v5967_v58 = vcombine.low %v5872_v45, %v5875_v9  ;;  %v617_v9 = vsel %vm5564_vm2, %v612_v56, %v5905_v30  ;;  %v1341_v37 = vsel %vm5564_vm2, %v1336_v40, %v5917_v49 }
  0x96   : > { %8002 = vst [vmem:[#allocation7_spill] sm:$0xff] %v5943_v44  ;;  %8005 = vst [vmem:[#allocation10_spill] sm:$0xff] %v5970_v21  ;;  %v627_v1 = vsel %vm5564_vm2, %v622_v46, %v5924_v10  ;;  %v632_v55 = vrot.slane %v631_v43, 4  ;;  %v1356_v40 = vshll.u32 %v5976_v24, 16 }
  0x97   : > { %8004 = vst [vmem:[#allocation9_spill] sm:$0xff] %v5967_v58 }
  0x98   : > { %2658 = vrot.lane.b32.xlu1 %v4799_v36, %s5456_s26 }
  0x99   : > { %2592 = vrot.lane.b32.xlu0 %v4766_v20, %s5456_s26 }
  0x9c   : > { %2388 = vrot.lane.b32.xlu1 %v4798_v39, %s5455_s21  ;;  %v5911_v18 = vpop.permute.xlu1 %2306  ;;  %v5922_v39 = vcombine.low %v282_v14, %v283_v12  ;;  %v1345_v14 = vor.u32 %v1344_v54, %v5917_v49  ;;  %v1348_v12 = vshll.u32 %v286_v15, 16  ;;  %v5950_v15 = vcombine.low %v5878_v34, %v285_v62 }
  0x9d   : > { %2594 = vrot.lane.b32.xlu0 %v4767_v61, %s5456_s26 }
  0x9e   : > { %v2305_v38 = vpop.permute.xlu0 %2304  ;;  %v1346_v34 = vrot.slane %v1345_v14, 4  ;;  %v1350_v62 = vrot.slane %v1348_v12, 5  ;;  %v5997_v14 = vld [vmem:[%s5491_s17 + $0x1d0] sm:$0xf] }
  0x9f   : > { %v1362_v46 = vshll.u32 %v5997_v14, 16  ;;  %v1366_v43 = vshrl.u32 %v5997_v14, 16 }
  0xa0   : > { %2390 = vrot.lane.b32.xlu1 %v4799_v36, %s5455_s21  ;;  %v640_v36 = vrot.slane %v638_v42, 4 }
  0xa1   : > { %2324 = vrot.lane.b32.xlu0 %v4766_v20, %s5455_s21  ;;  %v5947_v20 = vcombine.low %v5572_v33, %v5579_v52  ;;  %v1321_v33 = vsel %vm5564_vm2, %v1316_v25, %v5902_v19  ;;  %v1331_v52 = vsel %vm5564_vm2, %v1326_v35, %v5913_v47  ;;  %v644_v47 = vshll.u32 %v206_v26, 16 }
  0xa2   : > { %v2371_v54 = vpop.permute.xlu1 %2370  ;;  %v641_v35 = vor.u32 %v640_v36, %v5952_v3  ;;  %v5980_v45 = vcombine.low %v1321_v33, %v1331_v52  ;;  %v2707_v26 = vsel %vm2704_vm3, %v4692_v22, %v2305_v38  ;;  %v1351_v25 = vsel %vm5564_vm2, %v1346_v34, %v1350_v62  ;;  %v6020_v33 = vld [vmem:[%s5491_s17 + $0x90] sm:$0xf] }
  0xa3   : > { %8003 = vst [vmem:[#allocation8_spill] sm:$0xff] %v5947_v20  ;;  %v2806_v19 = vsel %vm2704_vm3, %v5943_v44, %v2371_v54  ;;  %v1353_v36 = vshrl.u32 %v5976_v24, 16  ;;  %v646_v4 = vrot.slane %v644_v47, 5  ;;  %v6010_v54 = vld [vmem:[%s5491_s17 + $0x8c] sm:$0xf]  ;;  %v8006_v52 = vcombine.low %v5932_v8, %v5935_v53 }
  0xa4   : > { %2526 = vrot.lane.b32.xlu1 %v5922_v39, %s5454_s18  ;;  %v2965_v10 = vsel %vm2897_vm4, %v2806_v19, %v5889_v17  ;;  %v642_v38 = vrot.slane %v641_v35, 4  ;;  %v4801_v17 = vcombine.low %v1341_v37, %v1351_v25  ;;  %v4768_v62 = vcombine.low %v617_v9, %v627_v1  ;;  %v290_v47 = vld [vmem:[%s5491_s17 + $0x1d8] sm:$0xf] }
  0xa5   : > { %2326 = vrot.lane.b32.xlu0 %v4767_v61, %s5455_s21  ;;  %v2710_v34 = vsel %vm2704_vm3, %v8006_v52, %v5911_v18  ;;  %v637_v53 = vsel %vm5564_vm2, %v632_v55, %v5952_v3  ;;  %v1355_v8 = vrot.slane %v1353_v36, 4  ;;  %v1358_v18 = vrot.slane %v1356_v40, 5  ;;  %v6056_v40 = vld [vmem:[%s5491_s17 + $0x94] sm:$0xf] }
  0xa6   : > { %v2641_v42 = vpop.permute.xlu1 %2640  ;;  %v649_v35 = vshrl.u32 %v6010_v54, 16  ;;  %v652_v9 = vshll.u32 %v6010_v54, 16  ;;  %v658_v1 = vshll.u32 %v6020_v33, 16  ;;  %v6050_v3 = vrot.slane %v1362_v46, 5 }
  0xa7   : > { %v2369_v61 = vpop.permute.xlu0 %2368  ;;  %v1368_v55 = vrot.slane %v1366_v43, 4  ;;  %v1386_v36 = vshrl.u32 %v290_v47, 16  ;;  %v668_v43 = vshll.u32 %v6056_v40, 16  ;;  %v672_v52 = vshrl.u32 %v6056_v40, 16 }
  0xa8   : > { %2528 = vrot.lane.b32.xlu1 %v5950_v15, %s5454_s18  ;;  %v2803_v0 = vsel %vm2704_vm3, %v5947_v20, %v2369_v61  ;;  %v647_v61 = vsel %vm5564_vm2, %v642_v38, %v646_v4  ;;  %v654_v38 = vrot.slane %v652_v9, 5  ;;  %v6062_v4 = vrot.slane %v658_v1, 5 }
  0xa9   : > { %2462 = vrot.lane.b32.xlu0 %v5967_v58, %s5454_s18  ;;  %v2963_v30 = vsel %vm2897_vm4, %v2803_v0, %v5854_v23  ;;  %v2899_v23 = vsel %vm2897_vm4, %v2707_v26, %v5882_v51  ;;  %v662_v26 = vshrl.u32 %v6020_v33, 16  ;;  %v2901_v0 = vsel %vm2897_vm4, %v2710_v34, %v5908_v2 }
  0xaa   : > { %v2643_v12 = vpop.permute.xlu1 %2642  ;;  %v3092_v49 = vsel %vm3026_vm5, %v2963_v30, %v2641_v42  ;;  %v6030_v42 = vld [vmem:[%s5491_s17 + $0x1d4] sm:$0xf]  ;;  %v4769_v2 = vcombine.low %v637_v53, %v647_v61  ;;  %v1359_v34 = vor.u32 %v1358_v18, %v1355_v8  ;;  %v1388_v9 = vrot.slane %v1386_v36, 4 }
  0xab   : > { %v3094_v22 = vsel %vm3026_vm5, %v2965_v10, %v2643_v12  ;;  %v2577_v56 = vpop.permute.xlu0 %2576  ;;  %5288 = vmatprep.mubr.msk.bf16.mxu1 %vm3186_vm6, %v3092_v49  ;;  %v1372_v25 = vshll.u32 %v6030_v42, 16  ;;  %v1376_v10 = vshrl.u32 %v6030_v42, 16  ;;  %v1382_v12 = vshll.u32 %v290_v47, 16 }
  0xac   : > { %2660 = vrot.lane.b32.xlu1 %v5980_v45, %s5456_s26  ;;  %v3028_v51 = vsel %vm3026_vm5, %v2899_v23, %v2577_v56  ;;  %5289 = vmatmul.mubr.msk.bf16.vlgmr.msra.gmra.mrb[0].mxu1 %vm3186_vm6, %v3094_v22  ;;  %v651_v22 = vrot.slane %v649_v35, 4  ;;  %v664_v56 = vrot.slane %v662_v26, 4  ;;  %v210_v23 = vld [vmem:[%s5491_s17 + $0x98] sm:$0xf] }
  0xad   : > { %2464 = vrot.lane.b32.xlu0 %v5970_v21, %s5454_s18  ;;  %5224 = vmatprep.mubr.msk.bf16.mxu0 %vm3186_vm6, %v3028_v51  ;;  %v1369_v51 = vor.u32 %v1368_v55, %v6050_v3  ;;  %v1374_v53 = vrot.slane %v1372_v25, 5  ;;  %v1378_v35 = vrot.slane %v1376_v10, 4  ;;  %v6072_v61 = vrot.slane %v1382_v12, 5  ;;  %v211_v21 = vld [vmem:[%s5491_s17 + $0x9c] sm:$0x1] }
  0xae   : > { %v6035_v19 = vpop.permute.xlu1 %2372  ;;  %v678_v26 = vshll.u32 %v210_v23, 16  ;;  %v665_v8 = vor.u32 %v664_v56, %v6062_v4  ;;  %v670_v55 = vrot.slane %v668_v43, 5  ;;  %v674_v25 = vrot.slane %v672_v52, 4 }
  0xaf   : > { %v2579_v37 = vpop.permute.xlu0 %2578  ;;  %v1360_v10 = vrot.slane %v1359_v34, 4  ;;  %v1370_v12 = vrot.slane %v1369_v51, 4  ;;  %v1379_v36 = vor.u32 %v1378_v35, %v1374_v53  ;;  %v1389_v44 = vor.u32 %v1388_v9, %v6072_v61 }
  0xb0   : > { %2662 = vrot.lane.b32.xlu1 %v4801_v17, %s5456_s26  ;;  %v3030_v30 = vsel %vm3026_vm5, %v2901_v0, %v2579_v37  ;;  %v682_v0 = vshrl.u32 %v210_v23, 16  ;;  %v291_v37 = vld [vmem:[%s5491_s17 + $0x1dc] sm:$0x1]  ;;  %v666_v56 = vrot.slane %v665_v8, 4  ;;  %v675_v52 = vor.u32 %v674_v25, %v670_v55 }
  0xb1   : > { %2596 = vrot.lane.b32.xlu0 %v4768_v62, %s5456_s26  ;;  %5225 = vmatmul.mubr.msk.bf16.vlgmr.msra.gmra.mrb[0].mxu0 %vm3186_vm6, %v3030_v30  ;;  %v655_v30 = vor.u32 %v654_v38, %v651_v22  ;;  %v1392_v20 = vshll.u32 %v291_v37, 16  ;;  %v1365_v43 = vsel %vm5564_vm2, %v1360_v10, %v6050_v3  ;;  %v2809_v34 = vsel %vm2704_vm3, %v5496_v5, %v6035_v19 }
  0xb2   : > { %v6060_v49 = vpop.permute.xlu1 %2374  ;;  %v684_v22 = vrot.slane %v682_v0, 4  ;;  %v1380_v51 = vrot.slane %v1379_v36, 4  ;;  %v1390_v35 = vrot.slane %v1389_v44, 4  ;;  %v688_v0 = vshll.u32 %v211_v21, 16 }
  0xb3   : > { %v6065_v46 = vpop.permute.xlu0 %2308  ;;  %v656_v38 = vrot.slane %v655_v30, 4  ;;  %v1394_v9 = vrot.slane %v1392_v20, 5  ;;  %v671_v20 = vsel %vm5564_vm2, %v666_v56, %v670_v55 }
  0xb4   : > { %2392 = vrot.lane.b32.xlu1 %v5980_v45, %s5455_s21  ;;  %v6078_v45 = vcombine.low %v5976_v24, %v5997_v14  ;;  %v6086_v14 = vrot.slane %v678_v26, 5  ;;  %v6103_v26 = vld [vmem:[%s5491_s17 + $0x1e0] sm:$0xf] }
  0xb5   : > { %2598 = vrot.lane.b32.xlu0 %v4769_v2, %s5456_s26  ;;  %v661_v44 = vsel %vm5564_vm2, %v656_v38, %v6062_v4  ;;  %v1397_v4 = vshrl.u32 %v6103_v26, 16  ;;  %v1400_v37 = vshll.u32 %v6103_v26, 16 }
  0xb6   : > { %v2511_v1 = vpop.permute.xlu1 %2510  ;;  %v6142_v55 = vcombine.low %v661_v44, %v671_v20  ;;  %v6187_v20 = vld [vmem:[%s5491_s17 + $0xa8] sm:$0xf] }
  0xb7   : > { %v6081_v18 = vpop.permute.xlu0 %2310 }
  0xb8   : > { %2394 = vrot.lane.b32.xlu1 %v4801_v17, %s5455_s21  ;;  %v6092_v17 = vcombine.low %v6030_v42, %v290_v47  ;;  %v2967_v42 = vsel %vm2897_vm4, %v2809_v34, %v2511_v1  ;;  %v6109_v47 = vcombine.low %v6010_v54, %v6020_v33  ;;  %v6121_v54 = vcombine.low %v6056_v40, %v210_v23 }
  0xb9   : > { %2328 = vrot.lane.b32.xlu0 %v4768_v62, %s5455_s21  ;;  %v1375_v62 = vsel %vm5564_vm2, %v1370_v12, %v1374_v53  ;;  %v685_v53 = vor.u32 %v684_v22, %v6086_v14  ;;  %v676_v33 = vrot.slane %v675_v52, 4  ;;  %v2812_v1 = vsel %vm2704_vm3, %v5536_v41, %v6060_v49  ;;  %v6145_v49 = vld [vmem:[%s5491_s17 + $0xa0] sm:$0xf]  ;;  %v6157_v22 = vld [vmem:[%s5491_s17 + $0x1e8] sm:$0xf] }
  0xba   : > { %v2513_v24 = vpop.permute.xlu1 %2512  ;;  %v6124_v21 = vcombine.low %v1365_v43, %v1375_v62  ;;  %v1385_v40 = vsel %vm5564_vm2, %v1380_v51, %v6072_v61  ;;  %v1395_v23 = vsel %vm5564_vm2, %v1390_v35, %v1394_v9  ;;  %v690_v41 = vrot.slane %v688_v0, 5  ;;  %v295_v51 = vld [vmem:[%s5491_s17 + $0x1ec] sm:$0xf] }
  0xbb   : > { %v2447_v58 = vpop.permute.xlu0 %2446  ;;  %v2969_v30 = vsel %vm2897_vm4, %v2812_v1, %v2513_v24  ;;  %v686_v25 = vrot.slane %v685_v53, 4  ;;  %v2713_v61 = vsel %vm2704_vm3, %v5499_v11, %v6065_v46  ;;  %v6154_v24 = vld [vmem:[%s5491_s17 + $0xa4] sm:$0xf]  ;;  %v4803_v11 = vcombine.low %v1385_v40, %v1395_v23 }
  0xbc   : > { %2530 = vrot.lane.b32.xlu1 %v6078_v45, %s5454_s18  ;;  %v2903_v38 = vsel %vm2897_vm4, %v2713_v61, %v2447_v58  ;;  %v681_v46 = vsel %vm5564_vm2, %v676_v33, %v6086_v14  ;;  %v1399_v43 = vrot.slane %v1397_v4, 4  ;;  %v1402_v52 = vrot.slane %v1400_v37, 5 }
  0xbd   : > { %2330 = vrot.lane.b32.xlu0 %v4769_v2, %s5455_s21  ;;  %v6127_v2 = vld [vmem:[%s5491_s17 + $0x1e4] sm:$0xf]  ;;  %v693_v34 = vshrl.u32 %v6145_v49, 16  ;;  %v696_v58 = vshll.u32 %v6145_v49, 16  ;;  %v691_v14 = vsel %vm5564_vm2, %v686_v25, %v690_v41  ;;  %v702_v9 = vshll.u32 %v6154_v24, 16 }
  0xbe   : > { %v2645_v3 = vpop.permute.xlu1 %2644  ;;  %v1406_v12 = vshll.u32 %v6127_v2, 16  ;;  %v1410_v36 = vshrl.u32 %v6127_v2, 16  ;;  %v2716_v53 = vsel %vm2704_vm3, %v5541_v48, %v6081_v18  ;;  %v1420_v44 = vshrl.u32 %v6157_v22, 16  ;;  %v6193_v48 = vld [vmem:[%s5491_s17 + $0xac] sm:$0xf] }
  0xbf   : > { %v3096_v5 = vsel %vm3026_vm5, %v2967_v42, %v2645_v3  ;;  %v2449_v19 = vpop.permute.xlu0 %2448  ;;  %v706_v42 = vshrl.u32 %v6154_v24, 16  ;;  %v1416_v3 = vshll.u32 %v6157_v22, 16  ;;  %v1426_v1 = vshll.u32 %v295_v51, 16 }
  0xc0   : > { %2532 = vrot.lane.b32.xlu1 %v6092_v17, %s5454_s18  ;;  %5292 = vmatprep.mubr.msk.bf16.mxu1 %vm3186_vm6, %v3096_v5  ;;  %v6183_v0 = vrot.slane %v1406_v12, 5  ;;  %v1412_v5 = vrot.slane %v1410_v36, 4  ;;  %v2905_v33 = vsel %vm2897_vm4, %v2716_v53, %v2449_v19  ;;  %v1430_v40 = vshrl.u32 %v295_v51, 16 }
  0xc1   : > { %2466 = vrot.lane.b32.xlu0 %v6109_v47, %s5454_s18  ;;  %v4771_v37 = vcombine.low %v681_v46, %v691_v14  ;;  %v6200_v19 = vrot.slane %v702_v9, 5  ;;  %v708_v25 = vrot.slane %v706_v42, 4  ;;  %v1418_v41 = vrot.slane %v1416_v3, 5  ;;  %v296_v14 = vld [vmem:[%s5491_s17 + $0x1f0] sm:$0x1] }
  0xc2   : > { %v2647_v8 = vpop.permute.xlu1 %2646  ;;  %v712_v61 = vshll.u32 %v6187_v20, 16  ;;  %v716_v12 = vshrl.u32 %v6187_v20, 16  ;;  %v1403_v36 = vor.u32 %v1402_v52, %v1399_v43  ;;  %v6209_v46 = vrot.slane %v1426_v1, 5 }
  0xc3   : > { %v3098_v10 = vsel %vm3026_vm5, %v2969_v30, %v2647_v8  ;;  %v2581_v56 = vpop.permute.xlu0 %2580  ;;  %v695_v30 = vrot.slane %v693_v34, 4  ;;  %v698_v8 = vrot.slane %v696_v58, 5  ;;  %v722_v34 = vshll.u32 %v6193_v48, 16 }
  0xc4   : > { %2664 = vrot.lane.b32.xlu1 %v6124_v21, %s5456_s26  ;;  %5293 = vmatmul.mubr.msk.bf16.gmra.mrb[4].mxu1 %vm3186_vm6, %v3098_v10  ;;  %v3032_v62 = vsel %vm3026_vm5, %v2903_v38, %v2581_v56  ;;  %v1422_v10 = vrot.slane %v1420_v44, 4  ;;  %v1413_v38 = vor.u32 %v1412_v5, %v6183_v0  ;;  %v726_v58 = vshrl.u32 %v6193_v48, 16 }
  0xc5   : > { %2468 = vrot.lane.b32.xlu0 %v6121_v54, %s5454_s18  ;;  %5228 = vmatprep.mubr.msk.bf16.mxu0 %vm3186_vm6, %v3032_v62  ;;  %v1432_v62 = vrot.slane %v1430_v40, 4  ;;  %v6217_v43 = vcombine.low %v6103_v26, %v6127_v2  ;;  %v714_v52 = vrot.slane %v712_v61, 5  ;;  %v699_v42 = vor.u32 %v698_v8, %v695_v30  ;;  %v216_v26 = vld [vmem:[%s5491_s17 + $0xb0] sm:$0x1] }
  0xc6   : > { %v6173_v35 = vpop.permute.xlu1 %2376  ;;  %v718_v3 = vrot.slane %v716_v12, 4  ;;  %v1404_v53 = vrot.slane %v1403_v36, 4  ;;  %v1414_v5 = vrot.slane %v1413_v38, 4  ;;  %v1423_v44 = vor.u32 %v1422_v10, %v1418_v41 }
  0xc7   : > { %v2583_v4 = vpop.permute.xlu0 %2582  ;;  %v728_v1 = vrot.slane %v726_v58, 4  ;;  %v1433_v40 = vor.u32 %v1432_v62, %v6209_v46  ;;  %v6230_v30 = vcombine.low %v6157_v22, %v295_v51  ;;  %v700_v8 = vrot.slane %v699_v42, 4 }
  0xc8   : > { %2666 = vrot.lane.b32.xlu1 %v4803_v11, %s5456_s26  ;;  %v3034_v23 = vsel %vm3026_vm5, %v2905_v33, %v2583_v4  ;;  %v6223_v4 = vrot.slane %v722_v34, 5  ;;  %v1419_v61 = vsel %vm5564_vm2, %v1414_v5, %v1418_v41  ;;  %v1424_v10 = vrot.slane %v1423_v44, 4  ;;  %v6281_v44 = vld [vmem:[%s5491_s17 + $0xb4] sm:$0xf] }
  0xc9   : > { %2600 = vrot.lane.b32.xlu0 %v6142_v55, %s5456_s26  ;;  %5229 = vmatmul.mubr.msk.bf16.gmra.mrb[4].mxu0 %vm3186_vm6, %v3034_v23  ;;  %v1436_v23 = vshll.u32 %v296_v14, 16  ;;  %v719_v12 = vor.u32 %v718_v3, %v714_v52  ;;  %v732_v38 = vshll.u32 %v216_v26, 16  ;;  %v6247_v41 = vcombine.low %v6145_v49, %v6154_v24 }
  0xca   : > { %v6198_v18 = vpop.permute.xlu1 %2378  ;;  %v729_v51 = vor.u32 %v728_v1, %v6223_v4  ;;  %v705_v58 = vsel %vm5564_vm2, %v700_v8, %v6200_v19  ;;  %v1429_v24 = vsel %vm5564_vm2, %v1424_v10, %v6209_v46  ;;  %v6302_v8 = vld [vmem:[%s5491_s17 + $0x1fc] sm:$0xf]  ;;  %v737_v10 = vshrl.u32 %v6281_v44, 16 }
  0xcb   : > { %v6205_v56 = vpop.permute.xlu0 %2312  ;;  %v1438_v22 = vrot.slane %v1436_v23, 5  ;;  %v2818_v3 = vsel %vm2704_vm3, %v5684_v57, %v6198_v18  ;;  %v6290_v18 = vld [vmem:[%s5491_s17 + $0xb8] sm:$0xf] }
  0xcc   : > { %2396 = vrot.lane.b32.xlu1 %v6124_v21, %s5455_s21  ;;  %v709_v21 = vor.u32 %v708_v25, %v6200_v19 }
  0xcd   : > { %2602 = vrot.lane.b32.xlu0 %v4771_v37, %s5456_s26 }
  0xce   : > { %v2515_v9 = vpop.permute.xlu1 %2514  ;;  %v710_v25 = vrot.slane %v709_v21, 4  ;;  %v734_v21 = vrot.slane %v732_v38, 5  ;;  %v1464_v38 = vshrl.u32 %v6302_v8, 16 }
  0xcf   : > { %v6220_v33 = vpop.permute.xlu0 %2314 }
  0xd0   : > { %2398 = vrot.lane.b32.xlu1 %v4803_v11, %s5455_s21  ;;  %v1409_v11 = vsel %vm5564_vm2, %v1404_v53, %v6183_v0  ;;  %v2815_v0 = vsel %vm2704_vm3, %v5679_v32, %v6173_v35  ;;  %v715_v14 = vsel %vm5564_vm2, %v710_v25, %v714_v52  ;;  %v720_v35 = vrot.slane %v719_v12, 4  ;;  %v6305_v25 = vld [vmem:[%s5491_s17 + $0x200] sm:$0xf] }
  0xd1   : > { %2332 = vrot.lane.b32.xlu0 %v6142_v55, %s5455_s21  ;;  %v1434_v55 = vrot.slane %v1433_v40, 4  ;;  %v2971_v62 = vsel %vm2897_vm4, %v2815_v0, %v2515_v9  ;;  %v6255_v32 = vcombine.low %v1409_v11, %v1419_v61  ;;  %v6258_v9 = vld [vmem:[%s5491_s17 + $0x1f4] sm:$0xf]  ;;  %v730_v52 = vrot.slane %v729_v51, 4 }
  0xd2   : > { %v2517_v2 = vpop.permute.xlu1 %2516  ;;  %v6276_v53 = vcombine.low %v6187_v20, %v6193_v48  ;;  %v6278_v5 = vcombine.low %v705_v58, %v715_v14  ;;  %v1441_v40 = vshrl.u32 %v6258_v9, 16  ;;  %v1444_v23 = vshll.u32 %v6258_v9, 16 }
  0xd3   : > { %v2451_v36 = vpop.permute.xlu0 %2450  ;;  %v1439_v19 = vsel %vm5564_vm2, %v1434_v55, %v1438_v22  ;;  %v2973_v46 = vsel %vm2897_vm4, %v2818_v3, %v2517_v2  ;;  %v2719_v20 = vsel %vm2704_vm3, %v5693_v63, %v6205_v56  ;;  %v725_v2 = vsel %vm5564_vm2, %v720_v35, %v6223_v4  ;;  %v6337_v3 = vld [vmem:[%s5491_s17 + $0xbc] sm:$0xf] }
  0xd4   : > { %2534 = vrot.lane.b32.xlu1 %v6217_v43, %s5454_s18  ;;  %v6296_v26 = vcombine.low %v1429_v24, %v1439_v19  ;;  %v2907_v11 = vsel %vm2897_vm4, %v2719_v20, %v2451_v36  ;;  %v735_v63 = vsel %vm5564_vm2, %v730_v52, %v734_v21  ;;  %v740_v12 = vshll.u32 %v6281_v44, 16 }
  0xd5   : > { %2334 = vrot.lane.b32.xlu0 %v4771_v37, %s5455_s21  ;;  %v6261_v37 = vld [vmem:[%s5491_s17 + $0x1f8] sm:$0xf]  ;;  %v746_v55 = vshll.u32 %v6290_v18, 16  ;;  %v750_v36 = vshrl.u32 %v6290_v18, 16  ;;  %v1460_v51 = vshll.u32 %v6302_v8, 16  ;;  %v1470_v0 = vshll.u32 %v6305_v25, 16 }
  0xd6   : > { %v2649_v34 = vpop.permute.xlu1 %2648  ;;  %v1450_v57 = vshll.u32 %v6261_v37, 16  ;;  %v1454_v56 = vshrl.u32 %v6261_v37, 16  ;;  %v1443_v58 = vrot.slane %v1441_v40, 4  ;;  %v1446_v14 = vrot.slane %v1444_v23, 5 }
  0xd7   : > { %v3100_v42 = vsel %vm3026_vm5, %v2971_v62, %v2649_v34  ;;  %v2453_v49 = vpop.permute.xlu0 %2452  ;;  %v1474_v62 = vshrl.u32 %v6305_v25, 16  ;;  %v2722_v34 = vsel %vm2704_vm3, %v5705_v60, %v6220_v33  ;;  %v4773_v19 = vcombine.low %v725_v2, %v735_v63 }
  0xd8   : > { %2536 = vrot.lane.b32.xlu1 %v6230_v30, %s5454_s18  ;;  %5296 = vmatprep.mubr.msk.bf16.mxu1 %vm3186_vm6, %v3100_v42  ;;  %v6331_v42 = vrot.slane %v1450_v57, 5  ;;  %v2909_v35 = vsel %vm2897_vm4, %v2722_v34, %v2453_v49  ;;  %v1456_v52 = vrot.slane %v1454_v56, 4  ;;  %v739_v21 = vrot.slane %v737_v10, 4  ;;  %v301_v56 = vld [vmem:[%s5491_s17 + $0x204] sm:$0x1] }
  0xd9   : > { %2470 = vrot.lane.b32.xlu0 %v6247_v41, %s5454_s18  ;;  %v742_v33 = vrot.slane %v740_v12, 5  ;;  %v752_v40 = vrot.slane %v750_v36, 4  ;;  %v6350_v23 = vrot.slane %v1460_v51, 5  ;;  %v1466_v57 = vrot.slane %v1464_v38, 4 }
  0xda   : > { %v2651_v1 = vpop.permute.xlu1 %2650  ;;  %v6352_v20 = vrot.slane %v1470_v0, 5  ;;  %v756_v2 = vshll.u32 %v6337_v3, 16  ;;  %v1457_v12 = vor.u32 %v1456_v52, %v6331_v42  ;;  %v221_v52 = vld [vmem:[%s5491_s17 + $0xc4] sm:$0x1] }
  0xdb   : > { %v3102_v48 = vsel %vm3026_vm5, %v2973_v46, %v2651_v1  ;;  %v2585_v61 = vpop.permute.xlu0 %2584  ;;  %v6340_v46 = vld [vmem:[%s5491_s17 + $0xc0] sm:$0xf]  ;;  %v6343_v1 = vrot.slane %v746_v55, 5  ;;  %v743_v55 = vor.u32 %v742_v33, %v739_v21  ;;  %v1467_v38 = vor.u32 %v1466_v57, %v6350_v23 }
  0xdc   : > { %2668 = vrot.lane.b32.xlu1 %v6255_v32, %s5456_s26  ;;  %5297 = vmatmul.mubr.msk.bf16.gmra.mrb[8].mxu1 %vm3186_vm6, %v3102_v48  ;;  %v3036_v4 = vsel %vm3026_vm5, %v2907_v11, %v2585_v61  ;;  %v1476_v48 = vrot.slane %v1474_v62, 4  ;;  %v760_v11 = vshrl.u32 %v6337_v3, 16  ;;  %v766_v61 = vshll.u32 %v6340_v46, 16 }
  0xdd   : > { %2472 = vrot.lane.b32.xlu0 %v6276_v53, %s5454_s18  ;;  %5232 = vmatprep.mubr.msk.bf16.mxu0 %vm3186_vm6, %v3036_v4  ;;  %v770_v63 = vshrl.u32 %v6340_v46, 16  ;;  %v1447_v4 = vor.u32 %v1446_v14, %v1443_v58  ;;  %v753_v51 = vor.u32 %v752_v40, %v6343_v1  ;;  %v1480_v62 = vshll.u32 %v301_v56, 16 }
  0xde   : > { %v6322_v22 = vpop.permute.xlu1 %2380  ;;  %v1477_v0 = vor.u32 %v1476_v48, %v6352_v20  ;;  %v758_v34 = vrot.slane %v756_v2, 5  ;;  %v6376_v14 = vcombine.low %v6258_v9, %v6261_v37  ;;  %v744_v33 = vrot.slane %v743_v55, 4 }
  0xdf   : > { %v2587_v24 = vpop.permute.xlu0 %2586  ;;  %v1448_v21 = vrot.slane %v1447_v4, 4  ;;  %v754_v57 = vrot.slane %v753_v51, 4  ;;  %v1468_v48 = vrot.slane %v1467_v38, 4  ;;  %v6386_v9 = vcombine.low %v6281_v44, %v6290_v18 }
  0xe0   : > { %2670 = vrot.lane.b32.xlu1 %v6296_v26, %s5456_s26  ;;  %v3038_v60 = vsel %vm3026_vm5, %v2909_v35, %v2587_v24  ;;  %v762_v35 = vrot.slane %v760_v11, 4  ;;  %v6368_v24 = vrot.slane %v766_v61, 5  ;;  %v1478_v2 = vrot.slane %v1477_v0, 4 }
  0xe1   : > { %2604 = vrot.lane.b32.xlu0 %v6278_v5, %s5456_s26  ;;  %5233 = vmatmul.mubr.msk.bf16.gmra.mrb[8].mxu0 %vm3186_vm6, %v3038_v60  ;;  %v1458_v60 = vrot.slane %v1457_v12, 4  ;;  %v1482_v11 = vrot.slane %v1480_v62, 5  ;;  %v6390_v37 = vcombine.low %v6302_v8, %v6305_v25  ;;  %v1453_v4 = vsel %vm5564_vm2, %v1448_v21, %v6331_v42  ;;  %v6414_v42 = vld [vmem:[%s5491_s17 + $0x208] sm:$0xf] }
  0xe2   : > { %v6348_v49 = vpop.permute.xlu1 %2382  ;;  %v763_v61 = vor.u32 %v762_v35, %v758_v34  ;;  %v749_v44 = vsel %vm5564_vm2, %v744_v33, %v6343_v1  ;;  %v1473_v25 = vsel %vm5564_vm2, %v1468_v48, %v6352_v20  ;;  %v6424_v20 = vcombine.low %v6337_v3, %v6340_v46 }
  0xe3   : > { %v6359_v10 = vpop.permute.xlu0 %2316  ;;  %v1463_v12 = vsel %vm5564_vm2, %v1458_v60, %v6350_v23  ;;  %v2824_v0 = vsel %vm2704_vm3, %v5735_v16, %v6348_v49  ;;  %v1485_v35 = vshrl.u32 %v6414_v42, 16  ;;  %v1488_v21 = vshll.u32 %v6414_v42, 16  ;;  %v6448_v60 = vld [vmem:[%s5491_s17 + $0x210] sm:$0xf] }
  0xe4   : > { %2400 = vrot.lane.b32.xlu1 %v6255_v32, %s5455_s21  ;;  %v772_v32 = vrot.slane %v770_v63, 4  ;;  %v764_v23 = vrot.slane %v763_v61, 4  ;;  %v4806_v38 = vcombine.low %v1453_v4, %v1463_v12  ;;  %v2725_v33 = vsel %vm2704_vm3, %v5743_v31, %v6359_v10 }
  0xe5   : > { %2606 = vrot.lane.b32.xlu0 %v4773_v19, %s5456_s26  ;;  %v1487_v12 = vrot.slane %v1485_v35, 4 }
  0xe6   : > { %v2519_v36 = vpop.permute.xlu1 %2518  ;;  %v773_v63 = vor.u32 %v772_v32, %v6368_v24  ;;  %v6436_v32 = vld [vmem:[%s5491_s17 + $0xc8] sm:$0xf] }
  0xe7   : > { %v6370_v58 = vpop.permute.xlu0 %2318  ;;  %v781_v31 = vshrl.u32 %v6436_v32, 16  ;;  %v784_v10 = vshll.u32 %v6436_v32, 16 }
  0xe8   : > { %2402 = vrot.lane.b32.xlu1 %v6296_v26, %s5455_s21  ;;  %v776_v26 = vshll.u32 %v221_v52, 16  ;;  %v774_v55 = vrot.slane %v773_v63, 4  ;;  %v6439_v52 = vld [vmem:[%s5491_s17 + $0xcc] sm:$0xf] }
  0xe9   : > { %2336 = vrot.lane.b32.xlu0 %v6278_v5, %s5455_s21  ;;  %v2821_v5 = vsel %vm2704_vm3, %v5730_v6, %v6322_v22  ;;  %v759_v6 = vsel %vm5564_vm2, %v754_v57, %v758_v34  ;;  %v1483_v22 = vsel %vm5564_vm2, %v1478_v2, %v1482_v11  ;;  %v6460_v2 = vld [vmem:[%s5491_s17 + $0x214] sm:$0xf]  ;;  %v790_v63 = vshll.u32 %v6439_v52, 16 }
  0xea   : > { %v2521_v40 = vpop.permute.xlu1 %2520  ;;  %v2975_v18 = vsel %vm2897_vm4, %v2821_v5, %v2519_v36  ;;  %v6418_v36 = vld [vmem:[%s5491_s17 + $0x20c] sm:$0xf]  ;;  %v6430_v62 = vcombine.low %v749_v44, %v759_v6  ;;  %v6432_v34 = vcombine.low %v1473_v25, %v1483_v22  ;;  %v1504_v5 = vshll.u32 %v6448_v60, 16 }
  0xeb   : > { %v2455_v56 = vpop.permute.xlu0 %2454  ;;  %v2977_v3 = vsel %vm2897_vm4, %v2824_v0, %v2521_v40  ;;  %v1494_v16 = vshll.u32 %v6418_v36, 16  ;;  %v1498_v49 = vshrl.u32 %v6418_v36, 16  ;;  %v769_v40 = vsel %vm5564_vm2, %v764_v23, %v6368_v24  ;;  %v6487_v23 = vld [vmem:[%s5491_s17 + $0xd0] sm:$0xf] }
  0xec   : > { %2538 = vrot.lane.b32.xlu1 %v6376_v14, %s5454_s18  ;;  %v2911_v11 = vsel %vm2897_vm4, %v2725_v33, %v2455_v56  ;;  %v1508_v56 = vshrl.u32 %v6448_v60, 16  ;;  %v1490_v44 = vrot.slane %v1488_v21, 5  ;;  %v2728_v6 = vsel %vm2704_vm3, %v5755_v28, %v6370_v58  ;;  %v225_v33 = vld [vmem:[%s5491_s17 + $0xd4] sm:$0xf] }
  0xed   : > { %2338 = vrot.lane.b32.xlu0 %v4773_v19, %s5455_s21  ;;  %v778_v19 = vrot.slane %v776_v26, 5  ;;  %v794_v26 = vshrl.u32 %v6439_v52, 16  ;;  %v6484_v22 = vrot.slane %v1494_v16, 5  ;;  %v783_v0 = vrot.slane %v781_v31, 4 }
  0xee   : > { %v2653_v8 = vpop.permute.xlu1 %2652  ;;  %v786_v35 = vrot.slane %v784_v10, 5  ;;  %v1510_v21 = vrot.slane %v1508_v56, 4 }
  0xef   : > { %v3104_v1 = vsel %vm3026_vm5, %v2975_v18, %v2653_v8  ;;  %v2457_v51 = vpop.permute.xlu0 %2456  ;;  %v779_v48 = vsel %vm5564_vm2, %v774_v55, %v778_v19  ;;  %v1514_v18 = vshll.u32 %v6460_v2, 16  ;;  %v1518_v8 = vshrl.u32 %v6460_v2, 16 }
  0xf0   : > { %2540 = vrot.lane.b32.xlu1 %v6390_v37, %s5454_s18  ;;  %5300 = vmatprep.mubr.msk.bf16.mxu1 %vm3186_vm6, %v3104_v1  ;;  %v6482_v25 = vcombine.low %v769_v40, %v779_v48  ;;  %v1500_v1 = vrot.slane %v1498_v49, 4  ;;  %v2913_v55 = vsel %vm2897_vm4, %v2728_v6, %v2457_v51  ;;  %v796_v58 = vrot.slane %v794_v26, 4  ;;  %v306_v48 = vld [vmem:[%s5491_s17 + $0x218] sm:$0x1] }
  0xf1   : > { %2474 = vrot.lane.b32.xlu0 %v6386_v9, %s5454_s18  ;;  %v6502_v16 = vrot.slane %v1514_v18, 5  ;;  %v1520_v49 = vrot.slane %v1518_v8, 4  ;;  %v804_v40 = vshrl.u32 %v6487_v23, 16  ;;  %v787_v10 = vor.u32 %v786_v35, %v783_v0 }
  0xf2   : > { %v2655_v46 = vpop.permute.xlu1 %2654  ;;  %v1501_v31 = vor.u32 %v1500_v1, %v6484_v22 }
  0xf3   : > { %v3106_v57 = vsel %vm3026_vm5, %v2977_v3, %v2655_v46  ;;  %v2589_v61 = vpop.permute.xlu0 %2588  ;;  %v6492_v3 = vrot.slane %v790_v63, 5  ;;  %v6495_v46 = vrot.slane %v1504_v5, 5  ;;  %v810_v63 = vshll.u32 %v225_v33, 16 }
  0xf4   : > { %2672 = vrot.lane.b32.xlu1 %v4806_v38, %s5456_s26  ;;  %5301 = vmatmul.mubr.msk.bf16.gmra.mrb[12].mxu1 %vm3186_vm6, %v3106_v57  ;;  %v3040_v24 = vsel %vm3026_vm5, %v2911_v11, %v2589_v61  ;;  %v800_v57 = vshll.u32 %v6487_v23, 16  ;;  %v1491_v61 = vor.u32 %v1490_v44, %v1487_v12  ;;  %v806_v8 = vrot.slane %v804_v40, 4 }
  0xf5   : > { %2476 = vrot.lane.b32.xlu0 %v6424_v20, %s5454_s18  ;;  %5236 = vmatprep.mubr.msk.bf16.mxu0 %vm3186_vm6, %v3040_v24  ;;  %v814_v24 = vshrl.u32 %v225_v33, 16  ;;  %v797_v26 = vor.u32 %v796_v58, %v6492_v3  ;;  %v1511_v5 = vor.u32 %v1510_v21, %v6495_v46  ;;  %v1521_v6 = vor.u32 %v1520_v49, %v6502_v16 }
  0xf6   : > { %v6475_v4 = vpop.permute.xlu1 %2384  ;;  %v802_v18 = vrot.slane %v800_v57, 5  ;;  %v6523_v12 = vcombine.low %v6414_v42, %v6418_v36  ;;  %v1492_v44 = vrot.slane %v1491_v61, 4  ;;  %v1502_v1 = vrot.slane %v1501_v31, 4  ;;  %v226_v36 = vld [vmem:[%s5491_s17 + $0xd8] sm:$0x1] }
  0xf7   : > { %v2591_v19 = vpop.permute.xlu0 %2590  ;;  %v6525_v0 = vrot.slane %v810_v63, 5  ;;  %v816_v35 = vrot.slane %v814_v24, 4  ;;  %v1512_v58 = vrot.slane %v1511_v5, 4  ;;  %v1522_v49 = vrot.slane %v1521_v6, 4  ;;  %v6559_v31 = vld [vmem:[%s5491_s17 + $0x21c] sm:$0xf] }
  0xf8   : > { %2674 = vrot.lane.b32.xlu1 %v6432_v34, %s5456_s26  ;;  %v3042_v28 = vsel %vm3026_vm5, %v2913_v55, %v2591_v19  ;;  %v1524_v55 = vshll.u32 %v306_v48, 16  ;;  %v788_v19 = vrot.slane %v787_v10, 4  ;;  %v6531_v42 = vcombine.low %v6436_v32, %v6439_v52  ;;  %v6569_v63 = vld [vmem:[%s5491_s17 + $0x220] sm:$0xf] }
  0xf9   : > { %2608 = vrot.lane.b32.xlu0 %v6430_v62, %s5456_s26  ;;  %5237 = vmatmul.mubr.msk.bf16.gmra.mrb[12].mxu0 %vm3186_vm6, %v3042_v28  ;;  %v798_v28 = vrot.slane %v797_v26, 4  ;;  %v6538_v48 = vcombine.low %v6448_v60, %v6460_v2  ;;  %v1507_v61 = vsel %vm5564_vm2, %v1502_v1, %v6495_v46  ;;  %v2827_v52 = vsel %vm2704_vm3, %v5780_v27, %v6475_v4  ;;  %v6597_v1 = vld [vmem:[%s5491_s17 + $0x224] sm:$0xf] }
  0xfa   : > { %v6500_v51 = vpop.permute.xlu1 %2386  ;;  %v1526_v57 = vrot.slane %v1524_v55, 5  ;;  %v793_v32 = vsel %vm5564_vm2, %v788_v19, %v6492_v3  ;;  %v1517_v2 = vsel %vm5564_vm2, %v1512_v58, %v6502_v16  ;;  %v820_v10 = vshll.u32 %v226_v36, 16  ;;  %v6608_v58 = vld [vmem:[%s5491_s17 + $0x228] sm:$0xf] }
  0xfb   : > { %v6508_v11 = vpop.permute.xlu0 %2320  ;;  %v803_v60 = vsel %vm5564_vm2, %v798_v28, %v802_v18  ;;  %v6573_v24 = vcombine.low %v6487_v23, %v225_v33  ;;  %v2830_v23 = vsel %vm2704_vm3, %v5785_v29, %v6500_v51  ;;  %v1538_v55 = vshll.u32 %v6569_v63, 16 }
  0xfc   : > { %2404 = vrot.lane.b32.xlu1 %v4806_v38, %s5455_s21  ;;  %v1527_v27 = vsel %vm5564_vm2, %v1522_v49, %v1526_v57  ;;  %v6580_v5 = vcombine.low %v793_v32, %v803_v60  ;;  %v822_v51 = vrot.slane %v820_v10, 5  ;;  %v1542_v28 = vshrl.u32 %v6569_v63, 16 }
  0xfd   : > { %2610 = vrot.lane.b32.xlu0 %v6482_v25, %s5456_s26  ;;  %v6590_v33 = vcombine.low %v1517_v2, %v1527_v27  ;;  %v2731_v49 = vsel %vm2704_vm3, %v5793_v59, %v6508_v11  ;;  %v1548_v59 = vshll.u32 %v6597_v1, 16  ;;  %v1552_v32 = vshrl.u32 %v6597_v1, 16 }
  0xfe   : > { %v2523_v56 = vpop.permute.xlu1 %2522 }
  0xff   : > { %v6517_v38 = vpop.permute.xlu0 %2322  ;;  %v2979_v46 = vsel %vm2897_vm4, %v2827_v52, %v2523_v56  ;;  %v1529_v56 = vshrl.u32 %v6559_v31, 16  ;;  %v1558_v52 = vshll.u32 %v6608_v58, 16 }
 0x100   : > { %2406 = vrot.lane.b32.xlu1 %v6432_v34, %s5455_s21  ;;  %v807_v34 = vor.u32 %v806_v8, %v802_v18  ;;  %v1532_v18 = vshll.u32 %v6559_v31, 16  ;;  %v6585_v8 = vld [vmem:[%s5491_s17 + $0xdc] sm:$0xf]  ;;  %v2734_v27 = vsel %vm2704_vm3, %v5805_v50, %v6517_v38  ;;  %v1554_v50 = vrot.slane %v1552_v32, 4 }
 0x101   : > { %2340 = vrot.lane.b32.xlu0 %v6430_v62, %s5455_s21  ;;  %v1497_v62 = vsel %vm5564_vm2, %v1492_v44, %v6484_v22  ;;  %v817_v22 = vor.u32 %v816_v35, %v6525_v0  ;;  %v6594_v44 = vld [vmem:[%s5491_s17 + $0xe0] sm:$0xf]  ;;  %v825_v57 = vshrl.u32 %v6585_v8, 16  ;;  %v6650_v38 = vrot.slane %v1558_v52, 5 }
 0x102   : > { %v2525_v21 = vpop.permute.xlu1 %2524  ;;  %v6566_v4 = vrot.slane %v807_v34, 4  ;;  %v828_v34 = vshll.u32 %v6585_v8, 16 }
 0x103   : > { %v2459_v40 = vpop.permute.xlu0 %2458  ;;  %v818_v6 = vrot.slane %v817_v22, 4  ;;  %v2981_v19 = vsel %vm2897_vm4, %v2830_v23, %v2525_v21  ;;  %v1531_v22 = vrot.slane %v1529_v56, 4  ;;  %v827_v10 = vrot.slane %v825_v57, 4 }
 0x104   : > { %2542 = vrot.lane.b32.xlu1 %v6523_v12, %s5454_s18  ;;  %v813_v29 = vsel %vm5564_vm2, %v6566_v4, %v6525_v0  ;;  %v2915_v36 = vsel %vm2897_vm4, %v2731_v49, %v2459_v40  ;;  %v834_v0 = vshll.u32 %v6594_v44, 16  ;;  %v1562_v40 = vshrl.u32 %v6608_v58, 16 }
 0x105   : > { %2342 = vrot.lane.b32.xlu0 %v6482_v25, %s5455_s21  ;;  %v6578_v25 = vcombine.low %v1497_v62, %v1507_v61  ;;  %v838_v61 = vshrl.u32 %v6594_v44, 16  ;;  %v823_v2 = vsel %vm5564_vm2, %v818_v6, %v822_v51  ;;  %v1544_v4 = vrot.slane %v1542_v28, 4  ;;  %v230_v28 = vld [vmem:[%s5491_s17 + $0xe8] sm:$0xf] }
 0x106   : > { %v2657_v3 = vpop.permute.xlu1 %2656  ;;  %v6642_v6 = vrot.slane %v834_v0, 5  ;;  %v1564_v51 = vrot.slane %v1562_v40, 4 }
 0x107   : > { %v3108_v16 = vsel %vm3026_vm5, %v2979_v46, %v2657_v3  ;;  %v2461_v26 = vpop.permute.xlu0 %2460  ;;  %v1534_v46 = vrot.slane %v1532_v18, 5  ;;  %v6634_v3 = vrot.slane %v1538_v55, 5  ;;  %v840_v56 = vrot.slane %v838_v61, 4  ;;  %v6647_v55 = vld [vmem:[%s5491_s17 + $0xe4] sm:$0xf] }
 0x108   : > { %2544 = vrot.lane.b32.xlu1 %v6538_v48, %s5454_s18  ;;  %5304 = vmatprep.mubr.msk.bf16.mxu1 %vm3186_vm6, %v3108_v16  ;;  %v830_v16 = vrot.slane %v828_v34, 5  ;;  %v2917_v23 = vsel %vm2897_vm4, %v2734_v27, %v2461_v26  ;;  %v6644_v18 = vrot.slane %v1548_v59, 5  ;;  %v4777_v26 = vcombine.low %v813_v29, %v823_v2 }
 0x109   : > { %2478 = vrot.lane.b32.xlu0 %v6531_v42, %s5454_s18  ;;  %v844_v57 = vshll.u32 %v6647_v55, 16  ;;  %v848_v34 = vshrl.u32 %v6647_v55, 16  ;;  %v854_v61 = vshll.u32 %v230_v28, 16  ;;  %v858_v59 = vshrl.u32 %v230_v28, 16 }
 0x10a   : > { %v2659_v35 = vpop.permute.xlu1 %2658  ;;  %v841_v29 = vor.u32 %v840_v56, %v6642_v6  ;;  %v1555_v32 = vor.u32 %v1554_v50, %v6644_v18  ;;  %v1565_v52 = vor.u32 %v1564_v51, %v6650_v38  ;;  %v231_v51 = vld [vmem:[%s5491_s17 + $0xec] sm:$0x1] }
 0x10b   : > { %v3110_v21 = vsel %vm3026_vm5, %v2981_v19, %v2659_v35  ;;  %v2593_v62 = vpop.permute.xlu0 %2592 }
 0x10c   : > { %2676 = vrot.lane.b32.xlu1 %v6578_v25, %s5456_s26  ;;  %5305 = vmatmul.mubr.msk.bf16.gmra.mrb[16].mxu1 %vm3186_vm6, %v3110_v21  ;;  %v3044_v11 = vsel %vm3026_vm5, %v2915_v36, %v2593_v62  ;;  %v311_v21 = vld [vmem:[%s5491_s17 + $0x22c] sm:$0x1]  ;;  %v1535_v36 = vor.u32 %v1534_v46, %v1531_v22  ;;  %v1545_v62 = vor.u32 %v1544_v4, %v6634_v3  ;;  %v846_v46 = vrot.slane %v844_v57, 5 }
 0x10d   : > { %2480 = vrot.lane.b32.xlu0 %v6573_v24, %s5454_s18  ;;  %5240 = vmatprep.mubr.msk.bf16.mxu0 %vm3186_vm6, %v3044_v11  ;;  %v831_v11 = vor.u32 %v830_v16, %v827_v10  ;;  %v1568_v40 = vshll.u32 %v311_v21, 16  ;;  %v6672_v22 = vcombine.low %v6559_v31, %v6569_v63  ;;  %v6678_v16 = vrot.slane %v854_v61, 5 }
 0x10e   : > { %v6630_v60 = vpop.permute.xlu1 %2388  ;;  %v1536_v27 = vrot.slane %v1535_v36, 4  ;;  %v1546_v4 = vrot.slane %v1545_v62, 4  ;;  %v842_v56 = vrot.slane %v841_v29, 4  ;;  %v1566_v50 = vrot.slane %v1565_v52, 4 }
 0x10f   : > { %v2595_v19 = vpop.permute.xlu0 %2594  ;;  %v1570_v31 = vrot.slane %v1568_v40, 5  ;;  %v6685_v21 = vcombine.low %v6597_v1, %v6608_v58  ;;  %v6729_v40 = vld [vmem:[%s5491_s17 + $0xf0] sm:$0xf] }
 0x110   : > { %2678 = vrot.lane.b32.xlu1 %v6590_v33, %s5456_s26  ;;  %v3046_v35 = vsel %vm3026_vm5, %v2917_v23, %v2595_v19  ;;  %v860_v23 = vrot.slane %v858_v59, 4  ;;  %v832_v19 = vrot.slane %v831_v11, 4  ;;  %v1551_v57 = vsel %vm5564_vm2, %v1546_v4, %v6644_v18 }
 0x111   : > { %2612 = vrot.lane.b32.xlu0 %v6580_v5, %s5456_s26  ;;  %5241 = vmatmul.mubr.msk.bf16.gmra.mrb[16].mxu0 %vm3186_vm6, %v3046_v35  ;;  %v1556_v35 = vrot.slane %v1555_v32, 4  ;;  %v847_v1 = vsel %vm5564_vm2, %v842_v56, %v846_v46  ;;  %v2833_v18 = vsel %vm2704_vm3, %v5833_v7, %v6630_v60  ;;  %v1571_v61 = vsel %vm5564_vm2, %v1566_v50, %v1570_v31  ;;  %v6719_v32 = vld [vmem:[%s5491_s17 + $0x234] sm:$0xf] }
 0x112   : > { %v6656_v49 = vpop.permute.xlu1 %2390  ;;  %v864_v59 = vshll.u32 %v231_v51, 16  ;;  %v6716_v11 = vcombine.low %v6585_v8, %v6594_v44  ;;  %v1586_v31 = vshrl.u32 %v6719_v32, 16  ;;  %v869_v51 = vshrl.u32 %v6729_v40, 16 }
 0x113   : > { %v6662_v0 = vpop.permute.xlu0 %2324  ;;  %v1561_v62 = vsel %vm5564_vm2, %v1556_v35, %v6650_v38  ;;  %v6724_v38 = vcombine.low %v6647_v55, %v230_v28  ;;  %v8008_v55 = vld [vmem:[#allocation4_spill] sm:$0xff] }
 0x114   : > { %2408 = vrot.lane.b32.xlu1 %v6578_v25, %s5455_s21  ;;  %v850_v25 = vrot.slane %v848_v34, 4  ;;  %v6694_v34 = vld [vmem:[%s5491_s17 + $0x230] sm:$0xf]  ;;  %v6736_v44 = vcombine.low %v1561_v62, %v1571_v61  ;;  %v2836_v28 = vsel %vm2704_vm3, %v8008_v55, %v6656_v49  ;;  %v6757_v49 = vld [vmem:[%s5491_s17 + $0x23c] sm:$0xf] }
 0x115   : > { %2614 = vrot.lane.b32.xlu0 %v4777_v26, %s5456_s26  ;;  %v1573_v7 = vshrl.u32 %v6694_v34, 16  ;;  %8007 = vst [vmem:[#allocation11_spill] sm:$0xff] %v6724_v38  ;;  %v1576_v4 = vshll.u32 %v6694_v34, 16 }
 0x116   : > { %v2527_v2 = vpop.permute.xlu1 %2526  ;;  %v851_v58 = vor.u32 %v850_v25, %v846_v46  ;;  %v6739_v25 = vld [vmem:[%s5491_s17 + $0xf4] sm:$0xf] }
 0x117   : > { %v6674_v10 = vpop.permute.xlu0 %2326  ;;  %v6752_v50 = vrot.slane %v1573_v7, 4 }
 0x118   : > { %2410 = vrot.lane.b32.xlu1 %v6590_v33, %s5455_s21  ;;  %v1541_v33 = vsel %vm5564_vm2, %v1536_v27, %v6634_v3  ;;  %v861_v3 = vor.u32 %v860_v23, %v6678_v16  ;;  %v866_v27 = vrot.slane %v864_v59, 5  ;;  %v1582_v23 = vshll.u32 %v6719_v32, 16 }
 0x119   : > { %2344 = vrot.lane.b32.xlu0 %v6580_v5, %s5455_s21  ;;  %v837_v5 = vsel %vm5564_vm2, %v832_v19, %v6642_v6  ;;  %v2983_v6 = vsel %vm2897_vm4, %v2833_v18, %v2527_v2  ;;  %v6726_v52 = vcombine.low %v1541_v33, %v1551_v57  ;;  %v852_v2 = vrot.slane %v851_v58, 4  ;;  %v6747_v19 = vld [vmem:[%s5491_s17 + $0x238] sm:$0xf] }
 0x11a   : > { %v2529_v63 = vpop.permute.xlu1 %2528  ;;  %v6734_v8 = vcombine.low %v837_v5, %v847_v1  ;;  %v862_v46 = vrot.slane %v861_v3, 4  ;;  %v8009_v33 = vld [vmem:[#allocation5_spill] sm:$0xff]  ;;  %v878_v1 = vshll.u32 %v6739_v25, 16  ;;  %v882_v18 = vshrl.u32 %v6739_v25, 16 }
 0x11b   : > { %v2463_v36 = vpop.permute.xlu0 %2462  ;;  %v2985_v56 = vsel %vm2897_vm4, %v2836_v28, %v2529_v63  ;;  %v2737_v57 = vsel %vm2704_vm3, %v8009_v33, %v6662_v0  ;;  %v872_v63 = vshll.u32 %v6729_v40, 16  ;;  %v1592_v62 = vshll.u32 %v6747_v19, 16 }
 0x11c   : > { %2546 = vrot.lane.b32.xlu1 %v6672_v22, %s5454_s18  ;;  %v2919_v58 = vsel %vm2897_vm4, %v2737_v57, %v2463_v36  ;;  %v1596_v0 = vshrl.u32 %v6747_v19, 16  ;;  %v857_v59 = vsel %vm5564_vm2, %v852_v2, %v6678_v16  ;;  %v1602_v36 = vshll.u32 %v6757_v49, 16  ;;  %v8010_v16 = vld [vmem:[#allocation6_spill] sm:$0xff]  ;;  %v6793_v57 = vld [vmem:[%s5491_s17 + $0xf8] sm:$0xf] }
 0x11d   : > { %2346 = vrot.lane.b32.xlu0 %v4777_v26, %s5455_s21  ;;  %v867_v7 = vsel %vm5564_vm2, %v862_v46, %v866_v27  ;;  %v6785_v55 = vrot.slane %v1582_v23, 5  ;;  %v1588_v28 = vrot.slane %v1586_v31, 4  ;;  %v2740_v2 = vsel %vm2704_vm3, %v8010_v16, %v6674_v10 }
 0x11e   : > { %v2661_v29 = vpop.permute.xlu1 %2660  ;;  %v6790_v33 = vrot.slane %v878_v1, 5  ;;  %v884_v46 = vrot.slane %v882_v18, 4  ;;  %v6798_v27 = vrot.slane %v1592_v62, 5  ;;  %v6801_v10 = vrot.slane %v1602_v36, 5 }
 0x11f   : > { %v3112_v60 = vsel %vm3026_vm5, %v2983_v6, %v2661_v29  ;;  %v2465_v26 = vpop.permute.xlu0 %2464  ;;  %v1606_v6 = vshrl.u32 %v6757_v49, 16  ;;  %v888_v1 = vshll.u32 %v6793_v57, 16  ;;  %v892_v18 = vshrl.u32 %v6793_v57, 16 }
 0x120   : > { %2548 = vrot.lane.b32.xlu1 %v6685_v21, %s5454_s18  ;;  %5308 = vmatprep.mubr.msk.bf16.mxu1 %vm3186_vm6, %v3112_v60  ;;  %v1578_v60 = vrot.slane %v1576_v4, 5  ;;  %v1598_v4 = vrot.slane %v1596_v0, 4  ;;  %v1589_v0 = vor.u32 %v1588_v28, %v6785_v55 }
 0x121   : > { %2482 = vrot.lane.b32.xlu0 %v6716_v11, %s5454_s18  ;;  %v1608_v31 = vrot.slane %v1606_v6, 4  ;;  %v890_v28 = vrot.slane %v888_v1, 5  ;;  %v236_v1 = vld [vmem:[%s5491_s17 + $0x100] sm:$0x1] }
 0x122   : > { %v2663_v35 = vpop.permute.xlu1 %2662  ;;  %v1579_v62 = vor.u32 %v1578_v60, %v6752_v50  ;;  %v6824_v60 = vcombine.low %v6694_v34, %v6719_v32 }
 0x123   : > { %v3114_v5 = vsel %vm3026_vm5, %v2985_v56, %v2663_v35  ;;  %v2597_v3 = vpop.permute.xlu0 %2596  ;;  %v871_v56 = vrot.slane %v869_v51, 4  ;;  %v874_v35 = vrot.slane %v872_v63, 5  ;;  %v235_v51 = vld [vmem:[%s5491_s17 + $0xfc] sm:$0xf] }
 0x124   : > { %2680 = vrot.lane.b32.xlu1 %v6726_v52, %s5456_s26  ;;  %5309 = vmatmul.mubr.msk.bf16.gmra.mrb[20].mxu1 %vm3186_vm6, %v3114_v5  ;;  %v3048_v61 = vsel %vm3026_vm5, %v2919_v58, %v2597_v3  ;;  %v2921_v5 = vsel %vm2897_vm4, %v2740_v2, %v2465_v26  ;;  %v4779_v26 = vcombine.low %v857_v59, %v867_v7  ;;  %v316_v3 = vld [vmem:[%s5491_s17 + $0x240] sm:$0x1]  ;;  %v898_v6 = vshll.u32 %v235_v51, 16 }
 0x125   : > { %2484 = vrot.lane.b32.xlu0 %v6724_v38, %s5454_s18  ;;  %5244 = vmatprep.mubr.msk.bf16.mxu0 %vm3186_vm6, %v3048_v61  ;;  %v875_v61 = vor.u32 %v874_v35, %v871_v56  ;;  %v902_v16 = vshrl.u32 %v235_v51, 16  ;;  %v885_v59 = vor.u32 %v884_v46, %v6790_v33  ;;  %v1599_v7 = vor.u32 %v1598_v4, %v6798_v27 }
 0x126   : > { %v6781_v29 = vpop.permute.xlu1 %2392  ;;  %v1609_v2 = vor.u32 %v1608_v31, %v6801_v10  ;;  %v1580_v56 = vrot.slane %v1579_v62, 4  ;;  %v1590_v35 = vrot.slane %v1589_v0, 4  ;;  %v6830_v4 = vrot.slane %v898_v6, 5 }
 0x127   : > { %v2599_v58 = vpop.permute.xlu0 %2598  ;;  %v886_v31 = vrot.slane %v885_v59, 4  ;;  %v6840_v62 = vcombine.low %v6747_v19, %v6757_v49 }
 0x128   : > { %2682 = vrot.lane.b32.xlu1 %v6736_v44, %s5456_s26  ;;  %v3050_v23 = vsel %vm3026_vm5, %v2921_v5, %v2599_v58  ;;  %v1612_v5 = vshll.u32 %v316_v3, 16  ;;  %v876_v58 = vrot.slane %v875_v61, 4  ;;  %v1600_v3 = vrot.slane %v1599_v7, 4 }
 0x129   : > { %2616 = vrot.lane.b32.xlu0 %v6734_v8, %s5456_s26  ;;  %5245 = vmatmul.mubr.msk.bf16.gmra.mrb[20].mxu0 %vm3186_vm6, %v3050_v23  ;;  %v904_v23 = vrot.slane %v902_v16, 4  ;;  %v1610_v38 = vrot.slane %v1609_v2, 4  ;;  %v1595_v0 = vsel %vm5564_vm2, %v1590_v35, %v6798_v27  ;;  %v891_v19 = vsel %vm5564_vm2, %v886_v31, %v890_v28 }
 0x12a   : > { %v6807_v63 = vpop.permute.xlu1 %2394  ;;  %v1614_v34 = vrot.slane %v1612_v5, 5  ;;  %v1605_v49 = vsel %vm5564_vm2, %v1600_v3, %v6801_v10  ;;  %v908_v16 = vshll.u32 %v236_v1, 16  ;;  %v6869_v10 = vcombine.low %v6729_v40, %v6739_v25  ;;  %v6872_v5 = vld [vmem:[%s5491_s17 + $0x248] sm:$0xf]  ;;  %v6904_v3 = vld [vmem:[%s5491_s17 + $0x250] sm:$0xf] }
 0x12b   : > { %v6814_v36 = vpop.permute.xlu0 %2328  ;;  %v905_v27 = vor.u32 %v904_v23, %v6830_v4  ;;  %v2842_v35 = vsel %vm2704_vm3, %v5950_v15, %v6807_v63  ;;  %v1626_v31 = vshll.u32 %v6872_v5, 16  ;;  %v8013_v15 = vld [vmem:[#allocation9_spill] sm:$0xff] }
 0x12c   : > { %2412 = vrot.lane.b32.xlu1 %v6726_v52, %s5455_s21  ;;  %v894_v52 = vrot.slane %v892_v18, 4  ;;  %v6836_v18 = vld [vmem:[%s5491_s17 + $0x244] sm:$0xf]  ;;  %v1615_v6 = vsel %vm5564_vm2, %v1610_v38, %v1614_v34  ;;  %8011 = vst [vmem:[#allocation4_spill] sm:$0xff] %v6869_v10  ;;  %v2743_v63 = vsel %vm2704_vm3, %v8013_v15, %v6814_v36  ;;  %v1646_v36 = vshll.u32 %v6904_v3, 16 }
 0x12d   : > { %2618 = vrot.lane.b32.xlu0 %v4779_v26, %s5456_s26  ;;  %v1617_v59 = vshrl.u32 %v6836_v18, 16  ;;  %v6891_v25 = vcombine.low %v1605_v49, %v1615_v6  ;;  %v6940_v15 = vld [vmem:[%s5491_s17 + $0x10c] sm:$0xf] }
 0x12e   : > { %v2531_v50 = vpop.permute.xlu1 %2530 }
 0x12f   : > { %v6826_v46 = vpop.permute.xlu0 %2330  ;;  %v6900_v23 = vrot.slane %v1617_v59, 4 }
 0x130   : > { %2414 = vrot.lane.b32.xlu1 %v6736_v44, %s5455_s21  ;;  %v1585_v44 = vsel %vm5564_vm2, %v1580_v56, %v6785_v55  ;;  %v895_v55 = vor.u32 %v894_v52, %v890_v28  ;;  %v6895_v56 = vld [vmem:[%s5491_s17 + $0x24c] sm:$0xf] }
 0x131   : > { %2348 = vrot.lane.b32.xlu0 %v6734_v8, %s5455_s21  ;;  %v881_v8 = vsel %vm5564_vm2, %v876_v58, %v6790_v33  ;;  %v2839_v33 = vsel %vm2704_vm3, %v5922_v39, %v6781_v29  ;;  %v6876_v29 = vcombine.low %v6793_v57, %v235_v51  ;;  %v6878_v38 = vcombine.low %v1585_v44, %v1595_v0 }
 0x132   : > { %v2533_v32 = vpop.permute.xlu1 %2532  ;;  %v2987_v7 = vsel %vm2897_vm4, %v2839_v33, %v2531_v50  ;;  %v6880_v28 = vcombine.low %v881_v8, %v891_v19  ;;  %v6883_v50 = vld [vmem:[%s5491_s17 + $0x104] sm:$0xf]  ;;  %v896_v52 = vrot.slane %v895_v55, 4  ;;  %v906_v57 = vrot.slane %v905_v27, 4 }
 0x133   : > { %v2467_v61 = vpop.permute.xlu0 %2466  ;;  %8012 = vst [vmem:[#allocation5_spill] sm:$0xff] %v6876_v29  ;;  %v1620_v51 = vshll.u32 %v6836_v18, 16  ;;  %v910_v58 = vrot.slane %v908_v16, 5  ;;  %v2989_v34 = vsel %vm2897_vm4, %v2842_v35, %v2533_v32  ;;  %v1630_v44 = vshrl.u32 %v6872_v5, 16 }
 0x134   : > { %2550 = vrot.lane.b32.xlu1 %v6824_v60, %s5454_s18  ;;  %v913_v0 = vshrl.u32 %v6883_v50, 16  ;;  %v916_v8 = vshll.u32 %v6883_v50, 16  ;;  %v2923_v55 = vsel %vm2897_vm4, %v2743_v63, %v2467_v61  ;;  %v1636_v33 = vshll.u32 %v6895_v56, 16 }
 0x135   : > { %2350 = vrot.lane.b32.xlu0 %v4779_v26, %s5455_s21  ;;  %v6886_v26 = vld [vmem:[%s5491_s17 + $0x108] sm:$0xf]  ;;  %v1640_v6 = vshrl.u32 %v6895_v56, 16  ;;  %v901_v59 = vsel %vm5564_vm2, %v896_v52, %v6830_v4  ;;  %v1622_v61 = vrot.slane %v1620_v51, 5  ;;  %v6937_v35 = vrot.slane %v1626_v31, 5  ;;  %v8014_v4 = vld [vmem:[#allocation10_spill] sm:$0xff] }
 0x136   : > { %v2665_v2 = vpop.permute.xlu1 %2664  ;;  %v922_v49 = vshll.u32 %v6886_v26, 16  ;;  %v926_v32 = vshrl.u32 %v6886_v26, 16  ;;  %v2746_v52 = vsel %vm2704_vm3, %v8014_v4, %v6826_v46  ;;  %v918_v51 = vrot.slane %v916_v8, 5 }
 0x137   : > { %v3116_v39 = vsel %vm3026_vm5, %v2987_v7, %v2665_v2  ;;  %v2469_v40 = vpop.permute.xlu0 %2468  ;;  %v1650_v7 = vshrl.u32 %v6904_v3, 16  ;;  %v6952_v31 = vrot.slane %v1646_v36, 5  ;;  %v932_v8 = vshll.u32 %v6940_v15, 16 }
 0x138   : > { %2552 = vrot.lane.b32.xlu1 %v6840_v62, %s5454_s18  ;;  %5312 = vmatprep.mubr.msk.bf16.mxu1 %vm3186_vm6, %v3116_v39  ;;  %v911_v39 = vsel %vm5564_vm2, %v906_v57, %v910_v58  ;;  %v6945_v63 = vrot.slane %v922_v49, 5  ;;  %v6950_v57 = vrot.slane %v1636_v33, 5  ;;  %v1642_v58 = vrot.slane %v1640_v6, 4  ;;  %v321_v33 = vld [vmem:[%s5491_s17 + $0x254] sm:$0x1] }
 0x139   : > { %2486 = vrot.lane.b32.xlu0 %v6869_v10, %s5454_s18  ;;  %v1652_v46 = vrot.slane %v1650_v7, 4  ;;  %v936_v49 = vshrl.u32 %v6940_v15, 16  ;;  %v1623_v36 = vor.u32 %v1622_v61, %v6900_v23  ;;  %v6976_v61 = vcombine.low %v6836_v18, %v6872_v5  ;;  %v241_v5 = vld [vmem:[%s5491_s17 + $0x114] sm:$0x1] }
 0x13a   : > { %v2667_v1 = vpop.permute.xlu1 %2666 }
 0x13b   : > { %v3118_v19 = vsel %vm3026_vm5, %v2989_v34, %v2667_v1  ;;  %v2601_v27 = vpop.permute.xlu0 %2600  ;;  %v1632_v34 = vrot.slane %v1630_v44, 4  ;;  %v915_v1 = vrot.slane %v913_v0, 4  ;;  %v240_v44 = vld [vmem:[%s5491_s17 + $0x110] sm:$0xf] }
 0x13c   : > { %2684 = vrot.lane.b32.xlu1 %v6878_v38, %s5456_s26  ;;  %5313 = vmatmul.mubr.msk.bf16.gmra.mrb[24].mxu1 %vm3186_vm6, %v3118_v19  ;;  %v3052_v16 = vsel %vm3026_vm5, %v2923_v55, %v2601_v27  ;;  %v928_v19 = vrot.slane %v926_v32, 4  ;;  %v2925_v55 = vsel %vm2897_vm4, %v2746_v52, %v2469_v40  ;;  %v4781_v40 = vcombine.low %v901_v59, %v911_v39 }
 0x13d   : > { %2488 = vrot.lane.b32.xlu0 %v6876_v29, %s5454_s18  ;;  %5248 = vmatprep.mubr.msk.bf16.mxu0 %vm3186_vm6, %v3052_v16  ;;  %v942_v6 = vshll.u32 %v240_v44, 16  ;;  %v1633_v16 = vor.u32 %v1632_v34, %v6937_v35  ;;  %v946_v7 = vshrl.u32 %v240_v44, 16  ;;  %v919_v52 = vor.u32 %v918_v51, %v915_v1 }
 0x13e   : > { %v6933_v2 = vpop.permute.xlu1 %2396  ;;  %v934_v59 = vrot.slane %v932_v8, 5  ;;  %v938_v39 = vrot.slane %v936_v49, 4  ;;  %v1656_v29 = vshll.u32 %v321_v33, 16  ;;  %v1624_v34 = vrot.slane %v1623_v36, 4 }
 0x13f   : > { %v2603_v27 = vpop.permute.xlu0 %2602  ;;  %v1634_v1 = vrot.slane %v1633_v16, 4 }
 0x140   : > { %2686 = vrot.lane.b32.xlu1 %v6891_v25, %s5456_s26  ;;  %v3054_v0 = vsel %vm3026_vm5, %v2925_v55, %v2603_v27  ;;  %v929_v55 = vor.u32 %v928_v19, %v6945_v63  ;;  %v1643_v27 = vor.u32 %v1642_v58, %v6950_v57  ;;  %v948_v19 = vrot.slane %v946_v7, 4 }
 0x141   : > { %2620 = vrot.lane.b32.xlu0 %v6880_v28, %s5456_s26  ;;  %5249 = vmatmul.mubr.msk.bf16.gmra.mrb[24].mxu0 %vm3186_vm6, %v3054_v0  ;;  %v1653_v0 = vor.u32 %v1652_v46, %v6952_v31  ;;  %v920_v58 = vrot.slane %v919_v52, 4  ;;  %v1658_v33 = vrot.slane %v1656_v29, 5  ;;  %v939_v10 = vor.u32 %v938_v39, %v934_v59  ;;  %v7016_v52 = vld [vmem:[%s5491_s17 + $0x258] sm:$0xf] }
 0x142   : > { %v6961_v32 = vpop.permute.xlu1 %2398  ;;  %v930_v46 = vrot.slane %v929_v55, 4  ;;  %v1644_v8 = vrot.slane %v1643_v27, 4  ;;  %v1639_v36 = vsel %vm5564_vm2, %v1634_v1, %v6950_v57  ;;  %v2845_v57 = vsel %vm2704_vm3, %v6078_v45, %v6933_v2  ;;  %v7034_v39 = vld [vmem:[%s5491_s17 + $0x118] sm:$0xf] }
 0x143   : > { %v6966_v4 = vpop.permute.xlu0 %2332  ;;  %v1654_v49 = vrot.slane %v1653_v0, 4  ;;  %v7013_v7 = vrot.slane %v939_v10, 4  ;;  %v7026_v2 = vcombine.low %v6940_v15, %v240_v44  ;;  %v1661_v15 = vshrl.u32 %v7016_v52, 16 }
 0x144   : > { %2416 = vrot.lane.b32.xlu1 %v6878_v38, %s5455_s21  ;;  %v6978_v38 = vrot.slane %v942_v6, 5  ;;  %v6989_v6 = vcombine.low %v6895_v56, %v6904_v3  ;;  %v935_v56 = vsel %vm5564_vm2, %v930_v46, %v934_v59  ;;  %v1649_v3 = vsel %vm5564_vm2, %v1644_v8, %v6952_v31  ;;  %v7031_v59 = vld [vmem:[%s5491_s17 + $0x25c] sm:$0xf] }
 0x145   : > { %2622 = vrot.lane.b32.xlu0 %v4781_v40, %s5456_s26  ;;  %v1659_v16 = vsel %vm5564_vm2, %v1654_v49, %v1658_v33  ;;  %v7022_v31 = vcombine.low %v6883_v50, %v6886_v26  ;;  %v1664_v44 = vshll.u32 %v7016_v52, 16  ;;  %v1670_v49 = vshll.u32 %v7031_v59, 16 }
 0x146   : > { %v2535_v23 = vpop.permute.xlu1 %2534  ;;  %v7041_v26 = vcombine.low %v1649_v3, %v1659_v16  ;;  %v1674_v33 = vshrl.u32 %v7031_v59, 16 }
 0x147   : > { %v6980_v51 = vpop.permute.xlu0 %2334  ;;  %v2991_v55 = vsel %vm2897_vm4, %v2845_v57, %v2535_v23  ;;  %v2848_v23 = vsel %vm2704_vm3, %v6092_v17, %v6961_v32  ;;  %v957_v17 = vshrl.u32 %v7034_v39, 16  ;;  %v7065_v32 = vld [vmem:[%s5491_s17 + $0x264] sm:$0xf] }
 0x148   : > { %2418 = vrot.lane.b32.xlu1 %v6891_v25, %s5455_s21  ;;  %v1629_v25 = vsel %vm5564_vm2, %v1624_v34, %v6937_v35  ;;  %v949_v35 = vor.u32 %v948_v19, %v6978_v38  ;;  %v945_v34 = vsel %vm5564_vm2, %v7013_v7, %v6978_v38  ;;  %v2749_v38 = vsel %vm2704_vm3, %v6109_v47, %v6966_v4 }
 0x149   : > { %2352 = vrot.lane.b32.xlu0 %v6880_v28, %s5455_s21  ;;  %v925_v28 = vsel %vm5564_vm2, %v920_v58, %v6945_v63  ;;  %v952_v63 = vshll.u32 %v241_v5, 16  ;;  %v7028_v10 = vcombine.low %v1629_v25, %v1639_v36  ;;  %v7056_v58 = vld [vmem:[%s5491_s17 + $0x260] sm:$0xf]  ;;  %v1690_v57 = vshll.u32 %v7065_v32, 16 }
 0x14a   : > { %v2537_v18 = vpop.permute.xlu1 %2536  ;;  %v7039_v50 = vcombine.low %v925_v28, %v935_v56  ;;  %v950_v1 = vrot.slane %v949_v35, 4  ;;  %v1680_v3 = vshll.u32 %v7056_v58, 16  ;;  %v1684_v47 = vshrl.u32 %v7056_v58, 16 }
 0x14b   : > { %v2471_v29 = vpop.permute.xlu0 %2470  ;;  %v954_v19 = vrot.slane %v952_v63, 5  ;;  %v2993_v46 = vsel %vm2897_vm4, %v2848_v23, %v2537_v18  ;;  %v960_v18 = vshll.u32 %v7034_v39, 16  ;;  %v1663_v35 = vrot.slane %v1661_v15, 4 }
 0x14c   : > { %2554 = vrot.lane.b32.xlu1 %v6976_v61, %s5454_s18  ;;  %v2927_v36 = vsel %vm2897_vm4, %v2749_v38, %v2471_v29  ;;  %v1694_v29 = vshrl.u32 %v7065_v32, 16  ;;  %v1666_v63 = vrot.slane %v1664_v44, 5  ;;  %v959_v15 = vrot.slane %v957_v17, 4  ;;  %v245_v17 = vld [vmem:[%s5491_s17 + $0x124] sm:$0xf] }
 0x14d   : > { %2354 = vrot.lane.b32.xlu0 %v4781_v40, %s5455_s21  ;;  %v7046_v40 = vld [vmem:[%s5491_s17 + $0x11c] sm:$0xf]  ;;  %v955_v7 = vsel %vm5564_vm2, %v950_v1, %v954_v19  ;;  %v962_v23 = vrot.slane %v960_v18, 5  ;;  %v7103_v1 = vrot.slane %v1680_v3, 5  ;;  %v1686_v19 = vrot.slane %v1684_v47, 4 }
 0x14e   : > { %v2669_v27 = vpop.permute.xlu1 %2668  ;;  %v966_v25 = vshll.u32 %v7046_v40, 16  ;;  %v970_v56 = vshrl.u32 %v7046_v40, 16 }
 0x14f   : > { %v3120_v45 = vsel %vm3026_vm5, %v2991_v55, %v2669_v27  ;;  %v2473_v0 = vpop.permute.xlu0 %2472  ;;  %v7090_v55 = vrot.slane %v1670_v49, 5  ;;  %v1676_v27 = vrot.slane %v1674_v33, 4  ;;  %v1696_v49 = vrot.slane %v1694_v29, 4 }
 0x150   : > { %2556 = vrot.lane.b32.xlu1 %v6989_v6, %s5454_s18  ;;  %5316 = vmatprep.mubr.msk.bf16.mxu1 %vm3186_vm6, %v3120_v45  ;;  %v2752_v45 = vsel %vm2704_vm3, %v6121_v54, %v6980_v51  ;;  %v972_v44 = vrot.slane %v970_v56, 4  ;;  %v7106_v51 = vrot.slane %v1690_v57, 5  ;;  %v963_v47 = vor.u32 %v962_v23, %v959_v15 }
 0x151   : > { %2490 = vrot.lane.b32.xlu0 %v7022_v31, %s5454_s18  ;;  %v2929_v38 = vsel %vm2897_vm4, %v2752_v45, %v2473_v0  ;;  %v4783_v0 = vcombine.low %v945_v34, %v955_v7  ;;  %v1677_v3 = vor.u32 %v1676_v27, %v7090_v55  ;;  %v1687_v34 = vor.u32 %v1686_v19, %v7103_v1 }
 0x152   : > { %v2671_v8 = vpop.permute.xlu1 %2670  ;;  %v986_v57 = vshll.u32 %v245_v17, 16  ;;  %v990_v29 = vshrl.u32 %v245_v17, 16  ;;  %v1697_v7 = vor.u32 %v1696_v49, %v7106_v51 }
 0x153   : > { %v3122_v5 = vsel %vm3026_vm5, %v2993_v46, %v2671_v8  ;;  %v2605_v28 = vpop.permute.xlu0 %2604  ;;  %v7095_v46 = vrot.slane %v966_v25, 5  ;;  %v7098_v8 = vld [vmem:[%s5491_s17 + $0x120] sm:$0xf]  ;;  %v1678_v23 = vrot.slane %v1677_v3, 4  ;;  %v1688_v19 = vrot.slane %v1687_v34, 4 }
 0x154   : > { %2688 = vrot.lane.b32.xlu1 %v7028_v10, %s5456_s26  ;;  %5317 = vmatmul.mubr.msk.bf16.gmra.mrb[28].mxu1 %vm3186_vm6, %v3122_v5  ;;  %v3056_v4 = vsel %vm3026_vm5, %v2927_v36, %v2605_v28  ;;  %v976_v18 = vshll.u32 %v7098_v8, 16  ;;  %v980_v25 = vshrl.u32 %v7098_v8, 16  ;;  %v326_v36 = vld [vmem:[%s5491_s17 + $0x268] sm:$0x1]  ;;  %v1667_v28 = vor.u32 %v1666_v63, %v1663_v35 }
 0x155   : > { %2492 = vrot.lane.b32.xlu0 %v7026_v2, %s5454_s18  ;;  %5252 = vmatprep.mubr.msk.bf16.mxu0 %vm3186_vm6, %v3056_v4  ;;  %v973_v4 = vor.u32 %v972_v44, %v7095_v46  ;;  %v1700_v45 = vshll.u32 %v326_v36, 16  ;;  %v992_v49 = vrot.slane %v990_v29, 4 }
 0x156   : > { %v7086_v16 = vpop.permute.xlu1 %2400  ;;  %v978_v63 = vrot.slane %v976_v18, 5  ;;  %v1668_v27 = vrot.slane %v1667_v28, 4  ;;  %v1698_v18 = vrot.slane %v1697_v7, 4 }
 0x157   : > { %v2607_v5 = vpop.permute.xlu0 %2606  ;;  %v974_v44 = vrot.slane %v973_v4, 4  ;;  %v1702_v36 = vrot.slane %v1700_v45, 5  ;;  %v7181_v45 = vcombine.low %v7098_v8, %v245_v17 }
 0x158   : > { %2690 = vrot.lane.b32.xlu1 %v7041_v26, %s5456_s26  ;;  %v3058_v54 = vsel %vm3026_vm5, %v2929_v38, %v2607_v5  ;;  %v982_v38 = vrot.slane %v980_v25, 4  ;;  %v964_v5 = vrot.slane %v963_v47, 4  ;;  %v1673_v28 = vsel %vm5564_vm2, %v1668_v27, %v7090_v55  ;;  %v7199_v27 = vld [vmem:[%s5491_s17 + $0x130] sm:$0xf] }
 0x159   : > { %2624 = vrot.lane.b32.xlu0 %v7039_v50, %s5456_s26  ;;  %5253 = vmatmul.mubr.msk.bf16.gmra.mrb[28].mxu0 %vm3186_vm6, %v3058_v54  ;;  %v7134_v54 = vrot.slane %v986_v57, 5  ;;  %v2851_v55 = vsel %vm2704_vm3, %v6217_v43, %v7086_v16  ;;  %v1703_v4 = vsel %vm5564_vm2, %v1698_v18, %v1702_v36  ;;  %v7166_v57 = vld [vmem:[%s5491_s17 + $0x26c] sm:$0xf]  ;;  %8015 = vst [vmem:[#allocation6_spill] sm:$0xff] %v7181_v45 }
 0x15a   : > { %v7111_v33 = vpop.permute.xlu1 %2402  ;;  %v983_v25 = vor.u32 %v982_v38, %v978_v63  ;;  %v969_v47 = vsel %vm5564_vm2, %v964_v5, %v7095_v46  ;;  %v7169_v46 = vld [vmem:[%s5491_s17 + $0x270] sm:$0xf]  ;;  %v1708_v8 = vshll.u32 %v7166_v57, 16 }
 0x15b   : > { %v7117_v56 = vpop.permute.xlu0 %2336  ;;  %v1714_v17 = vshll.u32 %v7169_v46, 16 }
 0x15c   : > { %2420 = vrot.lane.b32.xlu1 %v7028_v10, %s5455_s21  ;;  %v7128_v10 = vcombine.low %v7016_v52, %v7031_v59  ;;  %v246_v59 = vld [vmem:[%s5491_s17 + $0x128] sm:$0x1]  ;;  %v7177_v16 = vrot.slane %v983_v25, 4 }
 0x15d   : > { %2626 = vrot.lane.b32.xlu0 %v4783_v0, %s5456_s26  ;;  %v996_v34 = vshll.u32 %v246_v59, 16 }
 0x15e   : > { %v2539_v35 = vpop.permute.xlu1 %2538  ;;  %v989_v59 = vsel %vm5564_vm2, %v7177_v16, %v7134_v54  ;;  %v7245_v16 = vrot.slane %v1714_v17, 5 }
 0x15f   : > { %v7130_v15 = vpop.permute.xlu0 %2338  ;;  %v2995_v29 = vsel %vm2897_vm4, %v2851_v55, %v2539_v35  ;;  %v7188_v35 = vld [vmem:[%s5491_s17 + $0x12c] sm:$0xf] }
 0x160   : > { %2422 = vrot.lane.b32.xlu1 %v7041_v26, %s5455_s21  ;;  %v7141_v26 = vcombine.low %v7056_v58, %v7065_v32  ;;  %v979_v58 = vsel %vm5564_vm2, %v974_v44, %v978_v63  ;;  %v1693_v32 = vsel %vm5564_vm2, %v1688_v19, %v7106_v51  ;;  %v7175_v51 = vcombine.low %v7034_v39, %v7046_v40 }
 0x161   : > { %2356 = vrot.lane.b32.xlu0 %v7039_v50, %s5455_s21  ;;  %v1683_v50 = vsel %vm5564_vm2, %v1678_v23, %v7103_v1  ;;  %v993_v1 = vor.u32 %v992_v49, %v7134_v54  ;;  %v7185_v38 = vcombine.low %v969_v47, %v979_v58  ;;  %v7193_v39 = vcombine.low %v1693_v32, %v1703_v4  ;;  %v7206_v49 = vld [vmem:[%s5491_s17 + $0x274] sm:$0xf] }
 0x162   : > { %v2541_v52 = vpop.permute.xlu1 %2540  ;;  %v7183_v63 = vcombine.low %v1673_v28, %v1683_v50  ;;  %v1705_v40 = vshrl.u32 %v7166_v57, 16  ;;  %v2854_v23 = vsel %vm2704_vm3, %v6230_v30, %v7111_v33  ;;  %v998_v44 = vrot.slane %v996_v34, 5  ;;  %v7218_v33 = vld [vmem:[%s5491_s17 + $0x278] sm:$0xf] }
 0x163   : > { %v2475_v3 = vpop.permute.xlu0 %2474  ;;  %v994_v5 = vrot.slane %v993_v1, 4  ;;  %v1718_v19 = vshrl.u32 %v7169_v46, 16  ;;  %v2997_v18 = vsel %vm2897_vm4, %v2854_v23, %v2541_v52  ;;  %v1001_v25 = vshrl.u32 %v7188_v35, 16 }
 0x164   : > { %2558 = vrot.lane.b32.xlu1 %v7128_v10, %s5454_s18  ;;  %v1004_v30 = vshll.u32 %v7188_v35, 16  ;;  %v2755_v52 = vsel %vm2704_vm3, %v6247_v41, %v7117_v56  ;;  %v1010_v50 = vshll.u32 %v7199_v27, 16  ;;  %v1014_v47 = vshrl.u32 %v7199_v27, 16 }
 0x165   : > { %2358 = vrot.lane.b32.xlu0 %v4783_v0, %s5455_s21  ;;  %v2931_v58 = vsel %vm2897_vm4, %v2755_v52, %v2475_v3  ;;  %v1707_v32 = vrot.slane %v1705_v40, 4  ;;  %v1724_v55 = vshll.u32 %v7206_v49, 16  ;;  %v1728_v4 = vshrl.u32 %v7206_v49, 16  ;;  %v7236_v3 = vld [vmem:[%s5491_s17 + $0x134] sm:$0xf] }
 0x166   : > { %v2673_v43 = vpop.permute.xlu1 %2672  ;;  %v1710_v56 = vrot.slane %v1708_v8, 5  ;;  %v1734_v1 = vshll.u32 %v7218_v33, 16  ;;  %v1738_v34 = vshrl.u32 %v7218_v33, 16  ;;  %v1003_v40 = vrot.slane %v1001_v25, 4  ;;  %v7253_v52 = vld [vmem:[%s5491_s17 + $0x138] sm:$0xf] }
 0x167   : > { %v3124_v7 = vsel %vm3026_vm5, %v2995_v29, %v2673_v43  ;;  %v2477_v0 = vpop.permute.xlu0 %2476  ;;  %v999_v43 = vsel %vm5564_vm2, %v994_v5, %v998_v44  ;;  %v2758_v8 = vsel %vm2704_vm3, %v6276_v53, %v7130_v15  ;;  %v1006_v23 = vrot.slane %v1004_v30, 5 }
 0x168   : > { %2560 = vrot.lane.b32.xlu1 %v7141_v26, %s5454_s18  ;;  %5320 = vmatprep.mubr.msk.bf16.mxu1 %vm3186_vm6, %v3124_v7  ;;  %v1720_v7 = vrot.slane %v1718_v19, 4  ;;  %v7258_v17 = vrot.slane %v1724_v55, 5  ;;  %v1730_v5 = vrot.slane %v1728_v4, 4  ;;  %v1020_v44 = vshll.u32 %v7236_v3, 16 }
 0x169   : > { %2494 = vrot.lane.b32.xlu0 %v7175_v51, %s5454_s18  ;;  %v7262_v15 = vrot.slane %v1734_v1, 5  ;;  %v1740_v19 = vrot.slane %v1738_v34, 4  ;;  %v1024_v25 = vshrl.u32 %v7236_v3, 16  ;;  %v1711_v55 = vor.u32 %v1710_v56, %v1707_v32 }
 0x16a   : > { %v2675_v36 = vpop.permute.xlu1 %2674  ;;  %v1721_v4 = vor.u32 %v1720_v7, %v7245_v16  ;;  %v1007_v1 = vor.u32 %v1006_v23, %v1003_v40  ;;  %v7291_v23 = vcombine.low %v7166_v57, %v7169_v46  ;;  %v7301_v57 = vcombine.low %v7188_v35, %v7199_v27 }
 0x16b   : > { %v3126_v28 = vsel %vm3026_vm5, %v2997_v18, %v2675_v36  ;;  %v2609_v54 = vpop.permute.xlu0 %2608  ;;  %v7250_v18 = vrot.slane %v1010_v50, 5  ;;  %v1016_v36 = vrot.slane %v1014_v47, 4  ;;  %v1030_v50 = vshll.u32 %v7253_v52, 16 }
 0x16c   : > { %2692 = vrot.lane.b32.xlu1 %v7183_v63, %s5456_s26  ;;  %5321 = vmatmul.mubr.msk.bf16.gmra.mrb[32].mxu1 %vm3186_vm6, %v3126_v28  ;;  %v3060_v41 = vsel %vm3026_vm5, %v2931_v58, %v2609_v54  ;;  %v2933_v28 = vsel %vm2897_vm4, %v2758_v8, %v2477_v0  ;;  %v4785_v0 = vcombine.low %v989_v59, %v999_v43  ;;  %v1034_v47 = vshrl.u32 %v7253_v52, 16  ;;  %v331_v54 = vld [vmem:[%s5491_s17 + $0x27c] sm:$0x1] }
 0x16d   : > { %2496 = vrot.lane.b32.xlu0 %v7181_v45, %s5454_s18  ;;  %5256 = vmatprep.mubr.msk.bf16.mxu0 %vm3186_vm6, %v3060_v41  ;;  %v1017_v34 = vor.u32 %v1016_v36, %v7250_v18  ;;  %v1731_v59 = vor.u32 %v1730_v5, %v7258_v17  ;;  %v1022_v43 = vrot.slane %v1020_v44, 5  ;;  %v1026_v8 = vrot.slane %v1024_v25, 4 }
 0x16e   : > { %v7241_v29 = vpop.permute.xlu1 %2404  ;;  %v7282_v56 = vrot.slane %v1030_v50, 5  ;;  %v1036_v7 = vrot.slane %v1034_v47, 4  ;;  %v1722_v45 = vrot.slane %v1721_v4, 4  ;;  %v1008_v36 = vrot.slane %v1007_v1, 4  ;;  %v7294_v47 = vld [vmem:[%s5491_s17 + $0x280] sm:$0xf] }
 0x16f   : > { %v2611_v58 = vpop.permute.xlu0 %2610  ;;  %v1018_v5 = vrot.slane %v1017_v34, 4  ;;  %v1732_v44 = vrot.slane %v1731_v59, 4  ;;  %v1027_v50 = vor.u32 %v1026_v8, %v1022_v43  ;;  %v7305_v46 = vcombine.low %v7206_v49, %v7218_v33  ;;  %v7314_v1 = vld [vmem:[%s5491_s17 + $0x284] sm:$0xf] }
 0x170   : > { %2694 = vrot.lane.b32.xlu1 %v7193_v39, %s5456_s26  ;;  %v3062_v53 = vsel %vm3026_vm5, %v2933_v28, %v2611_v58  ;;  %v1741_v28 = vor.u32 %v1740_v19, %v7262_v15  ;;  %v1744_v58 = vshll.u32 %v331_v54, 16  ;;  %v1013_v35 = vsel %vm5564_vm2, %v1008_v36, %v7250_v18 }
 0x171   : > { %2628 = vrot.lane.b32.xlu0 %v7185_v38, %s5456_s26  ;;  %5257 = vmatmul.mubr.msk.bf16.gmra.mrb[32].mxu0 %vm3186_vm6, %v3062_v53  ;;  %v1712_v53 = vrot.slane %v1711_v55, 4  ;;  %v1037_v55 = vor.u32 %v1036_v7, %v7282_v56  ;;  %v1023_v27 = vsel %vm5564_vm2, %v1018_v5, %v1022_v43  ;;  %v1737_v49 = vsel %vm5564_vm2, %v1732_v44, %v7262_v15  ;;  %v7340_v15 = vld [vmem:[%s7980_s2] ss:$0 sm:$0xff] }
 0x172   : > { %v7268_v30 = vpop.permute.xlu1 %2406  ;;  %v1742_v19 = vrot.slane %v1741_v28, 4  ;;  %v1746_v25 = vrot.slane %v1744_v58, 5  ;;  %v1749_v33 = vshrl.u32 %v7294_v47, 16  ;;  %v1752_v18 = vshll.u32 %v7294_v47, 16 }
 0x173   : > { %v7274_v41 = vpop.permute.xlu0 %2340  ;;  %v1717_v4 = vsel %vm5564_vm2, %v1712_v53, %v7245_v16  ;;  %v7342_v8 = vrot.slane %v1037_v55, 4  ;;  %v7350_v58 = vcombine.low %v7236_v3, %v7253_v52  ;;  %v7357_v53 = vcombine.low %v1013_v35, %v1023_v27 }
 0x174   : > { %2424 = vrot.lane.b32.xlu1 %v7183_v63, %s5455_s21  ;;  %v251_v63 = vld [vmem:[%s5491_s17 + $0x13c] sm:$0x1]  ;;  %v1747_v16 = vsel %vm5564_vm2, %v1742_v19, %v1746_v25  ;;  %v7361_v36 = vrot.slane %v1749_v33, 4  ;;  %v1762_v5 = vshrl.u32 %v7314_v1, 16  ;;  %v2860_v3 = vsel %vm2704_vm3, %v6390_v37, %v7268_v30 }
 0x175   : > { %2630 = vrot.lane.b32.xlu0 %v4785_v0, %s5456_s26  ;;  %v7373_v25 = vrot.slane %v1752_v18, 5 }
 0x176   : > { %v2543_v32 = vpop.permute.xlu1 %2542 }
 0x177   : > { %v7285_v40 = vpop.permute.xlu0 %2342 }
 0x178   : > { %2426 = vrot.lane.b32.xlu1 %v7193_v39, %s5455_s21  ;;  %v1040_v39 = vshll.u32 %v251_v63, 16  ;;  %v7359_v63 = vcombine.low %v1737_v49, %v1747_v16 }
 0x179   : > { %2360 = vrot.lane.b32.xlu0 %v7185_v38, %s5455_s21  ;;  %v1727_v38 = vsel %vm5564_vm2, %v1722_v45, %v7258_v17  ;;  %v2857_v45 = vsel %vm2704_vm3, %v6376_v14, %v7241_v29  ;;  %v7332_v17 = vrot.slane %v1027_v50, 4  ;;  %v1758_v29 = vshll.u32 %v7314_v1, 16 }
 0x17a   : > { %v2545_v54 = vpop.permute.xlu1 %2544  ;;  %v2999_v59 = vsel %vm2897_vm4, %v2857_v45, %v2543_v32  ;;  %v7344_v14 = vrot.slane %v1040_v39, 5 }
 0x17b   : > { %v2479_v34 = vpop.permute.xlu0 %2478  ;;  %v1033_v19 = vsel %vm5564_vm2, %v7332_v17, %v7282_v56  ;;  %v3001_v50 = vsel %vm2897_vm4, %v2860_v3, %v2545_v54  ;;  %v7386_v56 = vld [vmem:[%s5491_s17 + $0x288] sm:$0xf]  ;;  %v2761_v54 = vsel %vm2704_vm3, %v6386_v9, %v7274_v41  ;;  %v7403_v9 = vrot.slane %v1762_v5, 4  ;;  %v7406_v41 = vld [vmem:[%s5491_s17 + $0x28c] sm:$0xf] }
 0x17c   : > { %2562 = vrot.lane.b32.xlu1 %v7291_v23, %s5454_s18  ;;  %v1043_v30 = vsel %vm5564_vm2, %v7342_v8, %v7344_v14  ;;  %v2935_v33 = vsel %vm2897_vm4, %v2761_v54, %v2479_v34  ;;  %v1768_v8 = vshll.u32 %v7386_v56, 16  ;;  %v1772_v3 = vshrl.u32 %v7386_v56, 16 }
 0x17d   : > { %2362 = vrot.lane.b32.xlu0 %v4785_v0, %s5455_s21  ;;  %v7352_v0 = vcombine.low %v1717_v4, %v1727_v38  ;;  %v7383_v4 = vrot.slane %v1758_v29, 5 }
 0x17e   : > { %v2677_v43 = vpop.permute.xlu1 %2676 }
 0x17f   : > { %v3128_v28 = vsel %vm3026_vm5, %v2999_v59, %v2677_v43  ;;  %v2481_v32 = vpop.permute.xlu0 %2480  ;;  %v5290_v7 = vpop.f32.mrb[0].mxu1 }
 0x180   : > { %2564 = vrot.lane.b32.xlu1 %v7305_v46, %s5454_s18  ;;  %5324 = vmatprep.mubr.msk.bf16.mxu1 %vm3186_vm6, %v3128_v28  ;;  %v3614_v52 = vadd.f32 %v5290_v7, %v7340_v15  ;;  %v3605_v44 = vpop.f32.mrb[1].mxu1 }
 0x181   : > { %2498 = vrot.lane.b32.xlu0 %v7301_v57, %s5454_s18  ;;  %v3606_v55 = vadd.f32 %v7340_v15, %v3605_v44  ;;  %v5291_v39 = vpop.f32.mrb[2].mxu1 }
 0x182   : > { %v2679_v37 = vpop.permute.xlu1 %2678  ;;  %v3926_v38 = vmax.f32 %v3614_v52, 0.0  ;;  %v3617_v35 = vadd.f32 %v5291_v39, %v7340_v15  ;;  %v3608_v49 = vpop.f32.mrb[3].mxu1  ;;  %v2764_v52 = vsel %vm2704_vm3, %v6424_v20, %v7285_v40  ;;  %v1778_v39 = vshll.u32 %v7406_v41, 16 }
 0x183   : > { %v3130_v27 = vsel %vm3026_vm5, %v3001_v50, %v2679_v37  ;;  %v2613_v45 = vpop.permute.xlu0 %2612  ;;  %v3924_v16 = vmax.f32 %v3606_v55, 0.0  ;;  %v3609_v17 = vadd.f32 %v7340_v15, %v3608_v49  ;;  %v2937_v37 = vsel %vm2897_vm4, %v2764_v52, %v2481_v32 }
 0x184   : > { %2696 = vrot.lane.b32.xlu1 %v7352_v0, %s5456_s26  ;;  %5325 = vmatmul.mubr.msk.bf16.gmra.mrb[36].mxu1 %vm3186_vm6, %v3130_v27  ;;  %v3064_v34 = vsel %vm3026_vm5, %v2935_v33, %v2613_v45  ;;  %v5226_v18 = vpop.f32.mrb[0].mxu0  ;;  %v5089_v59 = vpack.c.bf16 %v3926_v38, %v3926_v38  ;;  %v3927_v43 = vmax.f32 %v3617_v35, 0.0  ;;  %v1782_v32 = vshrl.u32 %v7406_v41, 16 }
 0x185   : > { %v3358_v14 = vadd.f32 %v5226_v18, %v7340_v15  ;;  %v3349_v29 = vpop.f32.mrb[1].mxu0  ;;  %v5087_v28 = vpack.c.bf16 %v3924_v16, %v3924_v16  ;;  %2500 = vrot.lane.b32.xlu0 %v7350_v58, %s5454_s18  ;;  %5260 = vmatprep.mubr.msk.bf16.mxu0 %vm3186_vm6, %v3064_v34  ;;  %v3925_v7 = vmax.f32 %v3609_v17, 0.0  ;;  %v4787_v17 = vcombine.low %v1033_v19, %v1043_v30 }
 0x186   : > { %v7414_v5 = vpop.permute.xlu1 %2408  ;;  %4567 = vst.msk [vmem:[%s7397_s5 + $0x108] sm:$0xf] %vm4500_vm7, %v5089_v59  ;;  %v3350_v44 = vadd.f32 %v7340_v15, %v3349_v29  ;;  %v5227_v50 = vpop.f32.mrb[2].mxu0  ;;  %v5090_v55 = vpack.c.bf16 %v3927_v43, %v3927_v43  ;;  %v1770_v29 = vrot.slane %v1768_v8, 5  ;;  %v1780_v30 = vrot.slane %v1778_v39, 5 }
 0x187   : > { %v3862_v54 = vmax.f32 %v3358_v14, 0.0  ;;  %4565 = vst.msk [vmem:[%s7397_s5 + $0x100] sm:$0xf] %vm4500_vm7, %v5087_v28  ;;  %v3361_v38 = vadd.f32 %v5227_v50, %v7340_v15  ;;  %v3352_v35 = vpop.f32.mrb[3].mxu0  ;;  %v5088_v27 = vpack.c.bf16 %v3925_v7, %v3925_v7  ;;  %v2615_v49 = vpop.permute.xlu0 %2614  ;;  %v1774_v28 = vrot.slane %v1772_v3, 4 }
 0x188   : > { %2698 = vrot.lane.b32.xlu1 %v7359_v63, %s5456_s26  ;;  %v3860_v20 = vmax.f32 %v3350_v44, 0.0  ;;  %4568 = vst.msk [vmem:[%s7397_s5 + $0x10c] sm:$0xf] %vm4500_vm7, %v5090_v55  ;;  %v3353_v40 = vadd.f32 %v7340_v15, %v3352_v35  ;;  %v3066_v33 = vsel %vm3026_vm5, %v2937_v37, %v2615_v49  ;;  %v1755_v7 = vor.u32 %v7373_v25, %v7361_v36  ;;  %v336_v50 = vld [vmem:[%s5491_s17 + $0x290] sm:$0x1] }
 0x189   : > { %v5025_v45 = vpack.c.bf16 %v3862_v54, %v3862_v54  ;;  %v3863_v16 = vmax.f32 %v3361_v38, 0.0  ;;  %4566 = vst.msk [vmem:[%s7397_s5 + $0x104] sm:$0xf] %vm4500_vm7, %v5088_v27  ;;  %2632 = vrot.lane.b32.xlu0 %v7357_v53, %s5456_s26  ;;  %5261 = vmatmul.mubr.msk.bf16.gmra.mrb[36].mxu0 %vm3186_vm6, %v3066_v33  ;;  %v1784_v52 = vrot.slane %v1782_v32, 4  ;;  %v1765_v44 = vor.u32 %v7403_v9, %v7383_v4 }
 0x18a   : > { %v2411_v34 = vpop.permute.xlu1 %2410  ;;  %v5023_v18 = vpack.c.bf16 %v3860_v20, %v3860_v20  ;;  %v3861_v59 = vmax.f32 %v3353_v40, 0.0  ;;  %v4820_v36 = vcombine.low %v7294_v47, %v7314_v1  ;;  %v1756_v25 = vrot.slane %v1755_v7, 4 }
 0x18b   : > { %4503 = vst.msk [vmem:[%s7397_s5 + $0x8] sm:$0xf] %vm4500_vm7, %v5025_v45  ;;  %v5026_v43 = vpack.c.bf16 %v3863_v16, %v3863_v16  ;;  %v2345_v14 = vpop.permute.xlu0 %2344  ;;  %v1788_v8 = vshll.u32 %v336_v50, 16  ;;  %v1766_v3 = vrot.slane %v1765_v44, 4  ;;  %v1775_v9 = vor.u32 %v1774_v28, %v1770_v29 }
 0x18c   : > { %2428 = vrot.lane.b32.xlu1 %v7352_v0, %s5455_s21  ;;  %4501 = vst.msk [vmem:[%s7397_s5] sm:$0xf] %vm4500_vm7, %v5023_v18  ;;  %v5024_v19 = vpack.c.bf16 %v3861_v59, %v3861_v59  ;;  %v1785_v39 = vor.u32 %v1784_v52, %v1780_v30  ;;  %v4821_v38 = vcombine.low %v7386_v56, %v7406_v41  ;;  %v8016_v59 = vld [vmem:[#allocation8_spill] sm:$0xff] }
 0x18d   : > { %4504 = vst.msk [vmem:[%s7397_s5 + $0xc] sm:$0xf] %vm4500_vm7, %v5026_v43  ;;  %2634 = vrot.lane.b32.xlu0 %v4787_v17, %s5456_s26  ;;  %v1790_v47 = vrot.slane %v1788_v8, 5  ;;  %v2863_v1 = vsel %vm2704_vm3, %v6523_v12, %v7414_v5  ;;  %v1771_v35 = vsel %vm5564_vm2, %v1766_v3, %v1770_v29  ;;  %v2866_v5 = vsel %vm2704_vm3, %v6538_v48, %v2411_v34 }
 0x18e   : > { %v2547_v55 = vpop.permute.xlu1 %2546  ;;  %4502 = vst.msk [vmem:[%s7397_s5 + $0x4] sm:$0xf] %vm4500_vm7, %v5024_v19  ;;  %v1786_v27 = vrot.slane %v1785_v39, 4  ;;  %v2767_v48 = vsel %vm2704_vm3, %v6531_v42, %v2345_v14 }
 0x18f   : > { %v7456_v0 = vpop.permute.xlu0 %2346  ;;  %v3003_v49 = vsel %vm2897_vm4, %v2863_v1, %v2547_v55 }
 0x190   : > { %2430 = vrot.lane.b32.xlu1 %v7359_v63, %s5455_s21  ;;  %v1761_v63 = vsel %vm5564_vm2, %v1756_v25, %v7383_v4 }
 0x191   : > { %2364 = vrot.lane.b32.xlu0 %v7357_v53, %s5455_s21  ;;  %v1776_v53 = vrot.slane %v1775_v9, 4  ;;  %v4822_v12 = vcombine.low %v1761_v63, %v1771_v35  ;;  %v8017_v9 = vld [vmem:[#allocation7_spill] sm:$0xff] }
 0x192   : > { %v2549_v37 = vpop.permute.xlu1 %2548 }
 0x193   : > { %v2483_v54 = vpop.permute.xlu0 %2482  ;;  %v1781_v16 = vsel %vm5564_vm2, %v1776_v53, %v1780_v30  ;;  %v3005_v18 = vsel %vm2897_vm4, %v2866_v5, %v2549_v37 }
 0x194   : > { %2566 = vrot.lane.b32.xlu1 %v4820_v36, %s5454_s18  ;;  %v2939_v30 = vsel %vm2897_vm4, %v2767_v48, %v2483_v54  ;;  %v2770_v54 = vsel %vm2704_vm3, %v6573_v24, %v7456_v0 }
 0x195   : > { %2366 = vrot.lane.b32.xlu0 %v4787_v17, %s5455_s21  ;;  %v1791_v17 = vsel %vm5564_vm2, %v1786_v27, %v1790_v47 }
 0x196   : > { %v2681_v20 = vpop.permute.xlu1 %2680  ;;  %v4823_v55 = vcombine.low %v1781_v16, %v1791_v17  ;;  %v8019_v16 = vld [vmem:[#allocation2_spill] sm:$0xff] }
 0x197   : > { %v3132_v56 = vsel %vm3026_vm5, %v3003_v49, %v2681_v20  ;;  %v5294_v41 = vpop.f32.mrb[4].mxu1  ;;  %v2485_v40 = vpop.permute.xlu0 %2484 }
 0x198   : > { %v3630_v4 = vadd.f32 %v5294_v41, %v7340_v15  ;;  %2568 = vrot.lane.b32.xlu1 %v4821_v38, %s5454_s18  ;;  %v3621_v33 = vpop.f32.mrb[5].mxu1  ;;  %5328 = vmatprep.mubr.msk.bf16.mxu1 %vm3186_vm6, %v3132_v56  ;;  %v2941_v1 = vsel %vm2897_vm4, %v2770_v54, %v2485_v40  ;;  %v8018_v40 = vld [vmem:[#allocation3_spill] sm:$0xff] }
 0x199   : > { %v3622_v32 = vadd.f32 %v7340_v15, %v3621_v33  ;;  %v5295_v45 = vpop.f32.mrb[6].mxu1  ;;  %2502 = vrot.lane.b32.xlu0 %v8016_v59, %s5454_s18 }
 0x19a   : > { %v3930_v43 = vmax.f32 %v3630_v4, 0.0  ;;  %v3633_v29 = vadd.f32 %v5295_v45, %v7340_v15  ;;  %v2683_v28 = vpop.permute.xlu1 %2682  ;;  %v3624_v7 = vpop.f32.mrb[7].mxu1 }
 0x19b   : > { %v3928_v34 = vmax.f32 %v3622_v32, 0.0  ;;  %v3134_v19 = vsel %vm3026_vm5, %v3005_v18, %v2683_v28  ;;  %v3625_v13 = vadd.f32 %v7340_v15, %v3624_v7  ;;  %v2617_v52 = vpop.permute.xlu0 %2616 }
 0x19c   : > { %v5093_v44 = vpack.c.bf16 %v3930_v43, %v3930_v43  ;;  %v3931_v50 = vmax.f32 %v3633_v29, 0.0  ;;  %2700 = vrot.lane.b32.xlu1 %v4822_v12, %s5456_s26  ;;  %5329 = vmatmul.mubr.msk.bf16.gmra.mrb[40].mxu1 %vm3186_vm6, %v3134_v19  ;;  %v3068_v36 = vsel %vm3026_vm5, %v2939_v30, %v2617_v52  ;;  %v5230_v42 = vpop.f32.mrb[4].mxu0 }
 0x19d   : > { %v5091_v14 = vpack.c.bf16 %v3928_v34, %v3928_v34  ;;  %v3929_v25 = vmax.f32 %v3625_v13, 0.0  ;;  %v3374_v8 = vadd.f32 %v5230_v42, %v7340_v15  ;;  %v3365_v3 = vpop.f32.mrb[5].mxu0  ;;  %2504 = vrot.lane.b32.xlu0 %v8017_v9, %s5454_s18  ;;  %5264 = vmatprep.mubr.msk.bf16.mxu0 %vm3186_vm6, %v3068_v36 }
 0x19e   : > { %4571 = vst.msk [vmem:[%s7397_s5 + $0x118] sm:$0xf] %vm4500_vm7, %v5093_v44  ;;  %v5094_v39 = vpack.c.bf16 %v3931_v50, %v3931_v50  ;;  %v2413_v37 = vpop.permute.xlu1 %2412  ;;  %v3366_v38 = vadd.f32 %v7340_v15, %v3365_v3  ;;  %v5231_v63 = vpop.f32.mrb[6].mxu0 }
 0x19f   : > { %4569 = vst.msk [vmem:[%s7397_s5 + $0x110] sm:$0xf] %vm4500_vm7, %v5091_v14  ;;  %v5092_v47 = vpack.c.bf16 %v3929_v25, %v3929_v25  ;;  %v3866_v35 = vmax.f32 %v3374_v8, 0.0  ;;  %v3377_v53 = vadd.f32 %v5231_v63, %v7340_v15  ;;  %v3368_v27 = vpop.f32.mrb[7].mxu0  ;;  %v2619_v49 = vpop.permute.xlu0 %2618  ;;  %v2869_v29 = vsel %vm2704_vm3, %v6672_v22, %v2413_v37 }
 0x1a0   : > { %4572 = vst.msk [vmem:[%s7397_s5 + $0x11c] sm:$0xf] %vm4500_vm7, %v5094_v39  ;;  %2702 = vrot.lane.b32.xlu1 %v4823_v55, %s5456_s26  ;;  %v3864_v24 = vmax.f32 %v3366_v38, 0.0  ;;  %v3369_v0 = vadd.f32 %v7340_v15, %v3368_v27  ;;  %v3070_v20 = vsel %vm3026_vm5, %v2941_v1, %v2619_v49  ;;  %v8020_v49 = vld [vmem:[#allocation11_spill] sm:$0xff] }
 0x1a1   : > { %4570 = vst.msk [vmem:[%s7397_s5 + $0x114] sm:$0xf] %vm4500_vm7, %v5092_v47  ;;  %v5029_v56 = vpack.c.bf16 %v3866_v35, %v3866_v35  ;;  %v3867_v41 = vmax.f32 %v3377_v53, 0.0  ;;  %2636 = vrot.lane.b32.xlu0 %v8018_v40, %s5456_s26  ;;  %5265 = vmatmul.mubr.msk.bf16.gmra.mrb[40].mxu0 %vm3186_vm6, %v3070_v20 }
 0x1a2   : > { %v2415_v4 = vpop.permute.xlu1 %2414  ;;  %v5027_v33 = vpack.c.bf16 %v3864_v24, %v3864_v24  ;;  %v3865_v12 = vmax.f32 %v3369_v0, 0.0 }
 0x1a3   : > { %4507 = vst.msk [vmem:[%s7397_s5 + $0x18] sm:$0xf] %vm4500_vm7, %v5029_v56  ;;  %v5030_v5 = vpack.c.bf16 %v3867_v41, %v3867_v41  ;;  %v2349_v32 = vpop.permute.xlu0 %2348  ;;  %v2872_v52 = vsel %vm2704_vm3, %v6685_v21, %v2415_v4 }
 0x1a4   : > { %4505 = vst.msk [vmem:[%s7397_s5 + $0x10] sm:$0xf] %vm4500_vm7, %v5027_v33  ;;  %v5028_v45 = vpack.c.bf16 %v3865_v12, %v3865_v12  ;;  %v2773_v25 = vsel %vm2704_vm3, %v6716_v11, %v2349_v32 }
 0x1a5   : > { %4508 = vst.msk [vmem:[%s7397_s5 + $0x1c] sm:$0xf] %vm4500_vm7, %v5030_v5  ;;  %2638 = vrot.lane.b32.xlu0 %v8019_v16, %s5456_s26 }
 0x1a6   : > { %v2551_v17 = vpop.permute.xlu1 %2550  ;;  %4506 = vst.msk [vmem:[%s7397_s5 + $0x14] sm:$0xf] %vm4500_vm7, %v5028_v45 }
 0x1a7   : > { %v2351_v18 = vpop.permute.xlu0 %2350  ;;  %v3007_v28 = vsel %vm2897_vm4, %v2869_v29, %v2551_v17 }
 0x1a8   : > { %v2776_v24 = vsel %vm2704_vm3, %v8020_v49, %v2351_v18 }
 0x1aa   : > { %v2553_v59 = vpop.permute.xlu1 %2552 }
 0x1ab   : > { %v2487_v43 = vpop.permute.xlu0 %2486  ;;  %v3009_v22 = vsel %vm2897_vm4, %v2872_v52, %v2553_v59 }
 0x1ac   : > { %v2943_v21 = vsel %vm2897_vm4, %v2773_v25, %v2487_v43 }
 0x1ae   : > { %v2685_v7 = vpop.permute.xlu1 %2684 }
 0x1af   : > { %v3136_v48 = vsel %vm3026_vm5, %v3007_v28, %v2685_v7  ;;  %v5298_v34 = vpop.f32.mrb[8].mxu1  ;;  %v2489_v19 = vpop.permute.xlu0 %2488 }
 0x1b0   : > { %v3646_v13 = vadd.f32 %v5298_v34, %v7340_v15  ;;  %v3637_v30 = vpop.f32.mrb[9].mxu1  ;;  %5332 = vmatprep.mubr.msk.bf16.mxu1 %vm3186_vm6, %v3136_v48  ;;  %v2945_v41 = vsel %vm2897_vm4, %v2776_v24, %v2489_v19 }
 0x1b1   : > { %v3638_v44 = vadd.f32 %v7340_v15, %v3637_v30  ;;  %v5299_v50 = vpop.f32.mrb[10].mxu1 }
 0x1b2   : > { %v3934_v55 = vmax.f32 %v3646_v13, 0.0  ;;  %v3649_v36 = vadd.f32 %v5299_v50, %v7340_v15  ;;  %v2687_v42 = vpop.permute.xlu1 %2686  ;;  %v3640_v14 = vpop.f32.mrb[11].mxu1 }
 0x1b3   : > { %v3932_v8 = vmax.f32 %v3638_v44, 0.0  ;;  %v3138_v3 = vsel %vm3026_vm5, %v3009_v22, %v2687_v42  ;;  %v3641_v9 = vadd.f32 %v7340_v15, %v3640_v14  ;;  %v2621_v39 = vpop.permute.xlu0 %2620 }
 0x1b4   : > { %v5097_v37 = vpack.c.bf16 %v3934_v55, %v3934_v55  ;;  %v3935_v54 = vmax.f32 %v3649_v36, 0.0  ;;  %5333 = vmatmul.mubr.msk.bf16.gmra.mrb[44].mxu1 %vm3186_vm6, %v3138_v3  ;;  %v3072_v38 = vsel %vm3026_vm5, %v2943_v21, %v2621_v39  ;;  %v5234_v63 = vpop.f32.mrb[8].mxu0 }
 0x1b5   : > { %v5095_v47 = vpack.c.bf16 %v3932_v8, %v3932_v8  ;;  %v3933_v1 = vmax.f32 %v3641_v9, 0.0  ;;  %v3390_v11 = vadd.f32 %v5234_v63, %v7340_v15  ;;  %v3381_v35 = vpop.f32.mrb[9].mxu0  ;;  %5268 = vmatprep.mubr.msk.bf16.mxu0 %vm3186_vm6, %v3072_v38 }
 0x1b6   : > { %4575 = vst.msk [vmem:[%s7397_s5 + $0x128] sm:$0xf] %vm4500_vm7, %v5097_v37  ;;  %v5098_v53 = vpack.c.bf16 %v3935_v54, %v3935_v54  ;;  %v2417_v27 = vpop.permute.xlu1 %2416  ;;  %v3382_v0 = vadd.f32 %v7340_v15, %v3381_v35  ;;  %v5235_v20 = vpop.f32.mrb[10].mxu0  ;;  %v8021_v37 = vld [vmem:[#allocation4_spill] sm:$0xff] }
 0x1b7   : > { %4573 = vst.msk [vmem:[%s7397_s5 + $0x120] sm:$0xf] %vm4500_vm7, %v5095_v47  ;;  %v5096_v56 = vpack.c.bf16 %v3933_v1, %v3933_v1  ;;  %v3870_v40 = vmax.f32 %v3390_v11, 0.0  ;;  %v3393_v4 = vadd.f32 %v5235_v20, %v7340_v15  ;;  %v3384_v33 = vpop.f32.mrb[11].mxu0  ;;  %v2623_v12 = vpop.permute.xlu0 %2622  ;;  %v2875_v30 = vsel %vm2704_vm3, %v6824_v60, %v2417_v27 }
 0x1b8   : > { %4576 = vst.msk [vmem:[%s7397_s5 + $0x12c] sm:$0xf] %vm4500_vm7, %v5098_v53  ;;  %v3868_v5 = vmax.f32 %v3382_v0, 0.0  ;;  %v3385_v32 = vadd.f32 %v7340_v15, %v3384_v33  ;;  %v3074_v45 = vsel %vm3026_vm5, %v2945_v41, %v2623_v12 }
 0x1b9   : > { %4574 = vst.msk [vmem:[%s7397_s5 + $0x124] sm:$0xf] %vm4500_vm7, %v5096_v56  ;;  %v5033_v16 = vpack.c.bf16 %v3870_v40, %v3870_v40  ;;  %v3871_v17 = vmax.f32 %v3393_v4, 0.0  ;;  %5269 = vmatmul.mubr.msk.bf16.gmra.mrb[44].mxu0 %vm3186_vm6, %v3074_v45  ;;  %v8022_v40 = vld [vmem:[#allocation5_spill] sm:$0xff] }
 0x1ba   : > { %v2419_v18 = vpop.permute.xlu1 %2418  ;;  %v5031_v59 = vpack.c.bf16 %v3868_v5, %v3868_v5  ;;  %v3869_v43 = vmax.f32 %v3385_v32, 0.0 }
 0x1bb   : > { %4511 = vst.msk [vmem:[%s7397_s5 + $0x28] sm:$0xf] %vm4500_vm7, %v5033_v16  ;;  %v5034_v29 = vpack.c.bf16 %v3871_v17, %v3871_v17  ;;  %v2353_v28 = vpop.permute.xlu0 %2352  ;;  %v2878_v14 = vsel %vm2704_vm3, %v6840_v62, %v2419_v18 }
 0x1bc   : > { %4509 = vst.msk [vmem:[%s7397_s5 + $0x20] sm:$0xf] %vm4500_vm7, %v5031_v59  ;;  %v5032_v7 = vpack.c.bf16 %v3869_v43, %v3869_v43  ;;  %v2779_v54 = vsel %vm2704_vm3, %v8021_v37, %v2353_v28 }
 0x1bd   : > { %4512 = vst.msk [vmem:[%s7397_s5 + $0x2c] sm:$0xf] %vm4500_vm7, %v5034_v29 }
 0x1be   : > { %v2555_v48 = vpop.permute.xlu1 %2554  ;;  %4510 = vst.msk [vmem:[%s7397_s5 + $0x24] sm:$0xf] %vm4500_vm7, %v5032_v7 }
 0x1bf   : > { %v2355_v34 = vpop.permute.xlu0 %2354  ;;  %v3011_v52 = vsel %vm2897_vm4, %v2875_v30, %v2555_v48 }
 0x1c0   : > { %v2782_v4 = vsel %vm2704_vm3, %v8022_v40, %v2355_v34 }
 0x1c2   : > { %v2557_v19 = vpop.permute.xlu1 %2556 }
 0x1c3   : > { %v2491_v13 = vpop.permute.xlu0 %2490  ;;  %v3013_v60 = vsel %vm2897_vm4, %v2878_v14, %v2557_v19 }
 0x1c4   : > { %v2947_v62 = vsel %vm2897_vm4, %v2779_v54, %v2491_v13 }
 0x1c6   : > { %v2689_v44 = vpop.permute.xlu1 %2688 }
 0x1c7   : > { %v3140_v50 = vsel %vm3026_vm5, %v3011_v52, %v2689_v44  ;;  %v5302_v22 = vpop.f32.mrb[12].mxu1  ;;  %v2493_v55 = vpop.permute.xlu0 %2492 }
 0x1c8   : > { %v3662_v36 = vadd.f32 %v5302_v22, %v7340_v15  ;;  %v3653_v42 = vpop.f32.mrb[13].mxu1  ;;  %5336 = vmatprep.mubr.msk.bf16.mxu1 %vm3186_vm6, %v3140_v50  ;;  %v2949_v32 = vsel %vm2897_vm4, %v2782_v4, %v2493_v55 }
 0x1c9   : > { %v3654_v25 = vadd.f32 %v7340_v15, %v3653_v42  ;;  %v5303_v8 = vpop.f32.mrb[14].mxu1 }
 0x1ca   : > { %v3938_v3 = vmax.f32 %v3662_v36, 0.0  ;;  %v3665_v9 = vadd.f32 %v5303_v8, %v7340_v15  ;;  %v2691_v21 = vpop.permute.xlu1 %2690  ;;  %v3656_v39 = vpop.f32.mrb[15].mxu1 }
 0x1cb   : > { %v3936_v38 = vmax.f32 %v3654_v25, 0.0  ;;  %v3142_v63 = vsel %vm3026_vm5, %v3013_v60, %v2691_v21  ;;  %v3657_v47 = vadd.f32 %v7340_v15, %v3656_v39  ;;  %v2625_v1 = vpop.permute.xlu0 %2624 }
 0x1cc   : > { %v5101_v11 = vpack.c.bf16 %v3938_v3, %v3938_v3  ;;  %v3939_v35 = vmax.f32 %v3665_v9, 0.0  ;;  %5337 = vmatmul.mubr.msk.bf16.gmra.mrb[48].mxu1 %vm3186_vm6, %v3142_v63  ;;  %v3076_v53 = vsel %vm3026_vm5, %v2947_v62, %v2625_v1  ;;  %v5238_v27 = vpop.f32.mrb[12].mxu0 }
 0x1cd   : > { %v5099_v49 = vpack.c.bf16 %v3936_v38, %v3936_v38  ;;  %v3937_v24 = vmax.f32 %v3657_v47, 0.0  ;;  %v3406_v0 = vadd.f32 %v5238_v27, %v7340_v15  ;;  %v3397_v20 = vpop.f32.mrb[13].mxu0  ;;  %5272 = vmatprep.mubr.msk.bf16.mxu0 %vm3186_vm6, %v3076_v53 }
 0x1ce   : > { %4579 = vst.msk [vmem:[%s7397_s5 + $0x138] sm:$0xf] %vm4500_vm7, %v5101_v11  ;;  %v5102_v56 = vpack.c.bf16 %v3939_v35, %v3939_v35  ;;  %v2421_v41 = vpop.permute.xlu1 %2420  ;;  %v3398_v33 = vadd.f32 %v7340_v15, %v3397_v20  ;;  %v5239_v12 = vpop.f32.mrb[14].mxu0 }
 0x1cf   : > { %4577 = vst.msk [vmem:[%s7397_s5 + $0x130] sm:$0xf] %vm4500_vm7, %v5099_v49  ;;  %v5100_v5 = vpack.c.bf16 %v3937_v24, %v3937_v24  ;;  %v3874_v45 = vmax.f32 %v3406_v0, 0.0  ;;  %v3409_v16 = vadd.f32 %v5239_v12, %v7340_v15  ;;  %v3400_v17 = vpop.f32.mrb[15].mxu0  ;;  %v2627_v18 = vpop.permute.xlu0 %2626  ;;  %v2881_v36 = vsel %vm2704_vm3, %v6976_v61, %v2421_v41 }
 0x1d0   : > { %4580 = vst.msk [vmem:[%s7397_s5 + $0x13c] sm:$0xf] %vm4500_vm7, %v5102_v56  ;;  %v3872_v59 = vmax.f32 %v3398_v33, 0.0  ;;  %v3401_v43 = vadd.f32 %v7340_v15, %v3400_v17  ;;  %v3078_v29 = vsel %vm3026_vm5, %v2949_v32, %v2627_v18 }
 0x1d1   : > { %4578 = vst.msk [vmem:[%s7397_s5 + $0x134] sm:$0xf] %vm4500_vm7, %v5100_v5  ;;  %v5037_v28 = vpack.c.bf16 %v3874_v45, %v3874_v45  ;;  %v3875_v7 = vmax.f32 %v3409_v16, 0.0  ;;  %5273 = vmatmul.mubr.msk.bf16.gmra.mrb[48].mxu0 %vm3186_vm6, %v3078_v29 }
 0x1d2   : > { %v2423_v48 = vpop.permute.xlu1 %2422  ;;  %v5035_v34 = vpack.c.bf16 %v3872_v59, %v3872_v59  ;;  %v3873_v19 = vmax.f32 %v3401_v43, 0.0 }
 0x1d3   : > { %4515 = vst.msk [vmem:[%s7397_s5 + $0x38] sm:$0xf] %vm4500_vm7, %v5037_v28  ;;  %v5038_v13 = vpack.c.bf16 %v3875_v7, %v3875_v7  ;;  %v2357_v30 = vpop.permute.xlu0 %2356  ;;  %v2884_v21 = vsel %vm2704_vm3, %v6989_v6, %v2423_v48 }
 0x1d4   : > { %4513 = vst.msk [vmem:[%s7397_s5 + $0x30] sm:$0xf] %vm4500_vm7, %v5035_v34  ;;  %v5036_v52 = vpack.c.bf16 %v3873_v19, %v3873_v19  ;;  %v2785_v62 = vsel %vm2704_vm3, %v7022_v31, %v2357_v30 }
 0x1d5   : > { %4516 = vst.msk [vmem:[%s7397_s5 + $0x3c] sm:$0xf] %vm4500_vm7, %v5038_v13 }
 0x1d6   : > { %v2559_v44 = vpop.permute.xlu1 %2558  ;;  %4514 = vst.msk [vmem:[%s7397_s5 + $0x34] sm:$0xf] %vm4500_vm7, %v5036_v52 }
 0x1d7   : > { %v2359_v50 = vpop.permute.xlu0 %2358  ;;  %v3015_v42 = vsel %vm2897_vm4, %v2881_v36, %v2559_v44 }
 0x1d8   : > { %v2788_v33 = vsel %vm2704_vm3, %v7026_v2, %v2359_v50 }
 0x1da   : > { %v2561_v22 = vpop.permute.xlu1 %2560 }
 0x1db   : > { %v2495_v55 = vpop.permute.xlu0 %2494  ;;  %v3017_v61 = vsel %vm2897_vm4, %v2884_v21, %v2561_v22 }
 0x1dc   : > { %v2951_v6 = vsel %vm2897_vm4, %v2785_v62, %v2495_v55 }
 0x1de   : > { %v2693_v14 = vpop.permute.xlu1 %2692 }
 0x1df   : > { %v3144_v25 = vsel %vm3026_vm5, %v3015_v42, %v2693_v14  ;;  %v5306_v8 = vpop.f32.mrb[16].mxu1  ;;  %v2497_v60 = vpop.permute.xlu0 %2496 }
 0x1e0   : > { %v3678_v3 = vadd.f32 %v5306_v8, %v7340_v15  ;;  %v3669_v9 = vpop.f32.mrb[17].mxu1  ;;  %5340 = vmatprep.mubr.msk.bf16.mxu1 %vm3186_vm6, %v3144_v25  ;;  %v2953_v45 = vsel %vm2897_vm4, %v2788_v33, %v2497_v60 }
 0x1e1   : > { %v3670_v39 = vadd.f32 %v7340_v15, %v3669_v9  ;;  %v5307_v37 = vpop.f32.mrb[18].mxu1 }
 0x1e2   : > { %v3942_v54 = vmax.f32 %v3678_v3, 0.0  ;;  %v3681_v38 = vadd.f32 %v5307_v37, %v7340_v15  ;;  %v2695_v63 = vpop.permute.xlu1 %2694  ;;  %v3672_v47 = vpop.f32.mrb[19].mxu1 }
 0x1e3   : > { %v3940_v1 = vmax.f32 %v3670_v39, 0.0  ;;  %v3146_v11 = vsel %vm3026_vm5, %v3017_v61, %v2695_v63  ;;  %v3673_v35 = vadd.f32 %v7340_v15, %v3672_v47  ;;  %v2629_v53 = vpop.permute.xlu0 %2628 }
 0x1e4   : > { %v5105_v27 = vpack.c.bf16 %v3942_v54, %v3942_v54  ;;  %v3943_v49 = vmax.f32 %v3681_v38, 0.0  ;;  %5341 = vmatmul.mubr.msk.bf16.gmra.mrb[52].mxu1 %vm3186_vm6, %v3146_v11  ;;  %v3080_v24 = vsel %vm3026_vm5, %v2951_v6, %v2629_v53  ;;  %v5242_v0 = vpop.f32.mrb[16].mxu0 }
 0x1e5   : > { %v5103_v20 = vpack.c.bf16 %v3940_v1, %v3940_v1  ;;  %v3941_v56 = vmax.f32 %v3673_v35, 0.0  ;;  %v3422_v31 = vadd.f32 %v5242_v0, %v7340_v15  ;;  %v3413_v41 = vpop.f32.mrb[17].mxu0  ;;  %5276 = vmatprep.mubr.msk.bf16.mxu0 %vm3186_vm6, %v3080_v24 }
 0x1e6   : > { %4583 = vst.msk [vmem:[%s7397_s5 + $0x148] sm:$0xf] %vm4500_vm7, %v5105_v27  ;;  %v5106_v40 = vpack.c.bf16 %v3943_v49, %v3943_v49  ;;  %v2425_v4 = vpop.permute.xlu1 %2424  ;;  %v3414_v12 = vadd.f32 %v7340_v15, %v3413_v41  ;;  %v5243_v5 = vpop.f32.mrb[18].mxu0  ;;  %v8023_v41 = vld [vmem:[#allocation6_spill] sm:$0xff] }
 0x1e7   : > { %4581 = vst.msk [vmem:[%s7397_s5 + $0x140] sm:$0xf] %vm4500_vm7, %v5103_v20  ;;  %v5104_v32 = vpack.c.bf16 %v3941_v56, %v3941_v56  ;;  %v3878_v16 = vmax.f32 %v3422_v31, 0.0  ;;  %v3425_v17 = vadd.f32 %v5243_v5, %v7340_v15  ;;  %v3416_v18 = vpop.f32.mrb[19].mxu0  ;;  %v2631_v59 = vpop.permute.xlu0 %2630  ;;  %v2887_v36 = vsel %vm2704_vm3, %v7128_v10, %v2425_v4 }
 0x1e8   : > { %4584 = vst.msk [vmem:[%s7397_s5 + $0x14c] sm:$0xf] %vm4500_vm7, %v5106_v40  ;;  %v3876_v43 = vmax.f32 %v3414_v12, 0.0  ;;  %v3417_v2 = vadd.f32 %v7340_v15, %v3416_v18  ;;  %v3082_v29 = vsel %vm3026_vm5, %v2953_v45, %v2631_v59 }
 0x1e9   : > { %4582 = vst.msk [vmem:[%s7397_s5 + $0x144] sm:$0xf] %vm4500_vm7, %v5104_v32  ;;  %v5041_v28 = vpack.c.bf16 %v3878_v16, %v3878_v16  ;;  %v3879_v7 = vmax.f32 %v3425_v17, 0.0  ;;  %5277 = vmatmul.mubr.msk.bf16.gmra.mrb[52].mxu0 %vm3186_vm6, %v3082_v29 }
 0x1ea   : > { %v2427_v48 = vpop.permute.xlu1 %2426  ;;  %v5039_v34 = vpack.c.bf16 %v3876_v43, %v3876_v43  ;;  %v3877_v19 = vmax.f32 %v3417_v2, 0.0 }
 0x1eb   : > { %4519 = vst.msk [vmem:[%s7397_s5 + $0x48] sm:$0xf] %vm4500_vm7, %v5041_v28  ;;  %v5042_v13 = vpack.c.bf16 %v3879_v7, %v3879_v7  ;;  %v2361_v30 = vpop.permute.xlu0 %2360  ;;  %v2890_v21 = vsel %vm2704_vm3, %v7141_v26, %v2427_v48 }
 0x1ec   : > { %4517 = vst.msk [vmem:[%s7397_s5 + $0x40] sm:$0xf] %vm4500_vm7, %v5039_v34  ;;  %v5040_v52 = vpack.c.bf16 %v3877_v19, %v3877_v19  ;;  %v2791_v47 = vsel %vm2704_vm3, %v7175_v51, %v2361_v30 }
 0x1ed   : > { %4520 = vst.msk [vmem:[%s7397_s5 + $0x4c] sm:$0xf] %vm4500_vm7, %v5042_v13 }
 0x1ee   : > { %v2563_v44 = vpop.permute.xlu1 %2562  ;;  %4518 = vst.msk [vmem:[%s7397_s5 + $0x44] sm:$0xf] %vm4500_vm7, %v5040_v52 }
 0x1ef   : > { %v2363_v50 = vpop.permute.xlu0 %2362  ;;  %v3019_v42 = vsel %vm2897_vm4, %v2887_v36, %v2563_v44 }
 0x1f0   : > { %v2794_v40 = vsel %vm2704_vm3, %v8023_v41, %v2363_v50  ;;  %v7741_v41 = vld [vmem:[%s7980_s2] ss:$0 sm:$0xff] }
 0x1f2   : > { %v2565_v22 = vpop.permute.xlu1 %2564 }
 0x1f3   : > { %v2499_v55 = vpop.permute.xlu0 %2498  ;;  %v3021_v10 = vsel %vm2897_vm4, %v2890_v21, %v2565_v22 }
 0x1f4   : > { %v2955_v26 = vsel %vm2897_vm4, %v2791_v47, %v2499_v55 }
 0x1f6   : > { %v2697_v14 = vpop.permute.xlu1 %2696 }
 0x1f7   : > { %v3148_v25 = vsel %vm3026_vm5, %v3019_v42, %v2697_v14  ;;  %v5310_v8 = vpop.f32.mrb[20].mxu1  ;;  %v2501_v60 = vpop.permute.xlu0 %2500 }
 0x1f8   : > { %v3694_v3 = vadd.f32 %v5310_v8, %v7340_v15  ;;  %v3685_v9 = vpop.f32.mrb[21].mxu1  ;;  %5344 = vmatprep.mubr.msk.bf16.mxu1 %vm3186_vm6, %v3148_v25  ;;  %v2957_v5 = vsel %vm2897_vm4, %v2794_v40, %v2501_v60 }
 0x1f9   : > { %v3686_v39 = vadd.f32 %v7340_v15, %v3685_v9  ;;  %v5311_v37 = vpop.f32.mrb[22].mxu1 }
 0x1fa   : > { %v3946_v61 = vmax.f32 %v3694_v3, 0.0  ;;  %v3697_v54 = vadd.f32 %v5311_v37, %v7340_v15  ;;  %v2699_v38 = vpop.permute.xlu1 %2698  ;;  %v3688_v63 = vpop.f32.mrb[23].mxu1 }
 0x1fb   : > { %v3944_v62 = vmax.f32 %v3686_v39, 0.0  ;;  %v3150_v1 = vsel %vm3026_vm5, %v3021_v10, %v2699_v38  ;;  %v3689_v11 = vadd.f32 %v7340_v15, %v3688_v63  ;;  %v2633_v35 = vpop.permute.xlu0 %2632 }
 0x1fc   : > { %v5109_v6 = vpack.c.bf16 %v3946_v61, %v3946_v61  ;;  %v3947_v53 = vmax.f32 %v3697_v54, 0.0  ;;  %5345 = vmatmul.mubr.msk.bf16.gmra.mrb[56].mxu1 %vm3186_vm6, %v3150_v1  ;;  %v3084_v27 = vsel %vm3026_vm5, %v2955_v26, %v2633_v35  ;;  %v5246_v49 = vpop.f32.mrb[20].mxu0 }
 0x1fd   : > { %v5107_v24 = vpack.c.bf16 %v3944_v62, %v3944_v62  ;;  %v3945_v0 = vmax.f32 %v3689_v11, 0.0  ;;  %v3438_v51 = vadd.f32 %v5246_v49, %v7340_v15  ;;  %v3429_v20 = vpop.f32.mrb[21].mxu0  ;;  %5280 = vmatprep.mubr.msk.bf16.mxu0 %vm3186_vm6, %v3084_v27 }
 0x1fe   : > { %4587 = vst.msk [vmem:[%s7397_s5 + $0x158] sm:$0xf] %vm4500_vm7, %v5109_v6  ;;  %v5110_v56 = vpack.c.bf16 %v3947_v53, %v3947_v53  ;;  %v2429_v31 = vpop.permute.xlu1 %2428  ;;  %v3430_v4 = vadd.f32 %v7340_v15, %v3429_v20  ;;  %v5247_v33 = vpop.f32.mrb[22].mxu0 }
 0x1ff   : > { %4585 = vst.msk [vmem:[%s7397_s5 + $0x150] sm:$0xf] %vm4500_vm7, %v5107_v24  ;;  %v5108_v12 = vpack.c.bf16 %v3945_v0, %v3945_v0  ;;  %v3882_v32 = vmax.f32 %v3438_v51, 0.0  ;;  %v3441_v45 = vadd.f32 %v5247_v33, %v7340_v15  ;;  %v3432_v16 = vpop.f32.mrb[23].mxu0  ;;  %v2635_v17 = vpop.permute.xlu0 %2634  ;;  %v2893_v22 = vsel %vm2704_vm3, %v7291_v23, %v2429_v31 }
 0x200   : > { %4588 = vst.msk [vmem:[%s7397_s5 + $0x15c] sm:$0xf] %vm4500_vm7, %v5110_v56  ;;  %v3880_v18 = vmax.f32 %v3430_v4, 0.0  ;;  %v3433_v59 = vadd.f32 %v7340_v15, %v3432_v16  ;;  %v3086_v43 = vsel %vm3026_vm5, %v2957_v5, %v2635_v17 }
 0x201   : > { %4586 = vst.msk [vmem:[%s7397_s5 + $0x154] sm:$0xf] %vm4500_vm7, %v5108_v12  ;;  %v5045_v2 = vpack.c.bf16 %v3882_v32, %v3882_v32  ;;  %v3883_v29 = vmax.f32 %v3441_v45, 0.0  ;;  %5281 = vmatmul.mubr.msk.bf16.gmra.mrb[56].mxu0 %vm3186_vm6, %v3086_v43 }
 0x202   : > { %v2431_v28 = vpop.permute.xlu1 %2430  ;;  %v5043_v7 = vpack.c.bf16 %v3880_v18, %v3880_v18  ;;  %v3881_v48 = vmax.f32 %v3433_v59, 0.0 }
 0x203   : > { %4523 = vst.msk [vmem:[%s7397_s5 + $0x58] sm:$0xf] %vm4500_vm7, %v5045_v2  ;;  %v5046_v34 = vpack.c.bf16 %v3883_v29, %v3883_v29  ;;  %v2365_v19 = vpop.permute.xlu0 %2364  ;;  %v2896_v3 = vsel %vm2704_vm3, %v7305_v46, %v2431_v28 }
 0x204   : > { %4521 = vst.msk [vmem:[%s7397_s5 + $0x50] sm:$0xf] %vm4500_vm7, %v5043_v7  ;;  %v5044_v13 = vpack.c.bf16 %v3881_v48, %v3881_v48  ;;  %v2797_v54 = vsel %vm2704_vm3, %v7301_v57, %v2365_v19 }
 0x205   : > { %4524 = vst.msk [vmem:[%s7397_s5 + $0x5c] sm:$0xf] %vm4500_vm7, %v5046_v34 }
 0x206   : > { %v2567_v30 = vpop.permute.xlu1 %2566  ;;  %4522 = vst.msk [vmem:[%s7397_s5 + $0x54] sm:$0xf] %vm4500_vm7, %v5044_v13 }
 0x207   : > { %v2367_v52 = vpop.permute.xlu0 %2366  ;;  %v3023_v55 = vsel %vm2897_vm4, %v2893_v22, %v2567_v30 }
 0x208   : > { %v2800_v24 = vsel %vm2704_vm3, %v7350_v58, %v2367_v52 }
 0x20a   : > { %v2569_v44 = vpop.permute.xlu1 %2568 }
 0x20b   : > { %v2503_v50 = vpop.permute.xlu0 %2502  ;;  %v3025_v23 = vsel %vm2897_vm4, %v2896_v3, %v2569_v44 }
 0x20c   : > { %v2959_v46 = vsel %vm2897_vm4, %v2797_v54, %v2503_v50 }
 0x20e   : > { %v2701_v36 = vpop.permute.xlu1 %2700 }
 0x20f   : > { %v3152_v42 = vsel %vm3026_vm5, %v3023_v55, %v2701_v36  ;;  %v5314_v14 = vpop.f32.mrb[24].mxu1  ;;  %v2505_v25 = vpop.permute.xlu0 %2504 }
 0x210   : > { %v3710_v8 = vadd.f32 %v5314_v14, %v7340_v15  ;;  %v3701_v60 = vpop.f32.mrb[25].mxu1  ;;  %5348 = vmatprep.mubr.msk.bf16.mxu1 %vm3186_vm6, %v3152_v42  ;;  %v2961_v56 = vsel %vm2897_vm4, %v2800_v24, %v2505_v25 }
 0x211   : > { %v3702_v9 = vadd.f32 %v7340_v15, %v3701_v60  ;;  %v5315_v21 = vpop.f32.mrb[26].mxu1 }
 0x212   : > { %v3950_v39 = vmax.f32 %v3710_v8, 0.0  ;;  %v3713_v37 = vadd.f32 %v5315_v21, %v7340_v15  ;;  %v2703_v10 = vpop.permute.xlu1 %2702  ;;  %v3704_v61 = vpop.f32.mrb[27].mxu1 }
 0x213   : > { %v3948_v38 = vmax.f32 %v3702_v9, 0.0  ;;  %v3154_v63 = vsel %vm3026_vm5, %v3025_v23, %v2703_v10  ;;  %v3705_v47 = vadd.f32 %v7340_v15, %v3704_v61  ;;  %v2637_v62 = vpop.permute.xlu0 %2636 }
 0x214   : > { %v5113_v1 = vpack.c.bf16 %v3950_v39, %v3950_v39  ;;  %v3951_v11 = vmax.f32 %v3713_v37, 0.0  ;;  %5349 = vmatmul.mubr.msk.bf16.gmra.mrb[60].mxu1 %vm3186_vm6, %v3154_v63  ;;  %v3088_v26 = vsel %vm3026_vm5, %v2959_v46, %v2637_v62  ;;  %v5250_v35 = vpop.f32.mrb[24].mxu0 }
 0x215   : > { %v5111_v6 = vpack.c.bf16 %v3948_v38, %v3948_v38  ;;  %v3949_v53 = vmax.f32 %v3705_v47, 0.0  ;;  %v3454_v57 = vadd.f32 %v5250_v35, %v7340_v15  ;;  %v3445_v27 = vpop.f32.mrb[25].mxu0  ;;  %5284 = vmatprep.mubr.msk.bf16.mxu0 %vm3186_vm6, %v3088_v26 }
 0x216   : > { %4591 = vst.msk [vmem:[%s7397_s5 + $0x168] sm:$0xf] %vm4500_vm7, %v5113_v1  ;;  %v5114_v49 = vpack.c.bf16 %v3951_v11, %v3951_v11  ;;  %v3446_v0 = vadd.f32 %v7340_v15, %v3445_v27  ;;  %v5251_v51 = vpop.f32.mrb[26].mxu0 }
 0x217   : > { %4589 = vst.msk [vmem:[%s7397_s5 + $0x160] sm:$0xf] %vm4500_vm7, %v5111_v6  ;;  %v5112_v20 = vpack.c.bf16 %v3949_v53, %v3949_v53  ;;  %v3886_v31 = vmax.f32 %v3454_v57, 0.0  ;;  %v3457_v40 = vadd.f32 %v7741_v41, %v5251_v51  ;;  %v3448_v15 = vpop.f32.mrb[27].mxu0  ;;  %v2639_v58 = vpop.permute.xlu0 %2638 }
 0x218   : > { %4592 = vst.msk [vmem:[%s7397_s5 + $0x16c] sm:$0xf] %vm4500_vm7, %v5114_v49  ;;  %v3884_v4 = vmax.f32 %v3446_v0, 0.0  ;;  %v3449_v33 = vadd.f32 %v7741_v41, %v3448_v15  ;;  %v3090_v12 = vsel %vm3026_vm5, %v2961_v56, %v2639_v58 }
 0x219   : > { %4590 = vst.msk [vmem:[%s7397_s5 + $0x164] sm:$0xf] %vm4500_vm7, %v5112_v20  ;;  %v5049_v5 = vpack.c.bf16 %v3886_v31, %v3886_v31  ;;  %v3887_v32 = vmax.f32 %v3457_v40, 0.0  ;;  %5285 = vmatmul.mubr.msk.bf16.gmra.mrb[60].mxu0 %vm3186_vm6, %v3090_v12 }
 0x21a   : > { %v5047_v45 = vpack.c.bf16 %v3884_v4, %v3884_v4  ;;  %v3885_v16 = vmax.f32 %v3449_v33, 0.0 }
 0x21b   : > { %4527 = vst.msk [vmem:[%s7397_s5 + $0x68] sm:$0xf] %vm4500_vm7, %v5049_v5  ;;  %v5050_v17 = vpack.c.bf16 %v3887_v32, %v3887_v32 }
 0x21c   : > { %4525 = vst.msk [vmem:[%s7397_s5 + $0x60] sm:$0xf] %vm4500_vm7, %v5047_v45  ;;  %v5048_v18 = vpack.c.bf16 %v3885_v16, %v3885_v16 }
 0x21d   : > { %4528 = vst.msk [vmem:[%s7397_s5 + $0x6c] sm:$0xf] %vm4500_vm7, %v5050_v17 }
 0x21e   : > { %4526 = vst.msk [vmem:[%s7397_s5 + $0x64] sm:$0xf] %vm4500_vm7, %v5048_v18 }
 0x227   : > { %v5318_v59 = vpop.f32.mrb[28].mxu1 }
 0x228   : > { %v3726_v43 = vadd.f32 %v7741_v41, %v5318_v59  ;;  %v3717_v2 = vpop.f32.mrb[29].mxu1 }
 0x229   : > { %v3718_v29 = vadd.f32 %v7741_v41, %v3717_v2  ;;  %v5319_v28 = vpop.f32.mrb[30].mxu1 }
 0x22a   : > { %v3954_v7 = vmax.f32 %v3726_v43, 0.0  ;;  %v3729_v48 = vadd.f32 %v7741_v41, %v5319_v28  ;;  %v3720_v34 = vpop.f32.mrb[31].mxu1 }
 0x22b   : > { %v3952_v19 = vmax.f32 %v3718_v29, 0.0  ;;  %v3721_v13 = vadd.f32 %v7741_v41, %v3720_v34 }
 0x22c   : > { %v5117_v30 = vpack.c.bf16 %v3954_v7, %v3954_v7  ;;  %v3955_v52 = vmax.f32 %v3729_v48, 0.0  ;;  %v5254_v44 = vpop.f32.mrb[28].mxu0 }
 0x22d   : > { %v5115_v50 = vpack.c.bf16 %v3952_v19, %v3952_v19  ;;  %v3953_v22 = vmax.f32 %v3721_v13, 0.0  ;;  %v3470_v55 = vadd.f32 %v7741_v41, %v5254_v44  ;;  %v3461_v36 = vpop.f32.mrb[29].mxu0 }
 0x22e   : > { %4595 = vst.msk [vmem:[%s7397_s5 + $0x178] sm:$0xf] %vm4500_vm7, %v5117_v30  ;;  %v5118_v42 = vpack.c.bf16 %v3955_v52, %v3955_v52  ;;  %v3462_v14 = vadd.f32 %v7741_v41, %v3461_v36  ;;  %v5255_v25 = vpop.f32.mrb[30].mxu0 }
 0x22f   : > { %4593 = vst.msk [vmem:[%s7397_s5 + $0x170] sm:$0xf] %vm4500_vm7, %v5115_v50  ;;  %v5116_v8 = vpack.c.bf16 %v3953_v22, %v3953_v22  ;;  %v3890_v60 = vmax.f32 %v3470_v55, 0.0  ;;  %v3473_v3 = vadd.f32 %v7741_v41, %v5255_v25  ;;  %v3464_v9 = vpop.f32.mrb[31].mxu0 }
 0x230   : > { %4596 = vst.msk [vmem:[%s7397_s5 + $0x17c] sm:$0xf] %vm4500_vm7, %v5118_v42  ;;  %v3888_v21 = vmax.f32 %v3462_v14, 0.0  ;;  %v3465_v23 = vadd.f32 %v7741_v41, %v3464_v9 }
 0x231   : > { %4594 = vst.msk [vmem:[%s7397_s5 + $0x174] sm:$0xf] %vm4500_vm7, %v5116_v8  ;;  %v5053_v39 = vpack.c.bf16 %v3890_v60, %v3890_v60  ;;  %v3891_v37 = vmax.f32 %v3473_v3, 0.0 }
 0x232   : > { %v5051_v10 = vpack.c.bf16 %v3888_v21, %v3888_v21  ;;  %v3889_v61 = vmax.f32 %v3465_v23, 0.0 }
 0x233   : > { %4531 = vst.msk [vmem:[%s7397_s5 + $0x78] sm:$0xf] %vm4500_vm7, %v5053_v39  ;;  %v5054_v54 = vpack.c.bf16 %v3891_v37, %v3891_v37 }
 0x234   : > { %4529 = vst.msk [vmem:[%s7397_s5 + $0x70] sm:$0xf] %vm4500_vm7, %v5051_v10  ;;  %v5052_v38 = vpack.c.bf16 %v3889_v61, %v3889_v61 }
 0x235   : > { %4532 = vst.msk [vmem:[%s7397_s5 + $0x7c] sm:$0xf] %vm4500_vm7, %v5054_v54 }
 0x236   : > { %4530 = vst.msk [vmem:[%s7397_s5 + $0x74] sm:$0xf] %vm4500_vm7, %v5052_v38 }
 0x23f   : > { %v5322_v63 = vpop.f32.mrb[32].mxu1 }
 0x240   : > { %v3742_v47 = vadd.f32 %v7741_v41, %v5322_v63  ;;  %v3733_v46 = vpop.f32.mrb[33].mxu1 }
 0x241   : > { %v3734_v62 = vadd.f32 %v7741_v41, %v3733_v46  ;;  %v5323_v1 = vpop.f32.mrb[34].mxu1 }
 0x242   : > { %v3958_v11 = vmax.f32 %v3742_v47, 0.0  ;;  %v3745_v26 = vadd.f32 %v7741_v41, %v5323_v1  ;;  %v3736_v35 = vpop.f32.mrb[35].mxu1 }
 0x243   : > { %v3956_v6 = vmax.f32 %v3734_v62, 0.0  ;;  %v3737_v53 = vadd.f32 %v7741_v41, %v3736_v35 }
 0x244   : > { %v5121_v57 = vpack.c.bf16 %v3958_v11, %v3958_v11  ;;  %v3959_v27 = vmax.f32 %v3745_v26, 0.0  ;;  %v5258_v49 = vpop.f32.mrb[32].mxu0 }
 0x245   : > { %v5119_v24 = vpack.c.bf16 %v3956_v6, %v3956_v6  ;;  %v3957_v0 = vmax.f32 %v3737_v53, 0.0  ;;  %v3486_v51 = vadd.f32 %v7741_v41, %v5258_v49  ;;  %v3477_v20 = vpop.f32.mrb[33].mxu0 }
 0x246   : > { %4599 = vst.msk [vmem:[%s7397_s5 + $0x188] sm:$0xf] %vm4500_vm7, %v5121_v57  ;;  %v5122_v56 = vpack.c.bf16 %v3959_v27, %v3959_v27  ;;  %v3478_v31 = vadd.f32 %v7741_v41, %v3477_v20  ;;  %v5259_v40 = vpop.f32.mrb[34].mxu0 }
 0x247   : > { %4597 = vst.msk [vmem:[%s7397_s5 + $0x180] sm:$0xf] %vm4500_vm7, %v5119_v24  ;;  %v5120_v15 = vpack.c.bf16 %v3957_v0, %v3957_v0  ;;  %v3894_v58 = vmax.f32 %v3486_v51, 0.0  ;;  %v3489_v4 = vadd.f32 %v7741_v41, %v5259_v40  ;;  %v3480_v33 = vpop.f32.mrb[35].mxu0 }
 0x248   : > { %4600 = vst.msk [vmem:[%s7397_s5 + $0x18c] sm:$0xf] %vm4500_vm7, %v5122_v56  ;;  %v3892_v12 = vmax.f32 %v3478_v31, 0.0  ;;  %v3481_v5 = vadd.f32 %v7741_v41, %v3480_v33 }
 0x249   : > { %4598 = vst.msk [vmem:[%s7397_s5 + $0x184] sm:$0xf] %vm4500_vm7, %v5120_v15  ;;  %v5057_v32 = vpack.c.bf16 %v3894_v58, %v3894_v58  ;;  %v3895_v45 = vmax.f32 %v3489_v4, 0.0 }
 0x24a   : > { %v5055_v16 = vpack.c.bf16 %v3892_v12, %v3892_v12  ;;  %v3893_v17 = vmax.f32 %v3481_v5, 0.0 }
 0x24b   : > { %4535 = vst.msk [vmem:[%s7397_s5 + $0x88] sm:$0xf] %vm4500_vm7, %v5057_v32  ;;  %v5058_v18 = vpack.c.bf16 %v3895_v45, %v3895_v45 }
 0x24c   : > { %4533 = vst.msk [vmem:[%s7397_s5 + $0x80] sm:$0xf] %vm4500_vm7, %v5055_v16  ;;  %v5056_v59 = vpack.c.bf16 %v3893_v17, %v3893_v17 }
 0x24d   : > { %4536 = vst.msk [vmem:[%s7397_s5 + $0x8c] sm:$0xf] %vm4500_vm7, %v5058_v18 }
 0x24e   : > { %4534 = vst.msk [vmem:[%s7397_s5 + $0x84] sm:$0xf] %vm4500_vm7, %v5056_v59 }
 0x257   : > { %v5326_v43 = vpop.f32.mrb[36].mxu1 }
 0x258   : > { %v3758_v2 = vadd.f32 %v7741_v41, %v5326_v43  ;;  %v3749_v29 = vpop.f32.mrb[37].mxu1 }
 0x259   : > { %v3750_v28 = vadd.f32 %v7741_v41, %v3749_v29  ;;  %v5327_v7 = vpop.f32.mrb[38].mxu1 }
 0x25a   : > { %v3962_v48 = vmax.f32 %v3758_v2, 0.0  ;;  %v3761_v34 = vadd.f32 %v7741_v41, %v5327_v7  ;;  %v3752_v19 = vpop.f32.mrb[39].mxu1 }
 0x25b   : > { %v3960_v13 = vmax.f32 %v3750_v28, 0.0  ;;  %v3753_v30 = vadd.f32 %v7741_v41, %v3752_v19 }
 0x25c   : > { %v5125_v52 = vpack.c.bf16 %v3962_v48, %v3962_v48  ;;  %v3963_v44 = vmax.f32 %v3761_v34, 0.0  ;;  %v5262_v50 = vpop.f32.mrb[36].mxu0 }
 0x25d   : > { %v5123_v22 = vpack.c.bf16 %v3960_v13, %v3960_v13  ;;  %v3961_v55 = vmax.f32 %v3753_v30, 0.0  ;;  %v3502_v36 = vadd.f32 %v7741_v41, %v5262_v50  ;;  %v3493_v42 = vpop.f32.mrb[37].mxu0 }
 0x25e   : > { %4603 = vst.msk [vmem:[%s7397_s5 + $0x198] sm:$0xf] %vm4500_vm7, %v5125_v52  ;;  %v5126_v14 = vpack.c.bf16 %v3963_v44, %v3963_v44  ;;  %v3494_v25 = vadd.f32 %v7741_v41, %v3493_v42  ;;  %v5263_v8 = vpop.f32.mrb[38].mxu0 }
 0x25f   : > { %4601 = vst.msk [vmem:[%s7397_s5 + $0x190] sm:$0xf] %vm4500_vm7, %v5123_v22  ;;  %v5124_v60 = vpack.c.bf16 %v3961_v55, %v3961_v55  ;;  %v3898_v3 = vmax.f32 %v3502_v36, 0.0  ;;  %v3505_v9 = vadd.f32 %v7741_v41, %v5263_v8  ;;  %v3496_v21 = vpop.f32.mrb[39].mxu0 }
 0x260   : > { %4604 = vst.msk [vmem:[%s7397_s5 + $0x19c] sm:$0xf] %vm4500_vm7, %v5126_v14  ;;  %v3896_v23 = vmax.f32 %v3494_v25, 0.0  ;;  %v3497_v39 = vadd.f32 %v7741_v41, %v3496_v21 }
 0x261   : > { %4602 = vst.msk [vmem:[%s7397_s5 + $0x194] sm:$0xf] %vm4500_vm7, %v5124_v60  ;;  %v5061_v37 = vpack.c.bf16 %v3898_v3, %v3898_v3  ;;  %v3899_v10 = vmax.f32 %v3505_v9, 0.0 }
 0x262   : > { %v5059_v61 = vpack.c.bf16 %v3896_v23, %v3896_v23  ;;  %v3897_v54 = vmax.f32 %v3497_v39, 0.0 }
 0x263   : > { %4539 = vst.msk [vmem:[%s7397_s5 + $0x98] sm:$0xf] %vm4500_vm7, %v5061_v37  ;;  %v5062_v38 = vpack.c.bf16 %v3899_v10, %v3899_v10 }
 0x264   : > { %4537 = vst.msk [vmem:[%s7397_s5 + $0x90] sm:$0xf] %vm4500_vm7, %v5059_v61  ;;  %v5060_v63 = vpack.c.bf16 %v3897_v54, %v3897_v54 }
 0x265   : > { %4540 = vst.msk [vmem:[%s7397_s5 + $0x9c] sm:$0xf] %vm4500_vm7, %v5062_v38 }
 0x266   : > { %4538 = vst.msk [vmem:[%s7397_s5 + $0x94] sm:$0xf] %vm4500_vm7, %v5060_v63 }
 0x26f   : > { %v5330_v47 = vpop.f32.mrb[40].mxu1 }
 0x270   : > { %v3774_v46 = vadd.f32 %v7741_v41, %v5330_v47  ;;  %v3765_v62 = vpop.f32.mrb[41].mxu1 }
 0x271   : > { %v3766_v1 = vadd.f32 %v7741_v41, %v3765_v62  ;;  %v5331_v11 = vpop.f32.mrb[42].mxu1 }
 0x272   : > { %v3966_v26 = vmax.f32 %v3774_v46, 0.0  ;;  %v3777_v35 = vadd.f32 %v7741_v41, %v5331_v11  ;;  %v3768_v6 = vpop.f32.mrb[43].mxu1 }
 0x273   : > { %v3964_v53 = vmax.f32 %v3766_v1, 0.0  ;;  %v3769_v57 = vadd.f32 %v7741_v41, %v3768_v6 }
 0x274   : > { %v5129_v27 = vpack.c.bf16 %v3966_v26, %v3966_v26  ;;  %v3967_v49 = vmax.f32 %v3777_v35, 0.0  ;;  %v5266_v24 = vpop.f32.mrb[40].mxu0 }
 0x275   : > { %v5127_v0 = vpack.c.bf16 %v3964_v53, %v3964_v53  ;;  %v3965_v51 = vmax.f32 %v3769_v57, 0.0  ;;  %v3518_v20 = vadd.f32 %v7741_v41, %v5266_v24  ;;  %v3509_v56 = vpop.f32.mrb[41].mxu0 }
 0x276   : > { %4607 = vst.msk [vmem:[%s7397_s5 + $0x1a8] sm:$0xf] %vm4500_vm7, %v5129_v27  ;;  %v5130_v31 = vpack.c.bf16 %v3967_v49, %v3967_v49  ;;  %v3510_v40 = vadd.f32 %v7741_v41, %v3509_v56  ;;  %v5267_v15 = vpop.f32.mrb[42].mxu0 }
 0x277   : > { %4605 = vst.msk [vmem:[%s7397_s5 + $0x1a0] sm:$0xf] %vm4500_vm7, %v5127_v0  ;;  %v5128_v58 = vpack.c.bf16 %v3965_v51, %v3965_v51  ;;  %v3902_v4 = vmax.f32 %v3518_v20, 0.0  ;;  %v3521_v33 = vadd.f32 %v7741_v41, %v5267_v15  ;;  %v3512_v12 = vpop.f32.mrb[43].mxu0 }
 0x278   : > { %4608 = vst.msk [vmem:[%s7397_s5 + $0x1ac] sm:$0xf] %vm4500_vm7, %v5130_v31  ;;  %v3900_v5 = vmax.f32 %v3510_v40, 0.0  ;;  %v3513_v32 = vadd.f32 %v7741_v41, %v3512_v12 }
 0x279   : > { %4606 = vst.msk [vmem:[%s7397_s5 + $0x1a4] sm:$0xf] %vm4500_vm7, %v5128_v58  ;;  %v5065_v45 = vpack.c.bf16 %v3902_v4, %v3902_v4  ;;  %v3903_v16 = vmax.f32 %v3521_v33, 0.0 }
 0x27a   : > { %v5063_v17 = vpack.c.bf16 %v3900_v5, %v3900_v5  ;;  %v3901_v18 = vmax.f32 %v3513_v32, 0.0 }
 0x27b   : > { %4543 = vst.msk [vmem:[%s7397_s5 + $0xa8] sm:$0xf] %vm4500_vm7, %v5065_v45  ;;  %v5066_v59 = vpack.c.bf16 %v3903_v16, %v3903_v16 }
 0x27c   : > { %4541 = vst.msk [vmem:[%s7397_s5 + $0xa0] sm:$0xf] %vm4500_vm7, %v5063_v17  ;;  %v5064_v43 = vpack.c.bf16 %v3901_v18, %v3901_v18 }
 0x27d   : > { %4544 = vst.msk [vmem:[%s7397_s5 + $0xac] sm:$0xf] %vm4500_vm7, %v5066_v59 }
 0x27e   : > { %4542 = vst.msk [vmem:[%s7397_s5 + $0xa4] sm:$0xf] %vm4500_vm7, %v5064_v43 }
 0x287   : > { %v5334_v2 = vpop.f32.mrb[44].mxu1 }
 0x288   : > { %v3790_v29 = vadd.f32 %v7741_v41, %v5334_v2  ;;  %v3781_v28 = vpop.f32.mrb[45].mxu1 }
 0x289   : > { %v3782_v7 = vadd.f32 %v7741_v41, %v3781_v28  ;;  %v5335_v48 = vpop.f32.mrb[46].mxu1 }
 0x28a   : > { %v3970_v34 = vmax.f32 %v3790_v29, 0.0  ;;  %v3793_v19 = vadd.f32 %v7741_v41, %v5335_v48  ;;  %v3784_v13 = vpop.f32.mrb[47].mxu1 }
 0x28b   : > { %v3968_v30 = vmax.f32 %v3782_v7, 0.0  ;;  %v3785_v52 = vadd.f32 %v7741_v41, %v3784_v13 }
 0x28c   : > { %v5133_v44 = vpack.c.bf16 %v3970_v34, %v3970_v34  ;;  %v3971_v50 = vmax.f32 %v3793_v19, 0.0  ;;  %v5270_v22 = vpop.f32.mrb[44].mxu0 }
 0x28d   : > { %v5131_v55 = vpack.c.bf16 %v3968_v30, %v3968_v30  ;;  %v3969_v36 = vmax.f32 %v3785_v52, 0.0  ;;  %v3534_v42 = vadd.f32 %v7741_v41, %v5270_v22  ;;  %v3525_v14 = vpop.f32.mrb[45].mxu0 }
 0x28e   : > { %4611 = vst.msk [vmem:[%s7397_s5 + $0x1b8] sm:$0xf] %vm4500_vm7, %v5133_v44  ;;  %v5134_v25 = vpack.c.bf16 %v3971_v50, %v3971_v50  ;;  %v3526_v8 = vadd.f32 %v7741_v41, %v3525_v14  ;;  %v5271_v60 = vpop.f32.mrb[46].mxu0 }
 0x28f   : > { %4609 = vst.msk [vmem:[%s7397_s5 + $0x1b0] sm:$0xf] %vm4500_vm7, %v5131_v55  ;;  %v5132_v3 = vpack.c.bf16 %v3969_v36, %v3969_v36  ;;  %v3906_v9 = vmax.f32 %v3534_v42, 0.0  ;;  %v3537_v21 = vadd.f32 %v7741_v41, %v5271_v60  ;;  %v3528_v23 = vpop.f32.mrb[47].mxu0 }
 0x290   : > { %4612 = vst.msk [vmem:[%s7397_s5 + $0x1bc] sm:$0xf] %vm4500_vm7, %v5134_v25  ;;  %v3904_v39 = vmax.f32 %v3526_v8, 0.0  ;;  %v3529_v37 = vadd.f32 %v7741_v41, %v3528_v23 }
 0x291   : > { %4610 = vst.msk [vmem:[%s7397_s5 + $0x1b4] sm:$0xf] %vm4500_vm7, %v5132_v3  ;;  %v5069_v10 = vpack.c.bf16 %v3906_v9, %v3906_v9  ;;  %v3907_v61 = vmax.f32 %v3537_v21, 0.0 }
 0x292   : > { %v5067_v54 = vpack.c.bf16 %v3904_v39, %v3904_v39  ;;  %v3905_v38 = vmax.f32 %v3529_v37, 0.0 }
 0x293   : > { %4547 = vst.msk [vmem:[%s7397_s5 + $0xb8] sm:$0xf] %vm4500_vm7, %v5069_v10  ;;  %v5070_v63 = vpack.c.bf16 %v3907_v61, %v3907_v61 }
 0x294   : > { %4545 = vst.msk [vmem:[%s7397_s5 + $0xb0] sm:$0xf] %vm4500_vm7, %v5067_v54  ;;  %v5068_v47 = vpack.c.bf16 %v3905_v38, %v3905_v38 }
 0x295   : > { %4548 = vst.msk [vmem:[%s7397_s5 + $0xbc] sm:$0xf] %vm4500_vm7, %v5070_v63 }
 0x296   : > { %4546 = vst.msk [vmem:[%s7397_s5 + $0xb4] sm:$0xf] %vm4500_vm7, %v5068_v47 }
 0x29f   : > { %v5338_v46 = vpop.f32.mrb[48].mxu1 }
 0x2a0   : > { %v3806_v62 = vadd.f32 %v7741_v41, %v5338_v46  ;;  %v3797_v1 = vpop.f32.mrb[49].mxu1 }
 0x2a1   : > { %v3798_v11 = vadd.f32 %v7741_v41, %v3797_v1  ;;  %v5339_v26 = vpop.f32.mrb[50].mxu1 }
 0x2a2   : > { %v3974_v35 = vmax.f32 %v3806_v62, 0.0  ;;  %v3809_v6 = vadd.f32 %v7741_v41, %v5339_v26  ;;  %v3800_v53 = vpop.f32.mrb[51].mxu1 }
 0x2a3   : > { %v3972_v57 = vmax.f32 %v3798_v11, 0.0  ;;  %v3801_v27 = vadd.f32 %v7741_v41, %v3800_v53 }
 0x2a4   : > { %v5137_v49 = vpack.c.bf16 %v3974_v35, %v3974_v35  ;;  %v3975_v24 = vmax.f32 %v3809_v6, 0.0  ;;  %v5274_v0 = vpop.f32.mrb[48].mxu0 }
 0x2a5   : > { %v5135_v51 = vpack.c.bf16 %v3972_v57, %v3972_v57  ;;  %v3973_v20 = vmax.f32 %v3801_v27, 0.0  ;;  %v3550_v56 = vadd.f32 %v7741_v41, %v5274_v0  ;;  %v3541_v31 = vpop.f32.mrb[49].mxu0 }
 0x2a6   : > { %4615 = vst.msk [vmem:[%s7397_s5 + $0x1c8] sm:$0xf] %vm4500_vm7, %v5137_v49  ;;  %v5138_v40 = vpack.c.bf16 %v3975_v24, %v3975_v24  ;;  %v3542_v15 = vadd.f32 %v7741_v41, %v3541_v31  ;;  %v5275_v58 = vpop.f32.mrb[50].mxu0 }
 0x2a7   : > { %4613 = vst.msk [vmem:[%s7397_s5 + $0x1c0] sm:$0xf] %vm4500_vm7, %v5135_v51  ;;  %v5136_v4 = vpack.c.bf16 %v3973_v20, %v3973_v20  ;;  %v3910_v33 = vmax.f32 %v3550_v56, 0.0  ;;  %v3553_v12 = vadd.f32 %v7741_v41, %v5275_v58  ;;  %v3544_v5 = vpop.f32.mrb[51].mxu0 }
 0x2a8   : > { %4616 = vst.msk [vmem:[%s7397_s5 + $0x1cc] sm:$0xf] %vm4500_vm7, %v5138_v40  ;;  %v3908_v32 = vmax.f32 %v3542_v15, 0.0  ;;  %v3545_v45 = vadd.f32 %v7741_v41, %v3544_v5 }
 0x2a9   : > { %4614 = vst.msk [vmem:[%s7397_s5 + $0x1c4] sm:$0xf] %vm4500_vm7, %v5136_v4  ;;  %v5073_v16 = vpack.c.bf16 %v3910_v33, %v3910_v33  ;;  %v3911_v17 = vmax.f32 %v3553_v12, 0.0 }
 0x2aa   : > { %v5071_v18 = vpack.c.bf16 %v3908_v32, %v3908_v32  ;;  %v3909_v59 = vmax.f32 %v3545_v45, 0.0 }
 0x2ab   : > { %4551 = vst.msk [vmem:[%s7397_s5 + $0xc8] sm:$0xf] %vm4500_vm7, %v5073_v16  ;;  %v5074_v43 = vpack.c.bf16 %v3911_v17, %v3911_v17 }
 0x2ac   : > { %4549 = vst.msk [vmem:[%s7397_s5 + $0xc0] sm:$0xf] %vm4500_vm7, %v5071_v18  ;;  %v5072_v2 = vpack.c.bf16 %v3909_v59, %v3909_v59 }
 0x2ad   : > { %4552 = vst.msk [vmem:[%s7397_s5 + $0xcc] sm:$0xf] %vm4500_vm7, %v5074_v43 }
 0x2ae   : > { %4550 = vst.msk [vmem:[%s7397_s5 + $0xc4] sm:$0xf] %vm4500_vm7, %v5072_v2 }
 0x2b7   : > { %v5342_v29 = vpop.f32.mrb[52].mxu1 }
 0x2b8   : > { %v3822_v28 = vadd.f32 %v7741_v41, %v5342_v29  ;;  %v3813_v7 = vpop.f32.mrb[53].mxu1 }
 0x2b9   : > { %v3814_v48 = vadd.f32 %v7741_v41, %v3813_v7  ;;  %v5343_v34 = vpop.f32.mrb[54].mxu1 }
 0x2ba   : > { %v3978_v19 = vmax.f32 %v3822_v28, 0.0  ;;  %v3825_v13 = vadd.f32 %v7741_v41, %v5343_v34  ;;  %v3816_v30 = vpop.f32.mrb[55].mxu1 }
 0x2bb   : > { %v3976_v52 = vmax.f32 %v3814_v48, 0.0  ;;  %v3817_v44 = vadd.f32 %v7741_v41, %v3816_v30 }
 0x2bc   : > { %v5141_v50 = vpack.c.bf16 %v3978_v19, %v3978_v19  ;;  %v3979_v22 = vmax.f32 %v3825_v13, 0.0  ;;  %v5278_v55 = vpop.f32.mrb[52].mxu0 }
 0x2bd   : > { %v5139_v36 = vpack.c.bf16 %v3976_v52, %v3976_v52  ;;  %v3977_v42 = vmax.f32 %v3817_v44, 0.0  ;;  %v3566_v14 = vadd.f32 %v7741_v41, %v5278_v55  ;;  %v3557_v25 = vpop.f32.mrb[53].mxu0 }
 0x2be   : > { %4619 = vst.msk [vmem:[%s7397_s5 + $0x1d8] sm:$0xf] %vm4500_vm7, %v5141_v50  ;;  %v5142_v8 = vpack.c.bf16 %v3979_v22, %v3979_v22  ;;  %v3558_v60 = vadd.f32 %v7741_v41, %v3557_v25  ;;  %v5279_v3 = vpop.f32.mrb[54].mxu0 }
 0x2bf   : > { %4617 = vst.msk [vmem:[%s7397_s5 + $0x1d0] sm:$0xf] %vm4500_vm7, %v5139_v36  ;;  %v5140_v9 = vpack.c.bf16 %v3977_v42, %v3977_v42  ;;  %v3914_v21 = vmax.f32 %v3566_v14, 0.0  ;;  %v3569_v23 = vadd.f32 %v7741_v41, %v5279_v3  ;;  %v3560_v39 = vpop.f32.mrb[55].mxu0 }
 0x2c0   : > { %4620 = vst.msk [vmem:[%s7397_s5 + $0x1dc] sm:$0xf] %vm4500_vm7, %v5142_v8  ;;  %v3912_v37 = vmax.f32 %v3558_v60, 0.0  ;;  %v3561_v10 = vadd.f32 %v7741_v41, %v3560_v39 }
 0x2c1   : > { %4618 = vst.msk [vmem:[%s7397_s5 + $0x1d4] sm:$0xf] %vm4500_vm7, %v5140_v9  ;;  %v5077_v61 = vpack.c.bf16 %v3914_v21, %v3914_v21  ;;  %v3915_v54 = vmax.f32 %v3569_v23, 0.0 }
 0x2c2   : > { %v5075_v38 = vpack.c.bf16 %v3912_v37, %v3912_v37  ;;  %v3913_v63 = vmax.f32 %v3561_v10, 0.0 }
 0x2c3   : > { %4555 = vst.msk [vmem:[%s7397_s5 + $0xd8] sm:$0xf] %vm4500_vm7, %v5077_v61  ;;  %v5078_v47 = vpack.c.bf16 %v3915_v54, %v3915_v54 }
 0x2c4   : > { %4553 = vst.msk [vmem:[%s7397_s5 + $0xd0] sm:$0xf] %vm4500_vm7, %v5075_v38  ;;  %v5076_v46 = vpack.c.bf16 %v3913_v63, %v3913_v63 }
 0x2c5   : > { %4556 = vst.msk [vmem:[%s7397_s5 + $0xdc] sm:$0xf] %vm4500_vm7, %v5078_v47 }
 0x2c6   : > { %4554 = vst.msk [vmem:[%s7397_s5 + $0xd4] sm:$0xf] %vm4500_vm7, %v5076_v46 }
 0x2cf   : > { %v5346_v62 = vpop.f32.mrb[56].mxu1 }
 0x2d0   : > { %v3838_v1 = vadd.f32 %v7741_v41, %v5346_v62  ;;  %v3829_v11 = vpop.f32.mrb[57].mxu1 }
 0x2d1   : > { %v3830_v26 = vadd.f32 %v7741_v41, %v3829_v11  ;;  %v5347_v35 = vpop.f32.mrb[58].mxu1 }
 0x2d2   : > { %v3982_v6 = vmax.f32 %v3838_v1, 0.0  ;;  %v3841_v53 = vadd.f32 %v7741_v41, %v5347_v35  ;;  %v3832_v57 = vpop.f32.mrb[59].mxu1 }
 0x2d3   : > { %v3980_v27 = vmax.f32 %v3830_v26, 0.0  ;;  %v3833_v49 = vadd.f32 %v7741_v41, %v3832_v57 }
 0x2d4   : > { %v5145_v24 = vpack.c.bf16 %v3982_v6, %v3982_v6  ;;  %v3983_v0 = vmax.f32 %v3841_v53, 0.0  ;;  %v5282_v51 = vpop.f32.mrb[56].mxu0 }
 0x2d5   : > { %v5143_v20 = vpack.c.bf16 %v3980_v27, %v3980_v27  ;;  %v3981_v56 = vmax.f32 %v3833_v49, 0.0  ;;  %v3582_v31 = vadd.f32 %v7741_v41, %v5282_v51  ;;  %v3573_v40 = vpop.f32.mrb[57].mxu0 }
 0x2d6   : > { %4623 = vst.msk [vmem:[%s7397_s5 + $0x1e8] sm:$0xf] %vm4500_vm7, %v5145_v24  ;;  %v5146_v15 = vpack.c.bf16 %v3983_v0, %v3983_v0  ;;  %v3574_v58 = vadd.f32 %v7741_v41, %v3573_v40  ;;  %v5283_v4 = vpop.f32.mrb[58].mxu0 }
 0x2d7   : > { %4621 = vst.msk [vmem:[%s7397_s5 + $0x1e0] sm:$0xf] %vm4500_vm7, %v5143_v20  ;;  %v5144_v33 = vpack.c.bf16 %v3981_v56, %v3981_v56  ;;  %v3918_v12 = vmax.f32 %v3582_v31, 0.0  ;;  %v3585_v5 = vadd.f32 %v7741_v41, %v5283_v4  ;;  %v3576_v32 = vpop.f32.mrb[59].mxu0 }
 0x2d8   : > { %4624 = vst.msk [vmem:[%s7397_s5 + $0x1ec] sm:$0xf] %vm4500_vm7, %v5146_v15  ;;  %v3916_v45 = vmax.f32 %v3574_v58, 0.0  ;;  %v3577_v16 = vadd.f32 %v7741_v41, %v3576_v32 }
 0x2d9   : > { %4622 = vst.msk [vmem:[%s7397_s5 + $0x1e4] sm:$0xf] %vm4500_vm7, %v5144_v33  ;;  %v5081_v17 = vpack.c.bf16 %v3918_v12, %v3918_v12  ;;  %v3919_v18 = vmax.f32 %v3585_v5, 0.0 }
 0x2da   : > { %v5079_v59 = vpack.c.bf16 %v3916_v45, %v3916_v45  ;;  %v3917_v43 = vmax.f32 %v3577_v16, 0.0 }
 0x2db   : > { %4559 = vst.msk [vmem:[%s7397_s5 + $0xe8] sm:$0xf] %vm4500_vm7, %v5081_v17  ;;  %v5082_v2 = vpack.c.bf16 %v3919_v18, %v3919_v18 }
 0x2dc   : > { %4557 = vst.msk [vmem:[%s7397_s5 + $0xe0] sm:$0xf] %vm4500_vm7, %v5079_v59  ;;  %v5080_v29 = vpack.c.bf16 %v3917_v43, %v3917_v43 }
 0x2dd   : > { %4560 = vst.msk [vmem:[%s7397_s5 + $0xec] sm:$0xf] %vm4500_vm7, %v5082_v2 }
 0x2de   : > { %4558 = vst.msk [vmem:[%s7397_s5 + $0xe4] sm:$0xf] %vm4500_vm7, %v5080_v29 }
 0x2e7   : > { %v5350_v28 = vpop.f32.mrb[60].mxu1 }
 0x2e8   : > { %v3854_v7 = vadd.f32 %v7741_v41, %v5350_v28  ;;  %v3845_v48 = vpop.f32.mrb[61].mxu1 }
 0x2e9   : > { %v3846_v34 = vadd.f32 %v7741_v41, %v3845_v48  ;;  %v5351_v19 = vpop.f32.mrb[62].mxu1 }
 0x2ea   : > { %v3986_v13 = vmax.f32 %v3854_v7, 0.0  ;;  %v3857_v30 = vadd.f32 %v7741_v41, %v5351_v19  ;;  %v3848_v52 = vpop.f32.mrb[63].mxu1 }
 0x2eb   : > { %v3984_v44 = vmax.f32 %v3846_v34, 0.0  ;;  %v3849_v50 = vadd.f32 %v7741_v41, %v3848_v52 }
 0x2ec   : > { %v5149_v22 = vpack.c.bf16 %v3986_v13, %v3986_v13  ;;  %v3987_v55 = vmax.f32 %v3857_v30, 0.0  ;;  %v5286_v36 = vpop.f32.mrb[60].mxu0 }
 0x2ed   : > { %v5147_v42 = vpack.c.bf16 %v3984_v44, %v3984_v44  ;;  %v3985_v14 = vmax.f32 %v3849_v50, 0.0  ;;  %v3598_v25 = vadd.f32 %v7741_v41, %v5286_v36  ;;  %v3589_v8 = vpop.f32.mrb[61].mxu0 }
 0x2ee   : > { %4627 = vst.msk [vmem:[%s7397_s5 + $0x1f8] sm:$0xf] %vm4500_vm7, %v5149_v22  ;;  %v5150_v60 = vpack.c.bf16 %v3987_v55, %v3987_v55  ;;  %v3590_v3 = vadd.f32 %v7741_v41, %v3589_v8  ;;  %v5287_v9 = vpop.f32.mrb[62].mxu0 }
 0x2ef   : > { %4625 = vst.msk [vmem:[%s7397_s5 + $0x1f0] sm:$0xf] %vm4500_vm7, %v5147_v42  ;;  %v5148_v21 = vpack.c.bf16 %v3985_v14, %v3985_v14  ;;  %v3922_v23 = vmax.f32 %v3598_v25, 0.0  ;;  %v3601_v39 = vadd.f32 %v7741_v41, %v5287_v9  ;;  %v3592_v37 = vpop.f32.mrb[63].mxu0 }
 0x2f0   : > { %4628 = vst.msk [vmem:[%s7397_s5 + $0x1fc] sm:$0xf] %vm4500_vm7, %v5150_v60  ;;  %v3920_v10 = vmax.f32 %v3590_v3, 0.0  ;;  %v3593_v61 = vadd.f32 %v7741_v41, %v3592_v37 }
 0x2f1   : > { %4626 = vst.msk [vmem:[%s7397_s5 + $0x1f4] sm:$0xf] %vm4500_vm7, %v5148_v21  ;;  %v5085_v54 = vpack.c.bf16 %v3922_v23, %v3922_v23  ;;  %v3923_v38 = vmax.f32 %v3601_v39, 0.0 }
 0x2f2   : > { %v5083_v63 = vpack.c.bf16 %v3920_v10, %v3920_v10  ;;  %v3921_v47 = vmax.f32 %v3593_v61, 0.0 }
 0x2f3   : > { %4563 = vst.msk [vmem:[%s7397_s5 + $0xf8] sm:$0xf] %vm4500_vm7, %v5085_v54  ;;  %v5086_v46 = vpack.c.bf16 %v3923_v38, %v3923_v38 }
 0x2f4   : > { %4561 = vst.msk [vmem:[%s7397_s5 + $0xf0] sm:$0xf] %vm4500_vm7, %v5083_v63  ;;  %v5084_v62 = vpack.c.bf16 %v3921_v47, %v3921_v47 }
 0x2f5   : > { %4564 = vst.msk [vmem:[%s7397_s5 + $0xfc] sm:$0xf] %vm4500_vm7, %v5086_v46 }
 0x2f6   : > { %4562 = vst.msk [vmem:[%s7397_s5 + $0xf4] sm:$0xf] %vm4500_vm7, %v5084_v62 }
 0x2f7 PF: > { %s13_s12 = sadd.s32 1, %s5452_s12  }
 0x2f8   : > { %p10_p4 = scmp.ge.s32.totalorder %s13_s12, 4  }
 0x2fa   :  { %12 = sbr.rel (!%p10_p4) target bundleno = 1 (0x1), region = 62 }

// kernel: qnetwork_forward.4
= control target key start
LH: loop header
LB: loop body
LE: loop exit
PB: predicated region body
PF: predicated region fallthrough
CT: control target
= control target key end

     0   :  { %s6738_s25 = smov 0   ;;  %s9648_s0 = inlined_call_operand.vmem [shape: bf16[2,17,17,32], index: 0, kind: input, shape index: {}]   ;;  %s9649_s1 = inlined_call_operand.vmem [shape: bf16[128,16], index: 1, kind: input, shape index: {}]   ;;  %s9650_s2 = inlined_call_operand.vmem [shape: f32[1,16], index: 2, kind: input, shape index: {}]   ;;  %s9651_s3 = inlined_call_operand.vmem [shape: bf16[144,16], index: 3, kind: input, shape index: {}]   ;;  %s9652_s4 = inlined_call_operand.vmem [shape: f32[1,16], index: 4, kind: input, shape index: {}]   ;;  %s9653_s5 = inlined_call_operand.vmem [shape: bf16[144,4], index: 5, kind: input, shape index: {}]   ;;  %s9654_s6 = inlined_call_operand.vmem [shape: f32[1,4], index: 6, kind: input, shape index: {}]   ;;  %s9655_s7 = inlined_call_operand.vmem [shape: bf16[4,16], index: 7, kind: input, shape index: {}]   ;;  %s9656_s8 = inlined_call_operand.vmem [shape: f32[1,16], index: 8, kind: input, shape index: {}]   ;;  %s9657_s9 = inlined_call_operand.vmem [shape: bf16[144,4], index: 9, kind: input, shape index: {}]   ;;  %s9658_s10 = inlined_call_operand.vmem [shape: f32[1,4], index: 10, kind: input, shape index: {}]   ;;  %s9659_s11 = inlined_call_operand.vmem [shape: bf16[4,16], index: 11, kind: input, shape index: {}]   ;;  %s9660_s12 = inlined_call_operand.vmem [shape: f32[1,16], index: 12, kind: input, shape index: {}]   ;;  %s9661_s13 = inlined_call_operand.vmem [shape: bf16[2,16,16,16], index: 13, kind: output, shape index: {}]  }
   0x1 LB: > { %s6160_s26 = sadd.s32 4294967295, %s6658_s25   ;;  %p6164_p0 = scmp.ge.s32.totalorder %s6658_s25, 1  ;;  %s6658_s25 = sphi %s6738_s25, %s23_s25  }
   0x2   : > { %p387_p1 = scmp.lt.s32.totalorder %s6658_s25, 3 }
   0x4   : > { %p388_p2 = pnand %p6164_p0, %p387_p1 }
   0x6   : > { %391 = sbr.rel (%p388_p2) target bundleno = 2216 (0x8a8), region = 72 }
   0xd   : > { %p431_p3 = scmp.lt.s32.totalorder %s6160_s26, 1  ;;  %v6611_v0 = vld [vmem:[%s9649_s1] sm:$0xff]   ;;  %v6612_v1 = vld [vmem:[%s9649_s1 + $0x8] sm:$0xff]   ;;  %vm493_vm0 = vsmask.f32 3328  ;;  %v6613_v2 = vld [vmem:[%s9649_s1 + $0x10] sm:$0xff]  }
   0xe   : > { %6448 = vmatprep.subr.bf16.mxu0 %v6611_v0  ;;  %6564 = vmatprep.subr.bf16.mxu1 %v6611_v0  ;;  %vm494_vm1 = vsmask.f32 7440  ;;  %v6614_v11 = vld [vmem:[%s9649_s1 + $0x18] sm:$0xff]   ;;  %s6660_s22 = smov 64   ;;  %v6615_v41 = vld [vmem:[%s9649_s1 + $0x20] sm:$0xff]   ;;  %v6618_v61 = vld [vmem:[%s9649_s1 + $0x28] sm:$0xff]  }
   0xf   : > { %s9724_s26 = smov (!%p431_p3, %s6160_s26), 1  ;;  %6449 = vmatpush3.bf16.msra.mxu0 %v6611_v0  ;;  %6572 = vmatpush3.bf16.msra.mxu1 %v6611_v0  ;;  %vm6802_vm2 = vmor %vm493_vm0, %vm494_vm1  ;;  %s6662_s15 = smov 32   ;;  %vm1136_vm3 = vcmask 261120   ;;  %vm1185_vm4 = vcmask 523264   ;;  %vm1218_vm5 = vcmask 785408   ;;  %vm1700_vm6 = vcmask 1040384  }
  0x10   : > { %s6582_s14 = smul.u32 204, %s9724_s26  ;;  %6450 = vmatprep.subr.bf16.mxu0 %v6612_v1  ;;  %6565 = vmatprep.subr.bf16.mxu1 %v6612_v1  ;;  %vm1701_vm7 = vsmask.f32 256  ;;  %vm1962_vm9 = vcmask 1046528   ;;  %vm1737_vm10 = vsmask.f32 7424 }
  0x11   : > { %vm7178_vm8 = vmand %vm1700_vm6, %vm1701_vm7  ;;  %vm2252_vm11 = vcmask 130048   ;;  %s6665_s21 = smov 48   ;;  %s6666_s16 = smov 80   ;;  %vm2317_vm12 = vcmask 392192   ;;  %vm2382_vm13 = vcmask 654336   ;;  %vm2447_vm14 = vcmask 916480  }
  0x12   : > { %s6758_s17 = scalar_lea.vmem %s9648_s0, %s6582_s14  ;;  %s6661_s14 = smov 96   ;;  %vm4120_vm15 = vcmask 1041408   ;;  %vm4071_vm0 = vcmask 31744   ;;  %vm6072_vm1 = vcmask 125952  }
  0x13   : > { %v445_v3 = vld [vmem:[%s6758_s17 + $0xc] sm:$0xf]  ;;  %v446_v4 = vld [vmem:[%s6758_s17 + $0x10] sm:$0xf]  ;;  %v448_v5 = vld [vmem:[%s6758_s17 + $0x18] sm:$0xf]  ;;  %6451 = vmatpush3.bf16.msra.mxu0 %v6612_v1  ;;  %6573 = vmatpush3.bf16.msra.mxu1 %v6612_v1 }
  0x14   : > { %v530_v6 = vshll.u32 %v446_v4, 16  ;;  %v534_v7 = vshrl.u32 %v446_v4, 16  ;;  %v6766_v8 = vcombine.low %v445_v3, %v446_v4  ;;  %v521_v9 = vshrl.u32 %v445_v3, 16  ;;  %v449_v10 = vld [vmem:[%s6758_s17 + $0x1c] sm:$0xf]  ;;  %6452 = vmatprep.subr.bf16.mxu0 %v6613_v2  ;;  %6566 = vmatprep.subr.bf16.mxu1 %v6613_v2  ;;  %s6667_s20 = smov 112  }
  0x15   : > { %v524_v12 = vshll.u32 %v445_v3, 16  ;;  %v545_v13 = vshrl.u32 %v448_v5, 16  ;;  %v548_v14 = vshll.u32 %v448_v5, 16  ;;  %v554_v15 = vshll.u32 %v449_v10, 16  ;;  %v6773_v16 = vld [vmem:[%s6758_s17] sm:$0xf] }
  0x16   : > { %v6775_v17 = vrot.slane %v530_v6, 5  ;;  %v536_v18 = vrot.slane %v534_v7, 4  ;;  %1069 = vrot.lane.b32.xlu1 %v6766_v8, %s6660_s22  ;;  %v523_v19 = vrot.slane %v521_v9, 4  ;;  %v558_v20 = vshrl.u32 %v449_v10, 16  ;;  %v6780_v21 = vld [vmem:[%s6758_s17 + $0x4] sm:$0xf] }
  0x17   : > { %v526_v22 = vrot.slane %v524_v12, 5  ;;  %v547_v23 = vrot.slane %v545_v13, 4  ;;  %v550_v24 = vrot.slane %v548_v14, 5  ;;  %v556_v25 = vrot.slane %v554_v15, 5  ;;  %v444_v26 = vld [vmem:[%s6758_s17 + $0x8] sm:$0x1]  ;;  %6453 = vmatpush3.bf16.msra.mxu0 %v6613_v2  ;;  %6574 = vmatpush3.bf16.msra.mxu1 %v6613_v2 }
  0x18   : > { %v537_v27 = vor.u32 %v536_v18, %v6775_v17  ;;  %v560_v28 = vrot.slane %v558_v20, 4  ;;  %v6784_v29 = vcombine.low %v448_v5, %v449_v10  ;;  %v497_v30 = vshrl.u32 %v6773_v16, 16  ;;  %v450_v35 = vld [vmem:[%s6758_s17 + $0x20] sm:$0x1]  ;;  %v447_v40 = vld [vmem:[%s6758_s17 + $0x14] sm:$0x1]  ;;  %6454 = vmatprep.subr.bf16.mxu0 %v6614_v11  ;;  %6567 = vmatprep.subr.bf16.mxu1 %v6614_v11 }
  0x19   : > { %v527_v31 = vor.u32 %v526_v22, %v523_v19  ;;  %v500_v32 = vshll.u32 %v6773_v16, 16  ;;  %v506_v33 = vshll.u32 %v6780_v21, 16  ;;  %v510_v34 = vshrl.u32 %v6780_v21, 16  ;;  %v454_v46 = vld [vmem:[%s6758_s17 + $0x30] sm:$0xf] }
  0x1a   : > { %v6791_v36 = vrot.slane %v537_v27, 4  ;;  %1071 = vrot.lane.b32.xlu1 %v6784_v29, %s6660_s22  ;;  %v499_v37 = vrot.slane %v497_v30, 4  ;;  %v516_v38 = vshll.u32 %v444_v26, 16  ;;  %v551_v39 = vor.u32 %v550_v24, %v547_v23  ;;  %v455_v56 = vld [vmem:[%s6758_s17 + $0x34] sm:$0xf] }
  0x1b   : > { %v528_v42 = vrot.slane %v527_v31, 4  ;;  %v502_v43 = vrot.slane %v500_v32, 5  ;;  %v508_v44 = vrot.slane %v506_v33, 5  ;;  %v512_v45 = vrot.slane %v510_v34, 4  ;;  %6455 = vmatpush3.bf16.msra.mxu0 %v6614_v11  ;;  %6575 = vmatpush3.bf16.msra.mxu1 %v6614_v11  ;;  %v451_v6 = vld [vmem:[%s6758_s17 + $0x24] sm:$0xf] }
  0x1c   : > { %v518_v48 = vrot.slane %v516_v38, 5  ;;  %v552_v49 = vrot.slane %v551_v39, 4  ;;  %v561_v50 = vor.u32 %v560_v28, %v556_v25  ;;  %v564_v51 = vshll.u32 %v450_v35, 16  ;;  %6456 = vmatprep.subr.bf16.mxu0 %v6615_v41  ;;  %6568 = vmatprep.subr.bf16.mxu1 %v6615_v41  ;;  %v452_v12 = vld [vmem:[%s6758_s17 + $0x28] sm:$0xf]  ;;  %v6620_v18 = vld [vmem:[%s9649_s1 + $0x30] sm:$0xff]  }
  0x1d   : > { %v503_v52 = vor.u32 %v502_v43, %v499_v37  ;;  %v513_v53 = vor.u32 %v512_v45, %v508_v44  ;;  %v533_v54 = vsel %vm6802_vm2, %v528_v42, %v6775_v17  ;;  %v540_v55 = vshll.u32 %v447_v40, 16  ;;  %v453_v13 = vld [vmem:[%s6758_s17 + $0x2c] sm:$0x1]  ;;  %v456_v24 = vld [vmem:[%s6758_s17 + $0x38] sm:$0x1] }
  0x1e   : > { %v557_v57 = vsel %vm6802_vm2, %v552_v49, %v556_v25  ;;  %v562_v58 = vrot.slane %v561_v50, 4  ;;  %v566_v59 = vrot.slane %v564_v51, 5  ;;  %v593_v60 = vshrl.u32 %v454_v46, 16  ;;  %v6841_v30 = vld [vmem:[%s6758_s17 + $0x3c] sm:$0xf] }
  0x1f   : > { %v504_v62 = vrot.slane %v503_v52, 4  ;;  %v514_v63 = vrot.slane %v513_v53, 4  ;;  %v542_v0 = vrot.slane %v540_v55, 5  ;;  %v596_v1 = vshll.u32 %v454_v46, 16  ;;  %6457 = vmatpush3.bf16.msra.mxu0 %v6615_v41  ;;  %6576 = vmatpush3.bf16.msra.mxu1 %v6615_v41  ;;  %v6845_v35 = vld [vmem:[%s6758_s17 + $0x40] sm:$0xf] }
  0x20   : > { %v567_v2 = vsel %vm6802_vm2, %v562_v58, %v566_v59  ;;  %v595_v3 = vrot.slane %v593_v60, 4  ;;  %v602_v4 = vshll.u32 %v455_v56, 16  ;;  %v606_v5 = vshrl.u32 %v455_v56, 16  ;;  %6458 = vmatprep.subr.bf16.mxu0 %v6618_v61  ;;  %6569 = vmatprep.subr.bf16.mxu1 %v6618_v61  ;;  %v6621_v40 = vld [vmem:[%s9649_s1 + $0x38] sm:$0xff]   ;;  %v460_v55 = vld [vmem:[%s6758_s17 + $0x48] sm:$0xf] }
  0x21   : > { %v509_v7 = vsel %vm6802_vm2, %v504_v62, %v508_v44  ;;  %v519_v9 = vsel %vm6802_vm2, %v514_v63, %v518_v48  ;;  %v6822_v10 = vcombine.low %v557_v57, %v567_v2  ;;  %v543_v11 = vsel %vm6802_vm2, %v6791_v36, %v542_v0  ;;  %v459_v48 = vld [vmem:[%s6758_s17 + $0x44] sm:$0x1]  ;;  %v461_v60 = vld [vmem:[%s6758_s17 + $0x4c] sm:$0xf] }
  0x22   : > { %v6184_v14 = vcombine.low %v509_v7, %v519_v9  ;;  %v598_v15 = vrot.slane %v596_v1, 5  ;;  %v6829_v17 = vrot.slane %v602_v4, 5  ;;  %v608_v19 = vrot.slane %v606_v5, 4  ;;  %v462_v5 = vld [vmem:[%s6758_s17 + $0x50] sm:$0x1] }
  0x23   : > { %1106 = vrot.lane.b32.xlu1 %v6822_v10, %s6661_s14  ;;  %v6836_v20 = vcombine.low %v454_v46, %v455_v56  ;;  %v569_v22 = vshrl.u32 %v451_v6, 16  ;;  %v572_v23 = vshll.u32 %v451_v6, 16  ;;  %v6185_v25 = vcombine.low %v533_v54, %v543_v11  ;;  %6459 = vmatpush3.bf16.msra.mxu0 %v6618_v61 }
  0x24   : > { %1032 = vrot.lane.b32.xlu0 %v6184_v14, %s6662_s15  ;;  %v578_v26 = vshll.u32 %v452_v12, 16  ;;  %v582_v27 = vshrl.u32 %v452_v12, 16  ;;  %v588_v28 = vshll.u32 %v453_v13, 16  ;;  %v599_v33 = vor.u32 %v598_v15, %v595_v3  ;;  %6460 = vmatprep.subr.bf16.mxu0 %v6620_v18 }
  0x25   : > { %v571_v31 = vrot.slane %v569_v22, 4  ;;  %v574_v32 = vrot.slane %v572_v23, 5  ;;  %v609_v34 = vor.u32 %v608_v19, %v6829_v17  ;;  %v612_v39 = vshll.u32 %v456_v24, 16  ;;  %6577 = vmatpush3.bf16.msra.mxu1 %v6618_v61  ;;  %v6880_v24 = vld [vmem:[%s6758_s17 + $0x58] sm:$0xf] }
  0x26   : > { %v580_v36 = vrot.slane %v578_v26, 5  ;;  %v584_v37 = vrot.slane %v582_v27, 4  ;;  %v590_v38 = vrot.slane %v588_v28, 5  ;;  %v600_v42 = vrot.slane %v599_v33, 4  ;;  %6570 = vmatprep.subr.bf16.mxu1 %v6620_v18 }
  0x27   : > { %1075 = vrot.lane.b32.xlu1 %v6836_v20, %s6660_s22  ;;  %v575_v41 = vor.u32 %v574_v32, %v571_v31  ;;  %v610_v43 = vrot.slane %v609_v34, 4  ;;  %v617_v44 = vshrl.u32 %v6841_v30, 16  ;;  %v614_v46 = vrot.slane %v612_v39, 5  ;;  %6461 = vmatpush3.bf16.msra.mxu0 %v6620_v18  ;;  %v465_v31 = vld [vmem:[%s6758_s17 + $0x5c] sm:$0x1] }
  0x28   : > { %1034 = vrot.lane.b32.xlu0 %v6185_v25, %s6662_s15  ;;  %v585_v45 = vor.u32 %v584_v37, %v580_v36  ;;  %v620_v49 = vshll.u32 %v6841_v30, 16  ;;  %v626_v50 = vshll.u32 %v6845_v35, 16  ;;  %v6857_v52 = vcombine.low %v451_v6, %v452_v12  ;;  %6462 = vmatprep.subr.bf16.mxu0 %v6621_v40  ;;  %v6892_v34 = vld [vmem:[%s6758_s17 + $0x60] sm:$0xf] }
  0x29   : > { %v576_v51 = vrot.slane %v575_v41, 4  ;;  %v619_v53 = vrot.slane %v617_v44, 4  ;;  %v630_v54 = vshrl.u32 %v6845_v35, 16  ;;  %v605_v57 = vsel %vm6802_vm2, %v600_v42, %v6829_v17  ;;  %6578 = vmatpush3.bf16.msra.mxu1 %v6620_v18  ;;  %v6874_v17 = vld [vmem:[%s6758_s17 + $0x54] sm:$0xf] }
  0x2a   : > { %v586_v56 = vrot.slane %v585_v45, 4  ;;  %v622_v58 = vrot.slane %v620_v49, 5  ;;  %v628_v59 = vrot.slane %v626_v50, 5  ;;  %v615_v62 = vsel %vm6802_vm2, %v610_v43, %v614_v46  ;;  %6571 = vmatprep.subr.bf16.mxu1 %v6621_v40  ;;  %v468_v45 = vld [vmem:[%s6758_s17 + $0x68] sm:$0x1] }
  0x2b   : > { %v581_v61 = vsel %vm6802_vm2, %v576_v51, %v580_v36  ;;  %v632_v63 = vrot.slane %v630_v54, 4  ;;  %v636_v0 = vshll.u32 %v459_v48, 16  ;;  %v641_v3 = vshrl.u32 %v460_v55, 16  ;;  %6463 = vmatpush3.bf16.msra.mxu0 %v6621_v40 }
  0x2c   : > { %1104 = vrot.lane.b32.xlu0 %v6185_v25, %s6661_s14  ;;  %v591_v1 = vsel %vm6802_vm2, %v586_v56, %v590_v38  ;;  %v623_v2 = vor.u32 %v622_v58, %v619_v53  ;;  %v644_v4 = vshll.u32 %v460_v55, 16  ;;  %v650_v11 = vshll.u32 %v461_v60, 16 }
  0x2d   : > { %v6187_v6 = vcombine.low %v581_v61, %v591_v1  ;;  %v633_v7 = vor.u32 %v632_v63, %v628_v59  ;;  %v638_v9 = vrot.slane %v636_v0, 5  ;;  %v643_v13 = vrot.slane %v641_v3, 4  ;;  %6579 = vmatpush3.bf16.msra.mxu1 %v6621_v40  ;;  %v6896_v40 = vld [vmem:[%s6758_s17 + $0x64] sm:$0xf] }
  0x2e   : > { %v624_v12 = vrot.slane %v623_v2, 4  ;;  %v646_v14 = vrot.slane %v644_v4, 5  ;;  %v654_v15 = vshrl.u32 %v461_v60, 16  ;;  %v6877_v18 = vcombine.low %v605_v57, %v615_v62  ;;  %v6911_v57 = vld [vmem:[%s6758_s17 + $0x6c] sm:$0xf] }
  0x2f   : > { %1038 = vrot.lane.b32.xlu1 %v6187_v6, %s6662_s15  ;;  %v634_v19 = vrot.slane %v633_v7, 4  ;;  %v652_v22 = vrot.slane %v650_v11, 5  ;;  %v660_v23 = vshll.u32 %v462_v5, 16  ;;  %v665_v32 = vshrl.u32 %v6874_v17, 16  ;;  %v6918_v62 = vld [vmem:[%s6758_s17 + $0x70] sm:$0xf] }
  0x30   : > { %1073 = vrot.lane.b32.xlu0 %v6857_v52, %s6660_s22  ;;  %v629_v25 = vsel %vm6802_vm2, %v624_v12, %v628_v59  ;;  %v656_v26 = vrot.slane %v654_v15, 4  ;;  %v647_v27 = vor.u32 %v646_v14, %v643_v13  ;;  %v668_v33 = vshll.u32 %v6874_v17, 16  ;;  %v471_v5 = vld [vmem:[%s6758_s17 + $0x74] sm:$0x1]  ;;  %v6931_v12 = vld [vmem:[%s6758_s17 + $0x78] sm:$0xf] }
  0x31   : > { %v639_v28 = vsel %vm6802_vm2, %v634_v19, %v638_v9  ;;  %v662_v38 = vrot.slane %v660_v23, 5  ;;  %v674_v39 = vshll.u32 %v6880_v24, 16  ;;  %v667_v42 = vrot.slane %v665_v32, 4 }
  0x32   : > { %v648_v36 = vrot.slane %v647_v27, 4  ;;  %v657_v37 = vor.u32 %v656_v26, %v652_v22  ;;  %v6900_v41 = vcombine.low %v629_v25, %v639_v28  ;;  %v670_v43 = vrot.slane %v668_v33, 5 }
  0x33   : > { %1110 = vrot.lane.b32.xlu1 %v6877_v18, %s6661_s14  ;;  %v678_v44 = vshrl.u32 %v6880_v24, 16  ;;  %v676_v48 = vrot.slane %v674_v39, 5  ;;  %v684_v49 = vshll.u32 %v465_v31, 16  ;;  %v689_v50 = vshrl.u32 %v6892_v34, 16 }
  0x34   : > { %1036 = vrot.lane.b32.xlu0 %v6822_v10, %s6662_s15  ;;  %v658_v46 = vrot.slane %v657_v37, 4  ;;  %v6907_v51 = vcombine.low %v460_v55, %v461_v60  ;;  %v671_v53 = vor.u32 %v670_v43, %v667_v42  ;;  %v692_v56 = vshll.u32 %v6892_v34, 16  ;;  %v6951_v42 = vld [vmem:[%s6758_s17 + $0x84] sm:$0xf] }
  0x35   : > { %v680_v54 = vrot.slane %v678_v44, 4  ;;  %v653_v58 = vsel %vm6802_vm2, %v648_v36, %v652_v22  ;;  %v691_v59 = vrot.slane %v689_v50, 4  ;;  %v698_v10 = vshll.u32 %v6896_v40, 16  ;;  %v6965_v50 = vld [vmem:[%s6758_s17 + $0x88] sm:$0xf] }
  0x36   : > { %v702_v61 = vshrl.u32 %v6896_v40, 16  ;;  %v663_v55 = vsel %vm6802_vm2, %v658_v46, %v662_v38  ;;  %v672_v60 = vrot.slane %v671_v53, 4  ;;  %v694_v0 = vrot.slane %v692_v56, 5 }
  0x37   : > { %1042 = vrot.lane.b32.xlu1 %v6900_v41, %s6662_s15  ;;  %v681_v63 = vor.u32 %v680_v54, %v676_v48  ;;  %v686_v1 = vrot.slane %v684_v49, 5  ;;  %v700_v2 = vrot.slane %v698_v10, 5  ;;  %v708_v4 = vshll.u32 %v468_v45, 16 }
  0x38   : > { %1108 = vrot.lane.b32.xlu0 %v6187_v6, %s6661_s14  ;;  %v704_v3 = vrot.slane %v702_v61, 4  ;;  %v6928_v7 = vcombine.low %v6841_v30, %v6845_v35  ;;  %v695_v11 = vor.u32 %v694_v0, %v691_v59  ;;  %v6190_v13 = vcombine.low %v653_v58, %v663_v55  ;;  %v6936_v6 = vld [vmem:[%s6758_s17 + $0x7c] sm:$0xf]  ;;  %v474_v59 = vld [vmem:[%s6758_s17 + $0x80] sm:$0x1] }
  0x39   : > { %v682_v9 = vrot.slane %v681_v63, 4  ;;  %v713_v15 = vshrl.u32 %v6911_v57, 16  ;;  %v716_v19 = vshll.u32 %v6911_v57, 16  ;;  %v677_v22 = vsel %vm6802_vm2, %v672_v60, %v676_v48  ;;  %v477_v0 = vld [vmem:[%s6758_s17 + $0x8c] sm:$0x1] }
  0x3a   : > { %v705_v14 = vor.u32 %v704_v3, %v700_v2  ;;  %v710_v30 = vrot.slane %v708_v4, 5  ;;  %v722_v35 = vshll.u32 %v6918_v62, 16  ;;  %v726_v23 = vshrl.u32 %v6918_v62, 16 }
  0x3b   : > { %1079 = vrot.lane.b32.xlu1 %v6907_v51, %s6660_s22  ;;  %v687_v25 = vsel %vm6802_vm2, %v682_v9, %v686_v1  ;;  %v696_v26 = vrot.slane %v695_v11, 4  ;;  %v715_v27 = vrot.slane %v713_v15, 4  ;;  %v718_v28 = vrot.slane %v716_v19, 5  ;;  %v6985_v9 = vld [vmem:[%s6758_s17 + $0x94] sm:$0xf] }
  0x3c   : > { %1040 = vrot.lane.b32.xlu0 %v6877_v18, %s6662_s15  ;;  %v706_v31 = vrot.slane %v705_v14, 4  ;;  %v724_v32 = vrot.slane %v722_v35, 5  ;;  %v728_v33 = vrot.slane %v726_v23, 4  ;;  %v732_v36 = vshll.u32 %v471_v5, 16 }
  0x3d   : > { %v719_v37 = vor.u32 %v718_v28, %v715_v27  ;;  %v737_v38 = vshrl.u32 %v6931_v12, 16  ;;  %v740_v39 = vshll.u32 %v6931_v12, 16  ;;  %v6954_v18 = vcombine.low %v677_v22, %v687_v25 }
  0x3e   : > { %v746_v43 = vshll.u32 %v6936_v6, 16  ;;  %v729_v44 = vor.u32 %v728_v33, %v724_v32  ;;  %v750_v48 = vshrl.u32 %v6936_v6, 16  ;;  %v6962_v49 = vcombine.low %v6892_v34, %v6896_v40  ;;  %v480_v33 = vld [vmem:[%s6758_s17 + $0x98] sm:$0x1] }
  0x3f   : > { %1114 = vrot.lane.b32.xlu1 %v6190_v13, %s6661_s14  ;;  %v739_v45 = vrot.slane %v737_v38, 4  ;;  %v742_v46 = vrot.slane %v740_v39, 5  ;;  %v701_v53 = vsel %vm6802_vm2, %v696_v26, %v700_v2  ;;  %v711_v54 = vsel %vm6802_vm2, %v706_v31, %v710_v30  ;;  %v6982_v2 = vld [vmem:[%s6758_s17 + $0x90] sm:$0xf] }
  0x40   : > { %1077 = vrot.lane.b32.xlu0 %v6928_v7, %s6660_s22  ;;  %v720_v56 = vrot.slane %v719_v37, 4  ;;  %v734_v58 = vrot.slane %v732_v36, 5  ;;  %v748_v10 = vrot.slane %v746_v43, 5  ;;  %v752_v34 = vrot.slane %v750_v48, 4  ;;  %v7010_v36 = vld [vmem:[%s6758_s17 + $0x9c] sm:$0xf] }
  0x41   : > { %v761_v40 = vshrl.u32 %v6951_v42, 16  ;;  %v764_v61 = vshll.u32 %v6951_v42, 16  ;;  %v730_v55 = vrot.slane %v729_v44, 4  ;;  %v743_v60 = vor.u32 %v742_v46, %v739_v45  ;;  %v7019_v44 = vld [vmem:[%s6758_s17 + $0xa0] sm:$0xf] }
  0x42   : > { %v770_v63 = vshll.u32 %v6965_v50, 16  ;;  %v774_v1 = vshrl.u32 %v6965_v50, 16  ;;  %v6192_v3 = vcombine.low %v701_v53, %v711_v54  ;;  %v753_v11 = vor.u32 %v752_v34, %v748_v10 }
  0x43   : > { %1046 = vrot.lane.b32.xlu1 %v6954_v18, %s6662_s15  ;;  %v763_v4 = vrot.slane %v761_v40, 4  ;;  %v766_v5 = vrot.slane %v764_v61, 5  ;;  %v756_v14 = vshll.u32 %v474_v59, 16  ;;  %v6994_v19 = vcombine.low %v6874_v17, %v6880_v24 }
  0x44   : > { %1112 = vrot.lane.b32.xlu0 %v6900_v41, %s6661_s14  ;;  %v6989_v41 = vrot.slane %v770_v63, 5  ;;  %v776_v15 = vrot.slane %v774_v1, 4  ;;  %v725_v22 = vsel %vm6802_vm2, %v720_v56, %v724_v32  ;;  %v735_v30 = vsel %vm6802_vm2, %v730_v55, %v734_v58  ;;  %v484_v58 = vld [vmem:[%s6758_s17 + $0xa8] sm:$0xf]  ;;  %v485_v1 = vld [vmem:[%s6758_s17 + $0xac] sm:$0xf] }
  0x45   : > { %v744_v35 = vrot.slane %v743_v60, 4  ;;  %v785_v23 = vshrl.u32 %v6982_v2, 16  ;;  %v788_v25 = vshll.u32 %v6982_v2, 16  ;;  %v767_v26 = vor.u32 %v766_v5, %v763_v4 }
  0x46   : > { %v794_v27 = vshll.u32 %v6985_v9, 16  ;;  %v798_v17 = vshrl.u32 %v6985_v9, 16  ;;  %v6193_v24 = vcombine.low %v725_v22, %v735_v30  ;;  %v754_v28 = vrot.slane %v753_v11, 4 }
  0x47   : > { %1083 = vrot.lane.b32.xlu1 %v6962_v49, %s6660_s22  ;;  %v758_v31 = vrot.slane %v756_v14, 5  ;;  %v777_v32 = vor.u32 %v776_v15, %v6989_v41  ;;  %v7014_v37 = vcombine.low %v6931_v12, %v6936_v6  ;;  %v749_v38 = vsel %vm6802_vm2, %v744_v35, %v748_v10 }
  0x48   : > { %1044 = vrot.lane.b32.xlu0 %v6190_v13, %s6662_s15  ;;  %v780_v13 = vshll.u32 %v477_v0, 16  ;;  %v787_v39 = vrot.slane %v785_v23, 4  ;;  %v790_v43 = vrot.slane %v788_v25, 5  ;;  %v768_v45 = vrot.slane %v767_v26, 4  ;;  %v483_v0 = vld [vmem:[%s6758_s17 + $0xa4] sm:$0x1] }
  0x49   : > { %v796_v48 = vrot.slane %v794_v27, 5  ;;  %v800_v53 = vrot.slane %v798_v17, 4  ;;  %v759_v54 = vsel %vm6802_vm2, %v754_v28, %v758_v31  ;;  %v778_v12 = vrot.slane %v777_v32, 4 }
  0x4a   : > { %v782_v46 = vrot.slane %v780_v13, 5  ;;  %v809_v6 = vshrl.u32 %v7010_v36, 16  ;;  %v812_v56 = vshll.u32 %v7010_v36, 16  ;;  %v818_v59 = vshll.u32 %v7019_v44, 16 }
  0x4b   : > { %1118 = vrot.lane.b32.xlu1 %v6192_v3, %s6661_s14  ;;  %v822_v10 = vshrl.u32 %v7019_v44, 16  ;;  %v791_v34 = vor.u32 %v790_v43, %v787_v39  ;;  %v804_v40 = vshll.u32 %v480_v33, 16  ;;  %v6194_v61 = vcombine.low %v749_v38, %v759_v54  ;;  %v486_v38 = vld [vmem:[%s6758_s17 + $0xb0] sm:$0x1] }
  0x4c   : > { %1081 = vrot.lane.b32.xlu0 %v6994_v19, %s6660_s22  ;;  %v7033_v55 = vcombine.low %v6911_v57, %v6918_v62  ;;  %v773_v60 = vsel %vm6802_vm2, %v768_v45, %v6989_v41  ;;  %v801_v63 = vor.u32 %v800_v53, %v796_v48  ;;  %v811_v4 = vrot.slane %v809_v6, 4 }
  0x4d   : > { %v814_v5 = vrot.slane %v812_v56, 5  ;;  %v6168_v11 = vcombine.low %v6773_v16, %v6780_v21  ;;  %v820_v57 = vrot.slane %v818_v59, 5  ;;  %v824_v62 = vrot.slane %v822_v10, 4 }
  0x4e   : > { %v833_v14 = vshrl.u32 %v484_v58, 16  ;;  %v836_v41 = vshll.u32 %v484_v58, 16  ;;  %v792_v15 = vrot.slane %v791_v34, 4  ;;  %v806_v22 = vrot.slane %v804_v40, 5  ;;  %v487_v40 = vld [vmem:[%s6758_s17 + $0xb4] sm:$0xf] }
  0x4f   : > { %1050 = vrot.lane.b32.xlu1 %v6193_v24, %s6662_s15  ;;  %v842_v30 = vshll.u32 %v485_v1, 16  ;;  %v846_v35 = vshrl.u32 %v485_v1, 16  ;;  %v802_v25 = vrot.slane %v801_v63, 4  ;;  %v828_v26 = vshll.u32 %v483_v0, 16 }
  0x50   : > { %1116 = vrot.lane.b32.xlu0 %v6954_v18, %s6661_s14  ;;  %v783_v18 = vsel %vm6802_vm2, %v778_v12, %v782_v46  ;;  %v815_v13 = vor.u32 %v814_v5, %v811_v4  ;;  %v825_v27 = vor.u32 %v824_v62, %v820_v57  ;;  %v838_v17 = vrot.slane %v836_v41, 5 }
  0x51   : > { %v6195_v23 = vcombine.low %v773_v60, %v783_v18  ;;  %v844_v28 = vrot.slane %v842_v30, 5  ;;  %v848_v31 = vrot.slane %v846_v35, 4  ;;  %v7053_v32 = vcombine.low %v6982_v2, %v6985_v9  ;;  %v489_v60 = vld [vmem:[%s6758_s17 + $0xbc] sm:$0x1] }
  0x52   : > { %v797_v33 = vsel %vm6802_vm2, %v792_v15, %v796_v48  ;;  %v807_v39 = vsel %vm6802_vm2, %v802_v25, %v806_v22  ;;  %v816_v43 = vrot.slane %v815_v13, 4  ;;  %v826_v45 = vrot.slane %v825_v27, 4  ;;  %v491_v22 = vld [vmem:[%s6758_s17 + $0xc4] sm:$0xf] }
  0x53   : > { %1087 = vrot.lane.b32.xlu1 %v7014_v37, %s6660_s22  ;;  %v830_v46 = vrot.slane %v828_v26, 5  ;;  %v849_v54 = vor.u32 %v848_v31, %v844_v28  ;;  %v852_v12 = vshll.u32 %v486_v38, 16  ;;  %v6196_v2 = vcombine.low %v797_v33, %v807_v39 }
  0x54   : > { %1048 = vrot.lane.b32.xlu0 %v6192_v3, %s6662_s15  ;;  %v835_v3 = vrot.slane %v833_v14, 4  ;;  %v7066_v9 = vcombine.low %v6951_v42, %v6965_v50  ;;  %v7075_v34 = vcombine.low %v484_v58, %v485_v1  ;;  %v857_v63 = vshrl.u32 %v487_v40, 16  ;;  %v490_v14 = vld [vmem:[%s6758_s17 + $0xc0] sm:$0xf] }
  0x55   : > { %v831_v48 = vsel %vm6802_vm2, %v826_v45, %v830_v46  ;;  %v850_v56 = vrot.slane %v849_v54, 4  ;;  %v854_v59 = vrot.slane %v852_v12, 5  ;;  %v860_v0 = vshll.u32 %v487_v40, 16 }
  0x56   : > { %v839_v53 = vor.u32 %v838_v17, %v835_v3  ;;  %v876_v58 = vshll.u32 %v489_v60, 16  ;;  %v859_v1 = vrot.slane %v857_v63, 4  ;;  %v881_v30 = vshrl.u32 %v490_v14, 16 }
  0x57   : > { %1122 = vrot.lane.b32.xlu1 %v6194_v61, %s6661_s14  ;;  %v855_v50 = vsel %vm6802_vm2, %v850_v56, %v854_v59  ;;  %v862_v5 = vrot.slane %v860_v0, 5  ;;  %v884_v35 = vshll.u32 %v490_v14, 16  ;;  %v890_v13 = vshll.u32 %v491_v22, 16 }
  0x58   : > { %1085 = vrot.lane.b32.xlu0 %v7033_v55, %s6660_s22  ;;  %v840_v6 = vrot.slane %v839_v53, 4  ;;  %v878_v15 = vrot.slane %v876_v58, 5  ;;  %v894_v27 = vshrl.u32 %v491_v22, 16  ;;  %v7094_v3 = vcombine.low %v7010_v36, %v7019_v44 }
  0x59   : > { %v863_v25 = vor.u32 %v862_v5, %v859_v1  ;;  %v883_v17 = vrot.slane %v881_v30, 4  ;;  %v892_v39 = vrot.slane %v890_v13, 5 }
  0x5a   : > { %v845_v42 = vsel %vm6802_vm2, %v840_v6, %v844_v28  ;;  %v886_v28 = vrot.slane %v884_v35, 5 }
  0x5b   : > { %1054 = vrot.lane.b32.xlu1 %v6195_v23, %s6662_s15  ;;  %v6198_v41 = vcombine.low %v845_v42, %v855_v50  ;;  %v864_v33 = vrot.slane %v863_v25, 4 }
  0x5c   : > { %1120 = vrot.lane.b32.xlu0 %v6193_v24, %s6661_s14  ;;  %v821_v24 = vsel %vm6802_vm2, %v816_v43, %v820_v57  ;;  %v896_v43 = vrot.slane %v894_v27, 4  ;;  %v887_v45 = vor.u32 %v886_v28, %v883_v17 }
  0x5d   : > { %v6197_v10 = vcombine.low %v821_v24, %v831_v48  ;;  %v6200_v24 = vcombine.low %v490_v14, %v491_v22 }
  0x5e   : > { %v897_v54 = vor.u32 %v896_v43, %v892_v39  ;;  %v888_v44 = vrot.slane %v887_v45, 4 }
  0x5f   : > { %1091 = vrot.lane.b32.xlu1 %v7053_v32, %s6660_s22 }
  0x60   : > { %1052 = vrot.lane.b32.xlu0 %v6194_v61, %s6662_s15  ;;  %v488_v61 = vld [vmem:[%s6758_s17 + $0xb8] sm:$0xf]  ;;  %v893_v48 = vsel %vm6802_vm2, %v888_v44, %v892_v39 }
  0x61   : > { %v866_v18 = vshll.u32 %v488_v61, 16  ;;  %v870_v4 = vshrl.u32 %v488_v61, 16  ;;  %v7111_v59 = vcombine.low %v487_v40, %v488_v61 }
  0x63   : > { %1126 = vrot.lane.b32.xlu1 %v6196_v2, %s6661_s14  ;;  %v868_v57 = vrot.slane %v866_v18, 5  ;;  %v872_v62 = vrot.slane %v870_v4, 4 }
  0x64   : > { %1089 = vrot.lane.b32.xlu0 %v7066_v9, %s6660_s22 }
  0x65   : > { %v873_v26 = vor.u32 %v872_v62, %v868_v57  ;;  %v869_v46 = vsel %vm6802_vm2, %v864_v33, %v868_v57 }
  0x67   : > { %1058 = vrot.lane.b32.xlu1 %v6197_v10, %s6662_s15  ;;  %v874_v38 = vrot.slane %v873_v26, 4 }
  0x68   : > { %1124 = vrot.lane.b32.xlu0 %v6195_v23, %s6661_s14  ;;  %v492_v23 = vld [vmem:[%s6758_s17 + $0xc8] sm:$0x1]  ;;  %s6664_s17 = smov 16  }
  0x69   : > { %v900_v31 = vshll.u32 %v492_v23, 16  ;;  %v879_v53 = vsel %vm6802_vm2, %v874_v38, %v878_v15 }
  0x6a   : > { %v6199_v36 = vcombine.low %v869_v46, %v879_v53 }
  0x6b   : > { %1095 = vrot.lane.b32.xlu1 %v7075_v34, %s6660_s22  ;;  %v902_v12 = vrot.slane %v900_v31, 5 }
  0x6c   : > { %1056 = vrot.lane.b32.xlu0 %v6196_v2, %s6662_s15  ;;  %v898_v2 = vrot.slane %v897_v54, 4 }
  0x6e   : > { %v903_v6 = vsel %vm6802_vm2, %v898_v2, %v902_v12 }
  0x6f   : > { %1130 = vrot.lane.b32.xlu1 %v6198_v41, %s6661_s14  ;;  %v6201_v56 = vcombine.low %v893_v48, %v903_v6 }
  0x70   : > { %1093 = vrot.lane.b32.xlu0 %v7094_v3, %s6660_s22 }
  0x73   : > { %1062 = vrot.lane.b32.xlu1 %v6199_v36, %s6662_s15 }
  0x74   : > { %1128 = vrot.lane.b32.xlu0 %v6197_v10, %s6661_s14 }
  0x77   : > { %1099 = vrot.lane.b32.xlu1 %v6200_v24, %s6660_s22 }
  0x78   : > { %1060 = vrot.lane.b32.xlu0 %v6198_v41, %s6662_s15 }
  0x7b   : > { %1134 = vrot.lane.b32.xlu1 %v6201_v56, %s6661_s14 }
  0x7c   : > { %1097 = vrot.lane.b32.xlu0 %v7111_v59, %s6660_s22 }
  0x80   : > { %1132 = vrot.lane.b32.xlu0 %v6199_v36, %s6661_s14 }
  0x88   : > { %v1070_v10 = vpop.permute.xlu1 %1069 }
  0x8c   : > { %v1072_v42 = vpop.permute.xlu1 %1071 }
  0x95   : > { %v1107_v50 = vpop.permute.xlu1 %1106 }
  0x96   : > { %v1033_v60 = vpop.permute.xlu0 %1032 }
  0x97   : > { %v1139_v63 = vsel %vm1136_vm3, %v6168_v11, %v1033_v60 }
  0x98   : > { %v1187_v4 = vsel %vm1185_vm4, %v1139_v63, %v1070_v10 }
  0x99   : > { %v1076_v61 = vpop.permute.xlu1 %1075 }
  0x9a   : > { %v1035_v47 = vpop.permute.xlu0 %1034 }
  0x9b   : > { %v1142_v40 = vsel %vm1136_vm3, %v6766_v8, %v1035_v47 }
  0x9c   : > { %v1189_v0 = vsel %vm1185_vm4, %v1142_v40, %v1072_v42 }
  0x9d   : > { %v1223_v1 = vsel %vm1218_vm5, %v1189_v0, %v1107_v50 }
  0x9e   : > { %v1105_v18 = vpop.permute.xlu0 %1104 }
  0x9f   : > { %v1220_v58 = vsel %vm1218_vm5, %v1187_v4, %v1105_v18 }
  0xa0   : > { %6464 = vmatprep.mubr.bf16.mxu0 %v1220_v58 }
  0xa1   : > { %v1039_v5 = vpop.permute.xlu1 %1038  ;;  %6465 = vmatmul.mubr.bf16.vlgmr.msra.gmra.mrb[0].mxu0 %v1223_v1 }
  0xa2   : > { %v1074_v16 = vpop.permute.xlu0 %1073  ;;  %v1148_v8 = vsel %vm1136_vm3, %v6857_v52, %v1039_v5 }
  0xa3   : > { %v1193_v14 = vsel %vm1185_vm4, %v1148_v8, %v1076_v61 }
  0xa5   : > { %v1111_v21 = vpop.permute.xlu1 %1110 }
  0xa6   : > { %v1037_v11 = vpop.permute.xlu0 %1036  ;;  %v1229_v30 = vsel %vm1218_vm5, %v1193_v14, %v1111_v21 }
  0xa7   : > { %v1145_v57 = vsel %vm1136_vm3, %v6784_v29, %v1037_v11 }
  0xa8   : > { %v1191_v15 = vsel %vm1185_vm4, %v1145_v57, %v1074_v16 }
  0xa9   : > { %v1043_v62 = vpop.permute.xlu1 %1042 }
  0xaa   : > { %v1109_v41 = vpop.permute.xlu0 %1108  ;;  %v1154_v52 = vsel %vm1136_vm3, %v6928_v7, %v1043_v62 }
  0xab   : > { %v1226_v22 = vsel %vm1218_vm5, %v1191_v15, %v1109_v41 }
  0xac   : > { %6468 = vmatprep.mubr.bf16.mxu0 %v1226_v22 }
  0xad   : > { %v1080_v35 = vpop.permute.xlu1 %1079  ;;  %6469 = vmatmul.mubr.bf16.gmra.mrb[4].mxu0 %v1229_v30  ;;  %v9662_v30 = vmov 0  }
  0xae   : > { %v1041_v25 = vpop.permute.xlu0 %1040  ;;  %v1197_v29 = vsel %vm1185_vm4, %v1154_v52, %v1080_v35  ;;  %2623 = vmatprep.subr.bf16.mxu1 %v9662_v30  ;;  %3854 = vmatprep.subr.bf16.mxu0 %v9662_v30 }
  0xaf   : > { %v1151_v27 = vsel %vm1136_vm3, %v6836_v20, %v1041_v25 }
  0xb1   : > { %v1115_v26 = vpop.permute.xlu1 %1114 }
  0xb2   : > { %v1078_v13 = vpop.permute.xlu0 %1077  ;;  %v1235_v33 = vsel %vm1218_vm5, %v1197_v29, %v1115_v26 }
  0xb3   : > { %v1195_v17 = vsel %vm1185_vm4, %v1151_v27, %v1078_v13 }
  0xb5   : > { %v1047_v23 = vpop.permute.xlu1 %1046 }
  0xb6   : > { %v1113_v28 = vpop.permute.xlu0 %1112  ;;  %v1160_v7 = vsel %vm1136_vm3, %v6994_v19, %v1047_v23 }
  0xb7   : > { %v1232_v31 = vsel %vm1218_vm5, %v1195_v17, %v1113_v28 }
  0xb8   : > { %6472 = vmatprep.mubr.bf16.mxu0 %v1232_v31 }
  0xb9   : > { %v1084_v38 = vpop.permute.xlu1 %1083  ;;  %6473 = vmatmul.mubr.bf16.gmra.mrb[8].mxu0 %v1235_v33 }
  0xba   : > { %v1045_v39 = vpop.permute.xlu0 %1044  ;;  %v1201_v46 = vsel %vm1185_vm4, %v1160_v7, %v1084_v38 }
  0xbb   : > { %v1157_v20 = vsel %vm1136_vm3, %v6907_v51, %v1045_v39 }
  0xbd   : > { %v1119_v43 = vpop.permute.xlu1 %1118 }
  0xbe   : > { %v1082_v45 = vpop.permute.xlu0 %1081  ;;  %v1241_v12 = vsel %vm1218_vm5, %v1201_v46, %v1119_v43 }
  0xbf   : > { %v1199_v54 = vsel %vm1185_vm4, %v1157_v20, %v1082_v45 }
  0xc1   : > { %v1051_v53 = vpop.permute.xlu1 %1050 }
  0xc2   : > { %v1117_v36 = vpop.permute.xlu0 %1116  ;;  %v1166_v19 = vsel %vm1136_vm3, %v7033_v55, %v1051_v53 }
  0xc3   : > { %v1238_v44 = vsel %vm1218_vm5, %v1199_v54, %v1117_v36 }
  0xc4   : > { %6476 = vmatprep.mubr.bf16.mxu0 %v1238_v44 }
  0xc5   : > { %v1088_v2 = vpop.permute.xlu1 %1087  ;;  %6477 = vmatmul.mubr.bf16.gmra.mrb[12].mxu0 %v1241_v12 }
  0xc6   : > { %v1049_v24 = vpop.permute.xlu0 %1048  ;;  %v1205_v56 = vsel %vm1185_vm4, %v1166_v19, %v1088_v2 }
  0xc7   : > { %v1163_v51 = vsel %vm1136_vm3, %v6962_v49, %v1049_v24 }
  0xc9   : > { %v1123_v48 = vpop.permute.xlu1 %1122 }
  0xca   : > { %v1086_v6 = vpop.permute.xlu0 %1085  ;;  %v1247_v47 = vsel %vm1218_vm5, %v1205_v56, %v1123_v48 }
  0xcb   : > { %v1203_v42 = vsel %vm1185_vm4, %v1163_v51, %v1086_v6 }
  0xcd   : > { %v1055_v10 = vpop.permute.xlu1 %1054 }
  0xce   : > { %v1121_v50 = vpop.permute.xlu0 %1120  ;;  %v1172_v55 = vsel %vm1136_vm3, %v7066_v9, %v1055_v10 }
  0xcf   : > { %v1244_v60 = vsel %vm1218_vm5, %v1203_v42, %v1121_v50 }
  0xd0   : > { %6480 = vmatprep.mubr.bf16.mxu0 %v1244_v60 }
  0xd1   : > { %v1092_v63 = vpop.permute.xlu1 %1091  ;;  %6481 = vmatmul.mubr.bf16.gmra.mrb[16].mxu0 %v1247_v47 }
  0xd2   : > { %v1053_v40 = vpop.permute.xlu0 %1052  ;;  %v1209_v18 = vsel %vm1185_vm4, %v1172_v55, %v1092_v63 }
  0xd3   : > { %v1169_v49 = vsel %vm1136_vm3, %v7014_v37, %v1053_v40 }
  0xd5   : > { %v1127_v61 = vpop.permute.xlu1 %1126 }
  0xd6   : > { %v1090_v0 = vpop.permute.xlu0 %1089  ;;  %v1253_v16 = vsel %vm1218_vm5, %v1209_v18, %v1127_v61 }
  0xd7   : > { %v1207_v58 = vsel %vm1185_vm4, %v1169_v49, %v1090_v0 }
  0xd9   : > { %v1059_v4 = vpop.permute.xlu1 %1058 }
  0xda   : > { %v1125_v1 = vpop.permute.xlu0 %1124  ;;  %v1178_v9 = vsel %vm1136_vm3, %v7094_v3, %v1059_v4  ;;  %v1550_v3 = vrot.slane %v9662_v30, 7 }
  0xdb   : > { %v1250_v5 = vsel %vm1218_vm5, %v1207_v58, %v1125_v1 }
  0xdc   : > { %6484 = vmatprep.mubr.bf16.mxu1 %v1250_v5  ;;  %v7184_v35 = vsel %vm7178_vm8, 0, %v1550_v3  ;;  %v1720_v52 = vsel %vm7178_vm8, %v1550_v3, 0 }
  0xdd   : > { %6485 = vmatmul.mubr.bf16.vlgmr.msra.gmra.mrb[0].mxu1 %v1253_v16  ;;  %v1096_v21 = vpop.permute.xlu1 %1095  ;;  %v1741_v25 = vshll.u32 %v7184_v35, 16  ;;  %v1739_v29 = vshrl.u32 %v7184_v35, 16  ;;  %v1746_v23 = vshll.u32 %v1720_v52, 16  ;;  %v1963_v17 = vrot.slane %v7184_v35, 1 }
  0xde   : > { %v1057_v8 = vpop.permute.xlu0 %1056  ;;  %v1213_v37 = vsel %vm1185_vm4, %v1178_v9, %v1096_v21  ;;  %v1964_v28 = vrot.slane %v1720_v52, 1 }
  0xdf   : > { %v1175_v11 = vsel %vm1136_vm3, %v7053_v32, %v1057_v8  ;;  %v1743_v27 = vrot.slane %v1741_v25, 1  ;;  %v1748_v33 = vrot.slane %v1746_v23, 1 }
  0xe0   : > { %v7192_v39 = vsel %vm1962_vm9, %v1963_v17, %v1964_v28 }
  0xe1   : > { %v1131_v62 = vpop.permute.xlu1 %1130  ;;  %v1744_v31 = vor.u32 %v1743_v27, %v1739_v29  ;;  %9692 = vst [vmem:[#allocation2_spill] sm:$0xff] %v7192_v39  ;;  %2060 = vrot.lane.b32.xlu1 %v7192_v39, %s6662_s15 }
  0xe2   : > { %v1094_v57 = vpop.permute.xlu0 %1093  ;;  %v1259_v15 = vsel %vm1218_vm5, %v1213_v37, %v1131_v62 }
  0xe3   : > { %v1211_v14 = vsel %vm1185_vm4, %v1175_v11, %v1094_v57  ;;  %v7197_v7 = vsel %vm1737_vm10, %v1744_v31, %v1748_v33 }
  0xe4   : > { %2028 = vrot.lane.b32.xlu0 %v7197_v7, %s6664_s17 }
  0xe5   : > { %v1063_v13 = vpop.permute.xlu1 %1062 }
  0xe6   : > { %v1129_v41 = vpop.permute.xlu0 %1128  ;;  %v1184_v46 = vsel %vm1136_vm3, %v7111_v59, %v1063_v13 }
  0xe7   : > { %v1256_v22 = vsel %vm1218_vm5, %v1211_v14, %v1129_v41 }
  0xe8   : > { %6488 = vmatprep.mubr.bf16.mxu1 %v1256_v22 }
  0xe9   : > { %6489 = vmatmul.mubr.bf16.gmra.mrb[4].mxu1 %v1259_v15  ;;  %v1100_v43 = vpop.permute.xlu1 %1099 }
  0xea   : > { %v1061_v26 = vpop.permute.xlu0 %1060  ;;  %v1217_v53 = vsel %vm1185_vm4, %v1184_v46, %v1100_v43 }
  0xeb   : > { %v1181_v45 = vsel %vm1136_vm3, %v7075_v34, %v1061_v26  ;;  %v7212_v34 = vld [vmem:[%s9650_s2] ss:$0 sm:$0xff] }
  0xed   : > { %v1135_v36 = vpop.permute.xlu1 %1134 }
  0xee   : > { %v1098_v38 = vpop.permute.xlu0 %1097  ;;  %v1265_v12 = vsel %vm1218_vm5, %v1217_v53, %v1135_v36 }
  0xef   : > { %v1215_v20 = vsel %vm1185_vm4, %v1181_v45, %v1098_v38 }
  0xf2   : > { %v1133_v54 = vpop.permute.xlu0 %1132 }
  0xf3   : > { %v1262_v44 = vsel %vm1218_vm5, %v1215_v20, %v1133_v54 }
  0xf4   : > { %6492 = vmatprep.mubr.bf16.mxu1 %v1262_v44 }
  0xf5   : > { %6493 = vmatmul.mubr.bf16.gmra.mrb[8].mxu1 %v1265_v12 }
 0x174   : > { %v6466_v59 = vpop.f32.mrb[0].mxu0 }
 0x175   : > { %v1381_v2 = vadd.f32 %v6466_v59, %v7212_v34  ;;  %v1372_v24 = vpop.f32.mrb[1].mxu0 }
 0x176   : > { %v1373_v48 = vadd.f32 %v7212_v34, %v1372_v24  ;;  %v6467_v19 = vpop.f32.mrb[2].mxu0 }
 0x177   : > { %v1384_v6 = vadd.f32 %v6467_v19, %v7212_v34  ;;  %v1375_v56 = vpop.f32.mrb[3].mxu0  ;;  %v1501_v10 = vmax.f32 %v1381_v2, 0.0 }
 0x178   : > { %v1376_v51 = vadd.f32 %v7212_v34, %v1375_v56  ;;  %v1499_v50 = vmax.f32 %v1373_v48, 0.0 }
 0x179   : > { %v1502_v42 = vmax.f32 %v1384_v6, 0.0 }
 0x17a   : > { %v1500_v60 = vmax.f32 %v1376_v51, 0.0 }
 0x17b   : > { %v1532_v47 = vpack.c.bf16 %v1502_v42, %v1501_v10 }
 0x17c   : > { %v1531_v63 = vpack.c.bf16 %v1500_v60, %v1499_v50 }
 0x17d   : > { %v1562_v40 = vshrl.u32 %v1532_v47, 16  ;;  %v1565_v0 = vshll.u32 %v1532_v47, 16 }
 0x17e   : > { %v1555_v61 = vshrl.u32 %v1531_v63, 16  ;;  %v1558_v49 = vshll.u32 %v1531_v63, 16 }
 0x17f   : > { %v1564_v55 = vrot.slane %v1562_v40, 7 }
 0x180   : > { %v7218_v18 = vrot.slane %v1555_v61, 7  ;;  %v6470_v4 = vpop.f32.mrb[4].mxu0 }
 0x181   : > { %v1567_v58 = vor.u32 %v1565_v0, %v1564_v55  ;;  %v7222_v1 = vsel %vm7178_vm8, %v1564_v55, 0  ;;  %v1397_v5 = vadd.f32 %v6470_v4, %v7212_v34  ;;  %v1388_v16 = vpop.f32.mrb[5].mxu0 }
 0x182   : > { %v1560_v21 = vor.u32 %v1558_v49, %v7218_v18  ;;  %v1389_v8 = vadd.f32 %v7212_v34, %v1388_v16  ;;  %v6471_v9 = vpop.f32.mrb[6].mxu0  ;;  %v1970_v15 = vrot.slane %v7222_v1, 1  ;;  %v6624_v16 = vld [vmem:[%s9651_s3] sm:$0xff]  }
 0x183   : > { %v1400_v11 = vadd.f32 %v6471_v9, %v7212_v34  ;;  %v1391_v57 = vpop.f32.mrb[7].mxu0  ;;  %v7230_v37 = vsel %vm7178_vm8, 0, %v1567_v58  ;;  %v1505_v22 = vmax.f32 %v1397_v5, 0.0  ;;  %2624 = vmatpush1.bf16.msra.mxu1 %v6624_v16  ;;  %v1721_v16 = vsel %vm7178_vm8, %v7218_v18, 0 }
 0x184   : > { %v1392_v62 = vadd.f32 %v7212_v34, %v1391_v57  ;;  %2188 = vrot.lane.b32.xlu1 %v7230_v37, %s6661_s14  ;;  %v7237_v14 = vsel %vm7178_vm8, 0, %v1560_v21  ;;  %v1969_v41 = vrot.slane %v7230_v37, 1  ;;  %v1503_v25 = vmax.f32 %v1389_v8, 0.0  ;;  %2625 = vmatprep.subr.bf16.mxu1 %v9662_v30  ;;  %v6625_v57 = vld [vmem:[%s9651_s3 + $0x8] sm:$0xff]  }
 0x185   : > { %v1506_v3 = vmax.f32 %v1400_v11, 0.0  ;;  %2092 = vrot.lane.b32.xlu0 %v7237_v14, %s6665_s21  ;;  %v1967_v18 = vrot.slane %v1721_v16, 1 }
 0x186   : > { %v1504_v26 = vmax.f32 %v1392_v62, 0.0  ;;  %v7244_v52 = vsel %vm1962_vm9, %v1969_v41, %v1970_v15 }
 0x187   : > { %v7246_v13 = vpack.c.bf16 %v1506_v3, %v1505_v22  ;;  %6221 = vmatprep.mubr.msk.bf16.mxu1 %vm2252_vm11, %v7244_v52  ;;  %2626 = vmatpush1.bf16.msra.mxu1 %v6625_v57  ;;  %v6626_v22 = vld [vmem:[%s9651_s3 + $0x10] sm:$0xff]  }
 0x188   : > { %v7250_v29 = vpack.c.bf16 %v1504_v26, %v1503_v25  ;;  %2094 = vrot.lane.b32.xlu1 %v7230_v37, %s6665_s21  ;;  %2627 = vmatprep.subr.bf16.mxu1 %v9662_v30 }
 0x18b   : > { %2628 = vmatpush1.bf16.msra.mxu1 %v6626_v22  ;;  %v6632_v22 = vld [vmem:[%s9651_s3 + $0x40] sm:$0xff]  }
 0x18c   : > { %v6474_v27 = vpop.f32.mrb[8].mxu0  ;;  %2629 = vmatprep.subr.bf16.mxu1 %v9662_v30 }
 0x18d   : > { %v1413_v23 = vadd.f32 %v6474_v27, %v7212_v34  ;;  %v1404_v17 = vpop.f32.mrb[9].mxu0 }
 0x18e   : > { %v1405_v28 = vadd.f32 %v7212_v34, %v1404_v17  ;;  %v6475_v31 = vpop.f32.mrb[10].mxu0 }
 0x18f   : > { %v1416_v33 = vadd.f32 %v6475_v31, %v7212_v34  ;;  %v1407_v38 = vpop.f32.mrb[11].mxu0  ;;  %v1509_v45 = vmax.f32 %v1413_v23, 0.0  ;;  %v6627_v31 = vld [vmem:[%s9651_s3 + $0x18] sm:$0xff]  }
 0x190   : > { %v1408_v43 = vadd.f32 %v7212_v34, %v1407_v38  ;;  %v1507_v20 = vmax.f32 %v1405_v28, 0.0  ;;  %2630 = vmatpush1.bf16.msra.mxu1 %v6627_v31  ;;  %v1751_v31 = vshrl.u32 %v7237_v14, 16 }
 0x191   : > { %v1510_v46 = vmax.f32 %v1416_v33, 0.0  ;;  %2631 = vmatprep.subr.bf16.mxu1 %v9662_v30 }
 0x192   : > { %v1508_v53 = vmax.f32 %v1408_v43, 0.0 }
 0x193   : > { %v7258_v54 = vpack.c.bf16 %v1510_v46, %v1509_v45 }
 0x194   : > { %v7260_v36 = vpack.c.bf16 %v1508_v53, %v1507_v20  ;;  %v6628_v20 = vld [vmem:[%s9651_s3 + $0x20] sm:$0xff]  }
 0x195   : > { %2632 = vmatpush1.bf16.msra.mxu1 %v6628_v20 }
 0x196   : > { %2633 = vmatprep.subr.bf16.mxu1 %v9662_v30 }
 0x198   : > { %v6478_v44 = vpop.f32.mrb[12].mxu0 }
 0x199   : > { %v1429_v12 = vadd.f32 %v6478_v44, %v7212_v34  ;;  %v1420_v59 = vpop.f32.mrb[13].mxu0 }
 0x19a   : > { %v1421_v2 = vadd.f32 %v7212_v34, %v1420_v59  ;;  %v6479_v24 = vpop.f32.mrb[14].mxu0 }
 0x19b   : > { %v1432_v48 = vadd.f32 %v6479_v24, %v7212_v34  ;;  %v1423_v19 = vpop.f32.mrb[15].mxu0  ;;  %v1513_v56 = vmax.f32 %v1429_v12, 0.0 }
 0x19c   : > { %v1424_v6 = vadd.f32 %v7212_v34, %v1423_v19  ;;  %v1511_v10 = vmax.f32 %v1421_v2, 0.0 }
 0x19d   : > { %v1514_v51 = vmax.f32 %v1432_v48, 0.0 }
 0x19e   : > { %v1512_v42 = vmax.f32 %v1424_v6, 0.0 }
 0x19f   : > { %v7266_v50 = vpack.c.bf16 %v1514_v51, %v1513_v56  ;;  %v6629_v56 = vld [vmem:[%s9651_s3 + $0x28] sm:$0xff]  }
 0x1a0   : > { %v7268_v60 = vpack.c.bf16 %v1512_v42, %v1511_v10  ;;  %2634 = vmatpush1.bf16.msra.mxu1 %v6629_v56 }
 0x1a1   : > { %2635 = vmatprep.subr.bf16.mxu1 %v9662_v30 }
 0x1a4   : > { %v6482_v47 = vpop.f32.mrb[16].mxu0 }
 0x1a5   : > { %v1445_v63 = vadd.f32 %v6482_v47, %v7212_v34  ;;  %v1436_v40 = vpop.f32.mrb[17].mxu0 }
 0x1a6   : > { %v1437_v61 = vadd.f32 %v7212_v34, %v1436_v40  ;;  %v6483_v55 = vpop.f32.mrb[18].mxu0 }
 0x1a7   : > { %v1448_v0 = vadd.f32 %v6483_v55, %v7212_v34  ;;  %v1439_v49 = vpop.f32.mrb[19].mxu0  ;;  %v1517_v58 = vmax.f32 %v1445_v63, 0.0 }
 0x1a8   : > { %v1440_v4 = vadd.f32 %v7212_v34, %v1439_v49  ;;  %v1515_v21 = vmax.f32 %v1437_v61, 0.0 }
 0x1a9   : > { %v1518_v5 = vmax.f32 %v1448_v0, 0.0 }
 0x1aa   : > { %v1516_v8 = vmax.f32 %v1440_v4, 0.0 }
 0x1ab   : > { %v7277_v9 = vpack.c.bf16 %v1518_v5, %v1517_v58  ;;  %v6630_v58 = vld [vmem:[%s9651_s3 + $0x30] sm:$0xff]  }
 0x1ac   : > { %v7279_v11 = vpack.c.bf16 %v1516_v8, %v1515_v21  ;;  %2636 = vmatpush1.bf16.msra.mxu1 %v6630_v58  ;;  %v1966_v8 = vrot.slane %v7237_v14, 1 }
 0x1ad   : > { %2637 = vmatprep.subr.bf16.mxu1 %v9662_v30 }
 0x1b0   : > { %v6486_v62 = vpop.f32.mrb[0].mxu1 }
 0x1b1   : > { %v1461_v41 = vadd.f32 %v6486_v62, %v7212_v34  ;;  %v1452_v15 = vpop.f32.mrb[1].mxu1  ;;  %v6631_v62 = vld [vmem:[%s9651_s3 + $0x38] sm:$0xff]  }
 0x1b2   : > { %v1453_v3 = vadd.f32 %v7212_v34, %v1452_v15  ;;  %v6487_v25 = vpop.f32.mrb[2].mxu1  ;;  %2638 = vmatpush1.bf16.msra.mxu1 %v6631_v62  ;;  %v1968_v15 = vsel %vm1962_vm9, %v1966_v8, %v1967_v18 }
 0x1b3   : > { %v1464_v26 = vadd.f32 %v6487_v25, %v7212_v34  ;;  %v1455_v27 = vpop.f32.mrb[3].mxu1  ;;  %v1521_v17 = vmax.f32 %v1461_v41, 0.0  ;;  %v1753_v41 = vshll.u32 %v7237_v14, 16  ;;  %2639 = vmatprep.subr.bf16.mxu1 %v9662_v30 }
 0x1b4   : > { %v1456_v23 = vadd.f32 %v7212_v34, %v1455_v27  ;;  %v1519_v33 = vmax.f32 %v1453_v3, 0.0 }
 0x1b5   : > { %v1522_v28 = vmax.f32 %v1464_v26, 0.0  ;;  %v1755_v27 = vrot.slane %v1753_v41, 1 }
 0x1b6   : > { %v1520_v38 = vmax.f32 %v1456_v23, 0.0  ;;  %2640 = vmatpush1.bf16.msra.mxu1 %v6632_v22  ;;  %v1572_v22 = vshll.u32 %v7250_v29, 16 }
 0x1b7   : > { %v1542_v43 = vpack.c.bf16 %v1522_v28, %v1521_v17  ;;  %v1765_v17 = vshll.u32 %v7230_v37, 16 }
 0x1b8   : > { %v1541_v45 = vpack.c.bf16 %v1520_v38, %v1519_v33  ;;  %v1758_v33 = vshll.u32 %v1721_v16, 16 }
 0x1b9   : > { %v1632_v46 = vshrl.u32 %v1542_v43, 16  ;;  %v1635_v12 = vshll.u32 %v1542_v43, 16  ;;  %v1576_v43 = vshrl.u32 %v7246_v13, 16  ;;  %v1767_v20 = vrot.slane %v1765_v17, 1 }
 0x1ba   : > { %v1625_v53 = vshrl.u32 %v1541_v45, 16  ;;  %v1628_v2 = vshll.u32 %v1541_v45, 16 }
 0x1bb   : > { %v1634_v44 = vrot.slane %v1632_v46, 7  ;;  %v1756_v46 = vor.u32 %v1755_v27, %v1751_v31 }
 0x1bc   : > { %v1627_v59 = vrot.slane %v1625_v53, 7  ;;  %v6490_v24 = vpop.f32.mrb[4].mxu1  ;;  %v1760_v53 = vrot.slane %v1758_v33, 1 }
 0x1bd   : > { %v1637_v48 = vor.u32 %v1635_v12, %v1634_v44  ;;  %v1477_v19 = vadd.f32 %v6490_v24, %v7212_v34  ;;  %v1468_v6 = vpop.f32.mrb[5].mxu1  ;;  %v1732_v3 = vsel %vm7178_vm8, %v1634_v44, 0  ;;  %v1763_v44 = vshrl.u32 %v7230_v37, 16 }
 0x1be   : > { %v1630_v51 = vor.u32 %v1628_v2, %v1627_v59  ;;  %v1469_v10 = vadd.f32 %v7212_v34, %v1468_v6  ;;  %v6491_v42 = vpop.f32.mrb[6].mxu1  ;;  %v1731_v26 = vsel %vm7178_vm8, %v1627_v59, 0  ;;  %v2000_v28 = vrot.slane %v1732_v3, 1 }
 0x1bf   : > { %v7309_v47 = vsel %vm7178_vm8, 0, %v1637_v48  ;;  %v1525_v63 = vmax.f32 %v1477_v19, 0.0  ;;  %v1480_v40 = vadd.f32 %v6491_v42, %v7212_v34  ;;  %v1471_v61 = vpop.f32.mrb[7].mxu1  ;;  %v1997_v38 = vrot.slane %v1731_v26, 1 }
 0x1c0   : > { %9693 = vst [vmem:[#allocation3_spill] sm:$0xff] %v7309_v47  ;;  %2208 = vrot.lane.b32.xlu1 %v7309_v47, %s6661_s14  ;;  %v7316_v55 = vsel %vm7178_vm8, 0, %v1630_v51  ;;  %v1523_v0 = vmax.f32 %v1469_v10, 0.0  ;;  %v1472_v49 = vadd.f32 %v7212_v34, %v1471_v61  ;;  %v1999_v25 = vrot.slane %v7309_v47, 1 }
 0x1c1   : > { %2206 = vrot.lane.b32.xlu0 %v7316_v55, %s6661_s14  ;;  %v1526_v4 = vmax.f32 %v1480_v40, 0.0  ;;  %v1996_v23 = vrot.slane %v7316_v55, 1  ;;  %v1770_v12 = vshll.u32 %v7222_v1, 16  ;;  %v1578_v59 = vrot.slane %v1576_v43, 7 }
 0x1c2   : > { %v1524_v5 = vmax.f32 %v1472_v49, 0.0  ;;  %v7363_v45 = vsel %vm1962_vm9, %v1999_v25, %v2000_v28  ;;  %v1761_v2 = vsel %vm1737_vm10, %v1756_v46, %v1760_v53  ;;  %v1768_v24 = vor.u32 %v1767_v20, %v1763_v44 }
 0x1c3   : > { %v7328_v21 = vpack.c.bf16 %v1526_v4, %v1525_v63  ;;  %v1579_v48 = vshll.u32 %v7246_v13, 16  ;;  %v1772_v19 = vrot.slane %v1770_v12, 1  ;;  %v1873_v56 = vshll.u32 %v7316_v55, 16 }
 0x1c4   : > { %2114 = vrot.lane.b32.xlu1 %v7309_v47, %s6665_s21  ;;  %v7333_v57 = vpack.c.bf16 %v1524_v5, %v1523_v0  ;;  %v1885_v1 = vshll.u32 %v7309_v47, 16  ;;  %v1569_v42 = vshrl.u32 %v7250_v29, 16  ;;  %v1871_v61 = vshrl.u32 %v7316_v55, 16 }
 0x1c5   : > { %2112 = vrot.lane.b32.xlu0 %v7316_v55, %s6665_s21  ;;  %v1581_v6 = vor.u32 %v1579_v48, %v1578_v59  ;;  %v1773_v51 = vsel %vm1737_vm10, %v1768_v24, %v1772_v19  ;;  %v1875_v13 = vrot.slane %v1873_v56, 1  ;;  %v1878_v0 = vshll.u32 %v1731_v26, 16 }
 0x1c6   : > { %v1887_v63 = vrot.slane %v1885_v1, 1  ;;  %v1883_v4 = vshrl.u32 %v7309_v47, 16  ;;  %v1890_v58 = vshll.u32 %v1732_v3, 16  ;;  %v1571_v62 = vrot.slane %v1569_v42, 7 }
 0x1c7   : > { %v7386_v10 = vsel %vm7178_vm8, 0, %v1581_v6  ;;  %v1876_v16 = vor.u32 %v1875_v13, %v1871_v61  ;;  %v1880_v41 = vrot.slane %v1878_v0, 1  ;;  %v1639_v12 = vshrl.u32 %v7333_v57, 16 }
 0x1c8   : > { %2158 = vrot.lane.b32.xlu1 %v7244_v52, %s6666_s16  ;;  %v6494_v40 = vpop.f32.mrb[8].mxu1  ;;  %v1888_v18 = vor.u32 %v1887_v63, %v1883_v4  ;;  %v1892_v25 = vrot.slane %v1890_v58, 1  ;;  %v1574_v31 = vor.u32 %v1572_v22, %v1571_v62  ;;  %v1975_v53 = vrot.slane %v7386_v10, 1 }
 0x1c9   : > { %2156 = vrot.lane.b32.xlu0 %v1968_v15, %s6666_s16  ;;  %v1484_v49 = vpop.f32.mrb[9].mxu1  ;;  %v1493_v5 = vadd.f32 %v6494_v40, %v7212_v34  ;;  %v1723_v24 = vsel %vm7178_vm8, %v1571_v62, 0  ;;  %v1641_v6 = vrot.slane %v1639_v12, 7  ;;  %v1789_v0 = vshll.u32 %v7386_v10, 16 }
 0x1ca   : > { %v1485_v8 = vadd.f32 %v7212_v34, %v1484_v49  ;;  %v1893_v33 = vsel %vm1737_vm10, %v1888_v18, %v1892_v25  ;;  %v7413_v20 = vsel %vm7178_vm8, 0, %v1574_v31  ;;  %v1973_v49 = vrot.slane %v1723_v24, 1 }
 0x1cb   : > { %v1529_v26 = vmax.f32 %v1493_v5, 0.0  ;;  %v1777_v44 = vshll.u32 %v7413_v20, 16  ;;  %v1775_v56 = vshrl.u32 %v7413_v20, 16  ;;  %v1972_v61 = vrot.slane %v7413_v20, 1 }
 0x1cc   : > { %2064 = vrot.lane.b32.xlu1 %v7244_v52, %s6662_s15  ;;  %v7368_v52 = vsel %vm1962_vm9, %v1996_v23, %v1997_v38  ;;  %v1881_v23 = vsel %vm1737_vm10, %v1876_v16, %v1880_v41  ;;  %v1527_v17 = vmax.f32 %v1485_v8, 0.0  ;;  %v1583_v58 = vshrl.u32 %v7260_v36, 16 }
 0x1cd   : > { %2062 = vrot.lane.b32.xlu0 %v1968_v15, %s6662_s15  ;;  %v6495_v15 = vpop.f32.mrb[10].mxu1  ;;  %v1779_v19 = vrot.slane %v1777_v44, 1  ;;  %v7452_v5 = vsel %vm1962_vm9, %v1972_v61, %v1973_v49  ;;  %v1791_v16 = vrot.slane %v1789_v0, 1  ;;  %v1593_v8 = vshll.u32 %v7258_v54, 16 }
 0x1ce   : > { %v1496_v3 = vadd.f32 %v6495_v15, %v7212_v34  ;;  %v1487_v27 = vpop.f32.mrb[11].mxu1  ;;  %v1787_v62 = vshrl.u32 %v7386_v10, 16  ;;  %v1585_v22 = vrot.slane %v1583_v58, 7  ;;  %v7461_v25 = vsel %vm7178_vm8, %v1641_v6, 0 }
 0x1cf   : > { %v1488_v28 = vadd.f32 %v7212_v34, %v1487_v27  ;;  %v1724_v34 = vsel %vm7178_vm8, %v1578_v59, 0  ;;  %v1642_v59 = vshll.u32 %v7333_v57, 16  ;;  %v1780_v1 = vor.u32 %v1779_v19, %v1775_v56 }
 0x1d0   : > { %2178 = vrot.lane.b32.xlu1 %v7363_v45, %s6666_s16  ;;  %v1530_v38 = vmax.f32 %v1496_v3, 0.0  ;;  %v1590_v57 = vshrl.u32 %v7258_v54, 16  ;;  %v1794_v18 = vshll.u32 %v1724_v34, 16  ;;  %v1586_v54 = vshll.u32 %v7260_v36, 16 }
 0x1d1   : > { %2176 = vrot.lane.b32.xlu0 %v7368_v52, %s6666_s16  ;;  %v1528_v43 = vmax.f32 %v1488_v28, 0.0  ;;  %v1644_v13 = vor.u32 %v1642_v59, %v1641_v6  ;;  %v1902_v28 = vshll.u32 %v7461_v25, 16  ;;  %v1597_v0 = vshrl.u32 %v7268_v60, 16 }
 0x1d2   : > { %v7406_v29 = vpack.c.bf16 %v1530_v38, %v1529_v26  ;;  %v1592_v4 = vrot.slane %v1590_v57, 7  ;;  %v1792_v26 = vor.u32 %v1791_v16, %v1787_v62  ;;  %v1796_v3 = vrot.slane %v1794_v18, 1 }
 0x1d3   : > { %v7408_v46 = vpack.c.bf16 %v1528_v43, %v1527_v17  ;;  %v7443_v40 = vsel %vm7178_vm8, 0, %v1644_v13  ;;  %v1588_v31 = vor.u32 %v1586_v54, %v1585_v22  ;;  %v1904_v36 = vrot.slane %v1902_v28, 1 }
 0x1d4   : > { %2124 = vrot.lane.b32.xlu1 %v1761_v2, %s6660_s22  ;;  %9694 = vst [vmem:[#allocation4_spill] sm:$0xff] %v7443_v40  ;;  %v1595_v41 = vor.u32 %v1593_v8, %v1592_v4  ;;  %v1897_v15 = vshll.u32 %v7443_v40, 16  ;;  %v1599_v62 = vrot.slane %v1597_v0, 7  ;;  %v2003_v30 = vrot.slane %v7461_v25, 1 }
 0x1d5   : > { %2082 = vrot.lane.b32.xlu0 %v7368_v52, %s6662_s15  ;;  %v7481_v43 = vsel %vm7178_vm8, 0, %v1588_v31 }
 0x1d6   : > { %v7469_v27 = vsel %vm7178_vm8, 0, %v1595_v41  ;;  %v1899_v17 = vrot.slane %v1897_v15, 1  ;;  %v1801_v12 = vshll.u32 %v7481_v43, 16  ;;  %v1799_v59 = vshrl.u32 %v7481_v43, 16 }
 0x1d7   : > { %v1981_v44 = vrot.slane %v7469_v27, 1  ;;  %v1813_v13 = vshll.u32 %v7469_v27, 16  ;;  %v1811_v16 = vshrl.u32 %v7469_v27, 16  ;;  %v1607_v41 = vshll.u32 %v7266_v50, 16 }
 0x1d8   : > { %2030 = vrot.lane.b32.xlu1 %v1761_v2, %s6664_s17  ;;  %v1976_v2 = vrot.slane %v1724_v34, 1  ;;  %v1726_v34 = vsel %vm7178_vm8, %v1592_v4, 0  ;;  %v1803_v6 = vrot.slane %v1801_v12, 1  ;;  %v1600_v15 = vshll.u32 %v7268_v60, 16 }
 0x1d9   : > { %2220 = vrot.lane.b32.xlu0 %v1773_v51, %s6667_s20  ;;  %v1815_v4 = vrot.slane %v1813_v13, 1  ;;  %v1818_v58 = vshll.u32 %v1726_v34, 16 }
 0x1da   : > { %v7426_v48 = vsel %vm1962_vm9, %v1975_v53, %v1976_v2  ;;  %v1982_v2 = vrot.slane %v1726_v34, 1  ;;  %v1602_v54 = vor.u32 %v1600_v15, %v1599_v62  ;;  %v1727_v34 = vsel %vm7178_vm8, %v1599_v62, 0 }
 0x1db   : > { %v1816_v18 = vor.u32 %v1815_v4, %v1811_v16  ;;  %v1611_v4 = vshrl.u32 %v7279_v11, 16 }
 0x1dc   : > { %2192 = vrot.lane.b32.xlu1 %v7386_v10, %s6661_s14  ;;  %v7497_v19 = vsel %vm1962_vm9, %v1981_v44, %v1982_v2 }
 0x1dd   : > { %2126 = vrot.lane.b32.xlu0 %v1773_v51, %s6660_s22 }
 0x1e0   : > { %2098 = vrot.lane.b32.xlu1 %v7386_v10, %s6665_s21 }
 0x1e1   : > { %2032 = vrot.lane.b32.xlu0 %v1773_v51, %s6664_s17  ;;  %v1782_v51 = vshll.u32 %v1723_v24, 16  ;;  %v1725_v24 = vsel %vm7178_vm8, %v1585_v22, 0  ;;  %v1820_v22 = vrot.slane %v1818_v58, 1 }
 0x1e2   : > { %v1806_v56 = vshll.u32 %v1725_v24, 16  ;;  %v1979_v57 = vrot.slane %v1725_v24, 1  ;;  %v1830_v24 = vshll.u32 %v1727_v34, 16 }
 0x1e3   : > { %v1784_v42 = vrot.slane %v1782_v51, 1  ;;  %v1804_v51 = vor.u32 %v1803_v6, %v1799_v59 }
 0x1e4   : > { %2238 = vrot.lane.b32.xlu1 %v1881_v23, %s6667_s20  ;;  %v1832_v13 = vrot.slane %v1830_v24, 1 }
 0x1e5   : > { %2240 = vrot.lane.b32.xlu0 %v1893_v33, %s6667_s20  ;;  %v1785_v63 = vsel %vm1737_vm10, %v1780_v1, %v1784_v42  ;;  %v1978_v1 = vrot.slane %v7481_v43, 1  ;;  %v1808_v42 = vrot.slane %v1806_v56, 1 }
 0x1e7   : > { %v1809_v61 = vsel %vm1737_vm10, %v1804_v51, %v1808_v42  ;;  %v7515_v49 = vsel %vm1962_vm9, %v1978_v1, %v1979_v57  ;;  %v1985_v57 = vrot.slane %v1727_v34, 1 }
 0x1e8   : > { %2144 = vrot.lane.b32.xlu1 %v1881_v23, %s6660_s22 }
 0x1e9   : > { %2146 = vrot.lane.b32.xlu0 %v1893_v33, %s6660_s22 }
 0x1ec   : > { %2050 = vrot.lane.b32.xlu1 %v1881_v23, %s6664_s17  ;;  %v1895_v23 = vshrl.u32 %v7443_v40, 16 }
 0x1ed   : > { %2052 = vrot.lane.b32.xlu0 %v1893_v33, %s6664_s17  ;;  %v1797_v33 = vsel %vm1737_vm10, %v1792_v26, %v1796_v3  ;;  %v1821_v3 = vsel %vm1737_vm10, %v1816_v18, %v1820_v22  ;;  %v1613_v22 = vrot.slane %v1611_v4, 7 }
 0x1ee   : > { %v1900_v38 = vor.u32 %v1899_v17, %v1895_v23  ;;  %v7528_v23 = vpop.permute.xlu1 %2060 }
 0x1ef   : > { %v1729_v4 = vsel %vm7178_vm8, %v1613_v22, 0 }
 0x1f0   : > { %2162 = vrot.lane.b32.xlu1 %v7426_v48, %s6666_s16  ;;  %v7487_v53 = vsel %vm1737_vm10, %v1900_v38, %v1904_v36  ;;  %v2029_v38 = vpop.permute.xlu0 %2028 }
 0x1f1   : > { %2190 = vrot.lane.b32.xlu0 %v7413_v20, %s6661_s14 }
 0x1f4   : > { %2068 = vrot.lane.b32.xlu1 %v7426_v48, %s6662_s15 }
 0x1f5   : > { %2096 = vrot.lane.b32.xlu0 %v7413_v20, %s6665_s21 }
 0x1f7   : > { %v2093_v59 = vpop.permute.xlu0 %2092 }
 0x1f8   : > { %2222 = vrot.lane.b32.xlu1 %v1785_v63, %s6667_s20 }
 0x1f9   : > { %2210 = vrot.lane.b32.xlu0 %v7443_v40, %s6661_s14 }
 0x1fc   : > { %2128 = vrot.lane.b32.xlu1 %v1785_v63, %s6660_s22 }
 0x1fd   : > { %2160 = vrot.lane.b32.xlu0 %v7452_v5, %s6666_s16 }
 0x200   : > { %2034 = vrot.lane.b32.xlu1 %v1785_v63, %s6664_s17  ;;  %v1604_v63 = vshrl.u32 %v7266_v50, 16  ;;  %v7538_v50 = vsel %vm7178_vm8, 0, %v1602_v54  ;;  %v1621_v54 = vshll.u32 %v7277_v9, 16 }
 0x201   : > { %2066 = vrot.lane.b32.xlu0 %v7452_v5, %s6662_s15  ;;  %v1825_v31 = vshll.u32 %v7538_v50, 16  ;;  %v1823_v2 = vshrl.u32 %v7538_v50, 16  ;;  %v1984_v51 = vrot.slane %v7538_v50, 1 }
 0x202   : > { %v1606_v8 = vrot.slane %v1604_v63, 7  ;;  %v1618_v63 = vshrl.u32 %v7277_v9, 16 }
 0x203   : > { %v1827_v12 = vrot.slane %v1825_v31, 1  ;;  %v7577_v58 = vsel %vm1962_vm9, %v1984_v51, %v1985_v57 }
 0x204   : > { %2196 = vrot.lane.b32.xlu1 %v7469_v27, %s6661_s14  ;;  %v1609_v26 = vor.u32 %v1607_v41, %v1606_v8  ;;  %v1728_v60 = vsel %vm7178_vm8, %v1606_v8, 0  ;;  %v1620_v41 = vrot.slane %v1618_v63, 7 }
 0x205   : > { %2224 = vrot.lane.b32.xlu0 %v1797_v33, %s6667_s20  ;;  %v1988_v36 = vrot.slane %v1728_v60, 1  ;;  %v1828_v56 = vor.u32 %v1827_v12, %v1823_v2  ;;  %v1842_v18 = vshll.u32 %v1728_v60, 16 }
 0x206   : > { %v7532_v17 = vsel %vm7178_vm8, 0, %v1609_v26  ;;  %v1730_v51 = vsel %vm7178_vm8, %v1620_v41, 0 }
 0x207   : > { %v1987_v28 = vrot.slane %v7532_v17, 1  ;;  %v1837_v1 = vshll.u32 %v7532_v17, 16  ;;  %v1833_v0 = vsel %vm1737_vm10, %v1828_v56, %v1832_v13  ;;  %v1835_v62 = vshrl.u32 %v7532_v17, 16 }
 0x208   : > { %2102 = vrot.lane.b32.xlu1 %v7469_v27, %s6665_s21  ;;  %v1844_v31 = vrot.slane %v1842_v18, 1 }
 0x209   : > { %2130 = vrot.lane.b32.xlu0 %v1797_v33, %s6660_s22  ;;  %v7553_v44 = vsel %vm1962_vm9, %v1987_v28, %v1988_v36  ;;  %v1839_v16 = vrot.slane %v1837_v1, 1  ;;  %v1623_v36 = vor.u32 %v1621_v54, %v1620_v41 }
 0x20b   : > { %v1840_v26 = vor.u32 %v1839_v16, %v1835_v62  ;;  %v7602_v24 = vsel %vm7178_vm8, 0, %v1623_v36 }
 0x20c   : > { %2242 = vrot.lane.b32.xlu1 %v7487_v53, %s6667_s20  ;;  %v1993_v57 = vrot.slane %v7602_v24, 1 }
 0x20d   : > { %2036 = vrot.lane.b32.xlu0 %v1797_v33, %s6664_s17  ;;  %v7545_v33 = vpop.permute.xlu1 %2188  ;;  %v1845_v12 = vsel %vm1737_vm10, %v1840_v26, %v1844_v31 }
 0x210   : > { %2166 = vrot.lane.b32.xlu1 %v7497_v19, %s6666_s16 }
 0x211   : > { %2194 = vrot.lane.b32.xlu0 %v7481_v43, %s6661_s14  ;;  %v7560_v6 = vpop.permute.xlu1 %2094 }
 0x214   : > { %2072 = vrot.lane.b32.xlu1 %v7497_v19, %s6662_s15 }
 0x215   : > { %2100 = vrot.lane.b32.xlu0 %v7481_v43, %s6665_s21 }
 0x218   : > { %2226 = vrot.lane.b32.xlu1 %v1809_v61, %s6667_s20 }
 0x219   : > { %2164 = vrot.lane.b32.xlu0 %v7515_v49, %s6666_s16 }
 0x21c   : > { %2132 = vrot.lane.b32.xlu1 %v1809_v61, %s6660_s22 }
 0x21d   : > { %2070 = vrot.lane.b32.xlu0 %v7515_v49, %s6662_s15 }
 0x220   : > { %2038 = vrot.lane.b32.xlu1 %v1809_v61, %s6664_s17 }
 0x221   : > { %2228 = vrot.lane.b32.xlu0 %v1821_v3, %s6667_s20 }
 0x224   : > { %2200 = vrot.lane.b32.xlu1 %v7532_v17, %s6661_s14 }
 0x225   : > { %2134 = vrot.lane.b32.xlu0 %v1821_v3, %s6660_s22 }
 0x228   : > { %2106 = vrot.lane.b32.xlu1 %v7532_v17, %s6665_s21 }
 0x229   : > { %2040 = vrot.lane.b32.xlu0 %v1821_v3, %s6664_s17  ;;  %v1614_v3 = vshll.u32 %v7279_v11, 16  ;;  %v2254_v11 = vsel %vm2252_vm11, %v7184_v35, %v2029_v38 }
 0x22a   : > { %v7619_v13 = vsel %vm1136_vm3, %v2254_v11, %v7528_v23  ;;  %v1861_v11 = vshll.u32 %v7602_v24, 16 }
 0x22b   : > { %v1616_v60 = vor.u32 %v1614_v3, %v1613_v22  ;;  %9696 = vst [vmem:[#allocation6_spill] sm:$0xff] %v7619_v13  ;;  %v2319_v23 = vsel %vm2317_vm12, %v7619_v13, %v2093_v59  ;;  %v1854_v22 = vshll.u32 %v1729_v4, 16 }
 0x22c   : > { %2170 = vrot.lane.b32.xlu1 %v7553_v44, %s6666_s16 }
 0x22d   : > { %2198 = vrot.lane.b32.xlu0 %v7538_v50, %s6661_s14  ;;  %v7610_v56 = vsel %vm7178_vm8, 0, %v1616_v60 }
 0x22e   : > { %v1849_v63 = vshll.u32 %v7610_v56, 16  ;;  %v1847_v59 = vshrl.u32 %v7610_v56, 16 }
 0x230   : > { %2076 = vrot.lane.b32.xlu1 %v7553_v44, %s6662_s15  ;;  %v1851_v26 = vrot.slane %v1849_v63, 1 }
 0x231   : > { %2104 = vrot.lane.b32.xlu0 %v7538_v50, %s6665_s21 }
 0x232   : > { %v7568_v42 = vpop.permute.xlu1 %2208  ;;  %v1852_v60 = vor.u32 %v1851_v26, %v1847_v59  ;;  %v1646_v26 = vshrl.u32 %v7328_v21, 16  ;;  %v1859_v59 = vshrl.u32 %v7602_v24, 16 }
 0x233   : > { %v7571_v61 = vpop.permute.xlu0 %2206 }
 0x234   : > { %2230 = vrot.lane.b32.xlu1 %v1833_v0, %s6667_s20 }
 0x235   : > { %2168 = vrot.lane.b32.xlu0 %v7577_v58, %s6666_s16 }
 0x236   : > { %v7581_v8 = vpop.permute.xlu1 %2114 }
 0x237   : > { %v7584_v15 = vpop.permute.xlu0 %2112 }
 0x238   : > { %2136 = vrot.lane.b32.xlu1 %v1833_v0, %s6660_s22 }
 0x239   : > { %2074 = vrot.lane.b32.xlu0 %v7577_v58, %s6662_s15 }
 0x23a   : > { %v7591_v28 = vpop.permute.xlu1 %2158 }
 0x23b   : > { %v2157_v34 = vpop.permute.xlu0 %2156 }
 0x23c   : > { %2042 = vrot.lane.b32.xlu1 %v1833_v0, %s6664_s17  ;;  %v1994_v0 = vrot.slane %v1730_v51, 1 }
 0x23d   : > { %2232 = vrot.lane.b32.xlu0 %v1845_v12, %s6667_s20 }
 0x23e   : > { %v7596_v2 = vpop.permute.xlu1 %2064  ;;  %v7636_v41 = vsel %vm1962_vm9, %v1993_v57, %v1994_v0  ;;  %v1856_v57 = vrot.slane %v1854_v22, 1 }
 0x23f   : > { %v7598_v9 = vpop.permute.xlu0 %2062 }
 0x240   : > { %2204 = vrot.lane.b32.xlu1 %v7602_v24, %s6661_s14 }
 0x241   : > { %2138 = vrot.lane.b32.xlu0 %v1845_v12, %s6660_s22 }
 0x242   : > { %v7615_v1 = vpop.permute.xlu1 %2178 }
 0x243   : > { %9695 = vst [vmem:[#allocation5_spill] sm:$0xff] %v7615_v1  ;;  %v7621_v38 = vpop.permute.xlu0 %2176 }
 0x244   : > { %2110 = vrot.lane.b32.xlu1 %v7602_v24, %s6665_s21 }
 0x245   : > { %2044 = vrot.lane.b32.xlu0 %v1845_v12, %s6664_s17 }
 0x246   : > { %v2125_v16 = vpop.permute.xlu1 %2124 }
 0x247   : > { %v2351_v62 = vsel %vm1185_vm4, %v2319_v23, %v2125_v16  ;;  %v7633_v18 = vpop.permute.xlu0 %2082  ;;  %v1857_v23 = vsel %vm1737_vm10, %v1852_v60, %v1856_v57 }
 0x248   : > { %v2384_v54 = vsel %vm2382_vm13, %v2351_v62, %v2157_v34  ;;  %2174 = vrot.lane.b32.xlu1 %v7636_v41, %s6666_s16  ;;  %v1990_v34 = vrot.slane %v7610_v56, 1  ;;  %v1863_v62 = vrot.slane %v1861_v11, 1 }
 0x249   : > { %2202 = vrot.lane.b32.xlu0 %v7610_v56, %s6661_s14  ;;  %v2416_v31 = vsel %vm1218_vm5, %v2384_v54, %v7545_v33  ;;  %v1991_v33 = vrot.slane %v1729_v4, 1 }
 0x24a   : > { %v2031_v3 = vpop.permute.xlu1 %2030  ;;  %v1864_v22 = vor.u32 %v1863_v62, %v1859_v59  ;;  %v1656_v62 = vshll.u32 %v7408_v46, 16 }
 0x24b   : > { %v2221_v36 = vpop.permute.xlu0 %2220  ;;  %v7660_v16 = vsel %vm1962_vm9, %v1990_v34, %v1991_v33  ;;  %v1653_v34 = vshrl.u32 %v7408_v46, 16 }
 0x24c   : > { %v2449_v12 = vsel %vm2447_vm14, %v2416_v31, %v2221_v36  ;;  %2080 = vrot.lane.b32.xlu1 %v7636_v41, %s6662_s15  ;;  %v1648_v31 = vrot.slane %v1646_v26, 7  ;;  %v1649_v36 = vshll.u32 %v7328_v21, 16 }
 0x24d   : > { %2108 = vrot.lane.b32.xlu0 %v7610_v56, %s6665_s21  ;;  %2656 = vmatmul.mubr.bf16.vlgmr.msra.gmra.mrb[12].mxu1 %v2449_v12  ;;  %v1655_v21 = vrot.slane %v1653_v34, 7 }
 0x24e   : > { %v7653_v63 = vpop.permute.xlu1 %2192  ;;  %6222 = vmatprep.mubr.msk.bf16.mxu1 %vm2252_vm11, %v7452_v5  ;;  %v1866_v5 = vshll.u32 %v1730_v51, 16  ;;  %v1651_v57 = vor.u32 %v1649_v36, %v1648_v31  ;;  %v1734_v46 = vsel %vm7178_vm8, %v1648_v31, 0  ;;  %v2002_v31 = vrot.slane %v7443_v40, 1 }
 0x24f   : > { %v2127_v0 = vpop.permute.xlu0 %2126  ;;  %v7725_v39 = vsel %vm7178_vm8, %v1655_v21, 0 }
 0x250   : > { %2234 = vrot.lane.b32.xlu1 %v1857_v23, %s6667_s20  ;;  %v1868_v12 = vrot.slane %v1866_v5, 1  ;;  %v1658_v5 = vor.u32 %v1656_v62, %v1655_v21  ;;  %v1914_v62 = vshll.u32 %v1734_v46, 16 }
 0x251   : > { %2172 = vrot.lane.b32.xlu0 %v7660_v16, %s6666_s16 }
 0x252   : > { %v7665_v54 = vpop.permute.xlu1 %2098  ;;  %v1869_v51 = vsel %vm1737_vm10, %v1864_v22, %v1868_v12  ;;  %v2256_v22 = vsel %vm2252_vm11, %v7237_v14, %v2031_v3 }
 0x253   : > { %v2033_v4 = vpop.permute.xlu0 %2032  ;;  %v2288_v34 = vsel %vm1136_vm3, %v2256_v22, %v7598_v9 }
 0x254   : > { %2140 = vrot.lane.b32.xlu1 %v1857_v23, %s6660_s22  ;;  %v2321_v9 = vsel %vm2317_vm12, %v2288_v34, %v7560_v6  ;;  %v1916_v34 = vrot.slane %v1914_v62, 1  ;;  %v2006_v62 = vrot.slane %v1734_v46, 1 }
 0x255   : > { %2078 = vrot.lane.b32.xlu0 %v7660_v16, %s6662_s15  ;;  %v2353_v22 = vsel %vm1185_vm4, %v2321_v9, %v2127_v0  ;;  %v1926_v9 = vshll.u32 %v7725_v39, 16 }
 0x256   : > { %v7672_v60 = vpop.permute.xlu1 %2238 }
 0x257   : > { %v7675_v11 = vpop.permute.xlu0 %2240 }
 0x258   : > { %2046 = vrot.lane.b32.xlu1 %v1857_v23, %s6664_s17  ;;  %v7690_v23 = vsel %vm7178_vm8, 0, %v1651_v57  ;;  %v7708_v57 = vsel %vm7178_vm8, 0, %v1658_v5 }
 0x259   : > { %2236 = vrot.lane.b32.xlu0 %v1869_v51, %s6667_s20  ;;  %v1909_v12 = vshll.u32 %v7690_v23, 16  ;;  %v1921_v5 = vshll.u32 %v7708_v57, 16  ;;  %v1919_v0 = vshrl.u32 %v7708_v57, 16 }
 0x25a   : > { %v7680_v33 = vpop.permute.xlu1 %2144 }
 0x25b   : > { %v7683_v26 = vpop.permute.xlu0 %2146  ;;  %v1911_v13 = vrot.slane %v1909_v12, 1  ;;  %v7732_v12 = vsel %vm1962_vm9, %v2002_v31, %v2003_v30  ;;  %v1923_v21 = vrot.slane %v1921_v5, 1 }
 0x25c   : > { %2084 = vrot.lane.b32.xlu1 %v7363_v45, %s6662_s15 }
 0x25d   : > { %2142 = vrot.lane.b32.xlu0 %v1869_v51, %s6660_s22 }
 0x25e   : > { %v7692_v59 = vpop.permute.xlu1 %2050 }
 0x25f   : > { %v7696_v36 = vpop.permute.xlu0 %2052 }
 0x260   : > { %9697 = vst [vmem:[#allocation7_spill] sm:$0xff] %v7696_v36  ;;  %2148 = vrot.lane.b32.xlu1 %v7487_v53, %s6660_s22 }
 0x261   : > { %2048 = vrot.lane.b32.xlu0 %v1869_v51, %s6664_s17  ;;  %v1907_v51 = vshrl.u32 %v7690_v23, 16 }
 0x262   : > { %v7710_v14 = vpop.permute.xlu1 %2162 }
 0x263   : > { %v2191_v3 = vpop.permute.xlu0 %2190  ;;  %v1912_v6 = vor.u32 %v1911_v13, %v1907_v51  ;;  %v2005_v13 = vrot.slane %v7690_v23, 1  ;;  %v1660_v51 = vshrl.u32 %v7406_v29, 16 }
 0x264   : > { %2212 = vrot.lane.b32.xlu1 %v7690_v23, %s6661_s14 }
 0x265   : > { %2116 = vrot.lane.b32.xlu0 %v7443_v40, %s6665_s21  ;;  %v2386_v40 = vsel %vm2382_vm13, %v2353_v22, %v7591_v28  ;;  %v2258_v28 = vsel %vm2252_vm11, %v7230_v37, %v2033_v4  ;;  %v1917_v31 = vsel %vm1737_vm10, %v1912_v6, %v1916_v34  ;;  %v7757_v4 = vsel %vm1962_vm9, %v2005_v13, %v2006_v62 }
 0x266   : > { %v7727_v1 = vpop.permute.xlu1 %2068  ;;  %v2418_v47 = vsel %vm1218_vm5, %v2386_v40, %v2191_v3  ;;  %v1928_v40 = vrot.slane %v1926_v9, 1  ;;  %v2290_v46 = vsel %vm1136_vm3, %v2258_v28, %v7596_v2  ;;  %v1662_v5 = vrot.slane %v1660_v51, 7 }
 0x267   : > { %v2097_v25 = vpop.permute.xlu0 %2096  ;;  %v1663_v22 = vshll.u32 %v7406_v29, 16 }
 0x268   : > { %2054 = vrot.lane.b32.xlu1 %v7487_v53, %s6664_s17  ;;  %v2323_v3 = vsel %vm2317_vm12, %v2290_v46, %v2097_v25 }
 0x269   : > { %2180 = vrot.lane.b32.xlu0 %v7732_v12, %s6666_s16  ;;  %v1665_v25 = vor.u32 %v1663_v22, %v1662_v5 }
 0x26a   : > { %v2223_v36 = vpop.permute.xlu1 %2222 }
 0x26b   : > { %v7741_v53 = vpop.permute.xlu0 %2210  ;;  %v2452_v30 = vsel %vm2447_vm14, %v2418_v47, %v2223_v36  ;;  %v1924_v47 = vor.u32 %v1923_v21, %v1919_v0  ;;  %v1719_v13 = vsel %vm7178_vm8, 0, %v1665_v25 }
 0x26c   : > { %2118 = vrot.lane.b32.xlu1 %v7690_v23, %s6665_s21  ;;  %2664 = vmatmul.mubr.bf16.gmra.mrb[16].mxu1 %v2452_v30  ;;  %v2014_v28 = vshll.u32 %v1719_v13, 16  ;;  %v2012_v46 = vshrl.u32 %v1719_v13, 16 }
 0x26d   : > { %2244 = vrot.lane.b32.xlu0 %v1917_v31, %s6667_s20  ;;  %6223 = vmatprep.mubr.msk.bf16.mxu1 %vm2252_vm11, %v7426_v48  ;;  %v1929_v6 = vsel %vm1737_vm10, %v1924_v47, %v1928_v40  ;;  %v2008_v47 = vrot.slane %v7708_v57, 1 }
 0x26e   : > { %v2129_v36 = vpop.permute.xlu1 %2128 }
 0x26f   : > { %v2161_v37 = vpop.permute.xlu0 %2160  ;;  %v2355_v48 = vsel %vm1185_vm4, %v2323_v3, %v2129_v36  ;;  %v2009_v36 = vrot.slane %v7725_v39, 1 }
 0x270   : > { %2182 = vrot.lane.b32.xlu1 %v7757_v4, %s6666_s16  ;;  %v2388_v0 = vsel %vm2382_vm13, %v2355_v48, %v2161_v37  ;;  %v2016_v37 = vrot.slane %v2014_v28, 1 }
 0x271   : > { %2086 = vrot.lane.b32.xlu0 %v7732_v12, %s6662_s15  ;;  %v2420_v29 = vsel %vm1218_vm5, %v2388_v0, %v7653_v63  ;;  %v1736_v63 = vsel %vm7178_vm8, %v1662_v5, 0  ;;  %v7800_v48 = vsel %vm1962_vm9, %v2008_v47, %v2009_v36 }
 0x272   : > { %v2035_v2 = vpop.permute.xlu1 %2034  ;;  %v2019_v3 = vshll.u32 %v1736_v63, 16  ;;  %v2017_v0 = vor.u32 %v2016_v37, %v2012_v46 }
 0x273   : > { %v2067_v34 = vpop.permute.xlu0 %2066 }
 0x274   : > { %2246 = vrot.lane.b32.xlu1 %v1929_v6, %s6667_s20  ;;  %v2021_v39 = vrot.slane %v2019_v3, 1 }
 0x275   : > { %2150 = vrot.lane.b32.xlu0 %v1917_v31, %s6660_s22 }
 0x276   : > { %v7770_v21 = vpop.permute.xlu1 %2196 }
 0x277   : > { %v2225_v9 = vpop.permute.xlu0 %2224 }
 0x278   : > { %2088 = vrot.lane.b32.xlu1 %v7757_v4, %s6662_s15  ;;  %v2455_v30 = vsel %vm2447_vm14, %v2420_v29, %v2225_v9  ;;  %v2026_v9 = vrot.slane %v1736_v63, 1 }
 0x279   : > { %2214 = vrot.lane.b32.xlu0 %v7708_v57, %s6661_s14  ;;  %2672 = vmatmul.mubr.bf16.gmra.mrb[20].mxu1 %v2455_v30  ;;  %v2022_v30 = vsel %vm1737_vm10, %v2017_v0, %v2021_v39 }
 0x27a   : > { %v7781_v62 = vpop.permute.xlu1 %2102  ;;  %6224 = vmatprep.mubr.msk.bf16.mxu1 %vm2252_vm11, %v7515_v49  ;;  %v2260_v49 = vsel %vm2252_vm11, %v7413_v20, %v2035_v2  ;;  %v2025_v2 = vrot.slane %v1719_v13, 1 }
 0x27b   : > { %v2131_v51 = vpop.permute.xlu0 %2130 }
 0x27c   : > { %2152 = vrot.lane.b32.xlu1 %v1929_v6, %s6660_s22 }
 0x27d   : > { %2056 = vrot.lane.b32.xlu0 %v1917_v31, %s6664_s17  ;;  %v2292_v31 = vsel %vm1136_vm3, %v2260_v49, %v2067_v34 }
 0x27e   : > { %v7790_v40 = vpop.permute.xlu1 %2242  ;;  %v2325_v20 = vsel %vm2317_vm12, %v2292_v31, %v7665_v54  ;;  %v7814_v54 = vsel %vm1962_vm9, %v2025_v2, %v2026_v9 }
 0x27f   : > { %v2037_v22 = vpop.permute.xlu0 %2036  ;;  %v2357_v29 = vsel %vm1185_vm4, %v2325_v20, %v2131_v51 }
 0x280   : > { %2216 = vrot.lane.b32.xlu1 %v1719_v13, %s6661_s14  ;;  %v2390_v47 = vsel %vm2382_vm13, %v2357_v29, %v7710_v14 }
 0x281   : > { %2120 = vrot.lane.b32.xlu0 %v7708_v57, %s6665_s21 }
 0x282   : > { %v2167_v5 = vpop.permute.xlu1 %2166 }
 0x283   : > { %v2195_v25 = vpop.permute.xlu0 %2194 }
 0x284   : > { %2058 = vrot.lane.b32.xlu1 %v1929_v6, %s6664_s17  ;;  %v2262_v6 = vsel %vm2252_vm11, %v7386_v10, %v2037_v22  ;;  %v2422_v63 = vsel %vm1218_vm5, %v2390_v47, %v2195_v25 }
 0x285   : > { %2184 = vrot.lane.b32.xlu0 %v7800_v48, %s6666_s16  ;;  %v2294_v14 = vsel %vm1136_vm3, %v2262_v6, %v7727_v1 }
 0x286   : > { %v2073_v34 = vpop.permute.xlu1 %2072 }
 0x287   : > { %v2101_v28 = vpop.permute.xlu0 %2100 }
 0x288   : > { %2122 = vrot.lane.b32.xlu1 %v1719_v13, %s6665_s21  ;;  %v2327_v10 = vsel %vm2317_vm12, %v2294_v14, %v2101_v28 }
 0x289   : > { %2248 = vrot.lane.b32.xlu0 %v2022_v30, %s6667_s20 }
 0x28a   : > { %v2227_v51 = vpop.permute.xlu1 %2226 }
 0x28b   : > { %v2165_v36 = vpop.permute.xlu0 %2164  ;;  %v2458_v46 = vsel %vm2447_vm14, %v2422_v63, %v2227_v51 }
 0x28c   : > { %2680 = vmatmul.mubr.bf16.gmra.mrb[24].mxu1 %v2458_v46  ;;  %2186 = vrot.lane.b32.xlu1 %v7814_v54, %s6666_s16 }
 0x28d   : > { %2090 = vrot.lane.b32.xlu0 %v7800_v48, %s6662_s15  ;;  %6225 = vmatprep.mubr.msk.bf16.mxu1 %vm2252_vm11, %v7497_v19 }
 0x28e   : > { %v2133_v13 = vpop.permute.xlu1 %2132 }
 0x28f   : > { %v2359_v37 = vsel %vm1185_vm4, %v2327_v10, %v2133_v13  ;;  %v2071_v3 = vpop.permute.xlu0 %2070 }
 0x290   : > { %v2392_v49 = vsel %vm2382_vm13, %v2359_v37, %v2165_v36  ;;  %2250 = vrot.lane.b32.xlu1 %v7197_v7, %s6667_s20 }
 0x291   : > { %2154 = vrot.lane.b32.xlu0 %v2022_v30, %s6660_s22  ;;  %v2424_v31 = vsel %vm1218_vm5, %v2392_v49, %v7770_v21 }
 0x292   : > { %v2039_v1 = vpop.permute.xlu1 %2038 }
 0x293   : > { %v2229_v22 = vpop.permute.xlu0 %2228  ;;  %v2264_v7 = vsel %vm2252_vm11, %v7481_v43, %v2039_v1 }
 0x294   : > { %v2461_v19 = vsel %vm2447_vm14, %v2424_v31, %v2229_v22  ;;  %v2296_v2 = vsel %vm1136_vm3, %v2264_v7, %v2071_v3 }
 0x295   : > { %2218 = vrot.lane.b32.xlu0 %v7184_v35, %s6661_s14  ;;  %2688 = vmatmul.mubr.bf16.gmra.mrb[28].mxu1 %v2461_v19  ;;  %v2329_v29 = vsel %vm2317_vm12, %v2296_v2, %v7781_v62 }
 0x296   : > { %v2201_v0 = vpop.permute.xlu1 %2200  ;;  %6226 = vmatprep.mubr.msk.bf16.mxu1 %vm2252_vm11, %v7577_v58 }
 0x297   : > { %v2135_v39 = vpop.permute.xlu0 %2134 }
 0x298   : > { %v2361_v35 = vsel %vm1185_vm4, %v2329_v29, %v2135_v39 }
 0x299   : > { %v2394_v47 = vsel %vm2382_vm13, %v2361_v35, %v2167_v5 }
 0x29a   : > { %v2107_v25 = vpop.permute.xlu1 %2106 }
 0x29b   : > { %v2041_v20 = vpop.permute.xlu0 %2040 }
 0x29c   : > { %v2266_v58 = vsel %vm2252_vm11, %v7469_v27, %v2041_v20 }
 0x29d   : > { %v2298_v36 = vsel %vm1136_vm3, %v2266_v58, %v2073_v34 }
 0x29e   : > { %v2171_v9 = vpop.permute.xlu1 %2170 }
 0x29f   : > { %v2199_v21 = vpop.permute.xlu0 %2198 }
 0x2a0   : > { %v2426_v6 = vsel %vm1218_vm5, %v2394_v47, %v2199_v21 }
 0x2a2   : > { %v2077_v30 = vpop.permute.xlu1 %2076 }
 0x2a3   : > { %v2105_v28 = vpop.permute.xlu0 %2104 }
 0x2a4   : > { %v2331_v62 = vsel %vm2317_vm12, %v2298_v36, %v2105_v28 }
 0x2a6   : > { %v2231_v43 = vpop.permute.xlu1 %2230 }
 0x2a7   : > { %v2169_v63 = vpop.permute.xlu0 %2168  ;;  %v2464_v51 = vsel %vm2447_vm14, %v2426_v6, %v2231_v43 }
 0x2a8   : > { %2696 = vmatmul.mubr.bf16.gmra.mrb[32].mxu1 %v2464_v51 }
 0x2a9   : > { %6227 = vmatprep.mubr.msk.bf16.mxu1 %vm2252_vm11, %v7553_v44 }
 0x2aa   : > { %v2137_v46 = vpop.permute.xlu1 %2136 }
 0x2ab   : > { %v2363_v5 = vsel %vm1185_vm4, %v2331_v62, %v2137_v46  ;;  %v2075_v14 = vpop.permute.xlu0 %2074 }
 0x2ac   : > { %v2396_v27 = vsel %vm2382_vm13, %v2363_v5, %v2169_v63 }
 0x2ad   : > { %v2428_v37 = vsel %vm1218_vm5, %v2396_v27, %v2201_v0 }
 0x2ae   : > { %v2043_v10 = vpop.permute.xlu1 %2042 }
 0x2af   : > { %v2233_v13 = vpop.permute.xlu0 %2232  ;;  %v2268_v1 = vsel %vm2252_vm11, %v7538_v50, %v2043_v10 }
 0x2b0   : > { %v2467_v3 = vsel %vm2447_vm14, %v2428_v37, %v2233_v13  ;;  %v2300_v31 = vsel %vm1136_vm3, %v2268_v1, %v2075_v14 }
 0x2b1   : > { %2704 = vmatmul.mubr.bf16.gmra.mrb[36].mxu1 %v2467_v3  ;;  %v2333_v7 = vsel %vm2317_vm12, %v2300_v31, %v2107_v25 }
 0x2b2   : > { %v2205_v49 = vpop.permute.xlu1 %2204  ;;  %6228 = vmatprep.mubr.msk.bf16.mxu1 %vm2252_vm11, %v7660_v16 }
 0x2b3   : > { %v2139_v44 = vpop.permute.xlu0 %2138 }
 0x2b4   : > { %v2365_v0 = vsel %vm1185_vm4, %v2333_v7, %v2139_v44 }
 0x2b5   : > { %v2398_v21 = vsel %vm2382_vm13, %v2365_v0, %v2171_v9 }
 0x2b6   : > { %v2111_v34 = vpop.permute.xlu1 %2110 }
 0x2b7   : > { %v2045_v22 = vpop.permute.xlu0 %2044 }
 0x2b8   : > { %v2270_v16 = vsel %vm2252_vm11, %v7532_v17, %v2045_v22 }
 0x2b9   : > { %v2302_v47 = vsel %vm1136_vm3, %v2270_v16, %v2077_v30 }
 0x2ba   : > { %v2175_v19 = vpop.permute.xlu1 %2174 }
 0x2bb   : > { %v2203_v39 = vpop.permute.xlu0 %2202 }
 0x2bc   : > { %v2430_v29 = vsel %vm1218_vm5, %v2398_v21, %v2203_v39  ;;  %v9700_v39 = vld [vmem:[#allocation5_spill] sm:$0xff] }
 0x2be   : > { %v2081_v20 = vpop.permute.xlu1 %2080 }
 0x2bf   : > { %v2109_v2 = vpop.permute.xlu0 %2108 }
 0x2c0   : > { %v2335_v25 = vsel %vm2317_vm12, %v2302_v47, %v2109_v2 }
 0x2c2   : > { %v2235_v35 = vpop.permute.xlu1 %2234 }
 0x2c3   : > { %v2173_v50 = vpop.permute.xlu0 %2172  ;;  %v2470_v28 = vsel %vm2447_vm14, %v2430_v29, %v2235_v35  ;;  %v9701_v29 = vld [vmem:[#allocation4_spill] sm:$0xff] }
 0x2c4   : > { %2712 = vmatmul.mubr.bf16.gmra.mrb[40].mxu1 %v2470_v28 }
 0x2c5   : > { %6229 = vmatprep.mubr.msk.bf16.mxu1 %vm2252_vm11, %v7636_v41 }
 0x2c6   : > { %v2141_v58 = vpop.permute.xlu1 %2140 }
 0x2c7   : > { %v2367_v9 = vsel %vm1185_vm4, %v2335_v25, %v2141_v58  ;;  %v2079_v6 = vpop.permute.xlu0 %2078 }
 0x2c8   : > { %v2400_v17 = vsel %vm2382_vm13, %v2367_v9, %v2173_v50 }
 0x2c9   : > { %v2432_v36 = vsel %vm1218_vm5, %v2400_v17, %v2205_v49  ;;  %v2276_v49 = vsel %vm2252_vm11, %v7316_v55, %v7692_v59 }
 0x2ca   : > { %v2047_v43 = vpop.permute.xlu1 %2046  ;;  %v2308_v1 = vsel %vm1136_vm3, %v2276_v49, %v7633_v18 }
 0x2cb   : > { %v2272_v63 = vsel %vm2252_vm11, %v7610_v56, %v2047_v43  ;;  %v2237_v51 = vpop.permute.xlu0 %2236 }
 0x2cc   : > { %v2304_v30 = vsel %vm1136_vm3, %v2272_v63, %v2079_v6  ;;  %v2473_v62 = vsel %vm2447_vm14, %v2432_v36, %v2237_v51 }
 0x2cd   : > { %2720 = vmatmul.mubr.bf16.gmra.mrb[44].mxu1 %v2473_v62  ;;  %v2337_v46 = vsel %vm2317_vm12, %v2304_v30, %v2111_v34 }
 0x2ce   : > { %v2085_v41 = vpop.permute.xlu1 %2084  ;;  %6230 = vmatprep.mubr.msk.bf16.mxu1 %vm2252_vm11, %v7368_v52 }
 0x2cf   : > { %v2143_v5 = vpop.permute.xlu0 %2142 }
 0x2d0   : > { %v2369_v14 = vsel %vm1185_vm4, %v2337_v46, %v2143_v5 }
 0x2d1   : > { %v2402_v27 = vsel %vm2382_vm13, %v2369_v14, %v2175_v19  ;;  %v9699_v19 = vld [vmem:[#allocation3_spill] sm:$0xff] }
 0x2d2   : > { %v2149_v56 = vpop.permute.xlu1 %2148  ;;  %v2434_v10 = vsel %vm1218_vm5, %v2402_v27, %v7571_v61 }
 0x2d3   : > { %v2049_v13 = vpop.permute.xlu0 %2048  ;;  %v2476_v37 = vsel %vm2447_vm14, %v2434_v10, %v7672_v60 }
 0x2d4   : > { %v2274_v3 = vsel %vm2252_vm11, %v7602_v24, %v2049_v13  ;;  %v9702_v13 = vld [vmem:[#allocation2_spill] sm:$0xff] }
 0x2d5   : > { %v2306_v52 = vsel %vm1136_vm3, %v2274_v3, %v2081_v20  ;;  %2728 = vmatmul.mubr.bf16.gmra.mrb[48].mxu1 %v2476_v37 }
 0x2d6   : > { %v2339_v44 = vsel %vm2317_vm12, %v2306_v52, %v7584_v15  ;;  %v2213_v34 = vpop.permute.xlu1 %2212  ;;  %6231 = vmatprep.mubr.msk.bf16.mxu1 %vm2252_vm11, %v7363_v45  ;;  %v2341_v15 = vsel %vm2317_vm12, %v2308_v1, %v7581_v8 }
 0x2d7   : > { %v2117_v61 = vpop.permute.xlu0 %2116  ;;  %v2371_v60 = vsel %vm1185_vm4, %v2339_v44, %v7680_v33  ;;  %v9698_v33 = vld [vmem:[#allocation7_spill] sm:$0xff] }
 0x2d8   : > { %v2404_v24 = vsel %vm2382_vm13, %v2371_v60, %v7621_v38  ;;  %v2373_v38 = vsel %vm1185_vm4, %v2341_v15, %v7683_v26 }
 0x2d9   : > { %v2436_v55 = vsel %vm1218_vm5, %v2404_v24, %v7568_v42  ;;  %v2278_v42 = vsel %vm2252_vm11, %v9699_v19, %v9698_v33  ;;  %v2406_v7 = vsel %vm2382_vm13, %v2373_v38, %v9700_v39  ;;  %v6633_v39 = vld [vmem:[%s9653_s5] sm:$0xff]  }
 0x2da   : > { %v2055_v59 = vpop.permute.xlu1 %2054  ;;  %v2479_v45 = vsel %vm2447_vm14, %v2436_v55, %v7675_v11  ;;  %v2438_v11 = vsel %vm1218_vm5, %v2406_v7, %v7741_v53  ;;  %v2310_v0 = vsel %vm1136_vm3, %v2278_v42, %v2085_v41  ;;  %v7974_v55 = vld [vmem:[%s9652_s4] ss:$0 sm:$0xff]  ;;  %3855 = vmatpush1.bf16.msra.mxu0 %v6633_v39 }
 0x2db   : > { %v2181_v22 = vpop.permute.xlu0 %2180  ;;  %v2482_v26 = vsel %vm2447_vm14, %v2438_v11, %v7790_v40  ;;  %v2280_v35 = vsel %vm2252_vm11, %v9701_v29, %v2055_v59  ;;  %v9703_v11 = vmov 0  }
 0x2dc   : > { %3856 = vmatprep.subr.bf16.mxu0 %v9703_v11 }
 0x2dd   : > { %2736 = vmatmul.mubr.bf16.gmra.mrb[52].mxu1 %v2479_v45 }
 0x2de   : > { %v2119_v31 = vpop.permute.xlu1 %2118  ;;  %6232 = vmatprep.mubr.msk.bf16.mxu1 %vm2252_vm11, %v7732_v12  ;;  %v2343_v12 = vsel %vm2317_vm12, %v2310_v0, %v2117_v61 }
 0x2df   : > { %v2245_v18 = vpop.permute.xlu0 %2244  ;;  %v2375_v21 = vsel %vm1185_vm4, %v2343_v12, %v2149_v56 }
 0x2e0   : > { %v2408_v53 = vsel %vm2382_vm13, %v2375_v21, %v2181_v22 }
 0x2e1   : > { %v2440_v25 = vsel %vm1218_vm5, %v2408_v53, %v2213_v34 }
 0x2e2   : > { %v2183_v8 = vpop.permute.xlu1 %2182  ;;  %v2485_v58 = vsel %vm2447_vm14, %v2440_v25, %v2245_v18  ;;  %v6635_v25 = vld [vmem:[%s9653_s5 + $0x10] sm:$0xff]  }
 0x2e3   : > { %v2087_v20 = vpop.permute.xlu0 %2086 }
 0x2e4   : > { %v2312_v50 = vsel %vm1136_vm3, %v2280_v35, %v2087_v20 }
 0x2e5   : > { %2744 = vmatmul.mubr.bf16.gmra.mrb[56].mxu1 %v2482_v26  ;;  %v2345_v40 = vsel %vm2317_vm12, %v2312_v50, %v2119_v31  ;;  %v6634_v50 = vld [vmem:[%s9653_s5 + $0x8] sm:$0xff]  }
 0x2e6   : > { %v2247_v2 = vpop.permute.xlu1 %2246  ;;  %6233 = vmatprep.mubr.msk.bf16.mxu1 %vm2252_vm11, %v7757_v4  ;;  %3857 = vmatpush1.bf16.msra.mxu0 %v6634_v50 }
 0x2e7   : > { %v2151_v16 = vpop.permute.xlu0 %2150  ;;  %3858 = vmatprep.subr.bf16.mxu0 %v9703_v11 }
 0x2e8   : > { %v2377_v4 = vsel %vm1185_vm4, %v2345_v40, %v2151_v16 }
 0x2e9   : > { %v2410_v17 = vsel %vm2382_vm13, %v2377_v4, %v2183_v8  ;;  %v6637_v4 = vld [vmem:[%s9653_s5 + $0x20] sm:$0xff]  }
 0x2ea   : > { %v2089_v28 = vpop.permute.xlu1 %2088  ;;  %3859 = vmatpush1.bf16.msra.mxu0 %v6635_v25 }
 0x2eb   : > { %v2215_v47 = vpop.permute.xlu0 %2214  ;;  %3860 = vmatprep.subr.bf16.mxu0 %v9703_v11 }
 0x2ec   : > { %v2442_v63 = vsel %vm1218_vm5, %v2410_v17, %v2215_v47 }
 0x2ed   : > { %2752 = vmatmul.mubr.bf16.gmra.mrb[60].mxu1 %v2485_v58  ;;  %v2488_v41 = vsel %vm2447_vm14, %v2442_v63, %v2247_v2  ;;  %v6636_v58 = vld [vmem:[%s9653_s5 + $0x18] sm:$0xff]  }
 0x2ee   : > { %v2153_v9 = vpop.permute.xlu1 %2152  ;;  %6234 = vmatprep.mubr.msk.bf16.mxu1 %vm2252_vm11, %v7800_v48  ;;  %3861 = vmatpush1.bf16.msra.mxu0 %v6636_v58 }
 0x2ef   : > { %v2057_v6 = vpop.permute.xlu0 %2056  ;;  %3862 = vmatprep.subr.bf16.mxu0 %v9703_v11 }
 0x2f0   : > { %v2282_v43 = vsel %vm2252_vm11, %v7690_v23, %v2057_v6 }
 0x2f1   : > { %v2314_v36 = vsel %vm1136_vm3, %v2282_v43, %v2089_v28 }
 0x2f2   : > { %v2217_v51 = vpop.permute.xlu1 %2216  ;;  %3863 = vmatpush1.bf16.msra.mxu0 %v6637_v4 }
 0x2f3   : > { %v2121_v30 = vpop.permute.xlu0 %2120  ;;  %3864 = vmatprep.subr.bf16.mxu0 %v9703_v11 }
 0x2f4   : > { %v2347_v62 = vsel %vm2317_vm12, %v2314_v36, %v2121_v30  ;;  %v6638_v36 = vld [vmem:[%s9653_s5 + $0x28] sm:$0xff]  }
 0x2f5   : > { %2760 = vmatmul.mubr.bf16.gmra.mrb[64].mxu1 %v2488_v41  ;;  %v2379_v48 = vsel %vm1185_vm4, %v2347_v62, %v2153_v9  ;;  %v6639_v41 = vld [vmem:[%s9653_s5 + $0x30] sm:$0xff]  }
 0x2f6   : > { %v2059_v46 = vpop.permute.xlu1 %2058  ;;  %6235 = vmatprep.mubr.msk.bf16.mxu1 %vm2252_vm11, %v7814_v54  ;;  %3865 = vmatpush1.bf16.msra.mxu0 %v6638_v36 }
 0x2f7   : > { %v2185_v5 = vpop.permute.xlu0 %2184  ;;  %v2284_v37 = vsel %vm2252_vm11, %v7708_v57, %v2059_v46  ;;  %3866 = vmatprep.subr.bf16.mxu0 %v9703_v11 }
 0x2f8   : > { %v2412_v23 = vsel %vm2382_vm13, %v2379_v48, %v2185_v5  ;;  %v6640_v5 = vld [vmem:[%s9653_s5 + $0x38] sm:$0xff]  }
 0x2f9   : > { %v2444_v56 = vsel %vm1218_vm5, %v2412_v23, %v2217_v51 }
 0x2fa   : > { %v2123_v14 = vpop.permute.xlu1 %2122  ;;  %3867 = vmatpush1.bf16.msra.mxu0 %v6639_v41 }
 0x2fb   : > { %v2249_v27 = vpop.permute.xlu0 %2248  ;;  %3868 = vmatprep.subr.bf16.mxu0 %v9703_v11 }
 0x2fc   : > { %v2491_v10 = vsel %vm2447_vm14, %v2444_v56, %v2249_v27 }
 0x2fd   : > { %2768 = vmatmul.mubr.bf16.gmra.mrb[68].mxu1 %v2491_v10 }
 0x2fe   : > { %6236 = vmatprep.mubr.msk.bf16.mxu1 %vm2252_vm11, %v9702_v13  ;;  %v2187_v52 = vpop.permute.xlu1 %2186  ;;  %3869 = vmatpush1.bf16.msra.mxu0 %v6640_v5 }
 0x2ff   : > { %v2091_v3 = vpop.permute.xlu0 %2090  ;;  %3870 = vmatprep.subr.bf16.mxu0 %v9703_v11 }
 0x300   : > { %v2316_v54 = vsel %vm1136_vm3, %v2284_v37, %v2091_v3 }
 0x301   : > { %v2349_v49 = vsel %vm2317_vm12, %v2316_v54, %v2123_v14  ;;  %v6641_v54 = vld [vmem:[%s9653_s5 + $0x40] sm:$0xff]  }
 0x302   : > { %v7962_v61 = vpop.permute.xlu1 %2250  ;;  %3871 = vmatpush1.bf16.msra.mxu0 %v6641_v54 }
 0x303   : > { %v2155_v44 = vpop.permute.xlu0 %2154  ;;  %5419 = vmatprep.subr.bf16.mxu0 %v9703_v11 }
 0x304   : > { %v2381_v34 = vsel %vm1185_vm4, %v2349_v49, %v2155_v44 }
 0x305   : > { %v2414_v60 = vsel %vm2382_vm13, %v2381_v34, %v2187_v52 }
 0x307   : > { %v7965_v24 = vpop.permute.xlu0 %2218 }
 0x308   : > { %v2446_v1 = vsel %vm1218_vm5, %v2414_v60, %v7965_v24 }
 0x309   : > { %v2494_v57 = vsel %vm2447_vm14, %v2446_v1, %v7962_v61 }
 0x30a   : > { %2776 = vmatmul.mubr.bf16.gmra.mrb[72].mxu1 %v2494_v57 }
 0x320   : > { %v2657_v59 = vpop.f32.mrb[12].mxu1 }
 0x321   : > { %v2658_v22 = vadd.f32 %v7974_v55, %v2657_v59  ;;  %v2659_v15 = vpop.f32.mrb[13].mxu1 }
 0x322   : > { %v2660_v45 = vpop.f32.mrb[14].mxu1 }
 0x323   : > { %v2661_v31 = vadd.f32 %v7974_v55, %v2660_v45  ;;  %v2662_v38 = vpop.f32.mrb[15].mxu1  ;;  %v2784_v18 = vmax.f32 %v2658_v22, 0.0 }
 0x325   : > { %v2785_v33 = vmax.f32 %v2661_v31, 0.0 }
 0x327   : > { %v7978_v19 = vpack.c.bf16 %v2785_v33, %v2784_v18 }
 0x329   : > { %v2833_v42 = vshrl.u32 %v7978_v19, 16  ;;  %v2836_v8 = vshll.u32 %v7978_v19, 16 }
 0x32b   : > { %v2835_v7 = vrot.slane %v2833_v42, 7 }
 0x32d   : > { %v2838_v0 = vor.u32 %v2836_v8, %v2835_v7  ;;  %v2992_v20 = vsel %vm7178_vm8, %v2835_v7, 0 }
 0x32e   : > { %v3219_v2 = vrot.slane %v2992_v20, 1  ;;  %v3016_v16 = vshll.u32 %v2992_v20, 16 }
 0x32f   : > { %v7990_v12 = vsel %vm7178_vm8, 0, %v2838_v0 }
 0x330   : > { %3340 = vrot.lane.b32.xlu0 %v7990_v12, %s6665_s21  ;;  %v3218_v26 = vrot.slane %v7990_v12, 1  ;;  %v3011_v21 = vshll.u32 %v7990_v12, 16  ;;  %v3009_v35 = vshrl.u32 %v7990_v12, 16  ;;  %v3018_v47 = vrot.slane %v3016_v16, 1 }
 0x332   : > { %v3220_v29 = vsel %vm1962_vm9, %v3218_v26, %v3219_v2  ;;  %v3013_v53 = vrot.slane %v3011_v21, 1 }
 0x334   : > { %3404 = vrot.lane.b32.xlu0 %v3220_v29, %s6666_s16  ;;  %v3014_v28 = vor.u32 %v3013_v53, %v3009_v35 }
 0x336   : > { %v3019_v40 = vsel %vm1737_vm10, %v3014_v28, %v3018_v47 }
 0x337   : > { %3372 = vrot.lane.b32.xlu1 %v3019_v40, %s6660_s22 }
 0x338   : > { %3310 = vrot.lane.b32.xlu0 %v3220_v29, %s6662_s15 }
 0x33b   : > { %3280 = vrot.lane.b32.xlu1 %v3019_v40, %s6664_s17 }
 0x33f   : > { %v2665_v9 = vpop.f32.mrb[16].mxu1 }
 0x340   : > { %v2666_v6 = vadd.f32 %v7974_v55, %v2665_v9  ;;  %v2667_v17 = vpop.f32.mrb[17].mxu1 }
 0x341   : > { %v2668_v43 = vpop.f32.mrb[18].mxu1 }
 0x342   : > { %v2669_v63 = vadd.f32 %v7974_v55, %v2668_v43  ;;  %v2670_v51 = vpop.f32.mrb[19].mxu1  ;;  %v2786_v30 = vmax.f32 %v2666_v6, 0.0 }
 0x344   : > { %v2787_v62 = vmax.f32 %v2669_v63, 0.0 }
 0x346   : > { %v8027_v46 = vpack.c.bf16 %v2787_v62, %v2786_v30 }
 0x348   : > { %v2840_v48 = vshrl.u32 %v8027_v46, 16  ;;  %v2843_v14 = vshll.u32 %v8027_v46, 16 }
 0x34a   : > { %v2842_v23 = vrot.slane %v2840_v48, 7 }
 0x34c   : > { %v2673_v27 = vpop.f32.mrb[20].mxu1  ;;  %v2845_v56 = vor.u32 %v2843_v14, %v2842_v23  ;;  %v2993_v10 = vsel %vm7178_vm8, %v2842_v23, 0 }
 0x34d   : > { %v2674_v37 = vadd.f32 %v7974_v55, %v2673_v27  ;;  %v2675_v3 = vpop.f32.mrb[21].mxu1  ;;  %v3222_v1 = vrot.slane %v2993_v10, 1  ;;  %v3028_v59 = vshll.u32 %v2993_v10, 16 }
 0x34e   : > { %v2676_v52 = vpop.f32.mrb[22].mxu1  ;;  %v8044_v49 = vsel %vm7178_vm8, 0, %v2845_v56 }
 0x34f   : > { %v2677_v44 = vadd.f32 %v7974_v55, %v2676_v52  ;;  %3436 = vrot.lane.b32.xlu1 %v8044_v49, %s6661_s14  ;;  %v2678_v34 = vpop.f32.mrb[23].mxu1  ;;  %v3221_v60 = vrot.slane %v8044_v49, 1  ;;  %v3023_v57 = vshll.u32 %v8044_v49, 16  ;;  %v2788_v22 = vmax.f32 %v2674_v37, 0.0 }
 0x350   : > { %v3021_v31 = vshrl.u32 %v8044_v49, 16  ;;  %v3030_v42 = vrot.slane %v3028_v59, 1 }
 0x351   : > { %v2789_v15 = vmax.f32 %v2677_v44, 0.0  ;;  %v3223_v45 = vsel %vm1962_vm9, %v3221_v60, %v3222_v1  ;;  %v3025_v38 = vrot.slane %v3023_v57, 1 }
 0x352   : > { %6247 = vmatprep.mubr.msk.bf16.mxu0 %vm2252_vm11, %v3223_v45 }
 0x353   : > { %v8056_v18 = vpack.c.bf16 %v2789_v15, %v2788_v22  ;;  %3342 = vrot.lane.b32.xlu1 %v8044_v49, %s6665_s21  ;;  %v3026_v33 = vor.u32 %v3025_v38, %v3021_v31 }
 0x355   : > { %v2847_v39 = vshrl.u32 %v8056_v18, 16  ;;  %v3031_v7 = vsel %vm1737_vm10, %v3026_v33, %v3030_v42  ;;  %v2850_v0 = vshll.u32 %v8056_v18, 16 }
 0x356   : > { %3466 = vrot.lane.b32.xlu0 %v3031_v7, %s6667_s20 }
 0x357   : > { %v2849_v8 = vrot.slane %v2847_v39, 7  ;;  %3406 = vrot.lane.b32.xlu1 %v3223_v45, %s6666_s16 }
 0x359   : > { %v2852_v20 = vor.u32 %v2850_v0, %v2849_v8  ;;  %v2994_v26 = vsel %vm7178_vm8, %v2849_v8, 0 }
 0x35a   : > { %3374 = vrot.lane.b32.xlu0 %v3031_v7, %s6660_s22  ;;  %v3040_v16 = vshll.u32 %v2994_v26, 16  ;;  %v3225_v30 = vrot.slane %v2994_v26, 1 }
 0x35b   : > { %3312 = vrot.lane.b32.xlu1 %v3223_v45, %s6662_s15  ;;  %v8071_v2 = vsel %vm7178_vm8, 0, %v2852_v20 }
 0x35c   : > { %v3035_v21 = vshll.u32 %v8071_v2, 16  ;;  %v3033_v29 = vshrl.u32 %v8071_v2, 16  ;;  %v3042_v25 = vrot.slane %v3040_v16, 1  ;;  %v3224_v63 = vrot.slane %v8071_v2, 1 }
 0x35e   : > { %v3037_v35 = vrot.slane %v3035_v21, 1  ;;  %3282 = vrot.lane.b32.xlu0 %v3031_v7, %s6664_s17  ;;  %v8092_v23 = vsel %vm1962_vm9, %v3224_v63, %v3225_v30 }
 0x35f   : > { %v2681_v53 = vpop.f32.mrb[24].mxu1 }
 0x360   : > { %v2682_v50 = vadd.f32 %v7974_v55, %v2681_v53  ;;  %v2683_v28 = vpop.f32.mrb[25].mxu1  ;;  %v3038_v47 = vor.u32 %v3037_v35, %v3033_v29 }
 0x361   : > { %v2684_v40 = vpop.f32.mrb[26].mxu1 }
 0x362   : > { %v2685_v58 = vadd.f32 %v7974_v55, %v2684_v40  ;;  %v2686_v4 = vpop.f32.mrb[27].mxu1  ;;  %v3043_v9 = vsel %vm1737_vm10, %v3038_v47, %v3042_v25  ;;  %3438 = vrot.lane.b32.xlu0 %v8071_v2, %s6661_s14  ;;  %v2790_v6 = vmax.f32 %v2682_v50, 0.0 }
 0x363   : > { %3468 = vrot.lane.b32.xlu1 %v3043_v9, %s6667_s20 }
 0x364   : > { %v2791_v17 = vmax.f32 %v2685_v58, 0.0 }
 0x366   : > { %v8082_v43 = vpack.c.bf16 %v2791_v17, %v2790_v6  ;;  %3344 = vrot.lane.b32.xlu0 %v8071_v2, %s6665_s21 }
 0x367   : > { %3376 = vrot.lane.b32.xlu1 %v3043_v9, %s6660_s22 }
 0x368   : > { %v2854_v51 = vshrl.u32 %v8082_v43, 16  ;;  %v2689_v36 = vpop.f32.mrb[28].mxu1  ;;  %v2857_v5 = vshll.u32 %v8082_v43, 16 }
 0x369   : > { %v2690_v62 = vadd.f32 %v7974_v55, %v2689_v36  ;;  %v2691_v41 = vpop.f32.mrb[29].mxu1 }
 0x36a   : > { %v2856_v48 = vrot.slane %v2854_v51, 7  ;;  %v2692_v14 = vpop.f32.mrb[30].mxu1  ;;  %3408 = vrot.lane.b32.xlu0 %v8092_v23, %s6666_s16 }
 0x36b   : > { %v2693_v27 = vadd.f32 %v7974_v55, %v2692_v14  ;;  %3284 = vrot.lane.b32.xlu1 %v3043_v9, %s6664_s17  ;;  %v2694_v56 = vpop.f32.mrb[31].mxu1  ;;  %v2792_v3 = vmax.f32 %v2690_v62, 0.0 }
 0x36c   : > { %v2859_v10 = vor.u32 %v2857_v5, %v2856_v48  ;;  %v2995_v37 = vsel %vm7178_vm8, %v2856_v48, 0 }
 0x36d   : > { %v2793_v54 = vmax.f32 %v2693_v27, 0.0  ;;  %v3052_v60 = vshll.u32 %v2995_v37, 16  ;;  %v3228_v33 = vrot.slane %v2995_v37, 1 }
 0x36e   : > { %v8102_v52 = vsel %vm7178_vm8, 0, %v2859_v10  ;;  %3314 = vrot.lane.b32.xlu0 %v8092_v23, %s6662_s15 }
 0x36f   : > { %v8104_v44 = vpack.c.bf16 %v2793_v54, %v2792_v3  ;;  %3440 = vrot.lane.b32.xlu1 %v8102_v52, %s6661_s14  ;;  %v3047_v34 = vshll.u32 %v8102_v52, 16  ;;  %v3045_v57 = vshrl.u32 %v8102_v52, 16  ;;  %v3227_v22 = vrot.slane %v8102_v52, 1 }
 0x370   : > { %v3054_v31 = vrot.slane %v3052_v60, 1 }
 0x371   : > { %v2861_v1 = vshrl.u32 %v8104_v44, 16  ;;  %v3049_v59 = vrot.slane %v3047_v34, 1  ;;  %v2864_v15 = vshll.u32 %v8104_v44, 16  ;;  %v8122_v8 = vsel %vm1962_vm9, %v3227_v22, %v3228_v33 }
 0x373   : > { %3346 = vrot.lane.b32.xlu1 %v8102_v52, %s6665_s21  ;;  %v3050_v45 = vor.u32 %v3049_v59, %v3045_v57  ;;  %v2863_v38 = vrot.slane %v2861_v1, 7 }
 0x375   : > { %v3055_v42 = vsel %vm1737_vm10, %v3050_v45, %v3054_v31  ;;  %v2866_v39 = vor.u32 %v2864_v15, %v2863_v38  ;;  %v2996_v7 = vsel %vm7178_vm8, %v2863_v38, 0 }
 0x376   : > { %3470 = vrot.lane.b32.xlu0 %v3055_v42, %s6667_s20  ;;  %v3064_v26 = vshll.u32 %v2996_v7, 16  ;;  %v3231_v27 = vrot.slane %v2996_v7, 1 }
 0x377   : > { %3410 = vrot.lane.b32.xlu1 %v8122_v8, %s6666_s16  ;;  %v8128_v0 = vsel %vm7178_vm8, 0, %v2866_v39 }
 0x378   : > { %v3059_v20 = vshll.u32 %v8128_v0, 16  ;;  %v3057_v21 = vshrl.u32 %v8128_v0, 16  ;;  %v3066_v28 = vrot.slane %v3064_v26, 1  ;;  %v3230_v30 = vrot.slane %v8128_v0, 1 }
 0x37a   : > { %3378 = vrot.lane.b32.xlu0 %v3055_v42, %s6660_s22  ;;  %v3061_v16 = vrot.slane %v3059_v20, 1  ;;  %v8156_v54 = vsel %vm1962_vm9, %v3230_v30, %v3231_v27 }
 0x37b   : > { %3316 = vrot.lane.b32.xlu1 %v8122_v8, %s6662_s15  ;;  %v2697_v29 = vpop.f32.mrb[32].mxu1 }
 0x37c   : > { %v2698_v35 = vadd.f32 %v7974_v55, %v2697_v29  ;;  %v2699_v53 = vpop.f32.mrb[33].mxu1  ;;  %v3062_v50 = vor.u32 %v3061_v16, %v3057_v21 }
 0x37d   : > { %v2700_v47 = vpop.f32.mrb[34].mxu1 }
 0x37e   : > { %v2701_v25 = vadd.f32 %v7974_v55, %v2700_v47  ;;  %3286 = vrot.lane.b32.xlu0 %v3055_v42, %s6664_s17  ;;  %v2702_v40 = vpop.f32.mrb[35].mxu1  ;;  %v3067_v58 = vsel %vm1737_vm10, %v3062_v50, %v3066_v28  ;;  %v2794_v4 = vmax.f32 %v2698_v35, 0.0 }
 0x37f   : > { %3472 = vrot.lane.b32.xlu1 %v3067_v58, %s6667_s20 }
 0x380   : > { %v2795_v9 = vmax.f32 %v2701_v25, 0.0 }
 0x382   : > { %v8140_v6 = vpack.c.bf16 %v2795_v9, %v2794_v4  ;;  %3442 = vrot.lane.b32.xlu0 %v8128_v0, %s6661_s14 }
 0x383   : > { %3380 = vrot.lane.b32.xlu1 %v3067_v58, %s6660_s22 }
 0x384   : > { %v2868_v17 = vshrl.u32 %v8140_v6, 16  ;;  %v2705_v63 = vpop.f32.mrb[36].mxu1  ;;  %v2871_v41 = vshll.u32 %v8140_v6, 16 }
 0x385   : > { %v2706_v51 = vadd.f32 %v7974_v55, %v2705_v63  ;;  %v2707_v36 = vpop.f32.mrb[37].mxu1 }
 0x386   : > { %v2870_v62 = vrot.slane %v2868_v17, 7  ;;  %3348 = vrot.lane.b32.xlu0 %v8128_v0, %s6665_s21  ;;  %v2708_v48 = vpop.f32.mrb[38].mxu1 }
 0x387   : > { %v2709_v5 = vadd.f32 %v7974_v55, %v2708_v48  ;;  %3288 = vrot.lane.b32.xlu1 %v3067_v58, %s6664_s17  ;;  %v2710_v14 = vpop.f32.mrb[39].mxu1  ;;  %v2796_v37 = vmax.f32 %v2706_v51, 0.0 }
 0x388   : > { %v2873_v56 = vor.u32 %v2871_v41, %v2870_v62  ;;  %v2997_v10 = vsel %vm7178_vm8, %v2870_v62, 0 }
 0x389   : > { %v2797_v3 = vmax.f32 %v2709_v5, 0.0  ;;  %v3076_v57 = vshll.u32 %v2997_v10, 16  ;;  %v3234_v39 = vrot.slane %v2997_v10, 1 }
 0x38a   : > { %3412 = vrot.lane.b32.xlu0 %v8156_v54, %s6666_s16  ;;  %v8162_v34 = vsel %vm7178_vm8, 0, %v2873_v56 }
 0x38b   : > { %v8164_v60 = vpack.c.bf16 %v2797_v3, %v2796_v37  ;;  %3444 = vrot.lane.b32.xlu1 %v8162_v34, %s6661_s14  ;;  %v3071_v1 = vshll.u32 %v8162_v34, 16  ;;  %v3069_v22 = vshrl.u32 %v8162_v34, 16  ;;  %v3233_v45 = vrot.slane %v8162_v34, 1 }
 0x38c   : > { %v3078_v33 = vrot.slane %v3076_v57, 1 }
 0x38d   : > { %v2875_v59 = vshrl.u32 %v8164_v60, 16  ;;  %v3073_v15 = vrot.slane %v3071_v1, 1  ;;  %v2878_v31 = vshll.u32 %v8164_v60, 16  ;;  %v8182_v21 = vsel %vm1962_vm9, %v3233_v45, %v3234_v39 }
 0x38e   : > { %3318 = vrot.lane.b32.xlu0 %v8156_v54, %s6662_s15 }
 0x38f   : > { %3350 = vrot.lane.b32.xlu1 %v8162_v34, %s6665_s21  ;;  %v3074_v38 = vor.u32 %v3073_v15, %v3069_v22  ;;  %v2877_v42 = vrot.slane %v2875_v59, 7 }
 0x391   : > { %v3079_v7 = vsel %vm1737_vm10, %v3074_v38, %v3078_v33  ;;  %v2880_v20 = vor.u32 %v2878_v31, %v2877_v42  ;;  %v2998_v26 = vsel %vm7178_vm8, %v2877_v42, 0 }
 0x392   : > { %3474 = vrot.lane.b32.xlu0 %v3079_v7, %s6667_s20  ;;  %v3088_v35 = vshll.u32 %v2998_v26, 16  ;;  %v3237_v1 = vrot.slane %v2998_v26, 1 }
 0x393   : > { %3414 = vrot.lane.b32.xlu1 %v8182_v21, %s6666_s16  ;;  %v8188_v16 = vsel %vm7178_vm8, 0, %v2880_v20 }
 0x394   : > { %v3083_v29 = vshll.u32 %v8188_v16, 16  ;;  %v3081_v53 = vshrl.u32 %v8188_v16, 16  ;;  %v3090_v58 = vrot.slane %v3088_v35, 1  ;;  %v3236_v14 = vrot.slane %v8188_v16, 1 }
 0x396   : > { %3382 = vrot.lane.b32.xlu0 %v3079_v7, %s6660_s22  ;;  %v3085_v50 = vrot.slane %v3083_v29, 1  ;;  %v8216_v45 = vsel %vm1962_vm9, %v3236_v14, %v3237_v1 }
 0x397   : > { %3320 = vrot.lane.b32.xlu1 %v8182_v21, %s6662_s15  ;;  %v2713_v28 = vpop.f32.mrb[40].mxu1 }
 0x398   : > { %v2714_v47 = vadd.f32 %v7974_v55, %v2713_v28  ;;  %v2715_v25 = vpop.f32.mrb[41].mxu1  ;;  %v3086_v40 = vor.u32 %v3085_v50, %v3081_v53 }
 0x399   : > { %v2716_v4 = vpop.f32.mrb[42].mxu1 }
 0x39a   : > { %v2717_v9 = vadd.f32 %v7974_v55, %v2716_v4  ;;  %3290 = vrot.lane.b32.xlu0 %v3079_v7, %s6664_s17  ;;  %v2718_v17 = vpop.f32.mrb[43].mxu1  ;;  %v3091_v63 = vsel %vm1737_vm10, %v3086_v40, %v3090_v58  ;;  %v2798_v51 = vmax.f32 %v2714_v47, 0.0 }
 0x39b   : > { %3476 = vrot.lane.b32.xlu1 %v3091_v63, %s6667_s20 }
 0x39c   : > { %v2799_v36 = vmax.f32 %v2717_v9, 0.0 }
 0x39e   : > { %v8200_v30 = vpack.c.bf16 %v2799_v36, %v2798_v51  ;;  %3446 = vrot.lane.b32.xlu0 %v8188_v16, %s6661_s14 }
 0x39f   : > { %3384 = vrot.lane.b32.xlu1 %v3091_v63, %s6660_s22 }
 0x3a0   : > { %v2882_v62 = vshrl.u32 %v8200_v30, 16  ;;  %v2721_v41 = vpop.f32.mrb[44].mxu1  ;;  %v2885_v56 = vshll.u32 %v8200_v30, 16 }
 0x3a1   : > { %v2722_v48 = vadd.f32 %v7974_v55, %v2721_v41  ;;  %v2723_v5 = vpop.f32.mrb[45].mxu1 }
 0x3a2   : > { %v2884_v27 = vrot.slane %v2882_v62, 7  ;;  %3352 = vrot.lane.b32.xlu0 %v8188_v16, %s6665_s21  ;;  %v2724_v10 = vpop.f32.mrb[46].mxu1 }
 0x3a3   : > { %v2725_v37 = vadd.f32 %v7974_v55, %v2724_v10  ;;  %3292 = vrot.lane.b32.xlu1 %v3091_v63, %s6664_s17  ;;  %v2726_v3 = vpop.f32.mrb[47].mxu1  ;;  %v2800_v22 = vmax.f32 %v2722_v48, 0.0 }
 0x3a4   : > { %v2887_v57 = vor.u32 %v2885_v56, %v2884_v27  ;;  %v2999_v59 = vsel %vm7178_vm8, %v2884_v27, 0 }
 0x3a5   : > { %v2801_v15 = vmax.f32 %v2725_v37, 0.0  ;;  %v3100_v38 = vshll.u32 %v2999_v59, 16  ;;  %v3240_v17 = vrot.slane %v2999_v59, 1 }
 0x3a6   : > { %3416 = vrot.lane.b32.xlu0 %v8216_v45, %s6666_s16  ;;  %v8222_v31 = vsel %vm7178_vm8, 0, %v2887_v57 }
 0x3a7   : > { %v8224_v33 = vpack.c.bf16 %v2801_v15, %v2800_v22  ;;  %3448 = vrot.lane.b32.xlu1 %v8222_v31, %s6661_s14  ;;  %v3095_v42 = vshll.u32 %v8222_v31, 16  ;;  %v3093_v29 = vshrl.u32 %v8222_v31, 16  ;;  %v3102_v50 = vrot.slane %v3100_v38, 1 }
 0x3a8   : > { %v2729_v39 = vpop.f32.mrb[48].mxu1  ;;  %v3239_v28 = vrot.slane %v8222_v31, 1 }
 0x3a9   : > { %v2889_v7 = vshrl.u32 %v8224_v33, 16  ;;  %v2730_v20 = vadd.f32 %v7974_v55, %v2729_v39  ;;  %v2731_v26 = vpop.f32.mrb[49].mxu1  ;;  %v3097_v35 = vrot.slane %v3095_v42, 1  ;;  %v2892_v47 = vshll.u32 %v8224_v33, 16 }
 0x3aa   : > { %3322 = vrot.lane.b32.xlu0 %v8216_v45, %s6662_s15  ;;  %v2732_v53 = vpop.f32.mrb[50].mxu1  ;;  %v8246_v41 = vsel %vm1962_vm9, %v3239_v28, %v3240_v17 }
 0x3ab   : > { %v2733_v25 = vadd.f32 %v7974_v55, %v2732_v53  ;;  %3354 = vrot.lane.b32.xlu1 %v8222_v31, %s6665_s21  ;;  %v2734_v40 = vpop.f32.mrb[51].mxu1  ;;  %v3098_v58 = vor.u32 %v3097_v35, %v3093_v29  ;;  %v2891_v4 = vrot.slane %v2889_v7, 7  ;;  %v2802_v9 = vmax.f32 %v2730_v20, 0.0  ;;  %v3373_v53 = vpop.permute.xlu1 %3372 }
 0x3ad   : > { %v2803_v63 = vmax.f32 %v2733_v25, 0.0  ;;  %v3103_v51 = vsel %vm1737_vm10, %v3098_v58, %v3102_v50  ;;  %v2894_v36 = vor.u32 %v2892_v47, %v2891_v4  ;;  %v8242_v62 = vsel %vm7178_vm8, %v2891_v4, 0  ;;  %v3341_v47 = vpop.permute.xlu0 %3340 }
 0x3ae   : > { %3478 = vrot.lane.b32.xlu0 %v3103_v51, %s6667_s20  ;;  %v3112_v56 = vshll.u32 %v8242_v62, 16 }
 0x3af   : > { %v8248_v48 = vpack.c.bf16 %v2803_v63, %v2802_v9  ;;  %3418 = vrot.lane.b32.xlu1 %v8246_v41, %s6666_s16  ;;  %v8254_v5 = vsel %vm7178_vm8, 0, %v2894_v36  ;;  %v4063_v36 = vld [vmem:[%s9655_s7] sm:$0x3] }
 0x3b0   : > { %v2737_v14 = vpop.f32.mrb[52].mxu1  ;;  %v3107_v27 = vshll.u32 %v8254_v5, 16  ;;  %v3105_v57 = vshrl.u32 %v8254_v5, 16  ;;  %v3114_v7 = vrot.slane %v3112_v56, 1  ;;  %6580 = vmatprep.subr.msk.bf16.mxu1 %vm4120_vm15, %v4063_v36  ;;  %v8287_v56 = vpop.permute.xlu1 %3280 }
 0x3b1   : > { %v2896_v10 = vshrl.u32 %v8248_v48, 16  ;;  %v2738_v37 = vadd.f32 %v7974_v55, %v2737_v14  ;;  %v2739_v3 = vpop.f32.mrb[53].mxu1  ;;  %v2899_v42 = vshll.u32 %v8248_v48, 16  ;;  %v3242_v14 = vrot.slane %v8254_v5, 1 }
 0x3b2   : > { %3386 = vrot.lane.b32.xlu0 %v3103_v51, %s6660_s22  ;;  %v2740_v1 = vpop.f32.mrb[54].mxu1  ;;  %v3109_v59 = vrot.slane %v3107_v27, 1  ;;  %v4122_v27 = vsel %vm4120_vm15, %v4063_v36, 0 }
 0x3b3   : > { %v2898_v22 = vrot.slane %v2896_v10, 7  ;;  %v2741_v15 = vadd.f32 %v7974_v55, %v2740_v1  ;;  %3324 = vrot.lane.b32.xlu1 %v8246_v41, %s6662_s15  ;;  %v2742_v38 = vpop.f32.mrb[55].mxu1  ;;  %v2804_v20 = vmax.f32 %v2738_v37, 0.0  ;;  %6497 = vmatpush3.bf16.msra.mxu1 %v4122_v27 }
 0x3b4   : > { %v3110_v39 = vor.u32 %v3109_v59, %v3105_v57  ;;  %v3405_v57 = vpop.permute.xlu0 %3404 }
 0x3b5   : > { %v2805_v26 = vmax.f32 %v2741_v15, 0.0  ;;  %v2901_v35 = vor.u32 %v2899_v42, %v2898_v22  ;;  %v3243_v15 = vrot.slane %v8242_v62, 1 }
 0x3b6   : > { %3294 = vrot.lane.b32.xlu0 %v3103_v51, %s6664_s17  ;;  %v3115_v29 = vsel %vm1737_vm10, %v3110_v39, %v3114_v7  ;;  %v3001_v39 = vsel %vm7178_vm8, %v2898_v22, 0 }
 0x3b7   : > { %v8268_v50 = vpack.c.bf16 %v2805_v26, %v2804_v20  ;;  %3480 = vrot.lane.b32.xlu1 %v3115_v29, %s6667_s20  ;;  %v8277_v9 = vsel %vm7178_vm8, 0, %v2901_v35  ;;  %v8301_v35 = vsel %vm1962_vm9, %v3242_v14, %v3243_v15 }
 0x3b8   : > { %v2745_v28 = vpop.f32.mrb[56].mxu1  ;;  %v3119_v1 = vshll.u32 %v8277_v9, 16 }
 0x3b9   : > { %v2903_v25 = vshrl.u32 %v8268_v50, 16  ;;  %v2746_v40 = vadd.f32 %v7974_v55, %v2745_v28  ;;  %v2747_v58 = vpop.f32.mrb[57].mxu1  ;;  %v2906_v10 = vshll.u32 %v8268_v50, 16 }
 0x3ba   : > { %3450 = vrot.lane.b32.xlu0 %v8254_v5, %s6661_s14  ;;  %v2748_v4 = vpop.f32.mrb[58].mxu1  ;;  %v3121_v28 = vrot.slane %v3119_v1, 1  ;;  %v3117_v58 = vshrl.u32 %v8277_v9, 16 }
 0x3bb   : > { %v2749_v17 = vadd.f32 %v7974_v55, %v2748_v4  ;;  %3388 = vrot.lane.b32.xlu1 %v3115_v29, %s6660_s22  ;;  %v2750_v63 = vpop.f32.mrb[59].mxu1  ;;  %v2905_v51 = vrot.slane %v2903_v25, 7  ;;  %v2806_v37 = vmax.f32 %v2746_v40, 0.0  ;;  %v9704_v25 = vld [vmem:[#allocation6_spill] sm:$0xff]  ;;  %v3124_v4 = vshll.u32 %v3001_v39, 16 }
 0x3bc   : > { %v3557_v40 = vsel %vm2317_vm12, %v9704_v25, %v3341_v47  ;;  %v3311_v47 = vpop.permute.xlu0 %3310 }
 0x3bd   : > { %v2807_v3 = vmax.f32 %v2749_v17, 0.0  ;;  %v2908_v38 = vor.u32 %v2906_v10, %v2905_v51  ;;  %v3589_v63 = vsel %vm1185_vm4, %v3557_v40, %v3373_v53  ;;  %v3122_v10 = vor.u32 %v3121_v28, %v3117_v58 }
 0x3be   : > { %3356 = vrot.lane.b32.xlu0 %v8254_v5, %s6665_s21  ;;  %v3126_v15 = vrot.slane %v3124_v4, 1  ;;  %v3621_v53 = vsel %vm2382_vm13, %v3589_v63, %v3405_v57 }
 0x3bf   : > { %v8293_v59 = vpack.c.bf16 %v2807_v3, %v2806_v37  ;;  %3296 = vrot.lane.b32.xlu1 %v3115_v29, %s6664_s17  ;;  %v8313_v17 = vsel %vm7178_vm8, 0, %v2908_v38  ;;  %v3245_v37 = vrot.slane %v8277_v9, 1  ;;  %v3246_v38 = vrot.slane %v3001_v39, 1 }
 0x3c0   : > { %v2753_v42 = vpop.f32.mrb[60].mxu1  ;;  %v3131_v3 = vshll.u32 %v8313_v17, 16  ;;  %v3127_v28 = vsel %vm1737_vm10, %v3122_v10, %v3126_v15  ;;  %v3497_v10 = vsel %vm2252_vm11, %v7990_v12, %v8287_v56 }
 0x3c1   : > { %v2754_v7 = vadd.f32 %v7974_v55, %v2753_v42  ;;  %v3437_v20 = vpop.permute.xlu1 %3436  ;;  %v2755_v26 = vpop.f32.mrb[61].mxu1  ;;  %v8328_v40 = vsel %vm1962_vm9, %v3245_v37, %v3246_v38 }
 0x3c2   : > { %3420 = vrot.lane.b32.xlu0 %v8301_v35, %s6666_s16  ;;  %v2756_v62 = vpop.f32.mrb[62].mxu1 }
 0x3c3   : > { %v2757_v29 = vadd.f32 %v7974_v55, %v2756_v62  ;;  %3452 = vrot.lane.b32.xlu1 %v8277_v9, %s6661_s14  ;;  %v2758_v22 = vpop.f32.mrb[63].mxu1  ;;  %v2808_v36 = vmax.f32 %v2754_v7, 0.0  ;;  %v3653_v7 = vsel %vm1218_vm5, %v3621_v53, %v3437_v20  ;;  %v8332_v62 = vsel %vm7178_vm8, %v2905_v51, 0 }
 0x3c4   : > { %v3133_v20 = vrot.slane %v3131_v3, 1 }
 0x3c5   : > { %v2809_v14 = vmax.f32 %v2757_v29, 0.0  ;;  %v3343_v27 = vpop.permute.xlu1 %3342  ;;  %v2910_v29 = vshrl.u32 %v8293_v59, 16 }
 0x3c6   : > { %3326 = vrot.lane.b32.xlu0 %v8301_v35, %s6662_s15 }
 0x3c7   : > { %v8320_v1 = vpack.c.bf16 %v2809_v14, %v2808_v36  ;;  %3358 = vrot.lane.b32.xlu1 %v8277_v9, %s6665_s21  ;;  %v3129_v36 = vshrl.u32 %v8313_v17, 16  ;;  %v3136_v14 = vshll.u32 %v8332_v62, 16  ;;  %v2912_v3 = vrot.slane %v2910_v29, 7 }
 0x3c8   : > { %v2761_v42 = vpop.f32.mrb[64].mxu1  ;;  %v3467_v26 = vpop.permute.xlu0 %3466 }
 0x3c9   : > { %v2762_v22 = vadd.f32 %v7974_v55, %v2761_v42  ;;  %v3684_v39 = vsel %vm2447_vm14, %v3653_v7, %v3467_v26  ;;  %v3407_v57 = vpop.permute.xlu1 %3406  ;;  %v2763_v58 = vpop.f32.mrb[65].mxu1  ;;  %v3134_v53 = vor.u32 %v3133_v20, %v3129_v36  ;;  %v3527_v42 = vsel %vm1136_vm3, %v3497_v10, %v3311_v47 }
 0x3ca   : > { %3482 = vrot.lane.b32.xlu0 %v3127_v28, %s6667_s20  ;;  %v2764_v4 = vpop.f32.mrb[66].mxu1  ;;  %3887 = vmatmul.mubr.bf16.vlgmr.msra.gmra.mrb[20].mxu0 %v3684_v39  ;;  %v3138_v58 = vrot.slane %v3136_v14, 1  ;;  %v3559_v12 = vsel %vm2317_vm12, %v3527_v42, %v3343_v27  ;;  %v2917_v47 = vshrl.u32 %v8320_v1, 16 }
 0x3cb   : > { %3422 = vrot.lane.b32.xlu1 %v8328_v40, %s6666_s16  ;;  %v2765_v63 = vadd.f32 %v7974_v55, %v2764_v4  ;;  %v2766_v51 = vpop.f32.mrb[67].mxu1  ;;  %6248 = vmatprep.mubr.msk.bf16.mxu0 %vm2252_vm11, %v8092_v23  ;;  %v2810_v15 = vmax.f32 %v2762_v22, 0.0  ;;  %v2913_v23 = vshll.u32 %v8293_v59, 16 }
 0x3cc   : > { %v3375_v37 = vpop.permute.xlu0 %3374 }
 0x3cd   : > { %v2811_v38 = vmax.f32 %v2765_v63, 0.0  ;;  %v3313_v26 = vpop.permute.xlu1 %3312  ;;  %v3591_v20 = vsel %vm1185_vm4, %v3559_v12, %v3375_v37  ;;  %v3139_v63 = vsel %vm1737_vm10, %v3134_v53, %v3138_v58  ;;  %v2915_v51 = vor.u32 %v2913_v23, %v2912_v3 }
 0x3ce   : > { %3390 = vrot.lane.b32.xlu0 %v3127_v28, %s6660_s22 }
 0x3cf   : > { %3328 = vrot.lane.b32.xlu1 %v8328_v40, %s6662_s15  ;;  %v8353_v7 = vpack.c.bf16 %v2811_v38, %v2810_v15  ;;  %v3623_v15 = vsel %vm2382_vm13, %v3591_v20, %v3407_v57  ;;  %v2920_v57 = vshll.u32 %v8320_v1, 16  ;;  %v3249_v20 = vrot.slane %v8332_v62, 1 }
 0x3d0   : > { %v2769_v39 = vpop.f32.mrb[68].mxu1  ;;  %v3283_v29 = vpop.permute.xlu0 %3282 }
 0x3d1   : > { %v2770_v56 = vadd.f32 %v7974_v55, %v2769_v39  ;;  %v2771_v22 = vpop.f32.mrb[69].mxu1  ;;  %v2919_v39 = vrot.slane %v2917_v47, 7 }
 0x3d2   : > { %3298 = vrot.lane.b32.xlu0 %v3127_v28, %s6664_s17  ;;  %v2772_v4 = vpop.f32.mrb[70].mxu1  ;;  %v8369_v28 = vsel %vm7178_vm8, 0, %v2915_v51 }
 0x3d3   : > { %v2773_v36 = vadd.f32 %v7974_v55, %v2772_v4  ;;  %3484 = vrot.lane.b32.xlu1 %v3139_v63, %s6667_s20  ;;  %v2774_v14 = vpop.f32.mrb[71].mxu1  ;;  %v2812_v27 = vmax.f32 %v2770_v56, 0.0  ;;  %v3248_v56 = vrot.slane %v8313_v17, 1  ;;  %v3143_v22 = vshll.u32 %v8369_v28, 16 }
 0x3d4   : > { %v3439_v38 = vpop.permute.xlu0 %3438  ;;  %v3003_v4 = vsel %vm7178_vm8, %v2912_v3, 0  ;;  %v2922_v51 = vor.u32 %v2920_v57, %v2919_v39  ;;  %v3141_v3 = vshrl.u32 %v8369_v28, 16 }
 0x3d5   : > { %v2813_v10 = vmax.f32 %v2773_v36, 0.0  ;;  %v3469_v42 = vpop.permute.xlu1 %3468  ;;  %v3655_v37 = vsel %vm1218_vm5, %v3623_v15, %v3439_v38  ;;  %v3145_v36 = vrot.slane %v3143_v22, 1 }
 0x3d6   : > { %3454 = vrot.lane.b32.xlu0 %v8313_v17, %s6661_s14  ;;  %v3687_v23 = vsel %vm2447_vm14, %v3655_v37, %v3469_v42  ;;  %v8399_v38 = vsel %vm7178_vm8, 0, %v2922_v51 }
 0x3d7   : > { %v8371_v53 = vpack.c.bf16 %v2813_v10, %v2812_v27  ;;  %3392 = vrot.lane.b32.xlu1 %v3139_v63, %s6660_s22  ;;  %3895 = vmatmul.mubr.bf16.gmra.mrb[24].mxu0 %v3687_v23  ;;  %v3148_v10 = vshll.u32 %v3003_v4, 16  ;;  %v3146_v57 = vor.u32 %v3145_v36, %v3141_v3  ;;  %v3155_v22 = vshll.u32 %v8399_v38, 16 }
 0x3d8   : > { %6249 = vmatprep.mubr.msk.bf16.mxu0 %vm2252_vm11, %v8122_v8  ;;  %v3345_v58 = vpop.permute.xlu0 %3344  ;;  %v8387_v8 = vsel %vm1962_vm9, %v3248_v56, %v3249_v20  ;;  %v3252_v36 = vrot.slane %v3003_v4, 1 }
 0x3d9   : > { %v3377_v12 = vpop.permute.xlu1 %3376 }
 0x3da   : > { %3360 = vrot.lane.b32.xlu0 %v8313_v17, %s6665_s21 }
 0x3db   : > { %3300 = vrot.lane.b32.xlu1 %v3139_v63, %s6664_s17  ;;  %v3499_v63 = vsel %vm2252_vm11, %v8044_v49, %v3283_v29  ;;  %v3251_v29 = vrot.slane %v8369_v28, 1 }
 0x3dc   : > { %v3409_v14 = vpop.permute.xlu0 %3408  ;;  %v3529_v56 = vsel %vm1136_vm3, %v3499_v63, %v3313_v26  ;;  %v3004_v63 = vsel %vm7178_vm8, %v2919_v39, 0  ;;  %v3153_v39 = vshrl.u32 %v8399_v38, 16 }
 0x3dd   : > { %v3285_v47 = vpop.permute.xlu1 %3284  ;;  %v2777_v27 = vpop.f32.mrb[72].mxu1  ;;  %v3561_v20 = vsel %vm2317_vm12, %v3529_v56, %v3345_v58  ;;  %v3160_v56 = vshll.u32 %v3004_v63, 16 }
 0x3de   : > { %3424 = vrot.lane.b32.xlu0 %v8387_v8, %s6666_s16  ;;  %v2778_v62 = vadd.f32 %v7974_v55, %v2777_v27  ;;  %v2779_v15 = vpop.f32.mrb[73].mxu1 }
 0x3df   : > { %3456 = vrot.lane.b32.xlu1 %v8369_v28, %s6661_s14  ;;  %v2780_v42 = vpop.f32.mrb[74].mxu1 }
 0x3e0   : > { %v2781_v37 = vadd.f32 %v7974_v55, %v2780_v42  ;;  %v2782_v23 = vpop.f32.mrb[75].mxu1  ;;  %v2814_v27 = vmax.f32 %v2778_v62, 0.0  ;;  %v3150_v55 = vrot.slane %v3148_v10, 1  ;;  %v3315_v15 = vpop.permute.xlu0 %3314  ;;  %v2924_v42 = vshrl.u32 %v8353_v7, 16 }
 0x3e1   : > { %v3441_v49 = vpop.permute.xlu1 %3440  ;;  %v3593_v23 = vsel %vm1185_vm4, %v3561_v20, %v3377_v12  ;;  %v8419_v62 = vsel %vm1962_vm9, %v3251_v29, %v3252_v36  ;;  %v3157_v10 = vrot.slane %v3155_v22, 1  ;;  %v3162_v22 = vrot.slane %v3160_v56, 1 }
 0x3e2   : > { %3330 = vrot.lane.b32.xlu0 %v8387_v8, %s6662_s15  ;;  %v2815_v51 = vmax.f32 %v2781_v37, 0.0  ;;  %v3151_v26 = vsel %vm1737_vm10, %v3146_v57, %v3150_v55  ;;  %v3625_v4 = vsel %vm2382_vm13, %v3593_v23, %v3409_v14  ;;  %v2926_v20 = vrot.slane %v2924_v42, 7 }
 0x3e3   : > { %3362 = vrot.lane.b32.xlu1 %v8369_v28, %s6665_s21  ;;  %v3657_v37 = vsel %vm1218_vm5, %v3625_v4, %v3441_v49  ;;  %v3158_v29 = vor.u32 %v3157_v10, %v3153_v39  ;;  %v2927_v14 = vshll.u32 %v8353_v7, 16  ;;  %v2931_v23 = vshrl.u32 %v8371_v53, 16 }
 0x3e4   : > { %v8410_v3 = vpack.c.bf16 %v2815_v51, %v2814_v27  ;;  %v3501_v51 = vsel %vm2252_vm11, %v8071_v2, %v3285_v47  ;;  %v2934_v39 = vshll.u32 %v8371_v53, 16  ;;  %v3254_v56 = vrot.slane %v8399_v38, 1 }
 0x3e5   : > { %v3347_v58 = vpop.permute.xlu1 %3346  ;;  %v3163_v36 = vsel %vm1737_vm10, %v3158_v29, %v3162_v22  ;;  %v2929_v42 = vor.u32 %v2927_v14, %v2926_v20  ;;  %v3531_v10 = vsel %vm1136_vm3, %v3501_v51, %v3315_v15  ;;  %v2933_v47 = vrot.slane %v2931_v23, 7 }
 0x3e6   : > { %3486 = vrot.lane.b32.xlu0 %v3151_v26, %s6667_s20  ;;  %v3005_v51 = vsel %vm7178_vm8, %v2926_v20, 0 }
 0x3e7   : > { %3426 = vrot.lane.b32.xlu1 %v8419_v62, %s6666_s16  ;;  %v8446_v2 = vsel %vm7178_vm8, 0, %v2929_v42 }
 0x3e8   : > { %v3471_v57 = vpop.permute.xlu0 %3470 }
 0x3e9   : > { %v3690_v12 = vsel %vm2447_vm14, %v3657_v37, %v3471_v57  ;;  %v3411_v27 = vpop.permute.xlu1 %3410 }
 0x3ea   : > { %3394 = vrot.lane.b32.xlu0 %v3151_v26, %s6660_s22  ;;  %3903 = vmatmul.mubr.bf16.gmra.mrb[28].mxu0 %v3690_v12  ;;  %v3167_v12 = vshll.u32 %v8446_v2, 16 }
 0x3eb   : > { %3332 = vrot.lane.b32.xlu1 %v8419_v62, %s6662_s15  ;;  %6250 = vmatprep.mubr.msk.bf16.mxu0 %vm2252_vm11, %v8156_v54  ;;  %v3563_v54 = vsel %vm2317_vm12, %v3531_v10, %v3347_v58 }
 0x3ec   : > { %v3379_v49 = vpop.permute.xlu0 %3378  ;;  %v3169_v10 = vrot.slane %v3167_v12, 1  ;;  %v3258_v12 = vrot.slane %v3005_v51, 1 }
 0x3ed   : > { %v3317_v55 = vpop.permute.xlu1 %3316  ;;  %v3595_v37 = vsel %vm1185_vm4, %v3563_v54, %v3379_v49  ;;  %v3255_v49 = vrot.slane %v3004_v63, 1  ;;  %v3172_v63 = vshll.u32 %v3005_v51, 16 }
 0x3ee   : > { %3302 = vrot.lane.b32.xlu0 %v3151_v26, %s6664_s17  ;;  %v3627_v15 = vsel %vm2382_vm13, %v3595_v37, %v3411_v27  ;;  %v2936_v27 = vor.u32 %v2934_v39, %v2933_v47  ;;  %v2938_v39 = vshrl.u32 %v8410_v3, 16 }
 0x3ef   : > { %3488 = vrot.lane.b32.xlu1 %v3163_v36, %s6667_s20  ;;  %v8465_v23 = vsel %vm1962_vm9, %v3254_v56, %v3255_v49 }
 0x3f0   : > { %v3287_v4 = vpop.permute.xlu0 %3286  ;;  %v8474_v20 = vsel %vm7178_vm8, 0, %v2936_v27  ;;  %v3006_v27 = vsel %vm7178_vm8, %v2933_v47, 0 }
 0x3f1   : > { %v3473_v57 = vpop.permute.xlu1 %3472  ;;  %v3503_v42 = vsel %vm2252_vm11, %v8102_v52, %v3287_v4 }
 0x3f2   : > { %3458 = vrot.lane.b32.xlu0 %v8399_v38, %s6661_s14  ;;  %v3533_v52 = vsel %vm1136_vm3, %v3503_v42, %v3317_v55 }
 0x3f3   : > { %3396 = vrot.lane.b32.xlu1 %v3163_v36, %s6660_s22 }
 0x3f4   : > { %v3443_v26 = vpop.permute.xlu0 %3442 }
 0x3f5   : > { %v3659_v58 = vsel %vm1218_vm5, %v3627_v15, %v3443_v26  ;;  %v3381_v29 = vpop.permute.xlu1 %3380  ;;  %v3257_v15 = vrot.slane %v8446_v2, 1  ;;  %v3179_v26 = vshll.u32 %v8474_v20, 16 }
 0x3f6   : > { %3364 = vrot.lane.b32.xlu0 %v8399_v38, %s6665_s21  ;;  %v3693_v14 = vsel %vm2447_vm14, %v3659_v58, %v3473_v57  ;;  %v3174_v58 = vrot.slane %v3172_v63, 1  ;;  %v3177_v63 = vshrl.u32 %v8474_v20, 16 }
 0x3f7   : > { %3304 = vrot.lane.b32.xlu1 %v3163_v36, %s6664_s17  ;;  %3911 = vmatmul.mubr.bf16.gmra.mrb[32].mxu0 %v3693_v14  ;;  %v8492_v42 = vsel %vm1962_vm9, %v3257_v15, %v3258_v12 }
 0x3f8   : > { %6251 = vmatprep.mubr.msk.bf16.mxu0 %vm2252_vm11, %v8182_v21  ;;  %v3349_v22 = vpop.permute.xlu0 %3348  ;;  %v3165_v21 = vshrl.u32 %v8446_v2, 16 }
 0x3f9   : > { %v3289_v54 = vpop.permute.xlu1 %3288  ;;  %v3565_v4 = vsel %vm2317_vm12, %v3533_v52, %v3349_v22  ;;  %v3184_v52 = vshll.u32 %v3006_v27, 16 }
 0x3fa   : > { %3428 = vrot.lane.b32.xlu0 %v8465_v23, %s6666_s16  ;;  %v3170_v37 = vor.u32 %v3169_v10, %v3165_v21  ;;  %v3597_v55 = vsel %vm1185_vm4, %v3565_v4, %v3381_v29  ;;  %v3181_v10 = vrot.slane %v3179_v26, 1  ;;  %v2940_v21 = vrot.slane %v2938_v39, 7 }
 0x3fb   : > { %3460 = vrot.lane.b32.xlu1 %v8446_v2, %s6661_s14  ;;  %v3186_v39 = vrot.slane %v3184_v52, 1 }
 0x3fc   : > { %v3413_v36 = vpop.permute.xlu0 %3412  ;;  %v3175_v49 = vsel %vm1737_vm10, %v3170_v37, %v3174_v58  ;;  %v3182_v37 = vor.u32 %v3181_v10, %v3177_v63 }
 0x3fd   : > { %v3445_v57 = vpop.permute.xlu1 %3444  ;;  %v3629_v14 = vsel %vm2382_vm13, %v3597_v55, %v3413_v36  ;;  %v2941_v36 = vshll.u32 %v8410_v3, 16 }
 0x3fe   : > { %3334 = vrot.lane.b32.xlu0 %v8465_v23, %s6662_s15  ;;  %v3661_v29 = vsel %vm1218_vm5, %v3629_v14, %v3445_v57  ;;  %v3505_v57 = vsel %vm2252_vm11, %v8128_v0, %v3289_v54  ;;  %v3187_v12 = vsel %vm1737_vm10, %v3182_v37, %v3186_v39  ;;  %v3261_v37 = vrot.slane %v3006_v27, 1 }
 0x3ff   : > { %3366 = vrot.lane.b32.xlu1 %v8446_v2, %s6665_s21  ;;  %v2943_v15 = vor.u32 %v2941_v36, %v2940_v21 }
 0x400   : > { %v3319_v56 = vpop.permute.xlu0 %3318 }
 0x401   : > { %v3351_v22 = vpop.permute.xlu1 %3350  ;;  %v3535_v58 = vsel %vm1136_vm3, %v3505_v57, %v3319_v56  ;;  %v2991_v14 = vsel %vm7178_vm8, 0, %v2943_v15 }
 0x402   : > { %3490 = vrot.lane.b32.xlu0 %v3175_v49, %s6667_s20  ;;  %v3567_v10 = vsel %vm2317_vm12, %v3535_v58, %v3351_v22  ;;  %v3266_v0 = vshll.u32 %v2991_v14, 16  ;;  %v3260_v22 = vrot.slane %v8474_v20, 1 }
 0x403   : > { %3430 = vrot.lane.b32.xlu1 %v8492_v42, %s6666_s16 }
 0x404   : > { %v3475_v51 = vpop.permute.xlu0 %3474  ;;  %v3268_v52 = vrot.slane %v3266_v0, 1 }
 0x405   : > { %v3696_v47 = vsel %vm2447_vm14, %v3661_v29, %v3475_v51  ;;  %v3415_v4 = vpop.permute.xlu1 %3414  ;;  %v3007_v51 = vsel %vm7178_vm8, %v2940_v21, 0 }
 0x406   : > { %3398 = vrot.lane.b32.xlu0 %v3175_v49, %s6660_s22  ;;  %3919 = vmatmul.mubr.bf16.gmra.mrb[36].mxu0 %v3696_v47  ;;  %v3271_v15 = vshll.u32 %v3007_v51, 16 }
 0x407   : > { %3336 = vrot.lane.b32.xlu1 %v8492_v42, %s6662_s15  ;;  %6252 = vmatprep.mubr.msk.bf16.mxu0 %vm2252_vm11, %v8216_v45 }
 0x408   : > { %v3383_v26 = vpop.permute.xlu0 %3382  ;;  %v3273_v27 = vrot.slane %v3271_v15, 1 }
 0x409   : > { %v3321_v55 = vpop.permute.xlu1 %3320  ;;  %v3599_v29 = vsel %vm1185_vm4, %v3567_v10, %v3383_v26  ;;  %v8532_v26 = vsel %vm1962_vm9, %v3260_v22, %v3261_v37 }
 0x40a   : > { %3306 = vrot.lane.b32.xlu0 %v3175_v49, %s6664_s17  ;;  %v3631_v56 = vsel %vm2382_vm13, %v3599_v29, %v3415_v4  ;;  %v3264_v4 = vshrl.u32 %v2991_v14, 16 }
 0x40b   : > { %3492 = vrot.lane.b32.xlu1 %v3187_v12, %s6667_s20 }
 0x40c   : > { %v3291_v45 = vpop.permute.xlu0 %3290  ;;  %v3269_v39 = vor.u32 %v3268_v52, %v3264_v4 }
 0x40d   : > { %v3477_v54 = vpop.permute.xlu1 %3476  ;;  %v3507_v57 = vsel %vm2252_vm11, %v8162_v34, %v3291_v45  ;;  %v3277_v34 = vrot.slane %v2991_v14, 1 }
 0x40e   : > { %3462 = vrot.lane.b32.xlu0 %v8474_v20, %s6661_s14  ;;  %v3274_v29 = vsel %vm1737_vm10, %v3269_v39, %v3273_v27 }
 0x40f   : > { %3400 = vrot.lane.b32.xlu1 %v3187_v12, %s6660_s22 }
 0x410   : > { %v3447_v49 = vpop.permute.xlu0 %3446 }
 0x411   : > { %v3663_v63 = vsel %vm1218_vm5, %v3631_v56, %v3447_v49  ;;  %v3385_v36 = vpop.permute.xlu1 %3384  ;;  %v3278_v56 = vrot.slane %v3007_v51, 1 }
 0x412   : > { %3368 = vrot.lane.b32.xlu0 %v8474_v20, %s6665_s21  ;;  %v3699_v47 = vsel %vm2447_vm14, %v3663_v63, %v3477_v54 }
 0x413   : > { %3308 = vrot.lane.b32.xlu1 %v3187_v12, %s6664_s17  ;;  %3927 = vmatmul.mubr.bf16.gmra.mrb[40].mxu0 %v3699_v47  ;;  %v3537_v12 = vsel %vm1136_vm3, %v3507_v57, %v3321_v55  ;;  %v8547_v55 = vsel %vm1962_vm9, %v3277_v34, %v3278_v56 }
 0x414   : > { %6253 = vmatprep.mubr.msk.bf16.mxu0 %vm2252_vm11, %v8246_v41  ;;  %v3353_v21 = vpop.permute.xlu0 %3352 }
 0x415   : > { %v3293_v58 = vpop.permute.xlu1 %3292  ;;  %v3569_v41 = vsel %vm2317_vm12, %v3537_v12, %v3353_v21 }
 0x416   : > { %3432 = vrot.lane.b32.xlu0 %v8532_v26, %s6666_s16  ;;  %v3601_v45 = vsel %vm1185_vm4, %v3569_v41, %v3385_v36  ;;  %v3509_v51 = vsel %vm2252_vm11, %v8188_v16, %v3293_v58 }
 0x417   : > { %3464 = vrot.lane.b32.xlu1 %v2991_v14, %s6661_s14 }
 0x418   : > { %v3417_v10 = vpop.permute.xlu0 %3416 }
 0x419   : > { %v3449_v0 = vpop.permute.xlu1 %3448  ;;  %v3633_v49 = vsel %vm2382_vm13, %v3601_v45, %v3417_v10 }
 0x41a   : > { %3494 = vrot.lane.b32.xlu0 %v3274_v29, %s6667_s20  ;;  %v3665_v22 = vsel %vm1218_vm5, %v3633_v49, %v3449_v0 }
 0x41b   : > { %3370 = vrot.lane.b32.xlu1 %v2991_v14, %s6665_s21 }
 0x41c   : > { %v3323_v54 = vpop.permute.xlu0 %3322 }
 0x41d   : > { %v3355_v63 = vpop.permute.xlu1 %3354  ;;  %v3539_v37 = vsel %vm1136_vm3, %v3509_v51, %v3323_v54 }
 0x41e   : > { %3338 = vrot.lane.b32.xlu0 %v8532_v26, %s6662_s15  ;;  %v3571_v15 = vsel %vm2317_vm12, %v3539_v37, %v3355_v63 }
 0x41f   : > { %3434 = vrot.lane.b32.xlu1 %v8547_v55, %s6666_s16 }
 0x420   : > { %v3479_v52 = vpop.permute.xlu0 %3478 }
 0x421   : > { %v3702_v14 = vsel %vm2447_vm14, %v3665_v22, %v3479_v52  ;;  %v3419_v36 = vpop.permute.xlu1 %3418 }
 0x422   : > { %3402 = vrot.lane.b32.xlu0 %v3274_v29, %s6660_s22  ;;  %3935 = vmatmul.mubr.bf16.gmra.mrb[44].mxu0 %v3702_v14 }
 0x423   : > { %6254 = vmatprep.mubr.msk.bf16.mxu0 %vm2252_vm11, %v8301_v35 }
 0x424   : > { %v3387_v47 = vpop.permute.xlu0 %3386 }
 0x425   : > { %v3325_v4 = vpop.permute.xlu1 %3324  ;;  %v3603_v57 = vsel %vm1185_vm4, %v3571_v15, %v3387_v47 }
 0x426   : > { %v3635_v27 = vsel %vm2382_vm13, %v3603_v57, %v3419_v36 }
 0x428   : > { %v3295_v21 = vpop.permute.xlu0 %3294 }
 0x429   : > { %v3481_v39 = vpop.permute.xlu1 %3480  ;;  %v3511_v58 = vsel %vm2252_vm11, %v8222_v31, %v3295_v21 }
 0x42a   : > { %v3541_v0 = vsel %vm1136_vm3, %v3511_v58, %v3325_v4 }
 0x42c   : > { %v3451_v12 = vpop.permute.xlu0 %3450 }
 0x42d   : > { %v3667_v10 = vsel %vm1218_vm5, %v3635_v27, %v3451_v12  ;;  %v3389_v41 = vpop.permute.xlu1 %3388 }
 0x42e   : > { %v3705_v35 = vsel %vm2447_vm14, %v3667_v10, %v3481_v39 }
 0x42f   : > { %3943 = vmatmul.mubr.bf16.gmra.mrb[48].mxu0 %v3705_v35 }
 0x430   : > { %6255 = vmatprep.mubr.msk.bf16.mxu0 %vm2252_vm11, %v8328_v40  ;;  %v3357_v16 = vpop.permute.xlu0 %3356 }
 0x431   : > { %v3297_v29 = vpop.permute.xlu1 %3296  ;;  %v3573_v45 = vsel %vm2317_vm12, %v3541_v0, %v3357_v16 }
 0x432   : > { %v3605_v56 = vsel %vm1185_vm4, %v3573_v45, %v3389_v41  ;;  %v3513_v31 = vsel %vm2252_vm11, %v8254_v5, %v3297_v29 }
 0x434   : > { %v3421_v34 = vpop.permute.xlu0 %3420 }
 0x435   : > { %v3453_v54 = vpop.permute.xlu1 %3452  ;;  %v3637_v63 = vsel %vm2382_vm13, %v3605_v56, %v3421_v34 }
 0x436   : > { %v3669_v52 = vsel %vm1218_vm5, %v3637_v63, %v3453_v54 }
 0x438   : > { %v3327_v49 = vpop.permute.xlu0 %3326 }
 0x439   : > { %v3359_v22 = vpop.permute.xlu1 %3358  ;;  %v3543_v47 = vsel %vm1136_vm3, %v3513_v31, %v3327_v49 }
 0x43a   : > { %v3575_v4 = vsel %vm2317_vm12, %v3543_v47, %v3359_v22 }
 0x43c   : > { %v3483_v40 = vpop.permute.xlu0 %3482 }
 0x43d   : > { %v3708_v14 = vsel %vm2447_vm14, %v3669_v52, %v3483_v40  ;;  %v3423_v36 = vpop.permute.xlu1 %3422 }
 0x43e   : > { %3951 = vmatmul.mubr.bf16.gmra.mrb[52].mxu0 %v3708_v14 }
 0x43f   : > { %6256 = vmatprep.mubr.msk.bf16.mxu0 %vm2252_vm11, %v8387_v8 }
 0x440   : > { %v3391_v51 = vpop.permute.xlu0 %3390 }
 0x441   : > { %v3329_v37 = vpop.permute.xlu1 %3328  ;;  %v3607_v21 = vsel %vm1185_vm4, %v3575_v4, %v3391_v51 }
 0x442   : > { %v3639_v39 = vsel %vm2382_vm13, %v3607_v21, %v3423_v36 }
 0x444   : > { %v3299_v15 = vpop.permute.xlu0 %3298 }
 0x445   : > { %v3485_v57 = vpop.permute.xlu1 %3484  ;;  %v3515_v41 = vsel %vm2252_vm11, %v8277_v9, %v3299_v15 }
 0x446   : > { %v3545_v16 = vsel %vm1136_vm3, %v3515_v41, %v3329_v37 }
 0x448   : > { %v3455_v27 = vpop.permute.xlu0 %3454 }
 0x449   : > { %v3671_v12 = vsel %vm1218_vm5, %v3639_v39, %v3455_v27  ;;  %v3393_v10 = vpop.permute.xlu1 %3392 }
 0x44a   : > { %v3711_v8 = vsel %vm2447_vm14, %v3671_v12, %v3485_v57 }
 0x44b   : > { %3959 = vmatmul.mubr.bf16.gmra.mrb[56].mxu0 %v3711_v8 }
 0x44c   : > { %6257 = vmatprep.mubr.msk.bf16.mxu0 %vm2252_vm11, %v8419_v62  ;;  %v3361_v5 = vpop.permute.xlu0 %3360 }
 0x44d   : > { %v3301_v35 = vpop.permute.xlu1 %3300  ;;  %v3577_v29 = vsel %vm2317_vm12, %v3545_v16, %v3361_v5 }
 0x44e   : > { %v3609_v34 = vsel %vm1185_vm4, %v3577_v29, %v3393_v10  ;;  %v3517_v9 = vsel %vm2252_vm11, %v8313_v17, %v3301_v35 }
 0x450   : > { %v3425_v58 = vpop.permute.xlu0 %3424 }
 0x451   : > { %v3457_v0 = vpop.permute.xlu1 %3456  ;;  %v3641_v54 = vsel %vm2382_vm13, %v3609_v34, %v3425_v58 }
 0x452   : > { %v3673_v49 = vsel %vm1218_vm5, %v3641_v54, %v3457_v0 }
 0x454   : > { %v3331_v45 = vpop.permute.xlu0 %3330 }
 0x455   : > { %v3363_v56 = vpop.permute.xlu1 %3362  ;;  %v3547_v40 = vsel %vm1136_vm3, %v3517_v9, %v3331_v45 }
 0x456   : > { %v3579_v36 = vsel %vm2317_vm12, %v3547_v40, %v3363_v56 }
 0x458   : > { %v3487_v62 = vpop.permute.xlu0 %3486 }
 0x459   : > { %v3714_v63 = vsel %vm2447_vm14, %v3673_v49, %v3487_v62  ;;  %v3427_v22 = vpop.permute.xlu1 %3426 }
 0x45a   : > { %3967 = vmatmul.mubr.bf16.gmra.mrb[60].mxu0 %v3714_v63 }
 0x45b   : > { %6258 = vmatprep.mubr.msk.bf16.mxu0 %vm2252_vm11, %v8465_v23 }
 0x45c   : > { %v3395_v52 = vpop.permute.xlu0 %3394 }
 0x45d   : > { %v3333_v14 = vpop.permute.xlu1 %3332  ;;  %v3611_v51 = vsel %vm1185_vm4, %v3579_v36, %v3395_v52 }
 0x45e   : > { %v3643_v37 = vsel %vm2382_vm13, %v3611_v51, %v3427_v22 }
 0x460   : > { %v3303_v31 = vpop.permute.xlu0 %3302 }
 0x461   : > { %v3489_v47 = vpop.permute.xlu1 %3488  ;;  %v3519_v57 = vsel %vm2252_vm11, %v8369_v28, %v3303_v31 }
 0x462   : > { %v3549_v27 = vsel %vm1136_vm3, %v3519_v57, %v3333_v14 }
 0x464   : > { %v3459_v4 = vpop.permute.xlu0 %3458 }
 0x465   : > { %v3675_v15 = vsel %vm1218_vm5, %v3643_v37, %v3459_v4  ;;  %v3397_v21 = vpop.permute.xlu1 %3396 }
 0x466   : > { %v3717_v23 = vsel %vm2447_vm14, %v3675_v15, %v3489_v47 }
 0x467   : > { %3975 = vmatmul.mubr.bf16.gmra.mrb[64].mxu0 %v3717_v23 }
 0x468   : > { %6259 = vmatprep.mubr.msk.bf16.mxu0 %vm2252_vm11, %v8492_v42  ;;  %v3365_v17 = vpop.permute.xlu0 %3364 }
 0x469   : > { %v3305_v39 = vpop.permute.xlu1 %3304  ;;  %v3581_v10 = vsel %vm2317_vm12, %v3549_v27, %v3365_v17 }
 0x46a   : > { %v3613_v5 = vsel %vm1185_vm4, %v3581_v10, %v3397_v21  ;;  %v3521_v28 = vsel %vm2252_vm11, %v8399_v38, %v3305_v39 }
 0x46c   : > { %v3429_v12 = vpop.permute.xlu0 %3428 }
 0x46d   : > { %v3461_v8 = vpop.permute.xlu1 %3460  ;;  %v3645_v35 = vsel %vm2382_vm13, %v3613_v5, %v3429_v12 }
 0x46e   : > { %v3677_v58 = vsel %vm1218_vm5, %v3645_v35, %v3461_v8 }
 0x470   : > { %v3335_v41 = vpop.permute.xlu0 %3334 }
 0x471   : > { %v3367_v16 = vpop.permute.xlu1 %3366  ;;  %v3551_v45 = vsel %vm1136_vm3, %v3521_v28, %v3335_v41 }
 0x472   : > { %v3583_v56 = vsel %vm2317_vm12, %v3551_v45, %v3367_v16 }
 0x474   : > { %v3491_v42 = vpop.permute.xlu0 %3490 }
 0x475   : > { %v3720_v29 = vsel %vm2447_vm14, %v3677_v58, %v3491_v42  ;;  %v3431_v0 = vpop.permute.xlu1 %3430 }
 0x476   : > { %3983 = vmatmul.mubr.bf16.gmra.mrb[68].mxu0 %v3720_v29 }
 0x477   : > { %6260 = vmatprep.mubr.msk.bf16.mxu0 %vm2252_vm11, %v8532_v26 }
 0x478   : > { %v3399_v34 = vpop.permute.xlu0 %3398 }
 0x479   : > { %v3337_v54 = vpop.permute.xlu1 %3336  ;;  %v3615_v62 = vsel %vm1185_vm4, %v3583_v56, %v3399_v34 }
 0x47a   : > { %v3647_v22 = vsel %vm2382_vm13, %v3615_v62, %v3431_v0 }
 0x47c   : > { %v3307_v49 = vpop.permute.xlu0 %3306 }
 0x47d   : > { %v3493_v63 = vpop.permute.xlu1 %3492  ;;  %v3523_v52 = vsel %vm2252_vm11, %v8446_v2, %v3307_v49 }
 0x47e   : > { %v3553_v14 = vsel %vm1136_vm3, %v3523_v52, %v3337_v54 }
 0x480   : > { %v3463_v9 = vpop.permute.xlu0 %3462 }
 0x481   : > { %v3679_v26 = vsel %vm1218_vm5, %v3647_v22, %v3463_v9  ;;  %v3401_v40 = vpop.permute.xlu1 %3400 }
 0x482   : > { %v3723_v38 = vsel %vm2447_vm14, %v3679_v26, %v3493_v63 }
 0x483   : > { %3991 = vmatmul.mubr.bf16.gmra.mrb[72].mxu0 %v3723_v38 }
 0x484   : > { %6261 = vmatprep.mubr.msk.bf16.mxu0 %vm2252_vm11, %v8547_v55  ;;  %v3369_v36 = vpop.permute.xlu0 %3368 }
 0x485   : > { %v3585_v31 = vsel %vm2317_vm12, %v3553_v14, %v3369_v36  ;;  %v3309_v51 = vpop.permute.xlu1 %3308 }
 0x486   : > { %v3617_v47 = vsel %vm1185_vm4, %v3585_v31, %v3401_v40  ;;  %v3525_v55 = vsel %vm2252_vm11, %v8474_v20, %v3309_v51  ;;  %v8649_v20 = vld [vmem:[%s9654_s6] ss:$0 sm:$0xff] }
 0x488   : > { %v3433_v37 = vpop.permute.xlu0 %3432 }
 0x489   : > { %v3649_v2 = vsel %vm2382_vm13, %v3617_v47, %v3433_v37  ;;  %v3465_v4 = vpop.permute.xlu1 %3464 }
 0x48a   : > { %v3681_v15 = vsel %vm1218_vm5, %v3649_v2, %v3465_v4 }
 0x48c   : > { %v3495_v21 = vpop.permute.xlu0 %3494 }
 0x48d   : > { %v3726_v23 = vsel %vm2447_vm14, %v3681_v15, %v3495_v21  ;;  %v3371_v17 = vpop.permute.xlu1 %3370 }
 0x48e   : > { %3999 = vmatmul.mubr.bf16.gmra.mrb[76].mxu0 %v3726_v23 }
 0x48f   : > { %6262 = vmatprep.mubr.msk.bf16.mxu0 %vm2252_vm11, %v9702_v13 }
 0x490   : > { %v3339_v57 = vpop.permute.xlu0 %3338 }
 0x491   : > { %v3555_v39 = vsel %vm1136_vm3, %v3525_v55, %v3339_v57  ;;  %v3435_v10 = vpop.permute.xlu1 %3434 }
 0x492   : > { %v3587_v27 = vsel %vm2317_vm12, %v3555_v39, %v3371_v17 }
 0x494   : > { %v3403_v12 = vpop.permute.xlu0 %3402 }
 0x495   : > { %v3619_v8 = vsel %vm1185_vm4, %v3587_v27, %v3403_v12 }
 0x496   : > { %v3651_v5 = vsel %vm2382_vm13, %v3619_v8, %v3435_v10 }
 0x497   : > { %v3682_v41 = vsel %vm1218_vm5, %v3651_v5, %v7965_v24 }
 0x498   : > { %v3728_v35 = vsel %vm2447_vm14, %v3682_v41, %v7962_v61 }
 0x499   : > { %4007 = vmatmul.mubr.bf16.gmra.mrb[80].mxu0 %v3728_v35 }
 0x49d   : > { %v3888_v16 = vpop.f32.mrb[20].mxu0 }
 0x49e   : > { %v3889_v58 = vadd.f32 %v8649_v20, %v3888_v16  ;;  %v3890_v42 = vpop.f32.mrb[21].mxu0 }
 0x49f   : > { %v3891_v29 = vpop.f32.mrb[22].mxu0 }
 0x4a0   : > { %v3892_v0 = vadd.f32 %v8649_v20, %v3891_v29  ;;  %v3893_v28 = vpop.f32.mrb[23].mxu0  ;;  %v4015_v34 = vmax.f32 %v3889_v58, 0.0 }
 0x4a2   : > { %v4016_v45 = vmax.f32 %v3892_v0, 0.0 }
 0x4a4   : > { %v4047_v54 = vpack.c.bf16 %v4016_v45, %v4015_v34 }
 0x4a6   : > { %6498 = vmatprep.mubr.msk.bf16.mxu1 %vm4071_vm0, %v4047_v54 }
 0x4aa   : > { %v3896_v56 = vpop.f32.mrb[24].mxu0 }
 0x4ab   : > { %v3897_v49 = vadd.f32 %v8649_v20, %v3896_v56  ;;  %v3898_v62 = vpop.f32.mrb[25].mxu0 }
 0x4ac   : > { %v3899_v63 = vpop.f32.mrb[26].mxu0 }
 0x4ad   : > { %v3900_v22 = vadd.f32 %v8649_v20, %v3899_v63  ;;  %v3901_v9 = vpop.f32.mrb[27].mxu0  ;;  %v4017_v52 = vmax.f32 %v3897_v49, 0.0 }
 0x4af   : > { %v4018_v26 = vmax.f32 %v3900_v22, 0.0 }
 0x4b1   : > { %v4048_v40 = vpack.c.bf16 %v4018_v26, %v4017_v52 }
 0x4b3   : > { %6499 = vmatmul.mubr.msk.bf16.vlgmr.msra.gmra.mrb[76].mxu1 %vm4071_vm0, %v4048_v40 }
 0x4bd   : > { %v3904_v38 = vpop.f32.mrb[28].mxu0 }
 0x4be   : > { %v3905_v14 = vadd.f32 %v8649_v20, %v3904_v38  ;;  %v3906_v36 = vpop.f32.mrb[29].mxu0 }
 0x4bf   : > { %v3907_v31 = vpop.f32.mrb[30].mxu0 }
 0x4c0   : > { %v3908_v51 = vadd.f32 %v8649_v20, %v3907_v31  ;;  %v3909_v47 = vpop.f32.mrb[31].mxu0  ;;  %v4019_v37 = vmax.f32 %v3905_v14, 0.0 }
 0x4c2   : > { %v4020_v2 = vmax.f32 %v3908_v51, 0.0 }
 0x4c4   : > { %v4049_v4 = vpack.c.bf16 %v4020_v2, %v4019_v37 }
 0x4c6   : > { %6502 = vmatprep.mubr.msk.bf16.mxu1 %vm4071_vm0, %v4049_v4 }
 0x4ca   : > { %v3912_v15 = vpop.f32.mrb[32].mxu0 }
 0x4cb   : > { %v3913_v21 = vadd.f32 %v8649_v20, %v3912_v15  ;;  %v3914_v23 = vpop.f32.mrb[33].mxu0 }
 0x4cc   : > { %v3915_v17 = vpop.f32.mrb[34].mxu0 }
 0x4cd   : > { %v3916_v55 = vadd.f32 %v8649_v20, %v3915_v17  ;;  %v3917_v57 = vpop.f32.mrb[35].mxu0  ;;  %v4021_v39 = vmax.f32 %v3913_v21, 0.0 }
 0x4cf   : > { %v4022_v27 = vmax.f32 %v3916_v55, 0.0 }
 0x4d1   : > { %v4050_v12 = vpack.c.bf16 %v4022_v27, %v4021_v39 }
 0x4d3   : > { %6503 = vmatmul.mubr.msk.bf16.gmra.mrb[80].mxu1 %vm4071_vm0, %v4050_v12 }
 0x4d9   : > { %v3920_v10 = vpop.f32.mrb[36].mxu0 }
 0x4da   : > { %v3921_v8 = vadd.f32 %v8649_v20, %v3920_v10  ;;  %v3922_v5 = vpop.f32.mrb[37].mxu0 }
 0x4db   : > { %v3923_v41 = vpop.f32.mrb[38].mxu0 }
 0x4dc   : > { %v3924_v35 = vadd.f32 %v8649_v20, %v3923_v41  ;;  %v3925_v16 = vpop.f32.mrb[39].mxu0  ;;  %v4023_v58 = vmax.f32 %v3921_v8, 0.0 }
 0x4de   : > { %v4024_v42 = vmax.f32 %v3924_v35, 0.0 }
 0x4e0   : > { %v4051_v29 = vpack.c.bf16 %v4024_v42, %v4023_v58 }
 0x4e2   : > { %6506 = vmatprep.mubr.msk.bf16.mxu1 %vm4071_vm0, %v4051_v29 }
 0x4e6   : > { %v3928_v0 = vpop.f32.mrb[40].mxu0 }
 0x4e7   : > { %v3929_v28 = vadd.f32 %v8649_v20, %v3928_v0  ;;  %v3930_v34 = vpop.f32.mrb[41].mxu0 }
 0x4e8   : > { %v3931_v45 = vpop.f32.mrb[42].mxu0 }
 0x4e9   : > { %v3932_v54 = vadd.f32 %v8649_v20, %v3931_v45  ;;  %v3933_v56 = vpop.f32.mrb[43].mxu0  ;;  %v4025_v49 = vmax.f32 %v3929_v28, 0.0 }
 0x4eb   : > { %v4026_v62 = vmax.f32 %v3932_v54, 0.0 }
 0x4ed   : > { %v4052_v63 = vpack.c.bf16 %v4026_v62, %v4025_v49 }
 0x4ef   : > { %6507 = vmatmul.mubr.msk.bf16.gmra.mrb[84].mxu1 %vm4071_vm0, %v4052_v63 }
 0x4f5   : > { %v3936_v22 = vpop.f32.mrb[44].mxu0 }
 0x4f6   : > { %v3937_v9 = vadd.f32 %v8649_v20, %v3936_v22  ;;  %v3938_v52 = vpop.f32.mrb[45].mxu0 }
 0x4f7   : > { %v3939_v26 = vpop.f32.mrb[46].mxu0 }
 0x4f8   : > { %v3940_v40 = vadd.f32 %v8649_v20, %v3939_v26  ;;  %v3941_v38 = vpop.f32.mrb[47].mxu0  ;;  %v4027_v14 = vmax.f32 %v3937_v9, 0.0 }
 0x4fa   : > { %v4028_v36 = vmax.f32 %v3940_v40, 0.0 }
 0x4fc   : > { %v4053_v31 = vpack.c.bf16 %v4028_v36, %v4027_v14 }
 0x4fe   : > { %6510 = vmatprep.mubr.msk.bf16.mxu1 %vm4071_vm0, %v4053_v31 }
 0x502   : > { %v3944_v51 = vpop.f32.mrb[48].mxu0 }
 0x503   : > { %v3945_v47 = vadd.f32 %v8649_v20, %v3944_v51  ;;  %v3946_v37 = vpop.f32.mrb[49].mxu0 }
 0x504   : > { %v3947_v2 = vpop.f32.mrb[50].mxu0 }
 0x505   : > { %v3948_v4 = vadd.f32 %v8649_v20, %v3947_v2  ;;  %v3949_v15 = vpop.f32.mrb[51].mxu0  ;;  %v4029_v21 = vmax.f32 %v3945_v47, 0.0 }
 0x507   : > { %v4030_v23 = vmax.f32 %v3948_v4, 0.0 }
 0x509   : > { %v4054_v17 = vpack.c.bf16 %v4030_v23, %v4029_v21 }
 0x50b   : > { %6511 = vmatmul.mubr.msk.bf16.gmra.mrb[88].mxu1 %vm4071_vm0, %v4054_v17 }
 0x511   : > { %v3952_v55 = vpop.f32.mrb[52].mxu0 }
 0x512   : > { %v3953_v57 = vadd.f32 %v8649_v20, %v3952_v55  ;;  %v3954_v39 = vpop.f32.mrb[53].mxu0 }
 0x513   : > { %v3955_v27 = vpop.f32.mrb[54].mxu0 }
 0x514   : > { %v3956_v12 = vadd.f32 %v8649_v20, %v3955_v27  ;;  %v3957_v10 = vpop.f32.mrb[55].mxu0  ;;  %v4031_v8 = vmax.f32 %v3953_v57, 0.0 }
 0x516   : > { %v4032_v5 = vmax.f32 %v3956_v12, 0.0 }
 0x518   : > { %v4055_v41 = vpack.c.bf16 %v4032_v5, %v4031_v8 }
 0x51a   : > { %6514 = vmatprep.mubr.msk.bf16.mxu1 %vm4071_vm0, %v4055_v41 }
 0x51e   : > { %v3960_v35 = vpop.f32.mrb[56].mxu0 }
 0x51f   : > { %v3961_v16 = vadd.f32 %v8649_v20, %v3960_v35  ;;  %v3962_v58 = vpop.f32.mrb[57].mxu0 }
 0x520   : > { %v3963_v42 = vpop.f32.mrb[58].mxu0 }
 0x521   : > { %v3964_v29 = vadd.f32 %v8649_v20, %v3963_v42  ;;  %v3965_v0 = vpop.f32.mrb[59].mxu0  ;;  %v4033_v28 = vmax.f32 %v3961_v16, 0.0 }
 0x523   : > { %v4034_v34 = vmax.f32 %v3964_v29, 0.0 }
 0x525   : > { %v4056_v45 = vpack.c.bf16 %v4034_v34, %v4033_v28 }
 0x527   : > { %6515 = vmatmul.mubr.msk.bf16.gmra.mrb[92].mxu1 %vm4071_vm0, %v4056_v45 }
 0x52d   : > { %v3968_v54 = vpop.f32.mrb[60].mxu0 }
 0x52e   : > { %v3969_v56 = vadd.f32 %v8649_v20, %v3968_v54  ;;  %v3970_v49 = vpop.f32.mrb[61].mxu0 }
 0x52f   : > { %v3971_v62 = vpop.f32.mrb[62].mxu0 }
 0x530   : > { %v3972_v63 = vadd.f32 %v8649_v20, %v3971_v62  ;;  %v3973_v22 = vpop.f32.mrb[63].mxu0  ;;  %v4035_v9 = vmax.f32 %v3969_v56, 0.0 }
 0x532   : > { %v4036_v52 = vmax.f32 %v3972_v63, 0.0 }
 0x534   : > { %v4057_v26 = vpack.c.bf16 %v4036_v52, %v4035_v9 }
 0x536   : > { %6518 = vmatprep.mubr.msk.bf16.mxu1 %vm4071_vm0, %v4057_v26 }
 0x53a   : > { %v3976_v40 = vpop.f32.mrb[64].mxu0 }
 0x53b   : > { %v3977_v38 = vadd.f32 %v8649_v20, %v3976_v40  ;;  %v3978_v14 = vpop.f32.mrb[65].mxu0 }
 0x53c   : > { %v3979_v36 = vpop.f32.mrb[66].mxu0 }
 0x53d   : > { %v3980_v31 = vadd.f32 %v8649_v20, %v3979_v36  ;;  %v3981_v51 = vpop.f32.mrb[67].mxu0  ;;  %v4037_v47 = vmax.f32 %v3977_v38, 0.0  ;;  %v6642_v36 = vld [vmem:[%s9657_s9] sm:$0xff]  }
 0x53e   : > { %5420 = vmatpush1.bf16.msra.mxu0 %v6642_v36  ;;  %v6643_v51 = vld [vmem:[%s9657_s9 + $0x8] sm:$0xff]  }
 0x53f   : > { %v4038_v37 = vmax.f32 %v3980_v31, 0.0  ;;  %5421 = vmatprep.subr.bf16.mxu0 %v9703_v11 }
 0x541   : > { %v4058_v2 = vpack.c.bf16 %v4038_v37, %v4037_v47  ;;  %v6644_v47 = vld [vmem:[%s9657_s9 + $0x10] sm:$0xff]  }
 0x542   : > { %5422 = vmatpush1.bf16.msra.mxu0 %v6643_v51 }
 0x543   : > { %6519 = vmatmul.mubr.msk.bf16.gmra.mrb[96].mxu1 %vm4071_vm0, %v4058_v2  ;;  %5423 = vmatprep.subr.bf16.mxu0 %v9703_v11 }
 0x546   : > { %5424 = vmatpush1.bf16.msra.mxu0 %v6644_v47 }
 0x547   : > { %5425 = vmatprep.subr.bf16.mxu0 %v9703_v11 }
 0x549   : > { %v3984_v4 = vpop.f32.mrb[68].mxu0 }
 0x54a   : > { %v3985_v15 = vadd.f32 %v8649_v20, %v3984_v4  ;;  %v3986_v21 = vpop.f32.mrb[69].mxu0  ;;  %v4287_v4 = vunpack.c.l.bf16 %v8027_v46 }
 0x54b   : > { %v3987_v23 = vpop.f32.mrb[70].mxu0 }
 0x54c   : > { %v3988_v17 = vadd.f32 %v8649_v20, %v3987_v23  ;;  %v3989_v55 = vpop.f32.mrb[71].mxu0  ;;  %v4039_v57 = vmax.f32 %v3985_v15, 0.0  ;;  %v4285_v23 = vunpack.c.l.bf16 %v7978_v19 }
 0x54e   : > { %v4040_v39 = vmax.f32 %v3988_v17, 0.0 }
 0x550   : > { %v4059_v27 = vpack.c.bf16 %v4040_v39, %v4039_v57  ;;  %v4288_v39 = vunpack.c.h.bf16 %v8027_v46  ;;  %v6646_v46 = vld [vmem:[%s9657_s9 + $0x20] sm:$0xff]  }
 0x552   : > { %6522 = vmatprep.mubr.msk.bf16.mxu1 %vm4071_vm0, %v4059_v27 }
 0x556   : > { %v3992_v12 = vpop.f32.mrb[72].mxu0 }
 0x557   : > { %v3993_v10 = vadd.f32 %v8649_v20, %v3992_v12  ;;  %v3994_v8 = vpop.f32.mrb[73].mxu0  ;;  %v6645_v12 = vld [vmem:[%s9657_s9 + $0x18] sm:$0xff]  }
 0x558   : > { %v3995_v5 = vpop.f32.mrb[74].mxu0  ;;  %5426 = vmatpush1.bf16.msra.mxu0 %v6645_v12 }
 0x559   : > { %v3996_v41 = vadd.f32 %v8649_v20, %v3995_v5  ;;  %v3997_v35 = vpop.f32.mrb[75].mxu0  ;;  %v4041_v16 = vmax.f32 %v3993_v10, 0.0  ;;  %v4286_v5 = vunpack.c.h.bf16 %v7978_v19  ;;  %5427 = vmatprep.subr.bf16.mxu0 %v9703_v11 }
 0x55b   : > { %v4042_v58 = vmax.f32 %v3996_v41, 0.0 }
 0x55c   : > { %5428 = vmatpush1.bf16.msra.mxu0 %v6646_v46 }
 0x55d   : > { %v4060_v42 = vpack.c.bf16 %v4042_v58, %v4041_v16  ;;  %5429 = vmatprep.subr.bf16.mxu0 %v9703_v11 }
 0x55f   : > { %6523 = vmatmul.mubr.msk.bf16.gmra.mrb[100].mxu1 %vm4071_vm0, %v4060_v42 }
 0x561   : > { %v4000_v29 = vpop.f32.mrb[76].mxu0 }
 0x562   : > { %v4001_v0 = vadd.f32 %v8649_v20, %v4000_v29  ;;  %v4002_v28 = vpop.f32.mrb[77].mxu0 }
 0x563   : > { %v4003_v34 = vpop.f32.mrb[78].mxu0 }
 0x564   : > { %v4004_v45 = vadd.f32 %v8649_v20, %v4003_v34  ;;  %v4005_v54 = vpop.f32.mrb[79].mxu0  ;;  %v4043_v56 = vmax.f32 %v4001_v0, 0.0  ;;  %v6647_v34 = vld [vmem:[%s9657_s9 + $0x28] sm:$0xff]  }
 0x565   : > { %5430 = vmatpush1.bf16.msra.mxu0 %v6647_v34 }
 0x566   : > { %v4044_v49 = vmax.f32 %v4004_v45, 0.0  ;;  %5431 = vmatprep.subr.bf16.mxu0 %v9703_v11 }
 0x568   : > { %v4061_v62 = vpack.c.bf16 %v4044_v49, %v4043_v56 }
 0x56a   : > { %6526 = vmatprep.mubr.msk.bf16.mxu1 %vm4071_vm0, %v4061_v62 }
 0x56c   : > { %v4008_v63 = vpop.f32.mrb[80].mxu0 }
 0x56d   : > { %v4009_v22 = vadd.f32 %v8649_v20, %v4008_v63  ;;  %v4010_v9 = vpop.f32.mrb[81].mxu0 }
 0x56e   : > { %v4011_v52 = vpop.f32.mrb[82].mxu0  ;;  %v6648_v9 = vld [vmem:[%s9657_s9 + $0x30] sm:$0xff]  }
 0x56f   : > { %v4012_v26 = vadd.f32 %v8649_v20, %v4011_v52  ;;  %v4013_v40 = vpop.f32.mrb[83].mxu0  ;;  %v4045_v38 = vmax.f32 %v4009_v22, 0.0  ;;  %v8709_v20 = vld [vmem:[%s9656_s8] ss:$0 sm:$0xff]  ;;  %5432 = vmatpush1.bf16.msra.mxu0 %v6648_v9 }
 0x570   : > { %5433 = vmatprep.subr.bf16.mxu0 %v9703_v11 }
 0x571   : > { %v4046_v14 = vmax.f32 %v4012_v26, 0.0 }
 0x573   : > { %v4062_v31 = vpack.c.bf16 %v4046_v14, %v4045_v38 }
 0x575   : > { %6527 = vmatmul.mubr.msk.bf16.gmra.mrb[104].mxu1 %vm4071_vm0, %v4062_v31 }
 0x586   : > { %v6500_v37 = vpop.f32.mrb[76].mxu1 }
 0x587   : > { %v4167_v2 = vadd.f32 %v6500_v37, %v8709_v20  ;;  %v4158_v15 = vpop.f32.mrb[77].mxu1 }
 0x588   : > { %v4159_v21 = vadd.f32 %v8709_v20, %v4158_v15  ;;  %v6501_v17 = vpop.f32.mrb[78].mxu1  ;;  %v6649_v15 = vld [vmem:[%s9657_s9 + $0x38] sm:$0xff]  }
 0x589   : > { %v4319_v55 = vadd.f32 %v4287_v4, %v4167_v2  ;;  %v4170_v57 = vadd.f32 %v6501_v17, %v8709_v20  ;;  %v4161_v27 = vpop.f32.mrb[79].mxu1  ;;  %5434 = vmatpush1.bf16.msra.mxu0 %v6649_v15 }
 0x58a   : > { %v4317_v10 = vadd.f32 %v4285_v23, %v4159_v21  ;;  %v4162_v8 = vadd.f32 %v8709_v20, %v4161_v27  ;;  %5435 = vmatprep.subr.bf16.mxu0 %v9703_v11 }
 0x58b   : > { %v4320_v41 = vadd.f32 %v4288_v39, %v4170_v57  ;;  %v4351_v16 = vmax.f32 %v4319_v55, 0.0  ;;  %v6650_v57 = vld [vmem:[%s9657_s9 + $0x40] sm:$0xff]  }
 0x58c   : > { %v4318_v35 = vadd.f32 %v4286_v5, %v4162_v8  ;;  %v4349_v42 = vmax.f32 %v4317_v10, 0.0 }
 0x58d   : > { %v4352_v58 = vmax.f32 %v4320_v41, 0.0  ;;  %5436 = vmatpush1.bf16.msra.mxu0 %v6650_v57 }
 0x58e   : > { %v4350_v29 = vmax.f32 %v4318_v35, 0.0 }
 0x58f   : > { %v8731_v0 = vpack.c.bf16 %v4352_v58, %v4351_v16  ;;  %v4291_v16 = vunpack.c.l.bf16 %v8082_v43 }
 0x590   : > { %v8733_v28 = vpack.c.bf16 %v4350_v29, %v4349_v42  ;;  %v4289_v42 = vunpack.c.l.bf16 %v8056_v18 }
 0x591   : > { %v4405_v19 = vshrl.u32 %v8731_v0, 16  ;;  %v4408_v56 = vshll.u32 %v8731_v0, 16 }
 0x592   : > { %v4398_v45 = vshrl.u32 %v8733_v28, 16  ;;  %v4401_v62 = vshll.u32 %v8733_v28, 16 }
 0x593   : > { %v4407_v54 = vrot.slane %v4405_v19, 7 }
 0x594   : > { %v4400_v49 = vrot.slane %v4398_v45, 7 }
 0x595   : > { %v4410_v63 = vor.u32 %v4408_v56, %v4407_v54  ;;  %v4558_v22 = vsel %vm7178_vm8, %v4407_v54, 0  ;;  %v4292_v54 = vunpack.c.h.bf16 %v8082_v43 }
 0x596   : > { %v4403_v52 = vor.u32 %v4401_v62, %v4400_v49  ;;  %v4557_v26 = vsel %vm7178_vm8, %v4400_v49, 0  ;;  %v4787_v36 = vrot.slane %v4558_v22, 1  ;;  %v4593_v17 = vshll.u32 %v4558_v22, 16 }
 0x597   : > { %v8753_v40 = vsel %vm7178_vm8, 0, %v4410_v63  ;;  %v4784_v47 = vrot.slane %v4557_v26, 1  ;;  %v4581_v12 = vshll.u32 %v4557_v26, 16  ;;  %v4290_v63 = vunpack.c.h.bf16 %v8056_v18 }
 0x598   : > { %5001 = vrot.lane.b32.xlu1 %v8753_v40, %s6661_s14  ;;  %v8759_v38 = vsel %vm7178_vm8, 0, %v4403_v52  ;;  %v4786_v14 = vrot.slane %v8753_v40, 1  ;;  %v4588_v31 = vshll.u32 %v8753_v40, 16  ;;  %v4586_v23 = vshrl.u32 %v8753_v40, 16 }
 0x599   : > { %4905 = vrot.lane.b32.xlu0 %v8759_v38, %s6665_s21  ;;  %v4783_v51 = vrot.slane %v8759_v38, 1  ;;  %v4576_v4 = vshll.u32 %v8759_v38, 16  ;;  %v4574_v27 = vshrl.u32 %v8759_v38, 16  ;;  %v4595_v10 = vrot.slane %v4593_v17, 1 }
 0x59a   : > { %v4788_v37 = vsel %vm1962_vm9, %v4786_v14, %v4787_v36  ;;  %v4590_v21 = vrot.slane %v4588_v31, 1  ;;  %v4583_v41 = vrot.slane %v4581_v12, 1 }
 0x59b   : > { %6290 = vmatprep.mubr.msk.bf16.mxu0 %vm2252_vm11, %v4788_v37  ;;  %v4785_v2 = vsel %vm1962_vm9, %v4783_v51, %v4784_v47  ;;  %v4578_v55 = vrot.slane %v4576_v4, 1 }
 0x59c   : > { %4907 = vrot.lane.b32.xlu1 %v8753_v40, %s6665_s21  ;;  %v4591_v39 = vor.u32 %v4590_v21, %v4586_v23 }
 0x59d   : > { %4969 = vrot.lane.b32.xlu0 %v4785_v2, %s6666_s16  ;;  %v4579_v8 = vor.u32 %v4578_v55, %v4574_v27 }
 0x59e   : > { %v4596_v11 = vsel %vm1737_vm10, %v4591_v39, %v4595_v10 }
 0x59f   : > { %v4584_v29 = vsel %vm1737_vm10, %v4579_v8, %v4583_v41 }
 0x5a0   : > { %4971 = vrot.lane.b32.xlu1 %v4788_v37, %s6666_s16 }
 0x5a1   : > { %4875 = vrot.lane.b32.xlu0 %v4785_v2, %s6662_s15 }
 0x5a4   : > { %4877 = vrot.lane.b32.xlu1 %v4788_v37, %s6662_s15 }
 0x5a5   : > { %5031 = vrot.lane.b32.xlu0 %v4596_v11, %s6667_s20 }
 0x5a6   : > { %v6504_v5 = vpop.f32.mrb[80].mxu1 }
 0x5a7   : > { %v4183_v35 = vadd.f32 %v6504_v5, %v8709_v20  ;;  %v4174_v58 = vpop.f32.mrb[81].mxu1 }
 0x5a8   : > { %v4175_v46 = vadd.f32 %v8709_v20, %v4174_v58  ;;  %v6505_v19 = vpop.f32.mrb[82].mxu1  ;;  %4937 = vrot.lane.b32.xlu1 %v4584_v29, %s6660_s22 }
 0x5a9   : > { %v4323_v34 = vadd.f32 %v4291_v16, %v4183_v35  ;;  %v4186_v45 = vadd.f32 %v6505_v19, %v8709_v20  ;;  %v4177_v56 = vpop.f32.mrb[83].mxu1  ;;  %4939 = vrot.lane.b32.xlu0 %v4596_v11, %s6660_s22 }
 0x5aa   : > { %v4321_v49 = vadd.f32 %v4289_v42, %v4175_v46  ;;  %v4178_v62 = vadd.f32 %v8709_v20, %v4177_v56 }
 0x5ab   : > { %v4324_v22 = vadd.f32 %v4292_v54, %v4186_v45  ;;  %v4355_v52 = vmax.f32 %v4323_v34, 0.0  ;;  %v4295_v45 = vunpack.c.l.bf16 %v8140_v6 }
 0x5ac   : > { %v4322_v9 = vadd.f32 %v4290_v63, %v4178_v62  ;;  %4845 = vrot.lane.b32.xlu1 %v4584_v29, %s6664_s17  ;;  %v4353_v14 = vmax.f32 %v4321_v49, 0.0  ;;  %v4293_v62 = vunpack.c.l.bf16 %v8104_v44 }
 0x5ad   : > { %v4356_v26 = vmax.f32 %v4324_v22, 0.0  ;;  %4847 = vrot.lane.b32.xlu0 %v4596_v11, %s6664_s17 }
 0x5ae   : > { %v4354_v36 = vmax.f32 %v4322_v9, 0.0 }
 0x5af   : > { %v8801_v31 = vpack.c.bf16 %v4356_v26, %v4355_v52  ;;  %v4296_v26 = vunpack.c.h.bf16 %v8140_v6 }
 0x5b0   : > { %v8803_v43 = vpack.c.bf16 %v4354_v36, %v4353_v14 }
 0x5b1   : > { %v4419_v51 = vshrl.u32 %v8801_v31, 16  ;;  %v4422_v18 = vshll.u32 %v8801_v31, 16 }
 0x5b2   : > { %9705 = vst [vmem:[#allocation7_spill] sm:$0xff] %v8803_v43  ;;  %v4412_v47 = vshrl.u32 %v8803_v43, 16  ;;  %v4415_v4 = vshll.u32 %v8803_v43, 16 }
 0x5b3   : > { %v4421_v37 = vrot.slane %v4419_v51, 7 }
 0x5b4   : > { %v4414_v2 = vrot.slane %v4412_v47, 7 }
 0x5b5   : > { %v4424_v15 = vor.u32 %v4422_v18, %v4421_v37  ;;  %v4560_v55 = vsel %vm7178_vm8, %v4421_v37, 0  ;;  %v4294_v37 = vunpack.c.h.bf16 %v8104_v44 }
 0x5b6   : > { %v4417_v21 = vor.u32 %v4415_v4, %v4414_v2  ;;  %v4559_v39 = vsel %vm7178_vm8, %v4414_v2, 0  ;;  %v4793_v8 = vrot.slane %v4560_v55, 1  ;;  %v4617_v19 = vshll.u32 %v4560_v55, 16 }
 0x5b7   : > { %v8811_v23 = vsel %vm7178_vm8, 0, %v4424_v15  ;;  %v4790_v11 = vrot.slane %v4559_v39, 1  ;;  %v4605_v46 = vshll.u32 %v4559_v39, 16 }
 0x5b8   : > { %5005 = vrot.lane.b32.xlu1 %v8811_v23, %s6661_s14  ;;  %v8817_v17 = vsel %vm7178_vm8, 0, %v4417_v21  ;;  %v4792_v57 = vrot.slane %v8811_v23, 1  ;;  %v4612_v10 = vshll.u32 %v8811_v23, 16  ;;  %v4610_v29 = vshrl.u32 %v8811_v23, 16 }
 0x5b9   : > { %5003 = vrot.lane.b32.xlu0 %v8817_v17, %s6661_s14  ;;  %v4600_v27 = vshll.u32 %v8817_v17, 16  ;;  %v4789_v12 = vrot.slane %v8817_v17, 1  ;;  %v4598_v58 = vshrl.u32 %v8817_v17, 16  ;;  %v4607_v36 = vrot.slane %v4605_v46, 1 }
 0x5ba   : > { %v8834_v5 = vsel %vm1962_vm9, %v4792_v57, %v4793_v8  ;;  %v4614_v16 = vrot.slane %v4612_v10, 1  ;;  %v4619_v18 = vrot.slane %v4617_v19, 1 }
 0x5bb   : > { %v4602_v41 = vrot.slane %v4600_v27, 1  ;;  %v8839_v35 = vsel %vm1962_vm9, %v4789_v12, %v4790_v11 }
 0x5bc   : > { %4911 = vrot.lane.b32.xlu1 %v8811_v23, %s6665_s21  ;;  %v4615_v22 = vor.u32 %v4614_v16, %v4610_v29 }
 0x5bd   : > { %4909 = vrot.lane.b32.xlu0 %v8817_v17, %s6665_s21  ;;  %v4603_v56 = vor.u32 %v4602_v41, %v4598_v58 }
 0x5be   : > { %v4620_v21 = vsel %vm1737_vm10, %v4615_v22, %v4619_v18 }
 0x5bf   : > { %v4608_v4 = vsel %vm1737_vm10, %v4603_v56, %v4607_v36 }
 0x5c0   : > { %4975 = vrot.lane.b32.xlu1 %v8834_v5, %s6666_s16 }
 0x5c1   : > { %4973 = vrot.lane.b32.xlu0 %v8839_v35, %s6666_s16 }
 0x5c2   : > { %v6508_v42 = vpop.f32.mrb[84].mxu1 }
 0x5c3   : > { %v4199_v34 = vadd.f32 %v6508_v42, %v8709_v20  ;;  %v4190_v54 = vpop.f32.mrb[85].mxu1 }
 0x5c4   : > { %v4191_v49 = vadd.f32 %v8709_v20, %v4190_v54  ;;  %4881 = vrot.lane.b32.xlu1 %v8834_v5, %s6662_s15  ;;  %v6509_v63 = vpop.f32.mrb[86].mxu1 }
 0x5c5   : > { %v4327_v9 = vadd.f32 %v4295_v45, %v4199_v34  ;;  %v4202_v52 = vadd.f32 %v6509_v63, %v8709_v20  ;;  %4879 = vrot.lane.b32.xlu0 %v8839_v35, %s6662_s15  ;;  %v4193_v14 = vpop.f32.mrb[87].mxu1 }
 0x5c6   : > { %v4325_v51 = vadd.f32 %v4293_v62, %v4191_v49  ;;  %v4194_v47 = vadd.f32 %v8709_v20, %v4193_v14 }
 0x5c7   : > { %v4328_v2 = vadd.f32 %v4296_v26, %v4202_v52  ;;  %v4359_v6 = vmax.f32 %v4327_v9, 0.0 }
 0x5c8   : > { %v4326_v15 = vadd.f32 %v4294_v37, %v4194_v47  ;;  %5033 = vrot.lane.b32.xlu1 %v4608_v4, %s6667_s20  ;;  %v4357_v57 = vmax.f32 %v4325_v51, 0.0 }
 0x5c9   : > { %v4360_v55 = vmax.f32 %v4328_v2, 0.0  ;;  %5035 = vrot.lane.b32.xlu0 %v4620_v21, %s6667_s20  ;;  %v4299_v2 = vunpack.c.l.bf16 %v8200_v30 }
 0x5ca   : > { %v4358_v39 = vmax.f32 %v4326_v15, 0.0 }
 0x5cb   : > { %v8861_v27 = vpack.c.bf16 %v4360_v55, %v4359_v6  ;;  %v4297_v6 = vunpack.c.l.bf16 %v8164_v60 }
 0x5cc   : > { %v8863_v12 = vpack.c.bf16 %v4358_v39, %v4357_v57  ;;  %4941 = vrot.lane.b32.xlu1 %v4608_v4, %s6660_s22 }
 0x5cd   : > { %9706 = vst [vmem:[#allocation3_spill] sm:$0xff] %v8861_v27  ;;  %4943 = vrot.lane.b32.xlu0 %v4620_v21, %s6660_s22  ;;  %v4433_v44 = vshrl.u32 %v8861_v27, 16  ;;  %v4436_v11 = vshll.u32 %v8861_v27, 16 }
 0x5ce   : > { %9707 = vst [vmem:[#allocation5_spill] sm:$0xff] %v8863_v12  ;;  %v4426_v10 = vshrl.u32 %v8863_v12, 16  ;;  %v4429_v16 = vshll.u32 %v8863_v12, 16 }
 0x5cf   : > { %v4435_v8 = vrot.slane %v4433_v44, 7 }
 0x5d0   : > { %4849 = vrot.lane.b32.xlu1 %v4608_v4, %s6664_s17  ;;  %v4428_v41 = vrot.slane %v4426_v10, 7  ;;  %v4300_v10 = vunpack.c.h.bf16 %v8200_v30 }
 0x5d1   : > { %4851 = vrot.lane.b32.xlu0 %v4620_v21, %s6664_s17  ;;  %v4438_v58 = vor.u32 %v4436_v11, %v4435_v8  ;;  %v4562_v19 = vsel %vm7178_vm8, %v4435_v8, 0 }
 0x5d2   : > { %v4431_v46 = vor.u32 %v4429_v16, %v4428_v41  ;;  %v4561_v45 = vsel %vm7178_vm8, %v4428_v41, 0  ;;  %v4799_v62 = vrot.slane %v4562_v19, 1  ;;  %v4641_v37 = vshll.u32 %v4562_v19, 16 }
 0x5d3   : > { %v8875_v42 = vsel %vm7178_vm8, 0, %v4438_v58  ;;  %v4796_v63 = vrot.slane %v4561_v45, 1  ;;  %v4629_v36 = vshll.u32 %v4561_v45, 16  ;;  %v4298_v58 = vunpack.c.h.bf16 %v8164_v60 }
 0x5d4   : > { %5009 = vrot.lane.b32.xlu1 %v8875_v42, %s6661_s14  ;;  %v8881_v29 = vsel %vm7178_vm8, 0, %v4431_v46  ;;  %v4798_v34 = vrot.slane %v8875_v42, 1  ;;  %v4636_v49 = vshll.u32 %v8875_v42, 16  ;;  %v4634_v47 = vshrl.u32 %v8875_v42, 16 }
 0x5d5   : > { %5007 = vrot.lane.b32.xlu0 %v8881_v29, %s6661_s14  ;;  %v4624_v54 = vshll.u32 %v8881_v29, 16  ;;  %v4795_v56 = vrot.slane %v8881_v29, 1  ;;  %v4622_v14 = vshrl.u32 %v8881_v29, 16  ;;  %v4631_v11 = vrot.slane %v4629_v36, 1 }
 0x5d6   : > { %v8898_v22 = vsel %vm1962_vm9, %v4798_v34, %v4799_v62  ;;  %v4638_v26 = vrot.slane %v4636_v49, 1  ;;  %v4643_v46 = vrot.slane %v4641_v37, 1 }
 0x5d7   : > { %v4626_v9 = vrot.slane %v4624_v54, 1  ;;  %v8903_v52 = vsel %vm1962_vm9, %v4795_v56, %v4796_v63 }
 0x5d8   : > { %4915 = vrot.lane.b32.xlu1 %v8875_v42, %s6665_s21  ;;  %v4639_v57 = vor.u32 %v4638_v26, %v4634_v47 }
 0x5d9   : > { %4913 = vrot.lane.b32.xlu0 %v8881_v29, %s6665_s21  ;;  %v4627_v15 = vor.u32 %v4626_v9, %v4622_v14 }
 0x5da   : > { %v4644_v54 = vsel %vm1737_vm10, %v4639_v57, %v4643_v46 }
 0x5db   : > { %v4632_v34 = vsel %vm1737_vm10, %v4627_v15, %v4631_v11 }
 0x5dc   : > { %4979 = vrot.lane.b32.xlu1 %v8898_v22, %s6666_s16 }
 0x5dd   : > { %4977 = vrot.lane.b32.xlu0 %v8903_v52, %s6666_s16 }
 0x5de   : > { %v6512_v51 = vpop.f32.mrb[88].mxu1 }
 0x5df   : > { %v4215_v18 = vadd.f32 %v6512_v51, %v8709_v20  ;;  %v4206_v4 = vpop.f32.mrb[89].mxu1 }
 0x5e0   : > { %v4207_v21 = vadd.f32 %v8709_v20, %v4206_v4  ;;  %4885 = vrot.lane.b32.xlu1 %v8898_v22, %s6662_s15  ;;  %v6513_v55 = vpop.f32.mrb[90].mxu1 }
 0x5e1   : > { %v4331_v39 = vadd.f32 %v4299_v2, %v4215_v18  ;;  %v4218_v44 = vadd.f32 %v6513_v55, %v8709_v20  ;;  %4883 = vrot.lane.b32.xlu0 %v8903_v52, %s6662_s15  ;;  %v4209_v8 = vpop.f32.mrb[91].mxu1 }
 0x5e2   : > { %v4329_v41 = vadd.f32 %v4297_v6, %v4207_v21  ;;  %v4210_v16 = vadd.f32 %v8709_v20, %v4209_v8 }
 0x5e3   : > { %v4332_v19 = vadd.f32 %v4300_v10, %v4218_v44  ;;  %v4363_v30 = vmax.f32 %v4331_v39, 0.0 }
 0x5e4   : > { %v4330_v45 = vadd.f32 %v4298_v58, %v4210_v16  ;;  %5037 = vrot.lane.b32.xlu1 %v4632_v34, %s6667_s20  ;;  %v4361_v49 = vmax.f32 %v4329_v41, 0.0 }
 0x5e5   : > { %v4364_v56 = vmax.f32 %v4332_v19, 0.0  ;;  %5039 = vrot.lane.b32.xlu0 %v4644_v54, %s6667_s20 }
 0x5e6   : > { %v4362_v62 = vmax.f32 %v4330_v45, 0.0 }
 0x5e7   : > { %v8925_v63 = vpack.c.bf16 %v4364_v56, %v4363_v30  ;;  %v4303_v30 = vunpack.c.l.bf16 %v8248_v48 }
 0x5e8   : > { %v8927_v9 = vpack.c.bf16 %v4362_v62, %v4361_v49  ;;  %4945 = vrot.lane.b32.xlu1 %v4632_v34, %s6660_s22 }
 0x5e9   : > { %9708 = vst [vmem:[#allocation4_spill] sm:$0xff] %v8925_v63  ;;  %4947 = vrot.lane.b32.xlu0 %v4644_v54, %s6660_s22  ;;  %v4447_v60 = vshrl.u32 %v8925_v63, 16  ;;  %v4450_v36 = vshll.u32 %v8925_v63, 16 }
 0x5ea   : > { %9709 = vst [vmem:[#allocation2_spill] sm:$0xff] %v8927_v9  ;;  %v4440_v26 = vshrl.u32 %v8927_v9, 16  ;;  %v4443_v47 = vshll.u32 %v8927_v9, 16 }
 0x5eb   : > { %v4449_v14 = vrot.slane %v4447_v60, 7  ;;  %v4301_v60 = vunpack.c.l.bf16 %v8224_v33 }
 0x5ec   : > { %4853 = vrot.lane.b32.xlu1 %v4632_v34, %s6664_s17  ;;  %v4442_v51 = vrot.slane %v4440_v26, 7 }
 0x5ed   : > { %4855 = vrot.lane.b32.xlu0 %v4644_v54, %s6664_s17  ;;  %v4452_v37 = vor.u32 %v4450_v36, %v4449_v14  ;;  %v4564_v15 = vsel %vm7178_vm8, %v4449_v14, 0 }
 0x5ee   : > { %v4445_v18 = vor.u32 %v4443_v47, %v4442_v51  ;;  %v4563_v6 = vsel %vm7178_vm8, %v4442_v51, 0  ;;  %v4805_v44 = vrot.slane %v4564_v15, 1  ;;  %v4665_v45 = vshll.u32 %v4564_v15, 16 }
 0x5ef   : > { %v8939_v2 = vsel %vm7178_vm8, 0, %v4452_v37  ;;  %v4802_v10 = vrot.slane %v4563_v6, 1  ;;  %v4653_v46 = vshll.u32 %v4563_v6, 16  ;;  %v4304_v47 = vunpack.c.h.bf16 %v8248_v48 }
 0x5f0   : > { %5013 = vrot.lane.b32.xlu1 %v8939_v2, %s6661_s14  ;;  %v8945_v4 = vsel %vm7178_vm8, 0, %v4445_v18  ;;  %v4804_v21 = vrot.slane %v8939_v2, 1  ;;  %v4660_v39 = vshll.u32 %v8939_v2, 16  ;;  %v4658_v34 = vshrl.u32 %v8939_v2, 16 }
 0x5f1   : > { %5011 = vrot.lane.b32.xlu0 %v8945_v4, %s6661_s14  ;;  %v4648_v55 = vshll.u32 %v8945_v4, 16  ;;  %v4801_v57 = vrot.slane %v8945_v4, 1  ;;  %v4646_v58 = vshrl.u32 %v8945_v4, 16  ;;  %v4655_v18 = vrot.slane %v4653_v46, 1 }
 0x5f2   : > { %v8962_v8 = vsel %vm1962_vm9, %v4804_v21, %v4805_v44  ;;  %v4662_v16 = vrot.slane %v4660_v39, 1  ;;  %v4302_v6 = vunpack.c.h.bf16 %v8224_v33 }
 0x5f3   : > { %v4650_v11 = vrot.slane %v4648_v55, 1  ;;  %v8967_v41 = vsel %vm1962_vm9, %v4801_v57, %v4802_v10  ;;  %v4667_v55 = vrot.slane %v4665_v45, 1 }
 0x5f4   : > { %4919 = vrot.lane.b32.xlu1 %v8939_v2, %s6665_s21  ;;  %v4663_v14 = vor.u32 %v4662_v16, %v4658_v34 }
 0x5f5   : > { %4917 = vrot.lane.b32.xlu0 %v8945_v4, %s6665_s21  ;;  %v4651_v49 = vor.u32 %v4650_v11, %v4646_v58 }
 0x5f6   : > { %v4668_v10 = vsel %vm1737_vm10, %v4663_v14, %v4667_v55 }
 0x5f7   : > { %v4656_v39 = vsel %vm1737_vm10, %v4651_v49, %v4655_v18 }
 0x5f8   : > { %4983 = vrot.lane.b32.xlu1 %v8962_v8, %s6666_s16 }
 0x5f9   : > { %4981 = vrot.lane.b32.xlu0 %v8967_v41, %s6666_s16 }
 0x5fa   : > { %v6516_v19 = vpop.f32.mrb[92].mxu1 }
 0x5fb   : > { %v4231_v54 = vadd.f32 %v6516_v19, %v8709_v20  ;;  %v4222_v56 = vpop.f32.mrb[93].mxu1 }
 0x5fc   : > { %v4223_v62 = vadd.f32 %v8709_v20, %v4222_v56  ;;  %4889 = vrot.lane.b32.xlu1 %v8962_v8, %s6662_s15  ;;  %v6517_v26 = vpop.f32.mrb[94].mxu1 }
 0x5fd   : > { %v4335_v36 = vadd.f32 %v4303_v30, %v4231_v54  ;;  %v4234_v51 = vadd.f32 %v6517_v26, %v8709_v20  ;;  %4887 = vrot.lane.b32.xlu0 %v8967_v41, %s6662_s15  ;;  %v4225_v37 = vpop.f32.mrb[95].mxu1 }
 0x5fe   : > { %v4333_v15 = vadd.f32 %v4301_v60, %v4223_v62  ;;  %v4226_v21 = vadd.f32 %v8709_v20, %v4225_v37 }
 0x5ff   : > { %v4336_v57 = vadd.f32 %v4304_v47, %v4234_v51  ;;  %v4367_v48 = vmax.f32 %v4335_v36, 0.0 }
 0x600   : > { %v4334_v44 = vadd.f32 %v4302_v6, %v4226_v21  ;;  %5041 = vrot.lane.b32.xlu1 %v4656_v39, %s6667_s20  ;;  %v4365_v16 = vmax.f32 %v4333_v15, 0.0 }
 0x601   : > { %v4368_v11 = vmax.f32 %v4336_v57, 0.0  ;;  %5043 = vrot.lane.b32.xlu0 %v4668_v10, %s6667_s20 }
 0x602   : > { %v4366_v58 = vmax.f32 %v4334_v44, 0.0 }
 0x603   : > { %v8989_v46 = vpack.c.bf16 %v4368_v11, %v4367_v48 }
 0x604   : > { %v8991_v19 = vpack.c.bf16 %v4366_v58, %v4365_v16  ;;  %4949 = vrot.lane.b32.xlu1 %v4656_v39, %s6660_s22 }
 0x605   : > { %9710 = vst [vmem:[#allocation6_spill] sm:$0xff] %v8989_v46  ;;  %4951 = vrot.lane.b32.xlu0 %v4668_v10, %s6660_s22  ;;  %v4461_v33 = vshrl.u32 %v8989_v46, 16  ;;  %v4464_v54 = vshll.u32 %v8989_v46, 16 }
 0x606   : > { %9711 = vst [vmem:[#allocation8_spill] sm:$0xff] %v8991_v19  ;;  %v4454_v34 = vshrl.u32 %v8991_v19, 16  ;;  %v4457_v56 = vshll.u32 %v8991_v19, 16  ;;  %v4308_v19 = vunpack.c.h.bf16 %v8293_v59 }
 0x607   : > { %v4463_v45 = vrot.slane %v4461_v33, 7 }
 0x608   : > { %4857 = vrot.lane.b32.xlu1 %v4656_v39, %s6664_s17  ;;  %v4456_v30 = vrot.slane %v4454_v34, 7 }
 0x609   : > { %4859 = vrot.lane.b32.xlu0 %v4668_v10, %s6664_s17  ;;  %v4466_v49 = vor.u32 %v4464_v54, %v4463_v45  ;;  %v4566_v51 = vsel %vm7178_vm8, %v4463_v45, 0 }
 0x60a   : > { %v4459_v62 = vor.u32 %v4457_v56, %v4456_v30  ;;  %v9001_v60 = vpop.permute.xlu1 %5001  ;;  %v4565_v18 = vsel %vm7178_vm8, %v4456_v30, 0  ;;  %v4811_v57 = vrot.slane %v4566_v51, 1  ;;  %v4689_v30 = vshll.u32 %v4566_v51, 16 }
 0x60b   : > { %v9005_v26 = vsel %vm7178_vm8, 0, %v4466_v49  ;;  %v4906_v14 = vpop.permute.xlu0 %4905  ;;  %v4808_v39 = vrot.slane %v4565_v18, 1  ;;  %v4677_v34 = vshll.u32 %v4565_v18, 16 }
 0x60c   : > { %5017 = vrot.lane.b32.xlu1 %v9005_v26, %s6661_s14  ;;  %v9011_v36 = vsel %vm7178_vm8, 0, %v4459_v62  ;;  %v4810_v37 = vrot.slane %v9005_v26, 1  ;;  %v4684_v55 = vshll.u32 %v9005_v26, 16  ;;  %v4682_v54 = vshrl.u32 %v9005_v26, 16 }
 0x60d   : > { %5015 = vrot.lane.b32.xlu0 %v9011_v36, %s6661_s14  ;;  %v4672_v15 = vshll.u32 %v9011_v36, 16  ;;  %v4807_v6 = vrot.slane %v9011_v36, 1  ;;  %v4670_v33 = vshrl.u32 %v9011_v36, 16  ;;  %v4307_v62 = vunpack.c.l.bf16 %v8293_v59 }
 0x60e   : > { %v9017_v47 = vpop.permute.xlu1 %4907  ;;  %v9032_v10 = vsel %vm1962_vm9, %v4810_v37, %v4811_v57  ;;  %v4686_v16 = vrot.slane %v4684_v55, 1  ;;  %v4305_v55 = vunpack.c.l.bf16 %v8268_v50  ;;  %v4679_v46 = vrot.slane %v4677_v34, 1 }
 0x60f   : > { %v4970_v21 = vpop.permute.xlu0 %4969  ;;  %v4674_v48 = vrot.slane %v4672_v15, 1  ;;  %v9037_v11 = vsel %vm1962_vm9, %v4807_v6, %v4808_v39  ;;  %v4691_v9 = vrot.slane %v4689_v30, 1  ;;  %v5122_v63 = vsel %vm2317_vm12, %v9704_v25, %v4906_v14 }
 0x610   : > { %4923 = vrot.lane.b32.xlu1 %v9005_v26, %s6665_s21  ;;  %v4687_v57 = vor.u32 %v4686_v16, %v4682_v54 }
 0x611   : > { %4921 = vrot.lane.b32.xlu0 %v9011_v36, %s6665_s21  ;;  %v4675_v15 = vor.u32 %v4674_v48, %v4670_v33 }
 0x612   : > { %v9029_v44 = vpop.permute.xlu1 %4971  ;;  %v4692_v34 = vsel %vm1737_vm10, %v4687_v57, %v4691_v9 }
 0x613   : > { %v9039_v58 = vpop.permute.xlu0 %4875 }
 0x614   : > { %4987 = vrot.lane.b32.xlu1 %v9032_v10, %s6666_s16 }
 0x615   : > { %4985 = vrot.lane.b32.xlu0 %v9037_v11, %s6666_s16 }
 0x616   : > { %v6520_v45 = vpop.f32.mrb[96].mxu1  ;;  %v9045_v56 = vpop.permute.xlu1 %4877 }
 0x617   : > { %v4247_v49 = vadd.f32 %v6520_v45, %v8709_v20  ;;  %v4238_v37 = vpop.f32.mrb[97].mxu1  ;;  %v5032_v16 = vpop.permute.xlu0 %5031 }
 0x618   : > { %v4239_v6 = vadd.f32 %v8709_v20, %v4238_v37  ;;  %4893 = vrot.lane.b32.xlu1 %v9032_v10, %s6662_s15  ;;  %v6521_v18 = vpop.f32.mrb[98].mxu1  ;;  %v4306_v37 = vunpack.c.h.bf16 %v8268_v50 }
 0x619   : > { %v4339_v39 = vadd.f32 %v4307_v62, %v4247_v49  ;;  %v4250_v51 = vadd.f32 %v6521_v18, %v8709_v20  ;;  %4891 = vrot.lane.b32.xlu0 %v9037_v11, %s6662_s15  ;;  %v4241_v45 = vpop.f32.mrb[99].mxu1  ;;  %v4680_v62 = vsel %vm1737_vm10, %v4675_v15, %v4679_v46 }
 0x61a   : > { %v4337_v48 = vadd.f32 %v4305_v55, %v4239_v6  ;;  %v4242_v33 = vadd.f32 %v8709_v20, %v4241_v45  ;;  %v4938_v49 = vpop.permute.xlu1 %4937 }
 0x61b   : > { %v4340_v54 = vadd.f32 %v4308_v19, %v4250_v51  ;;  %v5154_v18 = vsel %vm1185_vm4, %v5122_v63, %v4938_v49  ;;  %v4371_v6 = vmax.f32 %v4339_v39, 0.0  ;;  %v9075_v9 = vpop.permute.xlu0 %4939 }
 0x61c   : > { %v4338_v59 = vadd.f32 %v4306_v37, %v4242_v33  ;;  %5045 = vrot.lane.b32.xlu1 %v4680_v62, %s6667_s20  ;;  %v5186_v50 = vsel %vm2382_vm13, %v5154_v18, %v4970_v21  ;;  %v4369_v30 = vmax.f32 %v4337_v48, 0.0 }
 0x61d   : > { %v4372_v55 = vmax.f32 %v4340_v54, 0.0  ;;  %5047 = vrot.lane.b32.xlu0 %v4692_v34, %s6667_s20  ;;  %v5218_v19 = vsel %vm1218_vm5, %v5186_v50, %v9001_v60 }
 0x61e   : > { %v4370_v25 = vmax.f32 %v4338_v59, 0.0  ;;  %v5249_v46 = vsel %vm2447_vm14, %v5218_v19, %v5032_v16  ;;  %v4846_v48 = vpop.permute.xlu1 %4845 }
 0x61f   : > { %v9069_v14 = vpack.c.bf16 %v4372_v55, %v4371_v6  ;;  %5452 = vmatmul.mubr.bf16.vlgmr.msra.gmra.mrb[84].mxu0 %v5249_v46  ;;  %v5062_v50 = vsel %vm2252_vm11, %v8759_v38, %v4846_v48 }
 0x620   : > { %v9072_v63 = vpack.c.bf16 %v4370_v25, %v4369_v30  ;;  %4953 = vrot.lane.b32.xlu1 %v4680_v62, %s6660_s22  ;;  %6291 = vmatprep.mubr.msk.bf16.mxu0 %vm2252_vm11, %v8839_v35  ;;  %v9086_v35 = vpop.permute.xlu0 %4847 }
 0x621   : > { %9712 = vst [vmem:[#allocation9_spill] sm:$0xff] %v9069_v14  ;;  %4955 = vrot.lane.b32.xlu0 %v4692_v34, %s6660_s22  ;;  %v4475_v21 = vshrl.u32 %v9069_v14, 16  ;;  %v4478_v57 = vshll.u32 %v9069_v14, 16 }
 0x622   : > { %9713 = vst [vmem:[#allocation10_spill] sm:$0xff] %v9072_v63  ;;  %v4468_v60 = vshrl.u32 %v9072_v63, 16  ;;  %v4471_v51 = vshll.u32 %v9072_v63, 16 }
 0x623   : > { %v4477_v15 = vrot.slane %v4475_v21, 7 }
 0x624   : > { %4861 = vrot.lane.b32.xlu1 %v4680_v62, %s6664_s17  ;;  %v4470_v39 = vrot.slane %v4468_v60, 7 }
 0x625   : > { %4863 = vrot.lane.b32.xlu0 %v4692_v34, %s6664_s17  ;;  %v4480_v45 = vor.u32 %v4478_v57, %v4477_v15  ;;  %v4568_v49 = vsel %vm7178_vm8, %v4477_v15, 0  ;;  %v5092_v15 = vsel %vm1136_vm3, %v5062_v50, %v9039_v58 }
 0x626   : > { %v4473_v33 = vor.u32 %v4471_v51, %v4470_v39  ;;  %v4567_v18 = vsel %vm7178_vm8, %v4470_v39, 0  ;;  %v4817_v30 = vrot.slane %v4568_v49, 1  ;;  %v5124_v58 = vsel %vm2317_vm12, %v5092_v15, %v9017_v47 }
 0x627   : > { %v9090_v37 = vsel %vm7178_vm8, 0, %v4480_v45  ;;  %v4814_v19 = vrot.slane %v4567_v18, 1  ;;  %v4701_v51 = vshll.u32 %v4567_v18, 16  ;;  %v4309_v18 = vunpack.c.l.bf16 %v8320_v1 }
 0x628   : > { %5021 = vrot.lane.b32.xlu1 %v9090_v37, %s6661_s14  ;;  %v9096_v16 = vsel %vm7178_vm8, 0, %v4473_v33  ;;  %v4816_v59 = vrot.slane %v9090_v37, 1  ;;  %v4708_v55 = vshll.u32 %v9090_v37, 16  ;;  %v4706_v33 = vshrl.u32 %v9090_v37, 16 }
 0x629   : > { %5019 = vrot.lane.b32.xlu0 %v9096_v16, %s6661_s14  ;;  %v4696_v34 = vshll.u32 %v9096_v16, 16  ;;  %v4813_v6 = vrot.slane %v9096_v16, 1  ;;  %v4694_v39 = vshrl.u32 %v9096_v16, 16  ;;  %v4312_v15 = vunpack.c.h.bf16 %v8353_v7 }
 0x62a   : > { %v9100_v54 = vpop.permute.xlu1 %5005  ;;  %v9121_v21 = vsel %vm1962_vm9, %v4816_v59, %v4817_v30  ;;  %v4710_v57 = vrot.slane %v4708_v55, 1  ;;  %v4713_v59 = vshll.u32 %v4568_v49, 16  ;;  %v4310_v49 = vunpack.c.h.bf16 %v8320_v1 }
 0x62b   : > { %v5004_v62 = vpop.permute.xlu0 %5003  ;;  %v4698_v60 = vrot.slane %v4696_v34, 1  ;;  %v9128_v38 = vsel %vm1962_vm9, %v4813_v6, %v4814_v19  ;;  %v4311_v6 = vunpack.c.l.bf16 %v8353_v7 }
 0x62c   : > { %4927 = vrot.lane.b32.xlu1 %v9090_v37, %s6665_s21  ;;  %v4711_v14 = vor.u32 %v4710_v57, %v4706_v33  ;;  %v4715_v1 = vrot.slane %v4713_v59, 1 }
 0x62d   : > { %4925 = vrot.lane.b32.xlu0 %v9096_v16, %s6665_s21  ;;  %v4699_v30 = vor.u32 %v4698_v60, %v4694_v39  ;;  %v4703_v39 = vrot.slane %v4701_v51, 1 }
 0x62e   : > { %v9116_v25 = vpop.permute.xlu1 %4911 }
 0x62f   : > { %v9118_v46 = vpop.permute.xlu0 %4909 }
 0x630   : > { %4991 = vrot.lane.b32.xlu1 %v9121_v21, %s6666_s16 }
 0x631   : > { %4989 = vrot.lane.b32.xlu0 %v9128_v38, %s6666_s16 }
 0x632   : > { %v9133_v45 = vpop.permute.xlu1 %4975  ;;  %v6524_v48 = vpop.f32.mrb[100].mxu1 }
 0x633   : > { %v4263_v34 = vadd.f32 %v6524_v48, %v8709_v20  ;;  %v4254_v55 = vpop.f32.mrb[101].mxu1  ;;  %v4974_v50 = vpop.permute.xlu0 %4973  ;;  %v5156_v48 = vsel %vm1185_vm4, %v5124_v58, %v9075_v9 }
 0x634   : > { %v4255_v19 = vadd.f32 %v8709_v20, %v4254_v55  ;;  %4897 = vrot.lane.b32.xlu1 %v9121_v21, %s6662_s15  ;;  %v6525_v63 = vpop.f32.mrb[102].mxu1  ;;  %v5188_v51 = vsel %vm2382_vm13, %v5156_v48, %v9029_v44 }
 0x635   : > { %v4343_v12 = vadd.f32 %v4311_v6, %v4263_v34  ;;  %v4266_v47 = vadd.f32 %v6525_v63, %v8709_v20  ;;  %4895 = vrot.lane.b32.xlu0 %v9128_v38, %s6662_s15  ;;  %v4257_v60 = vpop.f32.mrb[103].mxu1  ;;  %v4704_v63 = vsel %vm1737_vm10, %v4699_v30, %v4703_v39  ;;  %v4716_v34 = vsel %vm1737_vm10, %v4711_v14, %v4715_v1 }
 0x636   : > { %v4341_v55 = vadd.f32 %v4309_v18, %v4255_v19  ;;  %v4258_v27 = vadd.f32 %v8709_v20, %v4257_v60  ;;  %v9152_v43 = vpop.permute.xlu1 %4881  ;;  %v5064_v20 = vsel %vm2252_vm11, %v8753_v40, %v9086_v35  ;;  %v5220_v59 = vsel %vm1218_vm5, %v5188_v51, %v5004_v62 }
 0x637   : > { %v4344_v57 = vadd.f32 %v4312_v15, %v4266_v47  ;;  %v9154_v33 = vpop.permute.xlu0 %4879  ;;  %v4375_v9 = vmax.f32 %v4343_v12, 0.0  ;;  %v5094_v12 = vsel %vm1136_vm3, %v5064_v20, %v9045_v56 }
 0x638   : > { %v4342_v7 = vadd.f32 %v4310_v49, %v4258_v27  ;;  %5049 = vrot.lane.b32.xlu1 %v4704_v63, %s6667_s20  ;;  %v4373_v6 = vmax.f32 %v4341_v55, 0.0  ;;  %v5126_v44 = vsel %vm2317_vm12, %v5094_v12, %v9118_v46  ;;  %v4315_v12 = vunpack.c.l.bf16 %v8410_v3 }
 0x639   : > { %v4376_v58 = vmax.f32 %v4344_v57, 0.0  ;;  %5051 = vrot.lane.b32.xlu0 %v4716_v34, %s6667_s20 }
 0x63a   : > { %v4374_v30 = vmax.f32 %v4342_v7, 0.0  ;;  %v5034_v27 = vpop.permute.xlu1 %5033 }
 0x63b   : > { %v9166_v19 = vpack.c.bf16 %v4376_v58, %v4375_v9  ;;  %v5036_v18 = vpop.permute.xlu0 %5035  ;;  %v5252_v14 = vsel %vm2447_vm14, %v5220_v59, %v5034_v27 }
 0x63c   : > { %v9169_v49 = vpack.c.bf16 %v4374_v30, %v4373_v6  ;;  %4957 = vrot.lane.b32.xlu1 %v4704_v63, %s6660_s22  ;;  %5460 = vmatmul.mubr.bf16.gmra.mrb[88].mxu0 %v5252_v14  ;;  %v4313_v30 = vunpack.c.l.bf16 %v8371_v53 }
 0x63d   : > { %4959 = vrot.lane.b32.xlu0 %v4716_v34, %s6660_s22  ;;  %6292 = vmatprep.mubr.msk.bf16.mxu0 %vm2252_vm11, %v8834_v5  ;;  %v4489_v40 = vshrl.u32 %v9166_v19, 16  ;;  %v4492_v56 = vshll.u32 %v9166_v19, 16 }
 0x63e   : > { %v4942_v35 = vpop.permute.xlu1 %4941  ;;  %v4482_v62 = vshrl.u32 %v9169_v49, 16  ;;  %v4485_v48 = vshll.u32 %v9169_v49, 16 }
 0x63f   : > { %v5158_v47 = vsel %vm1185_vm4, %v5126_v44, %v4942_v35  ;;  %v9182_v15 = vpop.permute.xlu0 %4943  ;;  %v4491_v60 = vrot.slane %v4489_v40, 7  ;;  %v4314_v44 = vunpack.c.h.bf16 %v8371_v53 }
 0x640   : > { %v5190_v39 = vsel %vm2382_vm13, %v5158_v47, %v4974_v50  ;;  %4865 = vrot.lane.b32.xlu1 %v4704_v63, %s6664_s17  ;;  %v4484_v5 = vrot.slane %v4482_v62, 7 }
 0x641   : > { %4867 = vrot.lane.b32.xlu0 %v4716_v34, %s6664_s17  ;;  %v4494_v46 = vor.u32 %v4492_v56, %v4491_v60  ;;  %v5222_v55 = vsel %vm1218_vm5, %v5190_v39, %v9100_v54  ;;  %v4570_v34 = vsel %vm7178_vm8, %v4491_v60, 0  ;;  %v4316_v39 = vunpack.c.h.bf16 %v8410_v3 }
 0x642   : > { %v4850_v1 = vpop.permute.xlu1 %4849  ;;  %v5255_v57 = vsel %vm2447_vm14, %v5222_v55, %v5036_v18  ;;  %v4487_v7 = vor.u32 %v4485_v48, %v4484_v5  ;;  %v4569_v59 = vsel %vm7178_vm8, %v4484_v5, 0  ;;  %v4823_v35 = vrot.slane %v4570_v34, 1 }
 0x643   : > { %v9192_v51 = vpop.permute.xlu0 %4851  ;;  %v9196_v50 = vsel %vm7178_vm8, 0, %v4494_v46  ;;  %v5066_v9 = vsel %vm2252_vm11, %v8817_v17, %v4850_v1  ;;  %v6651_v17 = vld [vmem:[%s9656_s8] ss:$0 sm:$0xff]  ;;  %v4820_v5 = vrot.slane %v4569_v59, 1 }
 0x644   : > { %5025 = vrot.lane.b32.xlu1 %v9196_v50, %s6661_s14  ;;  %5468 = vmatmul.mubr.bf16.gmra.mrb[92].mxu0 %v5255_v57  ;;  %v9202_v63 = vsel %vm7178_vm8, 0, %v4487_v7  ;;  %v4822_v20 = vrot.slane %v9196_v50, 1  ;;  %v4732_v18 = vshll.u32 %v9196_v50, 16  ;;  %v5096_v62 = vsel %vm1136_vm3, %v5066_v9, %v9154_v33 }
 0x645   : > { %5023 = vrot.lane.b32.xlu0 %v9202_v63, %s6661_s14  ;;  %6293 = vmatprep.mubr.msk.bf16.mxu0 %vm2252_vm11, %v8903_v52  ;;  %v4720_v6 = vshll.u32 %v9202_v63, 16  ;;  %v4819_v27 = vrot.slane %v9202_v63, 1  ;;  %v5128_v3 = vsel %vm2317_vm12, %v5096_v62, %v9116_v25 }
 0x646   : > { %v9208_v54 = vpop.permute.xlu1 %5009  ;;  %v9238_v57 = vsel %vm1962_vm9, %v4822_v20, %v4823_v35  ;;  %v4734_v9 = vrot.slane %v4732_v18, 1  ;;  %v4718_v20 = vshrl.u32 %v9202_v63, 16  ;;  %v5160_v25 = vsel %vm1185_vm4, %v5128_v3, %v9182_v15 }
 0x647   : > { %v9214_v58 = vpop.permute.xlu0 %5007  ;;  %v4722_v7 = vrot.slane %v4720_v6, 1  ;;  %v9243_v33 = vsel %vm1962_vm9, %v4819_v27, %v4820_v5  ;;  %v5192_v15 = vsel %vm2382_vm13, %v5160_v25, %v9133_v45 }
 0x648   : > { %4931 = vrot.lane.b32.xlu1 %v9196_v50, %s6665_s21  ;;  %v6528_v52 = vpop.f32.mrb[104].mxu1  ;;  %v5224_v45 = vsel %vm1218_vm5, %v5192_v15, %v9214_v58 }
 0x649   : > { %v4279_v14 = vadd.f32 %v6651_v17, %v6528_v52  ;;  %4929 = vrot.lane.b32.xlu0 %v9202_v63, %s6665_s21  ;;  %v4270_v40 = vpop.f32.mrb[105].mxu1  ;;  %v4723_v18 = vor.u32 %v4722_v7, %v4718_v20 }
 0x64a   : > { %v4271_v47 = vadd.f32 %v6651_v17, %v4270_v40  ;;  %v9234_v60 = vpop.permute.xlu1 %4915  ;;  %v6529_v56 = vpop.f32.mrb[106].mxu1  ;;  %v4737_v40 = vshll.u32 %v4570_v34, 16 }
 0x64b   : > { %v4347_v48 = vadd.f32 %v4315_v12, %v4279_v14  ;;  %v4282_v46 = vadd.f32 %v6651_v17, %v6529_v56  ;;  %v4273_v55 = vpop.f32.mrb[107].mxu1  ;;  %v4914_v1 = vpop.permute.xlu0 %4913  ;;  %v4725_v12 = vshll.u32 %v4569_v59, 16 }
 0x64c   : > { %v4345_v53 = vadd.f32 %v4313_v30, %v4271_v47  ;;  %v4274_v52 = vadd.f32 %v6651_v17, %v4273_v55  ;;  %4995 = vrot.lane.b32.xlu1 %v9238_v57, %s6666_s16  ;;  %v4730_v17 = vshrl.u32 %v9196_v50, 16 }
 0x64d   : > { %v4348_v14 = vadd.f32 %v4316_v39, %v4282_v46  ;;  %4993 = vrot.lane.b32.xlu0 %v9243_v33, %s6666_s16  ;;  %v4379_v35 = vmax.f32 %v4347_v48, 0.0  ;;  %v4739_v48 = vrot.slane %v4737_v40, 1 }
 0x64e   : > { %v4346_v6 = vadd.f32 %v4314_v44, %v4274_v52  ;;  %v9250_v30 = vpop.permute.xlu1 %4979  ;;  %v4377_v62 = vmax.f32 %v4345_v53, 0.0  ;;  %v4735_v39 = vor.u32 %v4734_v9, %v4730_v17  ;;  %v4727_v44 = vrot.slane %v4725_v12, 1 }
 0x64f   : > { %v4380_v27 = vmax.f32 %v4348_v14, 0.0  ;;  %v4978_v47 = vpop.permute.xlu0 %4977  ;;  %v5068_v9 = vsel %vm2252_vm11, %v8811_v23, %v9192_v51 }
 0x650   : > { %v4378_v56 = vmax.f32 %v4346_v6, 0.0  ;;  %4901 = vrot.lane.b32.xlu1 %v9238_v57, %s6662_s15  ;;  %v4728_v55 = vsel %vm1737_vm10, %v4723_v18, %v4727_v44  ;;  %v4740_v53 = vsel %vm1737_vm10, %v4735_v39, %v4739_v48  ;;  %v5098_v51 = vsel %vm1136_vm3, %v5068_v9, %v9152_v43 }
 0x651   : > { %v9257_v59 = vpack.c.bf16 %v4380_v27, %v4379_v35  ;;  %4899 = vrot.lane.b32.xlu0 %v9243_v33, %s6662_s15  ;;  %v5130_v58 = vsel %vm2317_vm12, %v5098_v51, %v4914_v1 }
 0x652   : > { %v9261_v34 = vpack.c.bf16 %v4378_v56, %v4377_v62  ;;  %v9263_v5 = vpop.permute.xlu1 %4885 }
 0x653   : > { %v4884_v46 = vpop.permute.xlu0 %4883  ;;  %v4503_v7 = vshrl.u32 %v9257_v59, 16  ;;  %v4506_v20 = vshll.u32 %v9257_v59, 16 }
 0x654   : > { %5053 = vrot.lane.b32.xlu1 %v4728_v55, %s6667_s20  ;;  %v4496_v52 = vshrl.u32 %v9261_v34, 16  ;;  %v4499_v6 = vshll.u32 %v9261_v34, 16 }
 0x655   : > { %5055 = vrot.lane.b32.xlu0 %v4740_v53, %s6667_s20  ;;  %v4505_v3 = vrot.slane %v4503_v7, 7 }
 0x656   : > { %v5038_v14 = vpop.permute.xlu1 %5037  ;;  %v4498_v12 = vrot.slane %v4496_v52, 7 }
 0x657   : > { %v5040_v17 = vpop.permute.xlu0 %5039  ;;  %v5258_v40 = vsel %vm2447_vm14, %v5224_v45, %v5038_v14  ;;  %v4508_v35 = vor.u32 %v4506_v20, %v4505_v3 }
 0x658   : > { %4961 = vrot.lane.b32.xlu1 %v4728_v55, %s6660_s22  ;;  %5476 = vmatmul.mubr.bf16.gmra.mrb[96].mxu0 %v5258_v40  ;;  %v4501_v23 = vor.u32 %v4499_v6, %v4498_v12  ;;  %v4571_v25 = vsel %vm7178_vm8, %v4498_v12, 0  ;;  %v4572_v12 = vsel %vm7178_vm8, %v4505_v3, 0 }
 0x659   : > { %4963 = vrot.lane.b32.xlu0 %v4740_v53, %s6660_s22  ;;  %6294 = vmatprep.mubr.msk.bf16.mxu0 %vm2252_vm11, %v8898_v22  ;;  %v4556_v22 = vsel %vm7178_vm8, 0, %v4508_v35  ;;  %v4749_v15 = vshll.u32 %v4571_v25, 16  ;;  %v4826_v35 = vrot.slane %v4571_v25, 1 }
 0x65a   : > { %v4946_v27 = vpop.permute.xlu1 %4945  ;;  %v9290_v18 = vsel %vm7178_vm8, 0, %v4501_v23  ;;  %v4829_v23 = vshrl.u32 %v4556_v22, 16 }
 0x65b   : > { %v5162_v62 = vsel %vm1185_vm4, %v5130_v58, %v4946_v27  ;;  %v4948_v56 = vpop.permute.xlu0 %4947  ;;  %v4744_v43 = vshll.u32 %v9290_v18, 16  ;;  %v4742_v44 = vshrl.u32 %v9290_v18, 16  ;;  %v4825_v6 = vrot.slane %v9290_v18, 1 }
 0x65c   : > { %v5194_v39 = vsel %vm2382_vm13, %v5162_v62, %v4978_v47  ;;  %4869 = vrot.lane.b32.xlu1 %v4728_v55, %s6664_s17  ;;  %v4831_v47 = vshll.u32 %v4556_v22, 16 }
 0x65d   : > { %4871 = vrot.lane.b32.xlu0 %v4740_v53, %s6664_s17  ;;  %v5226_v1 = vsel %vm1218_vm5, %v5194_v39, %v9208_v54  ;;  %v4746_v48 = vrot.slane %v4744_v43, 1  ;;  %v4751_v54 = vrot.slane %v4749_v15, 1  ;;  %v9322_v32 = vsel %vm1962_vm9, %v4825_v6, %v4826_v35 }
 0x65e   : > { %v4854_v7 = vpop.permute.xlu1 %4853  ;;  %v5261_v52 = vsel %vm2447_vm14, %v5226_v1, %v5040_v17  ;;  %v4833_v17 = vrot.slane %v4831_v47, 1 }
 0x65f   : > { %v4856_v9 = vpop.permute.xlu0 %4855  ;;  %v4747_v45 = vor.u32 %v4746_v48, %v4742_v44  ;;  %v5070_v53 = vsel %vm2252_vm11, %v8881_v29, %v4854_v7  ;;  %v4836_v29 = vshll.u32 %v4572_v12, 16  ;;  %v4843_v48 = vrot.slane %v4572_v12, 1 }
 0x660   : > { %5029 = vrot.lane.b32.xlu1 %v4556_v22, %s6661_s14  ;;  %5484 = vmatmul.mubr.bf16.gmra.mrb[100].mxu0 %v5261_v52  ;;  %v4834_v3 = vor.u32 %v4833_v17, %v4829_v23 }
 0x661   : > { %5027 = vrot.lane.b32.xlu0 %v9290_v18, %s6661_s14  ;;  %6295 = vmatprep.mubr.msk.bf16.mxu0 %vm2252_vm11, %v8967_v41  ;;  %v4752_v20 = vsel %vm1737_vm10, %v4747_v45, %v4751_v54  ;;  %v5100_v41 = vsel %vm1136_vm3, %v5070_v53, %v4884_v46  ;;  %v4838_v62 = vrot.slane %v4836_v29, 1 }
 0x662   : > { %v5014_v55 = vpop.permute.xlu1 %5013  ;;  %v5132_v58 = vsel %vm2317_vm12, %v5100_v41, %v9234_v60  ;;  %v4842_v60 = vrot.slane %v4556_v22, 1 }
 0x663   : > { %v5012_v14 = vpop.permute.xlu0 %5011  ;;  %v5164_v25 = vsel %vm1185_vm4, %v5132_v58, %v4948_v56  ;;  %v4839_v43 = vsel %vm1737_vm10, %v4834_v3, %v4838_v62  ;;  %v5072_v56 = vsel %vm2252_vm11, %v8875_v42, %v4856_v9 }
 0x664   : > { %5057 = vrot.lane.b32.xlu1 %v4752_v20, %s6667_s20  ;;  %v5196_v1 = vsel %vm2382_vm13, %v5164_v25, %v9250_v30  ;;  %v9341_v45 = vsel %vm1962_vm9, %v4842_v60, %v4843_v48 }
 0x665   : > { %4933 = vrot.lane.b32.xlu0 %v9290_v18, %s6665_s21  ;;  %v5228_v15 = vsel %vm1218_vm5, %v5196_v1, %v5012_v14 }
 0x666   : > { %v4920_v40 = vpop.permute.xlu1 %4919 }
 0x667   : > { %v4918_v51 = vpop.permute.xlu0 %4917 }
 0x668   : > { %4965 = vrot.lane.b32.xlu1 %v4752_v20, %s6660_s22 }
 0x669   : > { %4997 = vrot.lane.b32.xlu0 %v9322_v32, %s6666_s16 }
 0x66a   : > { %v4984_v27 = vpop.permute.xlu1 %4983 }
 0x66b   : > { %v4982_v46 = vpop.permute.xlu0 %4981 }
 0x66c   : > { %4935 = vrot.lane.b32.xlu1 %v4556_v22, %s6665_s21  ;;  %v5102_v22 = vsel %vm1136_vm3, %v5072_v56, %v9263_v5 }
 0x66d   : > { %5059 = vrot.lane.b32.xlu0 %v4839_v43, %s6667_s20  ;;  %v5134_v42 = vsel %vm2317_vm12, %v5102_v22, %v4918_v51  ;;  %s6357_s20 = sshll.u32 %s9724_s26, 7 }
 0x66e   : > { %v4890_v39 = vpop.permute.xlu1 %4889  ;;  %s9523_s23 = scalar_lea.vmem %s9661_s13, %s6357_s20 }
 0x66f   : > { %v4888_v44 = vpop.permute.xlu0 %4887 }
 0x670   : > { %4873 = vrot.lane.b32.xlu1 %v4752_v20, %s6664_s17 }
 0x671   : > { %4903 = vrot.lane.b32.xlu0 %v9322_v32, %s6662_s15 }
 0x672   : > { %v5042_v7 = vpop.permute.xlu1 %5041 }
 0x673   : > { %v5044_v52 = vpop.permute.xlu0 %5043  ;;  %v5264_v30 = vsel %vm2447_vm14, %v5228_v15, %v5042_v7 }
 0x674   : > { %4999 = vrot.lane.b32.xlu1 %v9341_v45, %s6666_s16  ;;  %5492 = vmatmul.mubr.bf16.gmra.mrb[104].mxu0 %v5264_v30 }
 0x675   : > { %4967 = vrot.lane.b32.xlu0 %v4839_v43, %s6660_s22  ;;  %6296 = vmatprep.mubr.msk.bf16.mxu0 %vm2252_vm11, %v8962_v8 }
 0x676   : > { %v4950_v9 = vpop.permute.xlu1 %4949 }
 0x677   : > { %v5166_v47 = vsel %vm1185_vm4, %v5134_v42, %v4950_v9  ;;  %v4952_v54 = vpop.permute.xlu0 %4951 }
 0x678   : > { %v5198_v53 = vsel %vm2382_vm13, %v5166_v47, %v4982_v46 }
 0x679   : > { %v5230_v14 = vsel %vm1218_vm5, %v5198_v53, %v5014_v55 }
 0x67a   : > { %v4858_v20 = vpop.permute.xlu1 %4857  ;;  %v5267_v12 = vsel %vm2447_vm14, %v5230_v14, %v5044_v52 }
 0x67b   : > { %v4860_v6 = vpop.permute.xlu0 %4859  ;;  %v5074_v8 = vsel %vm2252_vm11, %v8945_v4, %v4858_v20 }
 0x67c   : > { %5500 = vmatmul.mubr.bf16.gmra.mrb[108].mxu0 %v5267_v12  ;;  %v5104_v41 = vsel %vm1136_vm3, %v5074_v8, %v4888_v44 }
 0x67d   : > { %6297 = vmatprep.mubr.msk.bf16.mxu0 %vm2252_vm11, %v9037_v11  ;;  %v5136_v29 = vsel %vm2317_vm12, %v5104_v41, %v4920_v40  ;;  %v5076_v11 = vsel %vm2252_vm11, %v8939_v2, %v4860_v6 }
 0x67e   : > { %v5018_v5 = vpop.permute.xlu1 %5017  ;;  %v5168_v3 = vsel %vm1185_vm4, %v5136_v29, %v4952_v54  ;;  %v5106_v40 = vsel %vm1136_vm3, %v5076_v11, %v4890_v39  ;;  %v5628_v39 = vld [vmem:[%s9659_s11] sm:$0x3] }
 0x67f   : > { %v5016_v17 = vpop.permute.xlu0 %5015  ;;  %v5200_v62 = vsel %vm2382_vm13, %v5168_v3, %v4984_v27  ;;  %6581 = vmatprep.subr.msk.bf16.mxu1 %vm4120_vm15, %v5628_v39 }
 0x680   : > { %v5232_v4 = vsel %vm1218_vm5, %v5200_v62, %v5016_v17 }
 0x682   : > { %v4924_v35 = vpop.permute.xlu1 %4923 }
 0x683   : > { %v4922_v23 = vpop.permute.xlu0 %4921 }
 0x684   : > { %v5138_v44 = vsel %vm2317_vm12, %v5106_v40, %v4922_v23 }
 0x686   : > { %v4988_v55 = vpop.permute.xlu1 %4987 }
 0x687   : > { %v4986_v51 = vpop.permute.xlu0 %4985 }
 0x68a   : > { %v4894_v58 = vpop.permute.xlu1 %4893 }
 0x68b   : > { %v4892_v46 = vpop.permute.xlu0 %4891 }
 0x68e   : > { %v5046_v25 = vpop.permute.xlu1 %5045 }
 0x68f   : > { %v5048_v43 = vpop.permute.xlu0 %5047  ;;  %v5270_v1 = vsel %vm2447_vm14, %v5232_v4, %v5046_v25 }
 0x690   : > { %5508 = vmatmul.mubr.bf16.gmra.mrb[112].mxu0 %v5270_v1 }
 0x691   : > { %6298 = vmatprep.mubr.msk.bf16.mxu0 %vm2252_vm11, %v9032_v10  ;;  %v5685_v10 = vsel %vm4120_vm15, %v5628_v39, 0 }
 0x692   : > { %v4954_v60 = vpop.permute.xlu1 %4953  ;;  %6531 = vmatpush3.bf16.msra.mxu1 %v5685_v10 }
 0x693   : > { %v5170_v27 = vsel %vm1185_vm4, %v5138_v44, %v4954_v60  ;;  %v4956_v48 = vpop.permute.xlu0 %4955 }
 0x694   : > { %v5202_v2 = vsel %vm2382_vm13, %v5170_v27, %v4986_v51 }
 0x695   : > { %v5234_v56 = vsel %vm1218_vm5, %v5202_v2, %v5018_v5 }
 0x696   : > { %v4862_v15 = vpop.permute.xlu1 %4861  ;;  %v5273_v7 = vsel %vm2447_vm14, %v5234_v56, %v5048_v43 }
 0x697   : > { %v4864_v52 = vpop.permute.xlu0 %4863  ;;  %v5078_v22 = vsel %vm2252_vm11, %v9011_v36, %v4862_v15 }
 0x698   : > { %5516 = vmatmul.mubr.bf16.gmra.mrb[116].mxu0 %v5273_v7  ;;  %v5108_v9 = vsel %vm1136_vm3, %v5078_v22, %v4892_v46 }
 0x699   : > { %6299 = vmatprep.mubr.msk.bf16.mxu0 %vm2252_vm11, %v9128_v38  ;;  %v5140_v53 = vsel %vm2317_vm12, %v5108_v9, %v4924_v35  ;;  %v5080_v38 = vsel %vm2252_vm11, %v9005_v26, %v4864_v52 }
 0x69a   : > { %v5022_v30 = vpop.permute.xlu1 %5021  ;;  %v5172_v12 = vsel %vm1185_vm4, %v5140_v53, %v4956_v48  ;;  %v5110_v35 = vsel %vm1136_vm3, %v5080_v38, %v4894_v58 }
 0x69b   : > { %v5020_v42 = vpop.permute.xlu0 %5019  ;;  %v5204_v5 = vsel %vm2382_vm13, %v5172_v12, %v4988_v55 }
 0x69c   : > { %v5236_v36 = vsel %vm1218_vm5, %v5204_v5, %v5020_v42 }
 0x69e   : > { %v4928_v47 = vpop.permute.xlu1 %4927 }
 0x69f   : > { %v4926_v54 = vpop.permute.xlu0 %4925 }
 0x6a0   : > { %v5142_v29 = vsel %vm2317_vm12, %v5110_v35, %v4926_v54 }
 0x6a2   : > { %v4992_v14 = vpop.permute.xlu1 %4991 }
 0x6a3   : > { %v4990_v20 = vpop.permute.xlu0 %4989 }
 0x6a6   : > { %v4898_v6 = vpop.permute.xlu1 %4897 }
 0x6a7   : > { %v4896_v8 = vpop.permute.xlu0 %4895 }
 0x6aa   : > { %v5050_v17 = vpop.permute.xlu1 %5049 }
 0x6ab   : > { %v5052_v41 = vpop.permute.xlu0 %5051  ;;  %v5276_v23 = vsel %vm2447_vm14, %v5236_v36, %v5050_v17 }
 0x6ac   : > { %5524 = vmatmul.mubr.bf16.gmra.mrb[120].mxu0 %v5276_v23 }
 0x6ad   : > { %6300 = vmatprep.mubr.msk.bf16.mxu0 %vm2252_vm11, %v9121_v21 }
 0x6ae   : > { %v4958_v51 = vpop.permute.xlu1 %4957 }
 0x6af   : > { %v5174_v55 = vsel %vm1185_vm4, %v5142_v29, %v4958_v51  ;;  %v4960_v3 = vpop.permute.xlu0 %4959 }
 0x6b0   : > { %v5206_v26 = vsel %vm2382_vm13, %v5174_v55, %v4990_v20 }
 0x6b1   : > { %v5238_v62 = vsel %vm1218_vm5, %v5206_v26, %v5022_v30 }
 0x6b2   : > { %v4866_v46 = vpop.permute.xlu1 %4865  ;;  %v5279_v11 = vsel %vm2447_vm14, %v5238_v62, %v5052_v41 }
 0x6b3   : > { %v4868_v4 = vpop.permute.xlu0 %4867  ;;  %v5082_v21 = vsel %vm2252_vm11, %v9096_v16, %v4866_v46 }
 0x6b4   : > { %5532 = vmatmul.mubr.bf16.gmra.mrb[124].mxu0 %v5279_v11  ;;  %v5112_v43 = vsel %vm1136_vm3, %v5082_v21, %v4896_v8 }
 0x6b5   : > { %6301 = vmatprep.mubr.msk.bf16.mxu0 %vm2252_vm11, %v9243_v33  ;;  %v5144_v44 = vsel %vm2317_vm12, %v5112_v43, %v4928_v47  ;;  %v5084_v33 = vsel %vm2252_vm11, %v9090_v37, %v4868_v4 }
 0x6b6   : > { %v5026_v58 = vpop.permute.xlu1 %5025  ;;  %v5176_v48 = vsel %vm1185_vm4, %v5144_v44, %v4960_v3  ;;  %v5114_v10 = vsel %vm1136_vm3, %v5084_v33, %v4898_v6 }
 0x6b7   : > { %v5024_v25 = vpop.permute.xlu0 %5023  ;;  %v5208_v56 = vsel %vm2382_vm13, %v5176_v48, %v4992_v14 }
 0x6b8   : > { %v5240_v16 = vsel %vm1218_vm5, %v5208_v56, %v5024_v25 }
 0x6ba   : > { %v4932_v1 = vpop.permute.xlu1 %4931 }
 0x6bb   : > { %v4930_v40 = vpop.permute.xlu0 %4929 }
 0x6bc   : > { %v5146_v30 = vsel %vm2317_vm12, %v5114_v10, %v4930_v40 }
 0x6be   : > { %v4996_v60 = vpop.permute.xlu1 %4995 }
 0x6bf   : > { %v4994_v27 = vpop.permute.xlu0 %4993 }
 0x6c2   : > { %v4902_v2 = vpop.permute.xlu1 %4901 }
 0x6c3   : > { %v4900_v15 = vpop.permute.xlu0 %4899 }
 0x6c6   : > { %v5054_v7 = vpop.permute.xlu1 %5053 }
 0x6c7   : > { %v5056_v39 = vpop.permute.xlu0 %5055  ;;  %v5282_v52 = vsel %vm2447_vm14, %v5240_v16, %v5054_v7 }
 0x6c8   : > { %5540 = vmatmul.mubr.bf16.gmra.mrb[128].mxu0 %v5282_v52 }
 0x6c9   : > { %6302 = vmatprep.mubr.msk.bf16.mxu0 %vm2252_vm11, %v9238_v57 }
 0x6ca   : > { %v4962_v22 = vpop.permute.xlu1 %4961 }
 0x6cb   : > { %v5178_v42 = vsel %vm1185_vm4, %v5146_v30, %v4962_v22  ;;  %v4964_v9 = vpop.permute.xlu0 %4963 }
 0x6cc   : > { %v5210_v37 = vsel %vm2382_vm13, %v5178_v42, %v4994_v27 }
 0x6cd   : > { %v5242_v47 = vsel %vm1218_vm5, %v5210_v37, %v5026_v58 }
 0x6ce   : > { %v4870_v54 = vpop.permute.xlu1 %4869  ;;  %v5285_v53 = vsel %vm2447_vm14, %v5242_v47, %v5056_v39 }
 0x6cf   : > { %v5086_v14 = vsel %vm2252_vm11, %v9202_v63, %v4870_v54  ;;  %v4872_v20 = vpop.permute.xlu0 %4871 }
 0x6d0   : > { %v5116_v12 = vsel %vm1136_vm3, %v5086_v14, %v4900_v15  ;;  %5548 = vmatmul.mubr.bf16.gmra.mrb[132].mxu0 %v5285_v53  ;;  %v5088_v36 = vsel %vm2252_vm11, %v9196_v50, %v4872_v20 }
 0x6d1   : > { %v5148_v57 = vsel %vm2317_vm12, %v5116_v12, %v4932_v1  ;;  %6303 = vmatprep.mubr.msk.bf16.mxu0 %vm2252_vm11, %v9322_v32  ;;  %v5118_v35 = vsel %vm1136_vm3, %v5088_v36, %v4902_v2 }
 0x6d2   : > { %v5030_v6 = vpop.permute.xlu1 %5029  ;;  %v5180_v5 = vsel %vm1185_vm4, %v5148_v57, %v4964_v9 }
 0x6d3   : > { %v5212_v8 = vsel %vm2382_vm13, %v5180_v5, %v4996_v60  ;;  %v5028_v38 = vpop.permute.xlu0 %5027 }
 0x6d4   : > { %v5244_v63 = vsel %vm1218_vm5, %v5212_v8, %v5028_v38 }
 0x6d6   : > { %v5058_v17 = vpop.permute.xlu1 %5057 }
 0x6d7   : > { %v4934_v41 = vpop.permute.xlu0 %4933  ;;  %v5288_v23 = vsel %vm2447_vm14, %v5244_v63, %v5058_v17 }
 0x6d8   : > { %5556 = vmatmul.mubr.bf16.gmra.mrb[136].mxu0 %v5288_v23  ;;  %v5150_v32 = vsel %vm2317_vm12, %v5118_v35, %v4934_v41 }
 0x6d9   : > { %6304 = vmatprep.mubr.msk.bf16.mxu0 %vm2252_vm11, %v9341_v45 }
 0x6da   : > { %v4966_v29 = vpop.permute.xlu1 %4965 }
 0x6db   : > { %v5182_v51 = vsel %vm1185_vm4, %v5150_v32, %v4966_v29  ;;  %v4998_v55 = vpop.permute.xlu0 %4997 }
 0x6dc   : > { %v5214_v50 = vsel %vm2382_vm13, %v5182_v51, %v4998_v55 }
 0x6dd   : > { %v5246_v62 = vsel %vm1218_vm5, %v5214_v50, %v5030_v6 }
 0x6de   : > { %v4936_v3 = vpop.permute.xlu1 %4935 }
 0x6df   : > { %v5060_v26 = vpop.permute.xlu0 %5059 }
 0x6e0   : > { %v5291_v46 = vsel %vm2447_vm14, %v5246_v62, %v5060_v26 }
 0x6e1   : > { %5564 = vmatmul.mubr.bf16.gmra.mrb[140].mxu0 %v5291_v46 }
 0x6e2   : > { %v4874_v11 = vpop.permute.xlu1 %4873  ;;  %6305 = vmatprep.mubr.msk.bf16.mxu0 %vm2252_vm11, %v9702_v13 }
 0x6e3   : > { %v5090_v45 = vsel %vm2252_vm11, %v9290_v18, %v4874_v11  ;;  %v4904_v4 = vpop.permute.xlu0 %4903  ;;  %v9456_v18 = vld [vmem:[%s9658_s10] ss:$0 sm:$0xff] }
 0x6e4   : > { %v5120_v58 = vsel %vm1136_vm3, %v5090_v45, %v4904_v4 }
 0x6e5   : > { %v5152_v21 = vsel %vm2317_vm12, %v5120_v58, %v4936_v3 }
 0x6e6   : > { %v5000_v43 = vpop.permute.xlu1 %4999 }
 0x6e7   : > { %v4968_v25 = vpop.permute.xlu0 %4967 }
 0x6e8   : > { %v5184_v1 = vsel %vm1185_vm4, %v5152_v21, %v4968_v25 }
 0x6e9   : > { %v5216_v40 = vsel %vm2382_vm13, %v5184_v1, %v5000_v43 }
 0x6ea   : > { %v5247_v44 = vsel %vm1218_vm5, %v5216_v40, %v7965_v24 }
 0x6eb   : > { %v5293_v13 = vsel %vm2447_vm14, %v5247_v44, %v7962_v61 }
 0x6ec   : > { %5572 = vmatmul.mubr.bf16.gmra.mrb[144].mxu0 %v5293_v13 }
 0x6f2   : > { %v5453_v60 = vpop.f32.mrb[84].mxu0 }
 0x6f3   : > { %v5454_v27 = vadd.f32 %v9456_v18, %v5453_v60  ;;  %v5455_v48 = vpop.f32.mrb[85].mxu0 }
 0x6f4   : > { %v5456_v2 = vpop.f32.mrb[86].mxu0 }
 0x6f5   : > { %v5457_v56 = vadd.f32 %v9456_v18, %v5456_v2  ;;  %v5458_v15 = vpop.f32.mrb[87].mxu0  ;;  %v5580_v33 = vmax.f32 %v5454_v27, 0.0 }
 0x6f7   : > { %v5581_v16 = vmax.f32 %v5457_v56, 0.0 }
 0x6f9   : > { %v5612_v24 = vpack.c.bf16 %v5581_v16, %v5580_v33 }
 0x6fb   : > { %6532 = vmatprep.mubr.msk.bf16.mxu1 %vm4071_vm0, %v5612_v24 }
 0x70f   : > { %v5461_v61 = vpop.f32.mrb[88].mxu0 }
 0x710   : > { %v5462_v7 = vadd.f32 %v9456_v18, %v5461_v61  ;;  %v5463_v39 = vpop.f32.mrb[89].mxu0 }
 0x711   : > { %v5464_v52 = vpop.f32.mrb[90].mxu0 }
 0x712   : > { %v5465_v10 = vadd.f32 %v9456_v18, %v5464_v52  ;;  %v5466_v30 = vpop.f32.mrb[91].mxu0  ;;  %v5582_v22 = vmax.f32 %v5462_v7, 0.0 }
 0x714   : > { %v5583_v42 = vmax.f32 %v5465_v10, 0.0 }
 0x716   : > { %v5613_v9 = vpack.c.bf16 %v5583_v42, %v5582_v22 }
 0x717   : > { %v5469_v37 = vpop.f32.mrb[92].mxu0 }
 0x718   : > { %v5470_v47 = vadd.f32 %v9456_v18, %v5469_v37  ;;  %v5471_v54 = vpop.f32.mrb[93].mxu0  ;;  %6533 = vmatmul.mubr.msk.bf16.vlgmr.msra.gmra.mrb[108].mxu1 %vm4071_vm0, %v5613_v9 }
 0x719   : > { %v5472_v53 = vpop.f32.mrb[94].mxu0 }
 0x71a   : > { %v5473_v14 = vadd.f32 %v9456_v18, %v5472_v53  ;;  %v5474_v20 = vpop.f32.mrb[95].mxu0  ;;  %v5584_v12 = vmax.f32 %v5470_v47, 0.0 }
 0x71c   : > { %v5585_v57 = vmax.f32 %v5473_v14, 0.0 }
 0x71e   : > { %v5614_v6 = vpack.c.bf16 %v5585_v57, %v5584_v12 }
 0x720   : > { %6536 = vmatprep.mubr.msk.bf16.mxu1 %vm4071_vm0, %v5614_v6 }
 0x72b   : > { %v5477_v5 = vpop.f32.mrb[96].mxu0 }
 0x72c   : > { %v5478_v8 = vadd.f32 %v9456_v18, %v5477_v5  ;;  %v5479_v38 = vpop.f32.mrb[97].mxu0 }
 0x72d   : > { %v5480_v36 = vpop.f32.mrb[98].mxu0 }
 0x72e   : > { %v5481_v63 = vadd.f32 %v9456_v18, %v5480_v36  ;;  %v5482_v17 = vpop.f32.mrb[99].mxu0  ;;  %v5586_v41 = vmax.f32 %v5478_v8, 0.0 }
 0x730   : > { %v5587_v23 = vmax.f32 %v5481_v63, 0.0 }
 0x732   : > { %v5615_v35 = vpack.c.bf16 %v5587_v23, %v5586_v41 }
 0x733   : > { %v5485_v32 = vpop.f32.mrb[100].mxu0 }
 0x734   : > { %v5486_v29 = vadd.f32 %v9456_v18, %v5485_v32  ;;  %v5487_v51 = vpop.f32.mrb[101].mxu0  ;;  %6537 = vmatmul.mubr.msk.bf16.gmra.mrb[112].mxu1 %vm4071_vm0, %v5615_v35 }
 0x735   : > { %v5488_v55 = vpop.f32.mrb[102].mxu0 }
 0x736   : > { %v5489_v50 = vadd.f32 %v9456_v18, %v5488_v55  ;;  %v5490_v3 = vpop.f32.mrb[103].mxu0  ;;  %v5588_v26 = vmax.f32 %v5486_v29, 0.0 }
 0x738   : > { %v5589_v62 = vmax.f32 %v5489_v50, 0.0 }
 0x73a   : > { %v5616_v46 = vpack.c.bf16 %v5589_v62, %v5588_v26 }
 0x73c   : > { %6540 = vmatprep.mubr.msk.bf16.mxu1 %vm4071_vm0, %v5616_v46 }
 0x747   : > { %v5493_v11 = vpop.f32.mrb[104].mxu0 }
 0x748   : > { %v5494_v45 = vadd.f32 %v9456_v18, %v5493_v11  ;;  %v5495_v4 = vpop.f32.mrb[105].mxu0 }
 0x749   : > { %v5496_v58 = vpop.f32.mrb[106].mxu0 }
 0x74a   : > { %v5497_v21 = vadd.f32 %v9456_v18, %v5496_v58  ;;  %v5498_v25 = vpop.f32.mrb[107].mxu0  ;;  %v5590_v43 = vmax.f32 %v5494_v45, 0.0 }
 0x74c   : > { %v5591_v1 = vmax.f32 %v5497_v21, 0.0 }
 0x74e   : > { %v5617_v40 = vpack.c.bf16 %v5591_v1, %v5590_v43 }
 0x74f   : > { %v5501_v44 = vpop.f32.mrb[108].mxu0 }
 0x750   : > { %v5502_v13 = vadd.f32 %v9456_v18, %v5501_v44  ;;  %v5503_v60 = vpop.f32.mrb[109].mxu0  ;;  %6541 = vmatmul.mubr.msk.bf16.gmra.mrb[116].mxu1 %vm4071_vm0, %v5617_v40 }
 0x751   : > { %v5504_v27 = vpop.f32.mrb[110].mxu0 }
 0x752   : > { %v5505_v48 = vadd.f32 %v9456_v18, %v5504_v27  ;;  %v5506_v2 = vpop.f32.mrb[111].mxu0  ;;  %v5592_v56 = vmax.f32 %v5502_v13, 0.0 }
 0x754   : > { %v5593_v15 = vmax.f32 %v5505_v48, 0.0 }
 0x756   : > { %v5618_v33 = vpack.c.bf16 %v5593_v15, %v5592_v56 }
 0x758   : > { %6544 = vmatprep.mubr.msk.bf16.mxu1 %vm4071_vm0, %v5618_v33 }
 0x763   : > { %v5509_v16 = vpop.f32.mrb[112].mxu0 }
 0x764   : > { %v5510_v24 = vadd.f32 %v9456_v18, %v5509_v16  ;;  %v5511_v61 = vpop.f32.mrb[113].mxu0 }
 0x765   : > { %v5512_v7 = vpop.f32.mrb[114].mxu0 }
 0x766   : > { %v5513_v39 = vadd.f32 %v9456_v18, %v5512_v7  ;;  %v5514_v52 = vpop.f32.mrb[115].mxu0  ;;  %v5594_v10 = vmax.f32 %v5510_v24, 0.0 }
 0x768   : > { %v5595_v30 = vmax.f32 %v5513_v39, 0.0 }
 0x76a   : > { %v5619_v22 = vpack.c.bf16 %v5595_v30, %v5594_v10 }
 0x76b   : > { %v5517_v42 = vpop.f32.mrb[116].mxu0 }
 0x76c   : > { %v5518_v9 = vadd.f32 %v9456_v18, %v5517_v42  ;;  %v5519_v37 = vpop.f32.mrb[117].mxu0  ;;  %6545 = vmatmul.mubr.msk.bf16.gmra.mrb[120].mxu1 %vm4071_vm0, %v5619_v22 }
 0x76d   : > { %v5520_v47 = vpop.f32.mrb[118].mxu0 }
 0x76e   : > { %v5521_v54 = vadd.f32 %v9456_v18, %v5520_v47  ;;  %v5522_v53 = vpop.f32.mrb[119].mxu0  ;;  %v5596_v14 = vmax.f32 %v5518_v9, 0.0 }
 0x770   : > { %v5597_v20 = vmax.f32 %v5521_v54, 0.0 }
 0x772   : > { %v5620_v12 = vpack.c.bf16 %v5597_v20, %v5596_v14 }
 0x774   : > { %6548 = vmatprep.mubr.msk.bf16.mxu1 %vm4071_vm0, %v5620_v12 }
 0x77f   : > { %v5525_v57 = vpop.f32.mrb[120].mxu0 }
 0x780   : > { %v5526_v6 = vadd.f32 %v9456_v18, %v5525_v57  ;;  %v5527_v5 = vpop.f32.mrb[121].mxu0 }
 0x781   : > { %v5528_v8 = vpop.f32.mrb[122].mxu0 }
 0x782   : > { %v5529_v38 = vadd.f32 %v9456_v18, %v5528_v8  ;;  %v5530_v36 = vpop.f32.mrb[123].mxu0  ;;  %v5598_v63 = vmax.f32 %v5526_v6, 0.0 }
 0x784   : > { %v5599_v17 = vmax.f32 %v5529_v38, 0.0 }
 0x786   : > { %v5621_v41 = vpack.c.bf16 %v5599_v17, %v5598_v63  ;;  %v9509_v17 = vld [vmem:[%s9660_s12] ss:$0 sm:$0xff] }
 0x787   : > { %v5533_v23 = vpop.f32.mrb[124].mxu0 }
 0x788   : > { %v5534_v35 = vadd.f32 %v9456_v18, %v5533_v23  ;;  %v5535_v32 = vpop.f32.mrb[125].mxu0  ;;  %6549 = vmatmul.mubr.msk.bf16.gmra.mrb[124].mxu1 %vm4071_vm0, %v5621_v41 }
 0x789   : > { %v5536_v29 = vpop.f32.mrb[126].mxu0 }
 0x78a   : > { %v5537_v51 = vadd.f32 %v9456_v18, %v5536_v29  ;;  %v5538_v55 = vpop.f32.mrb[127].mxu0  ;;  %v5600_v50 = vmax.f32 %v5534_v35, 0.0  ;;  %v5850_v35 = vunpack.c.l.bf16 %v8731_v0 }
 0x78c   : > { %v5601_v3 = vmax.f32 %v5537_v51, 0.0 }
 0x78e   : > { %v5622_v26 = vpack.c.bf16 %v5601_v3, %v5600_v50  ;;  %v5851_v3 = vunpack.c.h.bf16 %v8731_v0 }
 0x790   : > { %6552 = vmatprep.mubr.msk.bf16.mxu1 %vm4071_vm0, %v5622_v26 }
 0x79b   : > { %v5541_v62 = vpop.f32.mrb[128].mxu0 }
 0x79c   : > { %v5542_v46 = vadd.f32 %v9456_v18, %v5541_v62  ;;  %v5543_v11 = vpop.f32.mrb[129].mxu0 }
 0x79d   : > { %v5544_v45 = vpop.f32.mrb[130].mxu0  ;;  %v5849_v11 = vunpack.c.h.bf16 %v8733_v28 }
 0x79e   : > { %v5545_v4 = vadd.f32 %v9456_v18, %v5544_v45  ;;  %v5546_v58 = vpop.f32.mrb[131].mxu0  ;;  %v5602_v21 = vmax.f32 %v5542_v46, 0.0 }
 0x7a0   : > { %v5603_v25 = vmax.f32 %v5545_v4, 0.0 }
 0x7a2   : > { %v5623_v43 = vpack.c.bf16 %v5603_v25, %v5602_v21 }
 0x7a3   : > { %v5549_v1 = vpop.f32.mrb[132].mxu0 }
 0x7a4   : > { %v5550_v40 = vadd.f32 %v9456_v18, %v5549_v1  ;;  %v5551_v44 = vpop.f32.mrb[133].mxu0  ;;  %6553 = vmatmul.mubr.msk.bf16.gmra.mrb[128].mxu1 %vm4071_vm0, %v5623_v43 }
 0x7a5   : > { %v5552_v13 = vpop.f32.mrb[134].mxu0 }
 0x7a6   : > { %v5553_v60 = vadd.f32 %v9456_v18, %v5552_v13  ;;  %v5554_v27 = vpop.f32.mrb[135].mxu0  ;;  %v5604_v48 = vmax.f32 %v5550_v40, 0.0 }
 0x7a8   : > { %v5605_v2 = vmax.f32 %v5553_v60, 0.0  ;;  %v5854_v60 = vunpack.c.l.bf16 %v8801_v31 }
 0x7aa   : > { %v5624_v56 = vpack.c.bf16 %v5605_v2, %v5604_v48  ;;  %v9714_v2 = vld [vmem:[#allocation7_spill] sm:$0xff] }
 0x7ab   : > { %v5557_v15 = vpop.f32.mrb[136].mxu0 }
 0x7ac   : > { %v5558_v33 = vadd.f32 %v9456_v18, %v5557_v15  ;;  %v5559_v16 = vpop.f32.mrb[137].mxu0  ;;  %6556 = vmatprep.mubr.msk.bf16.mxu1 %vm4071_vm0, %v5624_v56  ;;  %v5852_v56 = vunpack.c.l.bf16 %v9714_v2 }
 0x7ad   : > { %v5560_v24 = vpop.f32.mrb[138].mxu0 }
 0x7ae   : > { %v5561_v61 = vadd.f32 %v9456_v18, %v5560_v24  ;;  %v5562_v7 = vpop.f32.mrb[139].mxu0  ;;  %v5606_v39 = vmax.f32 %v5558_v33, 0.0  ;;  %v5855_v24 = vunpack.c.h.bf16 %v8801_v31 }
 0x7b0   : > { %v5607_v52 = vmax.f32 %v5561_v61, 0.0 }
 0x7b2   : > { %v5625_v10 = vpack.c.bf16 %v5607_v52, %v5606_v39  ;;  %v5853_v52 = vunpack.c.h.bf16 %v9714_v2 }
 0x7b4   : > { %v5565_v30 = vpop.f32.mrb[140].mxu0  ;;  %6557 = vmatmul.mubr.msk.bf16.gmra.mrb[132].mxu1 %vm4071_vm0, %v5625_v10 }
 0x7b5   : > { %v5566_v22 = vadd.f32 %v9456_v18, %v5565_v30  ;;  %v5567_v42 = vpop.f32.mrb[141].mxu0 }
 0x7b6   : > { %v5568_v9 = vpop.f32.mrb[142].mxu0 }
 0x7b7   : > { %v5569_v37 = vadd.f32 %v9456_v18, %v5568_v9  ;;  %v5570_v47 = vpop.f32.mrb[143].mxu0  ;;  %v5608_v54 = vmax.f32 %v5566_v22, 0.0 }
 0x7b9   : > { %v5609_v53 = vmax.f32 %v5569_v37, 0.0 }
 0x7bb   : > { %v5626_v14 = vpack.c.bf16 %v5609_v53, %v5608_v54 }
 0x7bd   : > { %6560 = vmatprep.mubr.msk.bf16.mxu1 %vm4071_vm0, %v5626_v14 }
 0x7bf   : > { %v5573_v20 = vpop.f32.mrb[144].mxu0 }
 0x7c0   : > { %v5574_v12 = vadd.f32 %v9456_v18, %v5573_v20  ;;  %v5575_v57 = vpop.f32.mrb[145].mxu0 }
 0x7c1   : > { %v5576_v6 = vpop.f32.mrb[146].mxu0 }
 0x7c2   : > { %v5577_v5 = vadd.f32 %v9456_v18, %v5576_v6  ;;  %v5578_v8 = vpop.f32.mrb[147].mxu0  ;;  %v5610_v38 = vmax.f32 %v5574_v12, 0.0  ;;  %v5848_v18 = vunpack.c.l.bf16 %v8733_v28  ;;  %v9715_v12 = vld [vmem:[#allocation3_spill] sm:$0xff] }
 0x7c3   : > { %v5858_v57 = vunpack.c.l.bf16 %v9715_v12  ;;  %v9716_v8 = vld [vmem:[#allocation5_spill] sm:$0xff] }
 0x7c4   : > { %v5611_v36 = vmax.f32 %v5577_v5, 0.0 }
 0x7c6   : > { %v5627_v63 = vpack.c.bf16 %v5611_v36, %v5610_v38  ;;  %v5856_v38 = vunpack.c.l.bf16 %v9716_v8 }
 0x7c8   : > { %6561 = vmatmul.mubr.msk.bf16.gmra.mrb[136].mxu1 %vm4071_vm0, %v5627_v63 }
 0x7eb   : > { %v6534_v41 = vpop.f32.mrb[108].mxu1 }
 0x7ec   : > { %v5730_v23 = vadd.f32 %v6534_v41, %v9509_v17  ;;  %v5721_v32 = vpop.f32.mrb[109].mxu1 }
 0x7ed   : > { %v5722_v29 = vadd.f32 %v9509_v17, %v5721_v32  ;;  %v6535_v51 = vpop.f32.mrb[110].mxu1 }
 0x7ee   : > { %v5882_v55 = vadd.f32 %v5850_v35, %v5730_v23  ;;  %v5733_v50 = vadd.f32 %v6535_v51, %v9509_v17  ;;  %v5724_v26 = vpop.f32.mrb[111].mxu1  ;;  %v5859_v23 = vunpack.c.h.bf16 %v9715_v12 }
 0x7ef   : > { %v5880_v62 = vadd.f32 %v5848_v18, %v5722_v29  ;;  %v5725_v46 = vadd.f32 %v9509_v17, %v5724_v26  ;;  %v5857_v18 = vunpack.c.h.bf16 %v9716_v8 }
 0x7f0   : > { %v5914_v45 = vmax.f32 %v5882_v55, 0.0  ;;  %v5883_v4 = vadd.f32 %v5851_v3, %v5733_v50 }
 0x7f1   : > { %v5912_v58 = vmax.f32 %v5880_v62, 0.0  ;;  %v5881_v0 = vadd.f32 %v5849_v11, %v5725_v46 }
 0x7f2   : > { %v6360_v21 = vpack.c.bf16 %v5914_v45, %v5914_v45  ;;  %v5915_v25 = vmax.f32 %v5883_v4, 0.0 }
 0x7f3   : > { %v6358_v43 = vpack.c.bf16 %v5912_v58, %v5912_v58  ;;  %v5913_v1 = vmax.f32 %v5881_v0, 0.0 }
 0x7f4   : > { %6075 = vst.msk [vmem:[%s9523_s23 + $0x8] sm:$0xf] %vm6072_vm1, %v6360_v21  ;;  %v6361_v28 = vpack.c.bf16 %v5915_v25, %v5915_v25  ;;  %v9717_v21 = vld [vmem:[#allocation4_spill] sm:$0xff] }
 0x7f5   : > { %6073 = vst.msk [vmem:[%s9523_s23] sm:$0xf] %vm6072_vm1, %v6358_v43  ;;  %v6359_v40 = vpack.c.bf16 %v5913_v1, %v5913_v1  ;;  %v5862_v25 = vunpack.c.l.bf16 %v9717_v21 }
 0x7f6   : > { %6076 = vst.msk [vmem:[%s9523_s23 + $0xc] sm:$0xf] %vm6072_vm1, %v6361_v28  ;;  %v9718_v28 = vld [vmem:[#allocation2_spill] sm:$0xff] }
 0x7f7   : > { %6074 = vst.msk [vmem:[%s9523_s23 + $0x4] sm:$0xf] %vm6072_vm1, %v6359_v40  ;;  %v5860_v40 = vunpack.c.l.bf16 %v9718_v28 }
 0x807   : > { %v6538_v44 = vpop.f32.mrb[112].mxu1 }
 0x808   : > { %v5746_v13 = vadd.f32 %v6538_v44, %v9509_v17  ;;  %v5737_v27 = vpop.f32.mrb[113].mxu1 }
 0x809   : > { %v5738_v48 = vadd.f32 %v9509_v17, %v5737_v27  ;;  %v6539_v15 = vpop.f32.mrb[114].mxu1  ;;  %v5863_v27 = vunpack.c.h.bf16 %v9717_v21 }
 0x80a   : > { %v5886_v33 = vadd.f32 %v5854_v60, %v5746_v13  ;;  %v5749_v16 = vadd.f32 %v6539_v15, %v9509_v17  ;;  %v5740_v61 = vpop.f32.mrb[115].mxu1  ;;  %v5861_v15 = vunpack.c.h.bf16 %v9718_v28 }
 0x80b   : > { %v5884_v7 = vadd.f32 %v5852_v56, %v5738_v48  ;;  %v5741_v39 = vadd.f32 %v9509_v17, %v5740_v61 }
 0x80c   : > { %v5918_v10 = vmax.f32 %v5886_v33, 0.0  ;;  %v5887_v30 = vadd.f32 %v5855_v24, %v5749_v16 }
 0x80d   : > { %v5916_v22 = vmax.f32 %v5884_v7, 0.0  ;;  %v5885_v42 = vadd.f32 %v5853_v52, %v5741_v39 }
 0x80e   : > { %v6364_v9 = vpack.c.bf16 %v5918_v10, %v5918_v10  ;;  %v5919_v37 = vmax.f32 %v5887_v30, 0.0 }
 0x80f   : > { %v6362_v47 = vpack.c.bf16 %v5916_v22, %v5916_v22  ;;  %v5917_v54 = vmax.f32 %v5885_v42, 0.0 }
 0x810   : > { %6079 = vst.msk [vmem:[%s9523_s23 + $0x18] sm:$0xf] %vm6072_vm1, %v6364_v9  ;;  %v6365_v53 = vpack.c.bf16 %v5919_v37, %v5919_v37  ;;  %v9719_v37 = vld [vmem:[#allocation6_spill] sm:$0xff] }
 0x811   : > { %6077 = vst.msk [vmem:[%s9523_s23 + $0x10] sm:$0xf] %vm6072_vm1, %v6362_v47  ;;  %v6363_v31 = vpack.c.bf16 %v5917_v54, %v5917_v54  ;;  %v5866_v47 = vunpack.c.l.bf16 %v9719_v37 }
 0x812   : > { %6080 = vst.msk [vmem:[%s9523_s23 + $0x1c] sm:$0xf] %vm6072_vm1, %v6365_v53 }
 0x813   : > { %6078 = vst.msk [vmem:[%s9523_s23 + $0x14] sm:$0xf] %vm6072_vm1, %v6363_v31  ;;  %v9720_v31 = vld [vmem:[#allocation8_spill] sm:$0xff] }
 0x823   : > { %v6542_v14 = vpop.f32.mrb[116].mxu1 }
 0x824   : > { %v5762_v20 = vadd.f32 %v6542_v14, %v9509_v17  ;;  %v5753_v6 = vpop.f32.mrb[117].mxu1  ;;  %v5864_v14 = vunpack.c.l.bf16 %v9720_v31 }
 0x825   : > { %v5754_v5 = vadd.f32 %v9509_v17, %v5753_v6  ;;  %v6543_v36 = vpop.f32.mrb[118].mxu1  ;;  %v5867_v6 = vunpack.c.h.bf16 %v9719_v37  ;;  %v5875_v37 = vunpack.c.h.bf16 %v9166_v19 }
 0x826   : > { %v5890_v63 = vadd.f32 %v5858_v57, %v5762_v20  ;;  %v5765_v41 = vadd.f32 %v6543_v36, %v9509_v17  ;;  %v5756_v35 = vpop.f32.mrb[119].mxu1  ;;  %v5865_v36 = vunpack.c.h.bf16 %v9720_v31  ;;  %v5873_v31 = vunpack.c.h.bf16 %v9169_v49 }
 0x827   : > { %v5888_v32 = vadd.f32 %v5856_v38, %v5754_v5  ;;  %v5757_v29 = vadd.f32 %v9509_v17, %v5756_v35 }
 0x828   : > { %v5922_v51 = vmax.f32 %v5890_v63, 0.0  ;;  %v5891_v55 = vadd.f32 %v5859_v23, %v5765_v41 }
 0x829   : > { %v5920_v50 = vmax.f32 %v5888_v32, 0.0  ;;  %v5889_v3 = vadd.f32 %v5857_v18, %v5757_v29 }
 0x82a   : > { %v6368_v26 = vpack.c.bf16 %v5922_v51, %v5922_v51  ;;  %v5923_v62 = vmax.f32 %v5891_v55, 0.0 }
 0x82b   : > { %v6366_v46 = vpack.c.bf16 %v5920_v50, %v5920_v50  ;;  %v5921_v11 = vmax.f32 %v5889_v3, 0.0 }
 0x82c   : > { %6083 = vst.msk [vmem:[%s9523_s23 + $0x28] sm:$0xf] %vm6072_vm1, %v6368_v26  ;;  %v6369_v45 = vpack.c.bf16 %v5923_v62, %v5923_v62  ;;  %v9721_v62 = vld [vmem:[#allocation9_spill] sm:$0xff] }
 0x82d   : > { %6081 = vst.msk [vmem:[%s9523_s23 + $0x20] sm:$0xf] %vm6072_vm1, %v6366_v46  ;;  %v6367_v4 = vpack.c.bf16 %v5921_v11, %v5921_v11  ;;  %v5870_v46 = vunpack.c.l.bf16 %v9721_v62 }
 0x82e   : > { %6084 = vst.msk [vmem:[%s9523_s23 + $0x2c] sm:$0xf] %vm6072_vm1, %v6369_v45 }
 0x82f   : > { %6082 = vst.msk [vmem:[%s9523_s23 + $0x24] sm:$0xf] %vm6072_vm1, %v6367_v4  ;;  %v9722_v4 = vld [vmem:[#allocation10_spill] sm:$0xff] }
 0x83f   : > { %v6546_v58 = vpop.f32.mrb[120].mxu1 }
 0x840   : > { %v5778_v0 = vadd.f32 %v6546_v58, %v9509_v17  ;;  %v5769_v43 = vpop.f32.mrb[121].mxu1  ;;  %v5868_v58 = vunpack.c.l.bf16 %v9722_v4 }
 0x841   : > { %v5770_v1 = vadd.f32 %v9509_v17, %v5769_v43  ;;  %v6547_v44 = vpop.f32.mrb[122].mxu1  ;;  %v5871_v43 = vunpack.c.h.bf16 %v9721_v62  ;;  %v5877_v62 = vunpack.c.h.bf16 %v9261_v34 }
 0x842   : > { %v5894_v13 = vadd.f32 %v5862_v25, %v5778_v0  ;;  %v5781_v60 = vadd.f32 %v6547_v44, %v9509_v17  ;;  %v5772_v48 = vpop.f32.mrb[123].mxu1  ;;  %v5869_v44 = vunpack.c.h.bf16 %v9722_v4 }
 0x843   : > { %v5892_v2 = vadd.f32 %v5860_v40, %v5770_v1  ;;  %v5773_v56 = vadd.f32 %v9509_v17, %v5772_v48 }
 0x844   : > { %v5926_v33 = vmax.f32 %v5894_v13, 0.0  ;;  %v5895_v16 = vadd.f32 %v5863_v27, %v5781_v60 }
 0x845   : > { %v5924_v24 = vmax.f32 %v5892_v2, 0.0  ;;  %v5893_v61 = vadd.f32 %v5861_v15, %v5773_v56 }
 0x846   : > { %v6372_v7 = vpack.c.bf16 %v5926_v33, %v5926_v33  ;;  %v5927_v39 = vmax.f32 %v5895_v16, 0.0 }
 0x847   : > { %v6370_v52 = vpack.c.bf16 %v5924_v24, %v5924_v24  ;;  %v5925_v10 = vmax.f32 %v5893_v61, 0.0 }
 0x848   : > { %6087 = vst.msk [vmem:[%s9523_s23 + $0x38] sm:$0xf] %vm6072_vm1, %v6372_v7  ;;  %v6373_v30 = vpack.c.bf16 %v5927_v39, %v5927_v39  ;;  %v5874_v39 = vunpack.c.l.bf16 %v9166_v19 }
 0x849   : > { %6085 = vst.msk [vmem:[%s9523_s23 + $0x30] sm:$0xf] %vm6072_vm1, %v6370_v52  ;;  %v6371_v22 = vpack.c.bf16 %v5925_v10, %v5925_v10 }
 0x84a   : > { %6088 = vst.msk [vmem:[%s9523_s23 + $0x3c] sm:$0xf] %vm6072_vm1, %v6373_v30  ;;  %v5872_v30 = vunpack.c.l.bf16 %v9169_v49 }
 0x84b   : > { %6086 = vst.msk [vmem:[%s9523_s23 + $0x34] sm:$0xf] %vm6072_vm1, %v6371_v22 }
 0x85b   : > { %v6550_v42 = vpop.f32.mrb[124].mxu1 }
 0x85c   : > { %v5794_v9 = vadd.f32 %v6550_v42, %v9509_v17  ;;  %v5785_v54 = vpop.f32.mrb[125].mxu1 }
 0x85d   : > { %v5786_v53 = vadd.f32 %v9509_v17, %v5785_v54  ;;  %v6551_v20 = vpop.f32.mrb[126].mxu1 }
 0x85e   : > { %v5898_v12 = vadd.f32 %v5866_v47, %v5794_v9  ;;  %v5797_v57 = vadd.f32 %v6551_v20, %v9509_v17  ;;  %v5788_v5 = vpop.f32.mrb[127].mxu1 }
 0x85f   : > { %v5896_v8 = vadd.f32 %v5864_v14, %v5786_v53  ;;  %v5789_v38 = vadd.f32 %v9509_v17, %v5788_v5 }
 0x860   : > { %v5930_v63 = vmax.f32 %v5898_v12, 0.0  ;;  %v5899_v41 = vadd.f32 %v5867_v6, %v5797_v57 }
 0x861   : > { %v5928_v23 = vmax.f32 %v5896_v8, 0.0  ;;  %v5897_v35 = vadd.f32 %v5865_v36, %v5789_v38 }
 0x862   : > { %v6376_v32 = vpack.c.bf16 %v5930_v63, %v5930_v63  ;;  %v5931_v29 = vmax.f32 %v5899_v41, 0.0  ;;  %v5878_v41 = vunpack.c.l.bf16 %v9257_v59 }
 0x863   : > { %v6374_v18 = vpack.c.bf16 %v5928_v23, %v5928_v23  ;;  %v5929_v51 = vmax.f32 %v5897_v35, 0.0 }
 0x864   : > { %6091 = vst.msk [vmem:[%s9523_s23 + $0x48] sm:$0xf] %vm6072_vm1, %v6376_v32  ;;  %v6377_v55 = vpack.c.bf16 %v5931_v29, %v5931_v29  ;;  %v5876_v32 = vunpack.c.l.bf16 %v9261_v34 }
 0x865   : > { %6089 = vst.msk [vmem:[%s9523_s23 + $0x40] sm:$0xf] %vm6072_vm1, %v6374_v18  ;;  %v6375_v50 = vpack.c.bf16 %v5929_v51, %v5929_v51 }
 0x866   : > { %6092 = vst.msk [vmem:[%s9523_s23 + $0x4c] sm:$0xf] %vm6072_vm1, %v6377_v55  ;;  %v5879_v55 = vunpack.c.h.bf16 %v9257_v59 }
 0x867   : > { %6090 = vst.msk [vmem:[%s9523_s23 + $0x44] sm:$0xf] %vm6072_vm1, %v6375_v50 }
 0x877   : > { %v6554_v3 = vpop.f32.mrb[128].mxu1 }
 0x878   : > { %v5810_v26 = vadd.f32 %v6554_v3, %v9509_v17  ;;  %v5801_v11 = vpop.f32.mrb[129].mxu1 }
 0x879   : > { %v5802_v45 = vadd.f32 %v9509_v17, %v5801_v11  ;;  %v6555_v0 = vpop.f32.mrb[130].mxu1 }
 0x87a   : > { %v5902_v21 = vadd.f32 %v5870_v46, %v5810_v26  ;;  %v5813_v25 = vadd.f32 %v6555_v0, %v9509_v17  ;;  %v5804_v1 = vpop.f32.mrb[131].mxu1 }
 0x87b   : > { %v5900_v28 = vadd.f32 %v5868_v58, %v5802_v45  ;;  %v5805_v40 = vadd.f32 %v9509_v17, %v5804_v1 }
 0x87c   : > { %v5934_v13 = vmax.f32 %v5902_v21, 0.0  ;;  %v5903_v60 = vadd.f32 %v5871_v43, %v5813_v25 }
 0x87d   : > { %v5932_v27 = vmax.f32 %v5900_v28, 0.0  ;;  %v5901_v48 = vadd.f32 %v5869_v44, %v5805_v40 }
 0x87e   : > { %v6380_v2 = vpack.c.bf16 %v5934_v13, %v5934_v13  ;;  %v5935_v56 = vmax.f32 %v5903_v60, 0.0 }
 0x87f   : > { %v6378_v15 = vpack.c.bf16 %v5932_v27, %v5932_v27  ;;  %v5933_v33 = vmax.f32 %v5901_v48, 0.0 }
 0x880   : > { %6095 = vst.msk [vmem:[%s9523_s23 + $0x58] sm:$0xf] %vm6072_vm1, %v6380_v2  ;;  %v6381_v16 = vpack.c.bf16 %v5935_v56, %v5935_v56 }
 0x881   : > { %6093 = vst.msk [vmem:[%s9523_s23 + $0x50] sm:$0xf] %vm6072_vm1, %v6378_v15  ;;  %v6379_v24 = vpack.c.bf16 %v5933_v33, %v5933_v33 }
 0x882   : > { %6096 = vst.msk [vmem:[%s9523_s23 + $0x5c] sm:$0xf] %vm6072_vm1, %v6381_v16 }
 0x883   : > { %6094 = vst.msk [vmem:[%s9523_s23 + $0x54] sm:$0xf] %vm6072_vm1, %v6379_v24 }
 0x887   : > { %v6558_v61 = vpop.f32.mrb[132].mxu1 }
 0x888   : > { %v5826_v7 = vadd.f32 %v6558_v61, %v9509_v17  ;;  %v5817_v52 = vpop.f32.mrb[133].mxu1 }
 0x889   : > { %v5818_v10 = vadd.f32 %v9509_v17, %v5817_v52  ;;  %v6559_v22 = vpop.f32.mrb[134].mxu1 }
 0x88a   : > { %v5906_v42 = vadd.f32 %v5874_v39, %v5826_v7  ;;  %v5829_v9 = vadd.f32 %v6559_v22, %v9509_v17  ;;  %v5820_v47 = vpop.f32.mrb[135].mxu1 }
 0x88b   : > { %v5904_v54 = vadd.f32 %v5872_v30, %v5818_v10  ;;  %v5821_v53 = vadd.f32 %v9509_v17, %v5820_v47 }
 0x88c   : > { %v5938_v14 = vmax.f32 %v5906_v42, 0.0  ;;  %v5907_v20 = vadd.f32 %v5875_v37, %v5829_v9 }
 0x88d   : > { %v5936_v12 = vmax.f32 %v5904_v54, 0.0  ;;  %v5905_v57 = vadd.f32 %v5873_v31, %v5821_v53 }
 0x88e   : > { %v6384_v6 = vpack.c.bf16 %v5938_v14, %v5938_v14  ;;  %v5939_v5 = vmax.f32 %v5907_v20, 0.0 }
 0x88f   : > { %v6382_v8 = vpack.c.bf16 %v5936_v12, %v5936_v12  ;;  %v5937_v38 = vmax.f32 %v5905_v57, 0.0 }
 0x890   : > { %6099 = vst.msk [vmem:[%s9523_s23 + $0x68] sm:$0xf] %vm6072_vm1, %v6384_v6  ;;  %v6385_v36 = vpack.c.bf16 %v5939_v5, %v5939_v5 }
 0x891   : > { %6097 = vst.msk [vmem:[%s9523_s23 + $0x60] sm:$0xf] %vm6072_vm1, %v6382_v8  ;;  %v6383_v19 = vpack.c.bf16 %v5937_v38, %v5937_v38 }
 0x892   : > { %6100 = vst.msk [vmem:[%s9523_s23 + $0x6c] sm:$0xf] %vm6072_vm1, %v6385_v36 }
 0x893   : > { %6098 = vst.msk [vmem:[%s9523_s23 + $0x64] sm:$0xf] %vm6072_vm1, %v6383_v19 }
 0x89b   : > { %v6562_v63 = vpop.f32.mrb[136].mxu1 }
 0x89c   : > { %v5842_v49 = vadd.f32 %v6562_v63, %v9509_v17  ;;  %v5833_v23 = vpop.f32.mrb[137].mxu1 }
 0x89d   : > { %v5834_v35 = vadd.f32 %v9509_v17, %v5833_v23  ;;  %v6563_v29 = vpop.f32.mrb[138].mxu1 }
 0x89e   : > { %v5910_v18 = vadd.f32 %v5878_v41, %v5842_v49  ;;  %v5845_v51 = vadd.f32 %v6563_v29, %v9509_v17  ;;  %v5836_v50 = vpop.f32.mrb[139].mxu1 }
 0x89f   : > { %v5908_v3 = vadd.f32 %v5876_v32, %v5834_v35  ;;  %v5837_v26 = vadd.f32 %v9509_v17, %v5836_v50 }
 0x8a0   : > { %v5942_v46 = vmax.f32 %v5910_v18, 0.0  ;;  %v5911_v11 = vadd.f32 %v5879_v55, %v5845_v51 }
 0x8a1   : > { %v5940_v45 = vmax.f32 %v5908_v3, 0.0  ;;  %v5909_v4 = vadd.f32 %v5877_v62, %v5837_v26 }
 0x8a2   : > { %v6388_v58 = vpack.c.bf16 %v5942_v46, %v5942_v46  ;;  %v5943_v0 = vmax.f32 %v5911_v11, 0.0 }
 0x8a3   : > { %v6386_v21 = vpack.c.bf16 %v5940_v45, %v5940_v45  ;;  %v5941_v25 = vmax.f32 %v5909_v4, 0.0 }
 0x8a4   : > { %6103 = vst.msk [vmem:[%s9523_s23 + $0x78] sm:$0xf] %vm6072_vm1, %v6388_v58  ;;  %v6389_v43 = vpack.c.bf16 %v5943_v0, %v5943_v0 }
 0x8a5   : > { %6101 = vst.msk [vmem:[%s9523_s23 + $0x70] sm:$0xf] %vm6072_vm1, %v6386_v21  ;;  %v6387_v59 = vpack.c.bf16 %v5941_v25, %v5941_v25 }
 0x8a6   : > { %6104 = vst.msk [vmem:[%s9523_s23 + $0x7c] sm:$0xf] %vm6072_vm1, %v6389_v43 }
 0x8a7   : > { %6102 = vst.msk [vmem:[%s9523_s23 + $0x74] sm:$0xf] %vm6072_vm1, %v6387_v59 }
 0x8a8 PF: > { %s23_s25 = sadd.s32 1, %s6658_s25  }
 0x8a9   : > { %p20_p4 = scmp.ge.s32.totalorder %s23_s25, 4  }
 0x8ab   :  { %22 = sbr.rel (!%p20_p4) target bundleno = 1 (0x1), region = 102 }

// kernel: qnetwork_forward.5
= control target key start
LH: loop header
LB: loop body
LE: loop exit
PB: predicated region body
PF: predicated region fallthrough
CT: control target
= control target key end

     0   :  { %s3340_s24 = smov 0   ;;  %s3342_s25 = smov 0   ;;  %s3619_s0 = inlined_call_operand.vmem [shape: bf16[8,4096], index: 0, kind: input, shape index: {}]   ;;  %s3620_s1 = inlined_call_operand.vmem [shape: bf16[4096,32], index: 1, kind: input, shape index: {}]   ;;  %s3621_s2 = inlined_call_operand.vmem [shape: f32[1,32], index: 2, kind: input, shape index: {}]   ;;  %s3622_s3 = inlined_call_operand.vmem [shape: bf16[8,10], index: 3, kind: input, shape index: {}]   ;;  %s3623_s4 = inlined_call_operand.vmem [shape: bf16[10,32], index: 4, kind: input, shape index: {}]   ;;  %s3624_s5 = inlined_call_operand.vmem [shape: f32[1,32], index: 5, kind: input, shape index: {}]   ;;  %s3625_s6 = inlined_call_operand.vmem [shape: bf16[32,32], index: 6, kind: input, shape index: {}]   ;;  %s3626_s7 = inlined_call_operand.vmem [shape: f32[1,32], index: 7, kind: input, shape index: {}]   ;;  %s3627_s8 = inlined_call_operand.vmem [shape: bf16[32,32], index: 8, kind: input, shape index: {}]   ;;  %s3628_s9 = inlined_call_operand.vmem [shape: f32[1,32], index: 9, kind: input, shape index: {}]   ;;  %s3629_s10 = inlined_call_operand.vmem [shape: bf16[32,32], index: 10, kind: input, shape index: {}]   ;;  %s3630_s11 = inlined_call_operand.vmem [shape: bf16[32,32], index: 11, kind: input, shape index: {}]   ;;  %s3631_s12 = inlined_call_operand.vmem [shape: f32[1,32], index: 12, kind: input, shape index: {}]   ;;  %s3632_s13 = inlined_call_operand.vmem [shape: bf16[32,32], index: 13, kind: input, shape index: {}]   ;;  %s3633_s14 = inlined_call_operand.vmem [shape: f32[1,32], index: 14, kind: input, shape index: {}]   ;;  %s3634_s15 = inlined_call_operand.vmem [shape: bf16[32,4], index: 15, kind: input, shape index: {}]   ;;  %s3635_s16 = inlined_call_operand.vmem [shape: f32[1,4], index: 16, kind: input, shape index: {}]   ;;  %s3636_s17 = inlined_call_operand.vmem [shape: f32[8,4], index: 17, kind: output, shape index: {}]  }
   0x1   :  { %3637 = sst [smem:[#allocation4_spill]] %s3619_s0  ;;  %s3344_s26 = smov 0  }
   0x2   :  { %3638 = sst [smem:[#allocation5_spill]] %s3620_s1 }
   0x3 LB: > { %s36_s27 = sadd.s32 1, %s3241_s25  ;;  %p2608_p0 = scmp.ge.s32.totalorder %s3245_s26, 1  ;;  %s3245_s26 = sphi %s3344_s26, %s27_s26   ;;  %s3241_s25 = sphi %s3342_s25, %s3644_s25   ;;  %s3237_s24 = sphi %s3340_s24, %s3643_s24  }
   0x4   : > { %p37_p1 = scmp.ge.s32.totalorder %s36_s27, 2  ;;  %p526_p2 = scmp.lt.s32.totalorder %s3245_s26, 3 }
   0x6   : > { %s3646_s27 = smov (%p37_p1, %s36_s27), 0  ;;  %p527_p3 = pnand %p2608_p0, %p526_p2 }
   0x7   : > { %3639 = sst [smem:[#allocation3_spill]] %s3646_s27  ;;  %s2609_s28 = sshll.u32 (!%p527_p3), %s3237_s24, 4 }
   0x8   : > { %530 = sbr.rel (%p527_p3) target bundleno = 1580 (0x62c), region = 88  ;;  %s2611_s29 = sshll.u32 (!%p527_p3), %s3237_s24, 8 }
   0x9   : > { %p593_p4 = scmp.lt.s32.totalorder (!%p527_p3), %s2609_s28, 31  ;;  %p601_p5 = scmp.lt.s32.totalorder (!%p527_p3), %s2611_s29, 511 }
   0xa   : > { %s3640_s19 = sld [smem:[#allocation4_spill]] (!%p527_p3)  ;;  %s3641_s23 = sld [smem:[#allocation5_spill]] (!%p527_p3) }
   0xb   : > { %p2613_p6 = scmp.ne.s32.totalorder (!%p527_p3), %s3237_s24, 0 }
   0xf   : > { %s3648_s28 = smov (!%p593_p4, %s2609_s28), 31  ;;  %s3650_s29 = smov (!%p601_p5, %s2611_s29), 511 }
  0x10   : > { %s2610_s0 = sshll.u32 %s3648_s28, 2  ;;  %s2612_s20 = sshll.u32 %s3650_s29, 2  ;;  %vm619_vm0 = vcmask (!%p2613_p6), 261120   ;;  %v3247_v0 = vmov (!%p2613_p6), 0.0  }
  0x11   : > { %s3365_s1 = scalar_lea.vmem %s3640_s19, %s2610_s0  ;;  %s3370_s27 = scalar_lea.vmem %s3641_s23, %s2612_s20  ;;  %620 = vst.msk [vmem:[#allocation2] sm:$0xff] (!%p2613_p6), %vm619_vm0, %v3247_v0 }
  0x12   : > { %618 = sbr.rel (%p2613_p6) target bundleno = 25 (0x19), region = 92 }
  0x19 PF: > { %v3066_v1 = vld [vmem:[%s3370_s27 + $0x40] sm:$0xff]   ;;  %v3070_v5 = vld [vmem:[%s3370_s27 + $0x48] sm:$0xff]   ;;  %v3074_v9 = vld [vmem:[%s3370_s27 + $0x50] sm:$0xff]   ;;  %vm2031_vm1 = vcmask 261120   ;;  %p2758_p7 = scmp.ne.s32.totalorder %s3237_s24, 1 }
  0x1a   : > { %v3067_v2 = vld [vmem:[%s3370_s27 + $0xc0] sm:$0xff]   ;;  %2789 = vmatprep.subr.bf16.mxu0 %v3066_v1  ;;  %v3071_v6 = vld [vmem:[%s3370_s27 + $0xc8] sm:$0xff]   ;;  %v3075_v10 = vld [vmem:[%s3370_s27 + $0xd0] sm:$0xff]   ;;  %vm2065_vm2 = vcmask (!%p2758_p7), 1044480   ;;  %vm3249_vm3 = vmmov (!%p2758_p7), 0   ;;  %vm2061_vm4 = vcmask (!%p2758_p7), 80896  }
  0x1b   : > { %v3068_v3 = vld [vmem:[%s3370_s27] sm:$0xff]   ;;  %2811 = vmatprep.subr.bf16.mxu1 %v3067_v2  ;;  %v3072_v7 = vld [vmem:[%s3370_s27 + $0x8] sm:$0xff]   ;;  %v3076_v11 = vld [vmem:[%s3370_s27 + $0x10] sm:$0xff]   ;;  %vm2510_vm5 = vcmask (!%p2758_p7), 31744  }
  0x1c   : > { %v3069_v4 = vld [vmem:[%s3370_s27 + $0x80] sm:$0xff]   ;;  %2790 = vmatpush3.bf16.msra.mxu0 %v3068_v3  ;;  %v3073_v8 = vld [vmem:[%s3370_s27 + $0x88] sm:$0xff]   ;;  %v3077_v12 = vld [vmem:[%s3370_s27 + $0x90] sm:$0xff]  }
  0x1d   : > { %2812 = vmatpush3.bf16.msra.mxu1 %v3069_v4  ;;  %2791 = vmatprep.subr.bf16.mxu0 %v3070_v5  ;;  %v3078_v13 = vld [vmem:[%s3370_s27 + $0x58] sm:$0xff]   ;;  %v3082_v17 = vld [vmem:[%s3370_s27 + $0x60] sm:$0xff]   ;;  %v3086_v21 = vld [vmem:[%s3370_s27 + $0x68] sm:$0xff]  }
  0x1e   : > { %2813 = vmatprep.subr.bf16.mxu1 %v3071_v6  ;;  %v3079_v14 = vld [vmem:[%s3370_s27 + $0xd8] sm:$0xff]   ;;  %v3083_v18 = vld [vmem:[%s3370_s27 + $0xe0] sm:$0xff]   ;;  %v3087_v22 = vld [vmem:[%s3370_s27 + $0xe8] sm:$0xff]  }
  0x1f   : > { %v3080_v15 = vld [vmem:[%s3370_s27 + $0x18] sm:$0xff]   ;;  %v3084_v19 = vld [vmem:[%s3370_s27 + $0x20] sm:$0xff]   ;;  %v3088_v23 = vld [vmem:[%s3370_s27 + $0x28] sm:$0xff]  }
  0x20   : > { %2792 = vmatpush3.bf16.msra.mxu0 %v3072_v7  ;;  %v3081_v16 = vld [vmem:[%s3370_s27 + $0x98] sm:$0xff]   ;;  %v3085_v20 = vld [vmem:[%s3370_s27 + $0xa0] sm:$0xff]   ;;  %v3089_v24 = vld [vmem:[%s3370_s27 + $0xa8] sm:$0xff]  }
  0x21   : > { %2814 = vmatpush3.bf16.msra.mxu1 %v3073_v8  ;;  %2793 = vmatprep.subr.bf16.mxu0 %v3074_v9  ;;  %v3090_v25 = vld [vmem:[%s3370_s27 + $0x70] sm:$0xff]   ;;  %v3094_v29 = vld [vmem:[%s3370_s27 + $0x78] sm:$0xff]   ;;  %v622_v33 = vld [vmem:[%s3365_s1] sm:$0xff] }
  0x22   : > { %2815 = vmatprep.subr.bf16.mxu1 %v3075_v10  ;;  %v3091_v26 = vld [vmem:[%s3370_s27 + $0xf0] sm:$0xff]   ;;  %v3095_v30 = vld [vmem:[%s3370_s27 + $0xf8] sm:$0xff]   ;;  %v623_v34 = vld [vmem:[%s3365_s1 + $0x8] sm:$0xff]  ;;  %v2614_v35 = vcombine.low %v622_v33, %v622_v33  ;;  %v2615_v36 = vcombine.high %v622_v33, %v622_v33 }
  0x23   : > { %v3092_v27 = vld [vmem:[%s3370_s27 + $0x30] sm:$0xff]   ;;  %v3096_v31 = vld [vmem:[%s3370_s27 + $0x38] sm:$0xff]   ;;  %v2616_v37 = vcombine.low %v623_v34, %v623_v34  ;;  %v2617_v38 = vcombine.high %v623_v34, %v623_v34  ;;  %v3102_v39 = vld [vmem:[%s3370_s27 + $0x140] sm:$0xff]  }
  0x24   : > { %2794 = vmatpush3.bf16.msra.mxu0 %v3076_v11  ;;  %v3093_v28 = vld [vmem:[%s3370_s27 + $0xb0] sm:$0xff]   ;;  %v3097_v32 = vld [vmem:[%s3370_s27 + $0xb8] sm:$0xff]   ;;  %v3103_v40 = vld [vmem:[%s3370_s27 + $0x1c0] sm:$0xff]   ;;  %1742 = vmatprep.mubr.bf16.mxu0 %v2615_v36 }
  0x25   : > { %2816 = vmatpush3.bf16.msra.mxu1 %v3077_v12  ;;  %2795 = vmatprep.subr.bf16.mxu0 %v3078_v13  ;;  %v3104_v41 = vld [vmem:[%s3370_s27 + $0x100] sm:$0xff]   ;;  %v3106_v43 = vld [vmem:[%s3370_s27 + $0x148] sm:$0xff]   ;;  %v3110_v47 = vld [vmem:[%s3370_s27 + $0x150] sm:$0xff]  }
  0x26   : > { %2817 = vmatprep.subr.bf16.mxu1 %v3079_v14  ;;  %1782 = vmatprep.mubr.bf16.mxu1 %v2617_v38  ;;  %v3105_v42 = vld [vmem:[%s3370_s27 + $0x180] sm:$0xff]   ;;  %v3107_v44 = vld [vmem:[%s3370_s27 + $0x1c8] sm:$0xff]   ;;  %v3111_v48 = vld [vmem:[%s3370_s27 + $0x1d0] sm:$0xff]  }
  0x27   : > { %v3108_v45 = vld [vmem:[%s3370_s27 + $0x108] sm:$0xff]   ;;  %v3112_v49 = vld [vmem:[%s3370_s27 + $0x110] sm:$0xff]   ;;  %v3114_v51 = vld [vmem:[%s3370_s27 + $0x158] sm:$0xff]  }
  0x28   : > { %2796 = vmatpush3.bf16.msra.mxu0 %v3080_v15  ;;  %v3109_v46 = vld [vmem:[%s3370_s27 + $0x188] sm:$0xff]   ;;  %v3113_v50 = vld [vmem:[%s3370_s27 + $0x190] sm:$0xff]   ;;  %v3115_v52 = vld [vmem:[%s3370_s27 + $0x1d8] sm:$0xff]  }
  0x29   : > { %2818 = vmatpush3.bf16.msra.mxu1 %v3081_v16  ;;  %2797 = vmatprep.subr.bf16.mxu0 %v3082_v17  ;;  %v3116_v53 = vld [vmem:[%s3370_s27 + $0x118] sm:$0xff]   ;;  %v3118_v55 = vld [vmem:[%s3370_s27 + $0x160] sm:$0xff]   ;;  %v3122_v59 = vld [vmem:[%s3370_s27 + $0x168] sm:$0xff]  }
  0x2a   : > { %2819 = vmatprep.subr.bf16.mxu1 %v3083_v18  ;;  %v3117_v54 = vld [vmem:[%s3370_s27 + $0x198] sm:$0xff]   ;;  %v3119_v56 = vld [vmem:[%s3370_s27 + $0x1e0] sm:$0xff]   ;;  %v3123_v60 = vld [vmem:[%s3370_s27 + $0x1e8] sm:$0xff]  }
  0x2b   : > { %v3120_v57 = vld [vmem:[%s3370_s27 + $0x120] sm:$0xff]   ;;  %v3124_v61 = vld [vmem:[%s3370_s27 + $0x128] sm:$0xff]   ;;  %v3126_v63 = vld [vmem:[%s3370_s27 + $0x170] sm:$0xff]  }
  0x2c   : > { %2798 = vmatpush3.bf16.msra.mxu0 %v3084_v19  ;;  %v3121_v58 = vld [vmem:[%s3370_s27 + $0x1a0] sm:$0xff]   ;;  %v3125_v62 = vld [vmem:[%s3370_s27 + $0x1a8] sm:$0xff]   ;;  %v3127_v0 = vld [vmem:[%s3370_s27 + $0x1f0] sm:$0xff]  }
  0x2d   : > { %2820 = vmatpush3.bf16.msra.mxu1 %v3085_v20  ;;  %2799 = vmatprep.subr.bf16.mxu0 %v3086_v21  ;;  %v3128_v1 = vld [vmem:[%s3370_s27 + $0x130] sm:$0xff]   ;;  %v3130_v3 = vld [vmem:[%s3370_s27 + $0x178] sm:$0xff]   ;;  %v3138_v13 = vld [vmem:[%s3370_s27 + $0x240] sm:$0xff]  }
  0x2e   : > { %2821 = vmatprep.subr.bf16.mxu1 %v3087_v22  ;;  %v3129_v2 = vld [vmem:[%s3370_s27 + $0x1b0] sm:$0xff]   ;;  %v3131_v4 = vld [vmem:[%s3370_s27 + $0x1f8] sm:$0xff]   ;;  %v3139_v14 = vld [vmem:[%s3370_s27 + $0x2c0] sm:$0xff]  }
  0x2f   : > { %v3132_v5 = vld [vmem:[%s3370_s27 + $0x138] sm:$0xff]   ;;  %v624_v7 = vld [vmem:[%s3365_s1 + $0x10] sm:$0xff]  ;;  %v3140_v15 = vld [vmem:[%s3370_s27 + $0x200] sm:$0xff]  }
  0x30   : > { %2800 = vmatpush3.bf16.msra.mxu0 %v3088_v23  ;;  %v3133_v6 = vld [vmem:[%s3370_s27 + $0x1b8] sm:$0xff]   ;;  %v2618_v8 = vcombine.low %v624_v7, %v624_v7  ;;  %v2619_v9 = vcombine.high %v624_v7, %v624_v7  ;;  %v3141_v16 = vld [vmem:[%s3370_s27 + $0x280] sm:$0xff]   ;;  %v3142_v17 = vld [vmem:[%s3370_s27 + $0x248] sm:$0xff]  }
  0x31   : > { %2822 = vmatpush3.bf16.msra.mxu1 %v3089_v24  ;;  %2801 = vmatprep.subr.bf16.mxu0 %v3090_v25  ;;  %v625_v10 = vld [vmem:[%s3365_s1 + $0x18] sm:$0xff]  ;;  %v3143_v18 = vld [vmem:[%s3370_s27 + $0x2c8] sm:$0xff]   ;;  %v3146_v21 = vld [vmem:[%s3370_s27 + $0x250] sm:$0xff]  }
  0x32   : > { %2823 = vmatprep.subr.bf16.mxu1 %v3091_v26  ;;  %v2620_v11 = vcombine.low %v625_v10, %v625_v10  ;;  %v2621_v12 = vcombine.high %v625_v10, %v625_v10  ;;  %v3144_v19 = vld [vmem:[%s3370_s27 + $0x208] sm:$0xff]   ;;  %v3147_v22 = vld [vmem:[%s3370_s27 + $0x2d0] sm:$0xff]   ;;  %v3150_v25 = vld [vmem:[%s3370_s27 + $0x258] sm:$0xff]  }
  0x33   : > { %v3145_v20 = vld [vmem:[%s3370_s27 + $0x288] sm:$0xff]   ;;  %v3148_v23 = vld [vmem:[%s3370_s27 + $0x210] sm:$0xff]   ;;  %v3151_v26 = vld [vmem:[%s3370_s27 + $0x2d8] sm:$0xff]  }
  0x34   : > { %2802 = vmatpush3.bf16.msra.mxu0 %v3092_v27  ;;  %v3149_v24 = vld [vmem:[%s3370_s27 + $0x290] sm:$0xff]   ;;  %v3152_v27 = vld [vmem:[%s3370_s27 + $0x218] sm:$0xff]   ;;  %v3158_v33 = vld [vmem:[%s3370_s27 + $0x268] sm:$0xff]  }
  0x35   : > { %2824 = vmatpush3.bf16.msra.mxu1 %v3093_v28  ;;  %2803 = vmatprep.subr.bf16.mxu0 %v3094_v29  ;;  %v3153_v28 = vld [vmem:[%s3370_s27 + $0x298] sm:$0xff]   ;;  %v3154_v29 = vld [vmem:[%s3370_s27 + $0x260] sm:$0xff]   ;;  %v3159_v34 = vld [vmem:[%s3370_s27 + $0x2e8] sm:$0xff]  }
  0x36   : > { %2825 = vmatprep.subr.bf16.mxu1 %v3095_v30  ;;  %v3155_v30 = vld [vmem:[%s3370_s27 + $0x2e0] sm:$0xff]   ;;  %v3161_v36 = vld [vmem:[%s3370_s27 + $0x2a8] sm:$0xff]   ;;  %v3163_v38 = vld [vmem:[%s3370_s27 + $0x2f0] sm:$0xff]  }
  0x37   : > { %v3194_v7 = vld [vmem:[%s3370_s27 + $0x368] sm:$0xff]  }
  0x38   : > { %2804 = vmatpush3.bf16.msra.mxu0 %v3096_v31  ;;  %v3156_v31 = vld [vmem:[%s3370_s27 + $0x220] sm:$0xff]   ;;  %v3197_v10 = vld [vmem:[%s3370_s27 + $0x3a8] sm:$0xff]  }
  0x39   : > { %2826 = vmatpush3.bf16.msra.mxu1 %v3097_v32  ;;  %2833 = vmatprep.subr.bf16.mxu0 %v3102_v39  ;;  %v3157_v32 = vld [vmem:[%s3370_s27 + $0x2a0] sm:$0xff]   ;;  %v3164_v39 = vld [vmem:[%s3370_s27 + $0x230] sm:$0xff]  }
  0x3a   : > { %2855 = vmatprep.subr.bf16.mxu1 %v3103_v40  ;;  %v3165_v40 = vld [vmem:[%s3370_s27 + $0x2b0] sm:$0xff]  }
  0x3b   : > { %1743 = vmatmul.mubr.bf16.vlgmr.msra.gmra.mrb[0].mxu0 %v2614_v35  ;;  %v3160_v35 = vld [vmem:[%s3370_s27 + $0x228] sm:$0xff]  }
  0x3c   : > { %1783 = vmatmul.mubr.bf16.vlgmr.msra.gmra.mrb[0].mxu1 %v2616_v37  ;;  %2834 = vmatpush3.bf16.msra.mxu0 %v3104_v41  ;;  %v3162_v37 = vld [vmem:[%s3370_s27 + $0x270] sm:$0xff]   ;;  %v3166_v41 = vld [vmem:[%s3370_s27 + $0x278] sm:$0xff]  }
  0x3d   : > { %2856 = vmatpush3.bf16.msra.mxu1 %v3105_v42  ;;  %2835 = vmatprep.subr.bf16.mxu0 %v3106_v43  ;;  %v3167_v42 = vld [vmem:[%s3370_s27 + $0x2f8] sm:$0xff]  }
  0x3e   : > { %2857 = vmatprep.subr.bf16.mxu1 %v3107_v44  ;;  %1822 = vmatprep.mubr.bf16.mxu0 %v2619_v9  ;;  %v3168_v43 = vld [vmem:[%s3370_s27 + $0x238] sm:$0xff]   ;;  %v3196_v9 = vld [vmem:[%s3370_s27 + $0x328] sm:$0xff]  }
  0x3f   : > { %1862 = vmatprep.mubr.bf16.mxu1 %v2621_v12  ;;  %v3169_v44 = vld [vmem:[%s3370_s27 + $0x2b8] sm:$0xff]   ;;  %v3199_v12 = vld [vmem:[%s3370_s27 + $0x3f0] sm:$0xff]  }
  0x40   : > { %2836 = vmatpush3.bf16.msra.mxu0 %v3108_v45  ;;  %v626_v45 = vld [vmem:[%s3365_s1 + $0x20] sm:$0xff] }
  0x41   : > { %2858 = vmatpush3.bf16.msra.mxu1 %v3109_v46  ;;  %2837 = vmatprep.subr.bf16.mxu0 %v3110_v47  ;;  %v627_v46 = vld [vmem:[%s3365_s1 + $0x28] sm:$0xff]  ;;  %v2622_v47 = vcombine.low %v626_v45, %v626_v45 }
  0x42   : > { %2859 = vmatprep.subr.bf16.mxu1 %v3111_v48  ;;  %v2623_v48 = vcombine.high %v626_v45, %v626_v45 }
  0x44   : > { %2838 = vmatpush3.bf16.msra.mxu0 %v3112_v49  ;;  %v2624_v49 = vcombine.low %v627_v46, %v627_v46 }
  0x45   : > { %2860 = vmatpush3.bf16.msra.mxu1 %v3113_v50  ;;  %2839 = vmatprep.subr.bf16.mxu0 %v3114_v51  ;;  %v2625_v50 = vcombine.high %v627_v46, %v627_v46  ;;  %v3174_v51 = vld [vmem:[%s3370_s27 + $0x340] sm:$0xff]  }
  0x46   : > { %2861 = vmatprep.subr.bf16.mxu1 %v3115_v52  ;;  %v3175_v52 = vld [vmem:[%s3370_s27 + $0x3c0] sm:$0xff]  }
  0x48   : > { %2840 = vmatpush3.bf16.msra.mxu0 %v3116_v53  ;;  %v3176_v53 = vld [vmem:[%s3370_s27 + $0x300] sm:$0xff]  }
  0x49   : > { %2862 = vmatpush3.bf16.msra.mxu1 %v3117_v54  ;;  %2841 = vmatprep.subr.bf16.mxu0 %v3118_v55  ;;  %v3177_v54 = vld [vmem:[%s3370_s27 + $0x380] sm:$0xff]   ;;  %v3178_v55 = vld [vmem:[%s3370_s27 + $0x348] sm:$0xff]  }
  0x4a   : > { %2863 = vmatprep.subr.bf16.mxu1 %v3119_v56  ;;  %v3179_v56 = vld [vmem:[%s3370_s27 + $0x3c8] sm:$0xff]  }
  0x4c   : > { %2842 = vmatpush3.bf16.msra.mxu0 %v3120_v57  ;;  %v3180_v57 = vld [vmem:[%s3370_s27 + $0x308] sm:$0xff]  }
  0x4d   : > { %2864 = vmatpush3.bf16.msra.mxu1 %v3121_v58  ;;  %2843 = vmatprep.subr.bf16.mxu0 %v3122_v59  ;;  %v3181_v58 = vld [vmem:[%s3370_s27 + $0x388] sm:$0xff]   ;;  %v3182_v59 = vld [vmem:[%s3370_s27 + $0x350] sm:$0xff]  }
  0x4e   : > { %2865 = vmatprep.subr.bf16.mxu1 %v3123_v60  ;;  %v3183_v60 = vld [vmem:[%s3370_s27 + $0x3d0] sm:$0xff]  }
  0x50   : > { %2844 = vmatpush3.bf16.msra.mxu0 %v3124_v61  ;;  %v3184_v61 = vld [vmem:[%s3370_s27 + $0x310] sm:$0xff]  }
  0x51   : > { %2866 = vmatpush3.bf16.msra.mxu1 %v3125_v62  ;;  %2845 = vmatprep.subr.bf16.mxu0 %v3126_v63  ;;  %v3185_v62 = vld [vmem:[%s3370_s27 + $0x390] sm:$0xff]   ;;  %v3186_v63 = vld [vmem:[%s3370_s27 + $0x358] sm:$0xff]  }
  0x52   : > { %2867 = vmatprep.subr.bf16.mxu1 %v3127_v0  ;;  %v3187_v0 = vld [vmem:[%s3370_s27 + $0x3d8] sm:$0xff]  }
  0x54   : > { %2846 = vmatpush3.bf16.msra.mxu0 %v3128_v1  ;;  %v3188_v1 = vld [vmem:[%s3370_s27 + $0x318] sm:$0xff]  }
  0x55   : > { %2868 = vmatpush3.bf16.msra.mxu1 %v3129_v2  ;;  %2847 = vmatprep.subr.bf16.mxu0 %v3130_v3  ;;  %v3189_v2 = vld [vmem:[%s3370_s27 + $0x398] sm:$0xff]   ;;  %v3190_v3 = vld [vmem:[%s3370_s27 + $0x360] sm:$0xff]  }
  0x56   : > { %2869 = vmatprep.subr.bf16.mxu1 %v3131_v4  ;;  %v3191_v4 = vld [vmem:[%s3370_s27 + $0x3e0] sm:$0xff]  }
  0x58   : > { %2848 = vmatpush3.bf16.msra.mxu0 %v3132_v5  ;;  %v3192_v5 = vld [vmem:[%s3370_s27 + $0x320] sm:$0xff]  }
  0x59   : > { %2870 = vmatpush3.bf16.msra.mxu1 %v3133_v6  ;;  %2877 = vmatprep.subr.bf16.mxu0 %v3138_v13  ;;  %v3193_v6 = vld [vmem:[%s3370_s27 + $0x3a0] sm:$0xff]   ;;  %v3200_v13 = vld [vmem:[%s3370_s27 + $0x330] sm:$0xff]  }
  0x5a   : > { %2899 = vmatprep.subr.bf16.mxu1 %v3139_v14  ;;  %v3201_v14 = vld [vmem:[%s3370_s27 + $0x3b0] sm:$0xff]  }
  0x5b   : > { %1823 = vmatmul.mubr.bf16.vlgmr.msra.gmra.mrb[4].mxu0 %v2618_v8  ;;  %v3195_v8 = vld [vmem:[%s3370_s27 + $0x3e8] sm:$0xff]  }
  0x5c   : > { %1863 = vmatmul.mubr.bf16.vlgmr.msra.gmra.mrb[4].mxu1 %v2620_v11  ;;  %2878 = vmatpush3.bf16.msra.mxu0 %v3140_v15  ;;  %v3198_v11 = vld [vmem:[%s3370_s27 + $0x370] sm:$0xff]   ;;  %v3202_v15 = vld [vmem:[%s3370_s27 + $0x378] sm:$0xff]  }
  0x5d   : > { %2900 = vmatpush3.bf16.msra.mxu1 %v3141_v16  ;;  %2879 = vmatprep.subr.bf16.mxu0 %v3142_v17  ;;  %v3203_v16 = vld [vmem:[%s3370_s27 + $0x3f8] sm:$0xff]  }
  0x5e   : > { %2901 = vmatprep.subr.bf16.mxu1 %v3143_v18  ;;  %1902 = vmatprep.mubr.bf16.mxu0 %v2623_v48  ;;  %v3204_v17 = vld [vmem:[%s3370_s27 + $0x338] sm:$0xff]  }
  0x5f   : > { %1942 = vmatprep.mubr.bf16.mxu1 %v2625_v50  ;;  %v3205_v18 = vld [vmem:[%s3370_s27 + $0x3b8] sm:$0xff]  }
  0x60   : > { %2880 = vmatpush3.bf16.msra.mxu0 %v3144_v19  ;;  %v628_v19 = vld [vmem:[%s3365_s1 + $0x30] sm:$0xff] }
  0x61   : > { %2902 = vmatpush3.bf16.msra.mxu1 %v3145_v20  ;;  %2881 = vmatprep.subr.bf16.mxu0 %v3146_v21  ;;  %v629_v20 = vld [vmem:[%s3365_s1 + $0x38] sm:$0xff]  ;;  %v2626_v21 = vcombine.low %v628_v19, %v628_v19 }
  0x62   : > { %2903 = vmatprep.subr.bf16.mxu1 %v3147_v22  ;;  %v2627_v22 = vcombine.high %v628_v19, %v628_v19 }
  0x64   : > { %2882 = vmatpush3.bf16.msra.mxu0 %v3148_v23  ;;  %v2628_v23 = vcombine.low %v629_v20, %v629_v20 }
  0x65   : > { %2904 = vmatpush3.bf16.msra.mxu1 %v3149_v24  ;;  %2883 = vmatprep.subr.bf16.mxu0 %v3150_v25  ;;  %v2629_v24 = vcombine.high %v629_v20, %v629_v20 }
  0x66   : > { %2905 = vmatprep.subr.bf16.mxu1 %v3151_v26 }
  0x68   : > { %2884 = vmatpush3.bf16.msra.mxu0 %v3152_v27 }
  0x69   : > { %2906 = vmatpush3.bf16.msra.mxu1 %v3153_v28  ;;  %2885 = vmatprep.subr.bf16.mxu0 %v3154_v29 }
  0x6a   : > { %2907 = vmatprep.subr.bf16.mxu1 %v3155_v30 }
  0x6c   : > { %2886 = vmatpush3.bf16.msra.mxu0 %v3156_v31 }
  0x6d   : > { %2908 = vmatpush3.bf16.msra.mxu1 %v3157_v32  ;;  %2887 = vmatprep.subr.bf16.mxu0 %v3158_v33 }
  0x6e   : > { %2909 = vmatprep.subr.bf16.mxu1 %v3159_v34 }
  0x70   : > { %2888 = vmatpush3.bf16.msra.mxu0 %v3160_v35 }
  0x71   : > { %2910 = vmatpush3.bf16.msra.mxu1 %v3161_v36  ;;  %2889 = vmatprep.subr.bf16.mxu0 %v3162_v37 }
  0x72   : > { %2911 = vmatprep.subr.bf16.mxu1 %v3163_v38 }
  0x74   : > { %2890 = vmatpush3.bf16.msra.mxu0 %v3164_v39 }
  0x75   : > { %2912 = vmatpush3.bf16.msra.mxu1 %v3165_v40  ;;  %2891 = vmatprep.subr.bf16.mxu0 %v3166_v41 }
  0x76   : > { %2913 = vmatprep.subr.bf16.mxu1 %v3167_v42 }
  0x78   : > { %2892 = vmatpush3.bf16.msra.mxu0 %v3168_v43 }
  0x79   : > { %2914 = vmatpush3.bf16.msra.mxu1 %v3169_v44  ;;  %2921 = vmatprep.subr.bf16.mxu0 %v3174_v51 }
  0x7a   : > { %2943 = vmatprep.subr.bf16.mxu1 %v3175_v52 }
  0x7b   : > { %1903 = vmatmul.mubr.bf16.vlgmr.msra.gmra.mrb[8].mxu0 %v2622_v47 }
  0x7c   : > { %1943 = vmatmul.mubr.bf16.vlgmr.msra.gmra.mrb[8].mxu1 %v2624_v49  ;;  %2922 = vmatpush3.bf16.msra.mxu0 %v3176_v53 }
  0x7d   : > { %2944 = vmatpush3.bf16.msra.mxu1 %v3177_v54  ;;  %2923 = vmatprep.subr.bf16.mxu0 %v3178_v55 }
  0x7e   : > { %2945 = vmatprep.subr.bf16.mxu1 %v3179_v56  ;;  %1982 = vmatprep.mubr.bf16.mxu0 %v2627_v22 }
  0x7f   : > { %2022 = vmatprep.mubr.bf16.mxu1 %v2629_v24 }
  0x80   : > { %2924 = vmatpush3.bf16.msra.mxu0 %v3180_v57 }
  0x81   : > { %2946 = vmatpush3.bf16.msra.mxu1 %v3181_v58  ;;  %2925 = vmatprep.subr.bf16.mxu0 %v3182_v59 }
  0x82   : > { %2947 = vmatprep.subr.bf16.mxu1 %v3183_v60 }
  0x84   : > { %2926 = vmatpush3.bf16.msra.mxu0 %v3184_v61 }
  0x85   : > { %2948 = vmatpush3.bf16.msra.mxu1 %v3185_v62  ;;  %2927 = vmatprep.subr.bf16.mxu0 %v3186_v63 }
  0x86   : > { %2949 = vmatprep.subr.bf16.mxu1 %v3187_v0 }
  0x88   : > { %2928 = vmatpush3.bf16.msra.mxu0 %v3188_v1 }
  0x89   : > { %2950 = vmatpush3.bf16.msra.mxu1 %v3189_v2  ;;  %2929 = vmatprep.subr.bf16.mxu0 %v3190_v3 }
  0x8a   : > { %2951 = vmatprep.subr.bf16.mxu1 %v3191_v4 }
  0x8c   : > { %2930 = vmatpush3.bf16.msra.mxu0 %v3192_v5 }
  0x8d   : > { %2952 = vmatpush3.bf16.msra.mxu1 %v3193_v6  ;;  %2931 = vmatprep.subr.bf16.mxu0 %v3194_v7  ;;  %v621_v7 = vld [vmem:[#allocation2] sm:$0xff] }
  0x8e   : > { %2953 = vmatprep.subr.bf16.mxu1 %v3195_v8 }
  0x90   : > { %2932 = vmatpush3.bf16.msra.mxu0 %v3196_v9 }
  0x91   : > { %2954 = vmatpush3.bf16.msra.mxu1 %v3197_v10  ;;  %2933 = vmatprep.subr.bf16.mxu0 %v3198_v11  ;;  %v3248_v10 = vmov (!%p2758_p7), 0.0   ;;  %v3210_v11 = vld [vmem:[%s3623_s4] sm:$0x1f] (!%p2758_p7)  }
  0x92   : > { %2955 = vmatprep.subr.bf16.mxu1 %v3199_v12  ;;  %v2046_v12 = vld [vmem:[%s3622_s3] sm:$0xf] (!%p2758_p7) }
  0x94   : > { %2934 = vmatpush3.bf16.msra.mxu0 %v3200_v13  ;;  %v2067_v13 = vsel (!%p2758_p7), %vm2065_vm2, %v3210_v11, 0  ;;  %v2782_v11 = vld [vmem:[%s3635_s16] ss:$0 sm:$0xff] (!%p2758_p7) }
  0x95   : > { %2956 = vmatpush3.bf16.msra.mxu1 %v3201_v14  ;;  %2935 = vmatprep.subr.bf16.mxu0 %v3202_v15  ;;  %v3211_v14 = vld [vmem:[%s3625_s6] sm:$0xff] (!%p2758_p7)   ;;  %v3212_v15 = vld [vmem:[%s3625_s6 + $0x8] sm:$0xff] (!%p2758_p7)  }
  0x96   : > { %2957 = vmatprep.subr.bf16.mxu1 %v3203_v16  ;;  %v3213_v16 = vld [vmem:[%s3627_s8] sm:$0xff] (!%p2758_p7)  }
  0x98   : > { %2936 = vmatpush3.bf16.msra.mxu0 %v3204_v17  ;;  %v2760_v17 = vld [vmem:[%s3624_s5] ss:$0 sm:$0xff] (!%p2758_p7) }
  0x99   : > { %2958 = vmatpush3.bf16.msra.mxu1 %v3205_v18  ;;  %2985 = vmatprep.subr.bf16.mxu0 (!%p2758_p7), %v3248_v10 }
  0x9a   : > { %2991 = vmatprep.subr.bf16.mxu1 (!%p2758_p7), %v3248_v10 }
  0x9b   : > { %1983 = vmatmul.mubr.bf16.vlgmr.msra.gmra.mrb[12].mxu0 %v2626_v21 }
  0x9c   : > { %2023 = vmatmul.mubr.bf16.vlgmr.msra.gmra.mrb[12].mxu1 %v2628_v23  ;;  %2987 = vmatprep.mubr.msk.bf16.mxu0 (!%p2758_p7), %vm3249_vm3, %v3248_v10 }
  0x9d   : > { %2995 = vmatprep.mubr.msk.bf16.mxu1 (!%p2758_p7), %vm3249_vm3, %v3248_v10  ;;  %2986 = vmatpush3.bf16.msra.mxu0 (!%p2758_p7), %v2067_v13 }
  0x9e   : > { %2999 = vmatprep.subr.bf16.mxu0 (!%p2758_p7), %v3248_v10  ;;  %2992 = vmatpush3.bf16.msra.mxu1 (!%p2758_p7), %v3211_v14 }
  0x9f   : > { %2993 = vmatprep.subr.bf16.mxu1 (!%p2758_p7), %v3248_v10 }
  0xa2   : > { %2994 = vmatpush3.bf16.msra.mxu1 (!%p2758_p7), %v3212_v15 }
  0xa3   : > { %3007 = vmatprep.subr.bf16.mxu1 (!%p2758_p7), %v3248_v10 }
 0x10e   : > { %v2805_v25 = vpop.f32.mrb[0].mxu0 }
 0x10f   : > { %v2827_v26 = vpop.f32.mrb[0].mxu1  ;;  %v2806_v27 = vpop.f32.mrb[1].mxu0 }
 0x110   : > { %v2828_v28 = vpop.f32.mrb[1].mxu1  ;;  %v2807_v29 = vadd.f32 %v2806_v27, %v2805_v25  ;;  %v2808_v31 = vpop.f32.mrb[2].mxu0  ;;  %v3214_v25 = vld [vmem:[%s3627_s8 + $0x8] sm:$0xff] (!%p2758_p7)   ;;  %v2763_v27 = vld [vmem:[%s3626_s7] ss:$0 sm:$0xff] (!%p2758_p7) }
 0x111   : > { %v2829_v30 = vadd.f32 %v2828_v28, %v2827_v26  ;;  %v2830_v32 = vpop.f32.mrb[2].mxu1  ;;  %v2809_v33 = vpop.f32.mrb[3].mxu0  ;;  %2988 = vmatmul.mubr.msk.bf16.vlgmr.msra.gmra.mrb[0].mxu0 (!%p2758_p7), %vm2061_vm4, %v2046_v12  ;;  %v3216_v26 = vld [vmem:[%s3630_s11] sm:$0xff] (!%p2758_p7)  }
 0x112   : > { %v2831_v34 = vpop.f32.mrb[3].mxu1  ;;  %3003 = vmatprep.mubr.msk.bf16.mxu0 (!%p2758_p7), %vm3249_vm3, %v3248_v10  ;;  %3000 = vmatpush3.bf16.msra.mxu0 (!%p2758_p7), %v3213_v16 }
 0x113   : > { %v1785_v35 = vadd.f32 %v2829_v30, %v2807_v29  ;;  %3001 = vmatprep.subr.bf16.mxu0 (!%p2758_p7), %v3248_v10  ;;  %v3215_v34 = vld [vmem:[%s3629_s10] sm:$0xff] (!%p2758_p7)  }
 0x116   : > { %3002 = vmatpush3.bf16.msra.mxu0 (!%p2758_p7), %v3214_v25 }
 0x117   : > { %3015 = vmatprep.subr.bf16.mxu0 (!%p2758_p7), %v3248_v10 }
 0x12e   : > { %v2849_v36 = vpop.f32.mrb[4].mxu0 }
 0x12f   : > { %v2871_v37 = vpop.f32.mrb[4].mxu1  ;;  %v2850_v38 = vpop.f32.mrb[5].mxu0 }
 0x130   : > { %v2872_v39 = vpop.f32.mrb[5].mxu1  ;;  %v2851_v40 = vadd.f32 %v2850_v38, %v2849_v36  ;;  %v2852_v42 = vpop.f32.mrb[6].mxu0  ;;  %v3217_v36 = vld [vmem:[%s3629_s10 + $0x8] sm:$0xff] (!%p2758_p7)   ;;  %v2759_v38 = vld [vmem:[%s3621_s2] ss:$0 sm:$0xff] (!%p2758_p7) }
 0x131   : > { %v2873_v41 = vadd.f32 %v2872_v39, %v2871_v37  ;;  %v2874_v43 = vpop.f32.mrb[6].mxu1  ;;  %v2853_v44 = vpop.f32.mrb[7].mxu0  ;;  %v2767_v42 = vld [vmem:[%s3628_s9] ss:$0 sm:$0xff] (!%p2758_p7) }
 0x132   : > { %v2875_v45 = vpop.f32.mrb[7].mxu1  ;;  %v1825_v46 = vadd.f32 %v2851_v40, %v1785_v35  ;;  %v3218_v40 = vld [vmem:[%s3630_s11 + $0x8] sm:$0xff] (!%p2758_p7)  }
 0x134   : > { %v1865_v47 = vadd.f32 %v2873_v41, %v1825_v46 }
 0x14e   : > { %v2893_v48 = vpop.f32.mrb[8].mxu0 }
 0x14f   : > { %v2915_v49 = vpop.f32.mrb[8].mxu1  ;;  %v2894_v50 = vpop.f32.mrb[9].mxu0 }
 0x150   : > { %v2895_v51 = vadd.f32 %v2894_v50, %v2893_v48  ;;  %v2916_v52 = vpop.f32.mrb[9].mxu1  ;;  %v2896_v53 = vpop.f32.mrb[10].mxu0 }
 0x151   : > { %v2917_v54 = vadd.f32 %v2916_v52, %v2915_v49  ;;  %v2918_v55 = vpop.f32.mrb[10].mxu1  ;;  %v2897_v56 = vpop.f32.mrb[11].mxu0 }
 0x152   : > { %v1905_v57 = vadd.f32 %v2895_v51, %v1865_v47  ;;  %v2919_v58 = vpop.f32.mrb[11].mxu1  ;;  %v3220_v55 = vld [vmem:[%s3632_s13 + $0x8] sm:$0xff] (!%p2758_p7)   ;;  %v3221_v56 = vld [vmem:[%s3634_s15] sm:$0xff] (!%p2758_p7)  }
 0x153   : > { %v2777_v58 = vld [vmem:[%s3631_s12] ss:$0 sm:$0xff] (!%p2758_p7) }
 0x154   : > { %v1945_v59 = vadd.f32 %v2917_v54, %v1905_v57  ;;  %v3219_v54 = vld [vmem:[%s3632_s13] sm:$0xff] (!%p2758_p7)  }
 0x16e   : > { %v2937_v60 = vpop.f32.mrb[12].mxu0 }
 0x16f   : > { %v2959_v61 = vpop.f32.mrb[12].mxu1  ;;  %v2938_v62 = vpop.f32.mrb[13].mxu0 }
 0x170   : > { %v2939_v63 = vadd.f32 %v2938_v62, %v2937_v60  ;;  %v2960_v0 = vpop.f32.mrb[13].mxu1  ;;  %v2940_v1 = vpop.f32.mrb[14].mxu0 }
 0x171   : > { %v2961_v2 = vadd.f32 %v2960_v0, %v2959_v61  ;;  %v2962_v3 = vpop.f32.mrb[14].mxu1  ;;  %v2941_v4 = vpop.f32.mrb[15].mxu0 }
 0x172   : > { %v1985_v5 = vadd.f32 %v2939_v63, %v1945_v59  ;;  %v2963_v6 = vpop.f32.mrb[15].mxu1  ;;  %2036 = sbr.rel (%p2758_p7) target bundleno = 1580 (0x62c), region = 96  ;;  %v2778_v3 = vld [vmem:[%s3633_s14] ss:$0 sm:$0xff] (!%p2758_p7) }
 0x174   : > { %v2025_v8 = vadd.f32 %v2961_v2, %v1985_v5  ;;  %v3222_v2 = vld [vmem:[%s3634_s15 + $0x8] sm:$0xff] (!%p2758_p7)  }
 0x176   : > { %v2030_v9 = vadd.f32 %v2025_v8, %v621_v7 }
 0x178   : > { %2032 = vst.msk [vmem:[#allocation2] sm:$0xff] %vm2031_vm1, %v2030_v9 }
 0x17f   : > { %v2037_v37 = vld [vmem:[#allocation2] sm:$0xff] }
 0x180   : > { %v2045_v39 = vadd.f32 %v2759_v38, %v2037_v37 }
 0x182   : > { %v2246_v41 = vpack.c.bf16 %v2045_v39, %v2045_v39 }
 0x1e4   : > { %v2103_v18 = vpop.f32.mrb[0].mxu0 }
 0x1e5   : > { %v2104_v19 = vadd.f32 %v2760_v17, %v2103_v18  ;;  %v2989_v20 = vpop.f32.mrb[1].mxu0 }
 0x1e6   : > { %v2106_v21 = vpop.f32.mrb[2].mxu0 }
 0x1e7   : > { %v2109_v22 = vmax.f32 %v2104_v19, 0.0  ;;  %v2990_v23 = vpop.f32.mrb[3].mxu0 }
 0x1e9   : > { %v2110_v24 = vpack.c.bf16 %v2109_v22, %v2109_v22 }
 0x1eb   : > { %2996 = vmatmul.mubr.msk.bf16.vlgmr.msra.gmra.mrb[0].mxu1 %vm2031_vm1, %v2110_v24 }
 0x1ec   : > { %3011 = vmatprep.mubr.msk.bf16.mxu1 %vm3249_vm3, %v3248_v10  ;;  %3008 = vmatpush3.bf16.msra.mxu1 %v3216_v26 }
 0x1ed   : > { %3009 = vmatprep.subr.bf16.mxu1 %v3248_v10 }
 0x1f0   : > { %3010 = vmatpush3.bf16.msra.mxu1 %v3218_v40 }
 0x1f1   : > { %3023 = vmatprep.subr.bf16.mxu1 %v3248_v10 }
 0x2be   : > { %v2171_v28 = vpop.f32.mrb[0].mxu1 }
 0x2bf   : > { %v2172_v29 = vadd.f32 %v2763_v27, %v2171_v28  ;;  %v2997_v30 = vpop.f32.mrb[1].mxu1 }
 0x2c0   : > { %v2174_v31 = vpop.f32.mrb[2].mxu1 }
 0x2c1   : > { %v2177_v32 = vmax.f32 %v2172_v29, 0.0  ;;  %v2998_v33 = vpop.f32.mrb[3].mxu1 }
 0x2c3   : > { %v2178_v35 = vpack.c.bf16 %v2177_v32, %v2177_v32 }
 0x2c5   : > { %3004 = vmatmul.mubr.msk.bf16.vlgmr.msra.gmra.mrb[4].mxu0 %vm2031_vm1, %v2178_v35 }
 0x2c6   : > { %3016 = vmatpush3.bf16.msra.mxu0 %v3215_v34  ;;  %3019 = vmatprep.mubr.msk.bf16.mxu0 %vm3249_vm3, %v3248_v10 }
 0x2c7   : > { %3017 = vmatprep.subr.bf16.mxu0 %v3248_v10 }
 0x2ca   : > { %3018 = vmatpush3.bf16.msra.mxu0 %v3217_v36 }
 0x2cb   : > { %3031 = vmatprep.subr.bf16.mxu0 %v3248_v10 }
 0x2cd   : > { %3020 = vmatmul.mubr.msk.bf16.vlgmr.msra.gmra.mrb[8].mxu0 %vm2031_vm1, %v2246_v41 }
 0x2ce   : > { %3035 = vmatprep.mubr.msk.bf16.mxu0 %vm3249_vm3, %v3248_v10  ;;  %3032 = vmatpush3.bf16.msra.mxu0 %v3221_v56 }
 0x2cf   : > { %3033 = vmatprep.subr.bf16.mxu0 %v3248_v10 }
 0x2d2   : > { %3034 = vmatpush3.bf16.msra.mxu0 %v3222_v2 }
 0x398   : > { %v2239_v43 = vpop.f32.mrb[4].mxu0 }
 0x399   : > { %v2240_v44 = vadd.f32 %v2767_v42, %v2239_v43  ;;  %v3005_v45 = vpop.f32.mrb[5].mxu0 }
 0x39a   : > { %v2242_v46 = vpop.f32.mrb[6].mxu0 }
 0x39b   : > { %v2245_v47 = vmax.f32 %v2240_v44, 0.0  ;;  %v3006_v48 = vpop.f32.mrb[7].mxu0 }
 0x39d   : > { %v2251_v49 = vpack.c.bf16 %v2245_v47, %v2245_v47 }
 0x39f   : > { %3012 = vmatmul.mubr.msk.bf16.vlgmr.msra.gmra.mrb[4].mxu1 %vm2031_vm1, %v2251_v49 }
 0x3a0   : > { %3027 = vmatprep.mubr.msk.bf16.mxu1 %vm3249_vm3, %v3248_v10  ;;  %v2360_v50 = vpop.f32.mrb[8].mxu0  ;;  %3024 = vmatpush3.bf16.msra.mxu1 %v3219_v54 }
 0x3a1   : > { %v3021_v51 = vpop.f32.mrb[9].mxu0  ;;  %3025 = vmatprep.subr.bf16.mxu1 %v3248_v10 }
 0x3a2   : > { %v2363_v52 = vpop.f32.mrb[10].mxu0 }
 0x3a3   : > { %v3022_v53 = vpop.f32.mrb[11].mxu0 }
 0x3a4   : > { %3026 = vmatpush3.bf16.msra.mxu1 %v3220_v55 }
 0x472   : > { %v2305_v57 = vpop.f32.mrb[4].mxu1 }
 0x473   : > { %v2361_v59 = vadd.f32 %v2360_v50, %v2305_v57  ;;  %v3013_v60 = vpop.f32.mrb[5].mxu1 }
 0x474   : > { %v2308_v61 = vpop.f32.mrb[6].mxu1 }
 0x475   : > { %v2373_v62 = vadd.f32 %v2777_v58, %v2361_v59  ;;  %v3014_v63 = vpop.f32.mrb[7].mxu1 }
 0x477   : > { %v2374_v0 = vmax.f32 %v2373_v62, 0.0 }
 0x479   : > { %v2375_v1 = vpack.c.bf16 %v2374_v0, %v2374_v0 }
 0x47b   : > { %3028 = vmatmul.mubr.msk.bf16.vlgmr.msra.gmra.mrb[8].mxu1 %vm2031_vm1, %v2375_v1 }
 0x54e   : > { %v2436_v4 = vpop.f32.mrb[8].mxu1 }
 0x54f   : > { %v2437_v5 = vadd.f32 %v2778_v3, %v2436_v4  ;;  %v3029_v6 = vpop.f32.mrb[9].mxu1 }
 0x550   : > { %v2439_v7 = vpop.f32.mrb[10].mxu1 }
 0x551   : > { %v2442_v8 = vmax.f32 %v2437_v5, 0.0  ;;  %v3030_v9 = vpop.f32.mrb[11].mxu1 }
 0x553   : > { %v2443_v10 = vpack.c.bf16 %v2442_v8, %v2442_v8 }
 0x555   : > { %3036 = vmatmul.mubr.msk.bf16.vlgmr.msra.gmra.mrb[12].mxu0 %vm2031_vm1, %v2443_v10 }
 0x628   : > { %v2504_v12 = vpop.f32.mrb[12].mxu0 }
 0x629   : > { %v2505_v13 = vadd.f32 %v2782_v11, %v2504_v12  ;;  %v3037_v14 = vpop.f32.mrb[13].mxu0 }
 0x62a   : > { %v2507_v15 = vpop.f32.mrb[14].mxu0 }
 0x62b   : > { %2511 = vst.msk [vmem:[%s3636_s17] sm:$0xff] %vm2510_vm5, %v2505_v13  ;;  %v3038_v16 = vpop.f32.mrb[15].mxu0 }
 0x62c PF: > { %s27_s26 = sadd.s32 1, %s3245_s26   ;;  %s3642_s30 = sld [smem:[#allocation3_spill]] }
 0x62d   : > { %p24_p8 = scmp.ge.s32.totalorder %s27_s26, 4   ;;  %s3643_s24 = smov %s3241_s25 }
 0x62f   :  { %26 = sbr.rel (!%p24_p8) target bundleno = 3 (0x3), region = 132 }
 0x632   : > { %s3644_s25 = smov %s3642_s30 }

</bundles_post_ra>
